<compile_context>
chip_gen: v7x
topology: tpu7x:2x2x1
jax: 0.10.0
libtpu: 0.0.40
codegen_flags: <defaults>
</compile_context>

<pallas_src>
import functools
import math

import jax
import jax.numpy as jnp
from jax import lax
from jax.experimental import pallas as pl
from jax.experimental.pallas import tpu as pltpu

# ---------------- configuration (small synthetic shapes) ----------------
BATCH = 2
IMG_H = IMG_W = 16
NUM_CHANNELS = 32          # backbone.num_channels
REDUCE_TIMES = 2           # backbone.reduce_times  -> features are 4x4
HIDDEN_DIM = 32            # transformer.d_model
NHEADS = 4
DIM_FF = 64
LN_EPS = 1e-5

MAX_TM = 512               # max token tile for the generic matmul kernel


# ============================ Pallas kernels =============================

def _matmul_bias_kernel(a_ref, w_ref, b_ref, o_ref, *, activation):
    a = a_ref[...].astype(jnp.bfloat16)
    acc = jnp.dot(a, w_ref[...], preferred_element_type=jnp.float32)
    acc = acc + b_ref[...]
    if activation == "relu":
        acc = jnp.maximum(acc, 0.0)
    o_ref[...] = acc.astype(o_ref.dtype)


def matmul_bias(a, w_bf16, bias_row, activation="none"):
    """a: (M, K) f32, w_bf16: (K, N) bf16, bias_row: (1, N) f32 -> (M, N) f32."""
    M, K = a.shape
    N = w_bf16.shape[1]
    if M >= 16:
        # >=2-step parallel grid (gives v7x's second TensorCore work),
        # with tiles as large as useful (bounded by MAX_TM).
        tm = min(MAX_TM, ((pl.cdiv(M, 2) + 7) // 8) * 8)
    else:
        tm = M
    grid_m = pl.cdiv(M, tm)
    cost = pl.CostEstimate(
        flops=2 * M * K * N, transcendentals=0,
        bytes_accessed=4 * M * K + 2 * K * N + 4 * M * N)
    return pl.pallas_call(
        functools.partial(_matmul_bias_kernel, activation=activation),
        out_shape=jax.ShapeDtypeStruct((M, N), jnp.float32),
        grid=(grid_m,),
        in_specs=[
            pl.BlockSpec((tm, K), lambda i: (i, 0)),
            pl.BlockSpec((K, N), lambda i: (0, 0)),
            pl.BlockSpec((1, N), lambda i: (0, 0)),
        ],
        out_specs=pl.BlockSpec((tm, N), lambda i: (i, 0)),
        compiler_params=pltpu.CompilerParams(
            dimension_semantics=("parallel",)),
        cost_estimate=cost,
    )(a, w_bf16, bias_row)


def _tlayer_kernel(xq_ref, pq_ref, xkv_ref, pkv_ref,
                   wq_ref, bq_ref, wk_ref, bk_ref, wv_ref, bv_ref,
                   wo_ref, bo_ref, g1_ref, h1_ref,
                   w1_ref, c1_ref, w2_ref, c2_ref, g2_ref, h2_ref,
                   o_ref, *, nheads, scale, eps):
    """One fused transformer block for one batch element:
       attn(q=xq+pq, k=xkv+pkv, v=xkv) -> +xq -> LN1 -> FFN -> +res -> LN2."""
    xq = xq_ref[0]                                      # (Lq, D) f32
    xkv = xkv_ref[0]                                    # (Lk, D) f32
    D = xq.shape[-1]
    dh = D // nheads

    # ---- full-width Q/K/V projections (one N=K=D dot each) ----
    q_in = (xq + pq_ref[0]).astype(jnp.bfloat16)
    k_in = (xkv + pkv_ref[0]).astype(jnp.bfloat16)
    v_in = xkv.astype(jnp.bfloat16)
    q = jnp.dot(q_in, wq_ref[...], preferred_element_type=jnp.float32) + bq_ref[...]
    k = jnp.dot(k_in, wk_ref[...], preferred_element_type=jnp.float32) + bk_ref[...]
    v = jnp.dot(v_in, wv_ref[...], preferred_element_type=jnp.float32) + bv_ref[...]
    qb = (q * scale).astype(jnp.bfloat16)
    kb = k.astype(jnp.bfloat16)
    vb = v.astype(jnp.bfloat16)

    # ---- only the scores / PV contractions stay per-head ----
    heads = []
    for h in range(nheads):                             # static unroll
        sl = slice(h * dh, (h + 1) * dh)
        s = lax.dot_general(qb[:, sl], kb[:, sl],
                            (((1,), (1,)), ((), ())),
                            preferred_element_type=jnp.float32)     # (Lq, Lk)
        s = s - jnp.max(s, axis=-1, keepdims=True)
        p = jnp.exp(s)
        p = p / jnp.sum(p, axis=-1, keepdims=True)      # exact (matches torch)
        heads.append(jnp.dot(p.astype(jnp.bfloat16), vb[:, sl],
                             preferred_element_type=jnp.float32))
    o = jnp.concatenate(heads, axis=-1).astype(jnp.bfloat16)        # (Lq, D)

    # ---- single output projection on concatenated heads ----
    attn = jnp.dot(o, wo_ref[...], preferred_element_type=jnp.float32) + bo_ref[...]

    # ---- residual + LayerNorm 1 ----
    y = xq + attn
    mu = jnp.mean(y, axis=-1, keepdims=True)
    yc = y - mu
    var = jnp.mean(yc * yc, axis=-1, keepdims=True)
    y = yc * lax.rsqrt(var + eps) * g1_ref[...] + h1_ref[...]

    # ---- FFN: linear -> relu -> linear ----
    f = jnp.dot(y.astype(jnp.bfloat16), w1_ref[...],
                preferred_element_type=jnp.float32) + c1_ref[...]
    f = jnp.maximum(f, 0.0)
    f = jnp.dot(f.astype(jnp.bfloat16), w2_ref[...],
                preferred_element_type=jnp.float32) + c2_ref[...]

    # ---- residual + LayerNorm 2 ----
    z = y + f
    mu2 = jnp.mean(z, axis=-1, keepdims=True)
    zc = z - mu2
    var2 = jnp.mean(zc * zc, axis=-1, keepdims=True)
    z = zc * lax.rsqrt(var2 + eps) * g2_ref[...] + h2_ref[...]
    o_ref[0] = z.astype(o_ref.dtype)


def transformer_layer(xq, posq, xkv, poskv, p, nheads):
    """Fused transformer block.  xq/posq: (B, Lq, D); xkv/poskv: (B, Lk, D)."""
    B, Lq, D = xq.shape
    Lk = xkv.shape[1]
    dh = D // nheads
    scale = 1.0 / math.sqrt(dh)
    a, f = p["attn"], p["ffn"]
    weights = [a["wq"], a["bq"], a["wk"], a["bk"], a["wv"], a["bv"],
               a["wo"], a["bo"], p["ln1_g"], p["ln1_b"],
               f["w1"], f["b1"], f["w2"], f["b2"], p["ln2_g"], p["ln2_b"]]
    FF = f["w1"].shape[1]
    act_q = pl.BlockSpec((1, Lq, D), lambda b: (b, 0, 0))
    act_k = pl.BlockSpec((1, Lk, D), lambda b: (b, 0, 0))
    w_specs = [pl.BlockSpec(w.shape, lambda b: (0, 0)) for w in weights]
    cost = pl.CostEstimate(
        flops=2 * B * (3 * Lq * D * D + 2 * Lq * Lk * D + Lq * D * D
                       + 2 * Lq * D * FF),
        transcendentals=B * (nheads * Lq * Lk + 4 * Lq),
        bytes_accessed=4 * B * (4 * Lq * D + 2 * Lk * D)
                       + 2 * (4 * D * D + 2 * D * FF))
    return pl.pallas_call(
        functools.partial(_tlayer_kernel, nheads=nheads, scale=scale,
                          eps=LN_EPS),
        out_shape=jax.ShapeDtypeStruct((B, Lq, D), jnp.float32),
        grid=(B,),
        in_specs=[act_q, act_q, act_k, act_k] + w_specs,
        out_specs=pl.BlockSpec((1, Lq, D), lambda b: (b, 0, 0)),
        compiler_params=pltpu.CompilerParams(
            dimension_semantics=("parallel",)),
        cost_estimate=cost,
    )(xq, posq, xkv, poskv, *weights)


def _conv3x3_kernel(*refs, wp, n_rows, activation, has_residual):
    """Stride-1 3x3 conv on a flattened padded tile, as ONE K=9C dot.

    x_ref: (1, Lx, C) flattened padded image (row-major, width wp, plus one
    slack row).  w_ref: (9*C, Cout) bf16 (tap-major).  o_ref: (1, n_rows,
    Cout) with n_rows = H*wp (last 2 columns of each output row are garbage
    and are sliced off in the wrapper).  Optional residual is pre-flattened
    to the same (n_rows, Cout) layout and added in-kernel.
    """
    if has_residual:
        x_ref, r_ref, w_ref, b_ref, o_ref = refs
    else:
        x_ref, w_ref, b_ref, o_ref = refs
    x = x_ref[0]                                        # (Lx, C) f32
    taps = [x[dy * wp + dx: dy * wp + dx + n_rows, :]
            for dy in range(3) for dx in range(3)]
    xcat = jnp.concatenate(taps, axis=-1).astype(jnp.bfloat16)   # (n_rows, 9C)
    acc = jnp.dot(xcat, w_ref[...], preferred_element_type=jnp.float32)
    acc = acc + b_ref[...]
    if activation == "relu":
        acc = jnp.maximum(acc, 0.0)
    if has_residual:
        acc = acc + r_ref[0]
    o_ref[0] = acc.astype(o_ref.dtype)


def conv3x3_s1_reflect(x, w9, bias_row, activation="none", residual=None):
    """3x3 stride-1 conv with reflect same-padding (== ReflectionPad2d(1) +
    Conv2d(k=3, padding=0)).  x: (B, H, W, C) NHWC, w9: (9*C, Cout) bf16,
    bias_row: (1, Cout).  If `residual` is given (shape (B, H, W, Cout)), it
    is added inside the kernel (fused ResBlock skip connection).
    """
    # TODO(synk): add a row-strip grid axis for large resolutions (v7x 64 MiB
    # VMEM); at these shapes one padded image per batch element fits easily.
    B, H, W, C = x.shape
    n_out = w9.shape[1]
    wp = W + 2
    lx = (H + 3) * wp
    n_rows = H * wp
    xp = jnp.pad(x, ((0, 0), (1, 1), (1, 1), (0, 0)), mode="reflect")
    xp = jnp.pad(xp, ((0, 0), (0, 1), (0, 0), (0, 0)))   # zero slack row: only
    # ever read into the discarded garbage columns of the last output row.
    xf = xp.reshape(B, lx, C)

    ops = [xf]
    in_specs = [pl.BlockSpec((1, lx, C), lambda b: (b, 0, 0))]
    if residual is not None:
        rf = jnp.pad(residual, ((0, 0), (0, 0), (0, 2), (0, 0)))
        rf = rf.reshape(B, n_rows, n_out)
        ops.append(rf)
        in_specs.append(pl.BlockSpec((1, n_rows, n_out), lambda b: (b, 0, 0)))
    ops += [w9, bias_row]
    in_specs += [pl.BlockSpec((9 * C, n_out), lambda b: (0, 0)),
                 pl.BlockSpec((1, n_out), lambda b: (0, 0))]

    cost = pl.CostEstimate(
        flops=2 * B * n_rows * 9 * C * n_out, transcendentals=0,
        bytes_accessed=4 * B * lx * C + 2 * 9 * C * n_out
                       + 4 * B * n_rows * n_out)
    out = pl.pallas_call(
        functools.partial(_conv3x3_kernel, wp=wp, n_rows=n_rows,
                          activation=activation,
                          has_residual=residual is not None),
        out_shape=jax.ShapeDtypeStruct((B, n_rows, n_out), jnp.float32),
        grid=(B,),
        in_specs=in_specs,
        out_specs=pl.BlockSpec((1, n_rows, n_out), lambda b: (b, 0, 0)),
        compiler_params=pltpu.CompilerParams(
            dimension_semantics=("parallel",)),
        cost_estimate=cost,
    )(*ops)
    # no 128-lane zero padding of the final 3-channel output (it caused ~42x
    # HBM write amplification); store only the real channels.
    return out.reshape(B, H, wp, n_out)[:, :, :W, :]


# ====================== conv / transformer building blocks ==============

def conv1x1(x_nhwc, w_bf16, bias_row, activation="none"):
    """nn.Conv2d(Cin, Cout, kernel_size=1).  w_bf16: (Cin, Cout)."""
    B, H, W, C = x_nhwc.shape
    y = matmul_bias(x_nhwc.reshape(B * H * W, C), w_bf16, bias_row, activation)
    return y.reshape(B, H, W, -1)


def conv3x3_s2_im2col(x_nhwc, w9, bias_row, activation="none"):
    """Stride-2 3x3 conv (backbone stand-in only) via im2col + Pallas matmul.
    TODO(synk): replace the XLA-side im2col with an in-kernel polyphase
    formulation to remove the 9x HBM intermediate at real resolutions."""
    xp = jnp.pad(x_nhwc, ((0, 0), (1, 1), (1, 1), (0, 0)))
    B, Hp, Wp, C = xp.shape
    Ho = (Hp - 3) // 2 + 1
    Wo = (Wp - 3) // 2 + 1
    cols = [xp[:, dy:dy + 2 * Ho:2, dx:dx + 2 * Wo:2, :]
            for dy in range(3) for dx in range(3)]
    patches = jnp.concatenate(cols, axis=-1)              # (B, Ho, Wo, 9C)
    y = matmul_bias(patches.reshape(B * Ho * Wo, 9 * C), w9, bias_row,
                    activation)
    return y.reshape(B, Ho, Wo, -1)


def upsample2x_bilinear(x_nhwc):
    # matches nn.Upsample(scale_factor=2, mode='bilinear') (align_corners=False)
    B, H, W, C = x_nhwc.shape
    return jax.image.resize(x_nhwc, (B, 2 * H, 2 * W, C), method="bilinear")


def position_embedding_sine(B, H, W, num_pos_feats, temperature=10000.0):
    """DETR-style sine position embedding (no padding in the mask)."""
    eps = 1e-6
    scale = 2.0 * math.pi
    y = jnp.arange(1, H + 1, dtype=jnp.float32)
    x = jnp.arange(1, W + 1, dtype=jnp.float32)
    y = y / (y[-1] + eps) * scale
    x = x / (x[-1] + eps) * scale
    dim_t = jnp.arange(num_pos_feats, dtype=jnp.float32)
    dim_t = temperature ** (2.0 * jnp.floor(dim_t / 2.0) / num_pos_feats)
    pos_y = y[:, None] / dim_t                            # (H, F)
    pos_x = x[:, None] / dim_t                            # (W, F)
    pos_y = jnp.stack([jnp.sin(pos_y[:, 0::2]), jnp.cos(pos_y[:, 1::2])],
                      axis=2).reshape(H, num_pos_feats)
    pos_x = jnp.stack([jnp.sin(pos_x[:, 0::2]), jnp.cos(pos_x[:, 1::2])],
                      axis=2).reshape(W, num_pos_feats)
    pos = jnp.concatenate(
        [jnp.broadcast_to(pos_y[:, None, :], (H, W, num_pos_feats)),
         jnp.broadcast_to(pos_x[None, :, :], (H, W, num_pos_feats))], axis=-1)
    return jnp.broadcast_to(pos[None], (B, H, W, 2 * num_pos_feats))


def backbone_standin(x_nhwc, p):
    # TODO(synk): the real backbone module is external; stand-in with
    # reduce_times stride-2 3x3 convs (3 -> C/2 -> C) + ReLU.
    y = conv3x3_s2_im2col(x_nhwc, p["w1"], p["b1"], activation="relu")
    y = conv3x3_s2_im2col(y, p["w2"], p["b2"], activation="relu")
    return y


def res_block(x, p):
    # TODO(synk): ResBlock is defined outside models/model.py; stand-in is
    # conv3x3 -> ReLU -> conv3x3 with the residual add fused into the second
    # conv kernel.
    h = conv3x3_s1_reflect(x, p["w1"], p["b1"], activation="relu")
    return conv3x3_s1_reflect(h, p["w2"], p["b2"], residual=x)


# =========================== full forward ================================

def istt_nofold_forward(samples_nchw, style_nchw, params):
    x_c = jnp.transpose(samples_nchw, (0, 2, 3, 1))       # NCHW -> NHWC
    x_s = jnp.transpose(style_nchw, (0, 2, 3, 1))

    src = backbone_standin(x_c, params["backbone_c"])     # (B, fh, fw, C)
    sty = backbone_standin(x_s, params["backbone_s"])
    B, fh, fw, _ = src.shape
    sh, sw = sty.shape[1], sty.shape[2]
    D = HIDDEN_DIM

    pos_c = position_embedding_sine(B, fh, fw, D // 2).reshape(B, fh * fw, D)
    pos_s = position_embedding_sine(B, sh, sw, D // 2).reshape(B, sh * sw, D)

    src_p = conv1x1(src, params["input_proj_c"]["w"],
                    params["input_proj_c"]["b"]).reshape(B, fh * fw, D)
    sty_p = conv1x1(sty, params["input_proj_s"]["w"],
                    params["input_proj_s"]["b"]).reshape(B, sh * sw, D)

    # TODO(synk): the real DETR-style transformer is an external module; this
    # stand-in is one fused encoder layer (style self-attention) and one fused
    # decoder layer (content tokens cross-attend to the encoded style memory).
    mem = transformer_layer(sty_p, pos_s, sty_p, pos_s,
                            params["transformer"]["enc"], NHEADS)
    hs = transformer_layer(src_p, pos_c, mem, pos_s,
                           params["transformer"]["dec"], NHEADS)

    hs_map = hs.reshape(B, fh, fw, D)                     # = permute+reshape
    res = conv1x1(hs_map, params["output_proj"]["w"],
                  params["output_proj"]["b"])

    # tail: [ResBlock, Upsample(2x bilinear), ReflectionPad2d(1), Conv3x3] * R
    # (ReflectionPad2d(1) + valid conv are fused into conv3x3_s1_reflect.)
    # TODO(synk): the bilinear upsample + following conv could be fused into a
    # single row-strip kernel; kept as XLA resize here.
    for stage in params["tail"]:
        res = res_block(res, stage["res"])
        res = upsample2x_bilinear(res)
        res = conv3x3_s1_reflect(res, stage["conv_w"], stage["conv_b"])

    return jnp.transpose(res, (0, 3, 1, 2))               # back to NCHW


# ========================= deterministic params ==========================

def make_params(seed=0):
    """Raw parameters in PyTorch-like layouts."""
    keys = iter(jax.random.split(jax.random.PRNGKey(seed), 64))

    def nrm(shape):
        fan_in = shape[0] if len(shape) == 2 else math.prod(shape[:-1])
        return (1.0 / math.sqrt(fan_in)) * jax.random.normal(
            next(keys), shape, dtype=jnp.float32)

    def z(shape):
        return jnp.zeros(shape, jnp.float32)

    def ones(shape):
        return jnp.ones(shape, jnp.float32)

    def backbone():
        half = NUM_CHANNELS // 2
        return {"w1": nrm((3, 3, 3, half)), "b1": z((half,)),
                "w2": nrm((3, 3, half, NUM_CHANNELS)), "b2": z((NUM_CHANNELS,))}

    def attn_params(D):
        return {"wq": nrm((D, D)), "bq": z((D,)),
                "wk": nrm((D, D)), "bk": z((D,)),
                "wv": nrm((D, D)), "bv": z((D,)),
                "wo": nrm((D, D)), "bo": z((D,))}

    def layer_params(D):
        return {"attn": attn_params(D),
                "ln1_g": ones((D,)), "ln1_b": z((D,)),
                "ffn": {"w1": nrm((D, DIM_FF)), "b1": z((DIM_FF,)),
                        "w2": nrm((DIM_FF, D)), "b2": z((D,))},
                "ln2_g": ones((D,)), "ln2_b": z((D,))}

    tail = []
    for ri in range(REDUCE_TIMES):
        times = 2 ** ri
        c_in = NUM_CHANNELS // times
        c_mid = NUM_CHANNELS // (times * 2)
        out_c = 3 if ri == REDUCE_TIMES - 1 else c_mid
        tail.append({
            "res": {"w1": nrm((3, 3, c_in, c_mid)), "b1": z((c_mid,)),
                    "w2": nrm((3, 3, c_mid, c_in)), "b2": z((c_in,))},
            "conv_w": nrm((3, 3, c_in, out_c)), "conv_b": z((out_c,)),
        })

    return {
        "backbone_c": backbone(),
        "backbone_s": backbone(),
        "input_proj_c": {"w": nrm((NUM_CHANNELS, HIDDEN_DIM)), "b": z((HIDDEN_DIM,))},
        "input_proj_s": {"w": nrm((NUM_CHANNELS, HIDDEN_DIM)), "b": z((HIDDEN_DIM,))},
        "output_proj": {"w": nrm((HIDDEN_DIM, NUM_CHANNELS)), "b": z((NUM_CHANNELS,))},
        "transformer": {"enc": layer_params(HIDDEN_DIM),
                        "dec": layer_params(HIDDEN_DIM)},
        "tail": tail,
    }


def prepare_params(raw):
    """One-time re-layout of weights into kernel-ready form (hoisted out of
    the per-forward path): bf16 matmul weights, (1, N) bias rows, and 3x3
    conv weights flattened tap-major to (9*Cin, Cout)."""
    def mat(w):
        return w.astype(jnp.bfloat16)

    def row(b):
        return b.reshape(1, -1).astype(jnp.float32)

    def conv9(w):                                        # (3,3,Cin,Cout)
        return w.reshape(-1, w.shape[-1]).astype(jnp.bfloat16)

    def attn(a):
        return {"wq": mat(a["wq"]), "bq": row(a["bq"]),
                "wk": mat(a["wk"]), "bk": row(a["bk"]),
                "wv": mat(a["wv"]), "bv": row(a["bv"]),
                "wo": mat(a["wo"]), "bo": row(a["bo"])}

    def layer(l):
        return {"attn": attn(l["attn"]),
                "ln1_g": row(l["ln1_g"]), "ln1_b": row(l["ln1_b"]),
                "ffn": {"w1": mat(l["ffn"]["w1"]), "b1": row(l["ffn"]["b1"]),
                        "w2": mat(l["ffn"]["w2"]), "b2": row(l["ffn"]["b2"])},
                "ln2_g": row(l["ln2_g"]), "ln2_b": row(l["ln2_b"])}

    def backbone(b):
        return {"w1": conv9(b["w1"]), "b1": row(b["b1"]),
                "w2": conv9(b["w2"]), "b2": row(b["b2"])}

    tail = []
    for st in raw["tail"]:
        tail.append({
            "res": {"w1": conv9(st["res"]["w1"]), "b1": row(st["res"]["b1"]),
                    "w2": conv9(st["res"]["w2"]), "b2": row(st["res"]["b2"])},
            "conv_w": conv9(st["conv_w"]), "conv_b": row(st["conv_b"]),
        })

    return {
        "backbone_c": backbone(raw["backbone_c"]),
        "backbone_s": backbone(raw["backbone_s"]),
        "input_proj_c": {"w": mat(raw["input_proj_c"]["w"]),
                         "b": row(raw["input_proj_c"]["b"])},
        "input_proj_s": {"w": mat(raw["input_proj_s"]["w"]),
                         "b": row(raw["input_proj_s"]["b"])},
        "output_proj": {"w": mat(raw["output_proj"]["w"]),
                        "b": row(raw["output_proj"]["b"])},
        "transformer": {"enc": layer(raw["transformer"]["enc"]),
                        "dec": layer(raw["transformer"]["dec"])},
        "tail": tail,
    }


# ================================ main ===================================

if __name__ == "__main__":
    raw_params = make_params(0)
    params = prepare_params(raw_params)       # one-time weight preparation

    key = jax.random.PRNGKey(0)
    k1, k2 = jax.random.split(key)
    samples = jax.random.normal(k1, (BATCH, 3, IMG_H, IMG_W), dtype=jnp.float32)
    style = jax.random.normal(k2, (BATCH, 3, IMG_H, IMG_W), dtype=jnp.float32)

    fwd = jax.jit(istt_nofold_forward)
    out = fwd(samples, style, params)
    out = jax.block_until_ready(out)
    assert out.shape == (BATCH, 3, IMG_H, IMG_W), out.shape
    print("KERNEL_OK")
</pallas_src>

<mosaic_0001>
module attributes {stable_mosaic.version = 11 : i64} {
  func.func @_matmul_bias_kernel(%arg0: i32, %arg1: memref<64x27xf32, #tpu.memory_space<vmem>>, %arg2: memref<27x16xbf16, #tpu.memory_space<vmem>>, %arg3: memref<1x16xf32, #tpu.memory_space<vmem>>, %arg4: memref<64x16xf32, #tpu.memory_space<vmem>>) attributes {dimension_semantics = [#tpu.dimension_semantics<parallel>], iteration_bounds = array<i64: 2>, scalar_prefetch = 0 : i64, scratch_operands = 0 : i64, tpu.core_type = #tpu.core_type<tc>, window_params = [{transform_indices = @transform_0, window_bounds = array<i64: 64, 27>}, {pipeline_mode = #tpu.pipeline_mode<synchronous>, transform_indices = @transform_1, window_bounds = array<i64: 27, 16>}, {pipeline_mode = #tpu.pipeline_mode<synchronous>, transform_indices = @transform_2, window_bounds = array<i64: 1, 16>}, {transform_indices = @transform_3, window_bounds = array<i64: 64, 16>}]} {
    %c0 = arith.constant 0 : index
    %c0_0 = arith.constant 0 : index
    %0 = vector.load %arg1[%c0, %c0_0] : memref<64x27xf32, #tpu.memory_space<vmem>>, vector<64x27xf32>
    %1 = arith.truncf %0 : vector<64x27xf32> to vector<64x27xbf16>
    %c0_1 = arith.constant 0 : index
    %c0_2 = arith.constant 0 : index
    %2 = vector.load %arg2[%c0_1, %c0_2] : memref<27x16xbf16, #tpu.memory_space<vmem>>, vector<27x16xbf16>
    %cst = arith.constant dense<0.000000e+00> : vector<64x16xf32>
    %3 = tpu.matmul %1, %2, %cst {dimension_numbers = #tpu.dot_dimension_numbers<[1], [0], [0], [1], [0, 0, 1, 1], [], []>} : vector<64x27xbf16>, vector<27x16xbf16>, vector<64x16xf32> -> vector<64x16xf32>
    %c0_3 = arith.constant 0 : index
    %c0_4 = arith.constant 0 : index
    %4 = vector.load %arg3[%c0_3, %c0_4] : memref<1x16xf32, #tpu.memory_space<vmem>>, vector<1x16xf32>
    %5 = vector.broadcast %4 : vector<1x16xf32> to vector<64x16xf32>
    %6 = arith.addf %3, %5 : vector<64x16xf32>
    %cst_5 = arith.constant 0.000000e+00 : f32
    %7 = vector.broadcast %cst_5 : f32 to vector<64x16xf32>
    %8 = arith.maximumf %6, %7 : vector<64x16xf32>
    %c0_6 = arith.constant 0 : index
    %c0_7 = arith.constant 0 : index
    %9 = vector.load %arg4[%c0_6, %c0_7] : memref<64x16xf32, #tpu.memory_space<vmem>>, vector<64x16xf32>
    tpu.vector_store %arg4[%c0_6, %c0_7], %8 {strides = array<i32>} : memref<64x16xf32, #tpu.memory_space<vmem>>, vector<64x16xf32>,
    return
  }
  func.func @transform_0(%arg0: i32) -> (i32, i32) {
    %c0_i32 = arith.constant 0 : i32
    %c0_i32_0 = arith.constant 0 : i32
    return %arg0, %c0_i32 : i32, i32
  }
  func.func @transform_1(%arg0: i32) -> (i32, i32) {
    %c0_i32 = arith.constant 0 : i32
    %c0_i32_0 = arith.constant 0 : i32
    %c0_i32_1 = arith.constant 0 : i32
    return %c0_i32, %c0_i32_0 : i32, i32
  }
  func.func @transform_2(%arg0: i32) -> (i32, i32) {
    %c0_i32 = arith.constant 0 : i32
    %c0_i32_0 = arith.constant 0 : i32
    %c0_i32_1 = arith.constant 0 : i32
    return %c0_i32, %c0_i32_0 : i32, i32
  }
  func.func @transform_3(%arg0: i32) -> (i32, i32) {
    %c0_i32 = arith.constant 0 : i32
    %c0_i32_0 = arith.constant 0 : i32
    return %arg0, %c0_i32 : i32, i32
  }
}

module attributes {stable_mosaic.version = 11 : i64} {
  func.func @_matmul_bias_kernel(%arg0: i32, %arg1: memref<16x32xf32, #tpu.memory_space<vmem>>, %arg2: memref<32x32xbf16, #tpu.memory_space<vmem>>, %arg3: memref<1x32xf32, #tpu.memory_space<vmem>>, %arg4: memref<16x32xf32, #tpu.memory_space<vmem>>) attributes {dimension_semantics = [#tpu.dimension_semantics<parallel>], iteration_bounds = array<i64: 2>, scalar_prefetch = 0 : i64, scratch_operands = 0 : i64, tpu.core_type = #tpu.core_type<tc>, window_params = [{transform_indices = @transform_0, window_bounds = array<i64: 16, 32>}, {pipeline_mode = #tpu.pipeline_mode<synchronous>, transform_indices = @transform_1, window_bounds = array<i64: 32, 32>}, {pipeline_mode = #tpu.pipeline_mode<synchronous>, transform_indices = @transform_2, window_bounds = array<i64: 1, 32>}, {transform_indices = @transform_3, window_bounds = array<i64: 16, 32>}]} {
    %c0 = arith.constant 0 : index
    %c0_0 = arith.constant 0 : index
    %0 = vector.load %arg1[%c0, %c0_0] : memref<16x32xf32, #tpu.memory_space<vmem>>, vector<16x32xf32>
    %1 = arith.truncf %0 : vector<16x32xf32> to vector<16x32xbf16>
    %c0_1 = arith.constant 0 : index
    %c0_2 = arith.constant 0 : index
    %2 = vector.load %arg2[%c0_1, %c0_2] : memref<32x32xbf16, #tpu.memory_space<vmem>>, vector<32x32xbf16>
    %cst = arith.constant dense<0.000000e+00> : vector<16x32xf32>
    %3 = tpu.matmul %1, %2, %cst {dimension_numbers = #tpu.dot_dimension_numbers<[1], [0], [0], [1], [0, 0, 1, 1], [], []>} : vector<16x32xbf16>, vector<32x32xbf16>, vector<16x32xf32> -> vector<16x32xf32>
    %c0_3 = arith.constant 0 : index
    %c0_4 = arith.constant 0 : index
    %4 = vector.load %arg3[%c0_3, %c0_4] : memref<1x32xf32, #tpu.memory_space<vmem>>, vector<1x32xf32>
    %5 = vector.broadcast %4 : vector<1x32xf32> to vector<16x32xf32>
    %6 = arith.addf %3, %5 : vector<16x32xf32>
    %c0_5 = arith.constant 0 : index
    %c0_6 = arith.constant 0 : index
    %7 = vector.load %arg4[%c0_5, %c0_6] : memref<16x32xf32, #tpu.memory_space<vmem>>, vector<16x32xf32>
    tpu.vector_store %arg4[%c0_5, %c0_6], %6 {strides = array<i32>} : memref<16x32xf32, #tpu.memory_space<vmem>>, vector<16x32xf32>,
    return
  }
  func.func @transform_0(%arg0: i32) -> (i32, i32) {
    %c0_i32 = arith.constant 0 : i32
    %c0_i32_0 = arith.constant 0 : i32
    return %arg0, %c0_i32 : i32, i32
  }
  func.func @transform_1(%arg0: i32) -> (i32, i32) {
    %c0_i32 = arith.constant 0 : i32
    %c0_i32_0 = arith.constant 0 : i32
    %c0_i32_1 = arith.constant 0 : i32
    return %c0_i32, %c0_i32_0 : i32, i32
  }
  func.func @transform_2(%arg0: i32) -> (i32, i32) {
    %c0_i32 = arith.constant 0 : i32
    %c0_i32_0 = arith.constant 0 : i32
    %c0_i32_1 = arith.constant 0 : i32
    return %c0_i32, %c0_i32_0 : i32, i32
  }
  func.func @transform_3(%arg0: i32) -> (i32, i32) {
    %c0_i32 = arith.constant 0 : i32
    %c0_i32_0 = arith.constant 0 : i32
    return %arg0, %c0_i32 : i32, i32
  }
}

module attributes {stable_mosaic.version = 11 : i64} {
  func.func @_matmul_bias_kernel(%arg0: i32, %arg1: memref<16x144xf32, #tpu.memory_space<vmem>>, %arg2: memref<144x32xbf16, #tpu.memory_space<vmem>>, %arg3: memref<1x32xf32, #tpu.memory_space<vmem>>, %arg4: memref<16x32xf32, #tpu.memory_space<vmem>>) attributes {dimension_semantics = [#tpu.dimension_semantics<parallel>], iteration_bounds = array<i64: 2>, scalar_prefetch = 0 : i64, scratch_operands = 0 : i64, tpu.core_type = #tpu.core_type<tc>, window_params = [{transform_indices = @transform_0, window_bounds = array<i64: 16, 144>}, {pipeline_mode = #tpu.pipeline_mode<synchronous>, transform_indices = @transform_1, window_bounds = array<i64: 144, 32>}, {pipeline_mode = #tpu.pipeline_mode<synchronous>, transform_indices = @transform_2, window_bounds = array<i64: 1, 32>}, {transform_indices = @transform_3, window_bounds = array<i64: 16, 32>}]} {
    %c0 = arith.constant 0 : index
    %c0_0 = arith.constant 0 : index
    %0 = vector.load %arg1[%c0, %c0_0] : memref<16x144xf32, #tpu.memory_space<vmem>>, vector<16x144xf32>
    %1 = arith.truncf %0 : vector<16x144xf32> to vector<16x144xbf16>
    %c0_1 = arith.constant 0 : index
    %c0_2 = arith.constant 0 : index
    %2 = vector.load %arg2[%c0_1, %c0_2] : memref<144x32xbf16, #tpu.memory_space<vmem>>, vector<144x32xbf16>
    %cst = arith.constant dense<0.000000e+00> : vector<16x32xf32>
    %3 = tpu.matmul %1, %2, %cst {dimension_numbers = #tpu.dot_dimension_numbers<[1], [0], [0], [1], [0, 0, 1, 1], [], []>} : vector<16x144xbf16>, vector<144x32xbf16>, vector<16x32xf32> -> vector<16x32xf32>
    %c0_3 = arith.constant 0 : index
    %c0_4 = arith.constant 0 : index
    %4 = vector.load %arg3[%c0_3, %c0_4] : memref<1x32xf32, #tpu.memory_space<vmem>>, vector<1x32xf32>
    %5 = vector.broadcast %4 : vector<1x32xf32> to vector<16x32xf32>
    %6 = arith.addf %3, %5 : vector<16x32xf32>
    %cst_5 = arith.constant 0.000000e+00 : f32
    %7 = vector.broadcast %cst_5 : f32 to vector<16x32xf32>
    %8 = arith.maximumf %6, %7 : vector<16x32xf32>
    %c0_6 = arith.constant 0 : index
    %c0_7 = arith.constant 0 : index
    %9 = vector.load %arg4[%c0_6, %c0_7] : memref<16x32xf32, #tpu.memory_space<vmem>>, vector<16x32xf32>
    tpu.vector_store %arg4[%c0_6, %c0_7], %8 {strides = array<i32>} : memref<16x32xf32, #tpu.memory_space<vmem>>, vector<16x32xf32>,
    return
  }
  func.func @transform_0(%arg0: i32) -> (i32, i32) {
    %c0_i32 = arith.constant 0 : i32
    %c0_i32_0 = arith.constant 0 : i32
    return %arg0, %c0_i32 : i32, i32
  }
  func.func @transform_1(%arg0: i32) -> (i32, i32) {
    %c0_i32 = arith.constant 0 : i32
    %c0_i32_0 = arith.constant 0 : i32
    %c0_i32_1 = arith.constant 0 : i32
    return %c0_i32, %c0_i32_0 : i32, i32
  }
  func.func @transform_2(%arg0: i32) -> (i32, i32) {
    %c0_i32 = arith.constant 0 : i32
    %c0_i32_0 = arith.constant 0 : i32
    %c0_i32_1 = arith.constant 0 : i32
    return %c0_i32, %c0_i32_0 : i32, i32
  }
  func.func @transform_3(%arg0: i32) -> (i32, i32) {
    %c0_i32 = arith.constant 0 : i32
    %c0_i32_0 = arith.constant 0 : i32
    return %arg0, %c0_i32 : i32, i32
  }
}

module attributes {stable_mosaic.version = 11 : i64} {
  func.func @_tlayer_kernel(%arg0: i32, %arg1: memref<1x16x32xf32, #tpu.memory_space<vmem>>, %arg2: memref<1x16x32xf32, #tpu.memory_space<vmem>>, %arg3: memref<1x16x32xf32, #tpu.memory_space<vmem>>, %arg4: memref<1x16x32xf32, #tpu.memory_space<vmem>>, %arg5: memref<32x32xbf16, #tpu.memory_space<vmem>>, %arg6: memref<1x32xf32, #tpu.memory_space<vmem>>, %arg7: memref<32x32xbf16, #tpu.memory_space<vmem>>, %arg8: memref<1x32xf32, #tpu.memory_space<vmem>>, %arg9: memref<32x32xbf16, #tpu.memory_space<vmem>>, %arg10: memref<1x32xf32, #tpu.memory_space<vmem>>, %arg11: memref<32x32xbf16, #tpu.memory_space<vmem>>, %arg12: memref<1x32xf32, #tpu.memory_space<vmem>>, %arg13: memref<1x32xf32, #tpu.memory_space<vmem>>, %arg14: memref<1x32xf32, #tpu.memory_space<vmem>>, %arg15: memref<32x64xbf16, #tpu.memory_space<vmem>>, %arg16: memref<1x64xf32, #tpu.memory_space<vmem>>, %arg17: memref<64x32xbf16, #tpu.memory_space<vmem>>, %arg18: memref<1x32xf32, #tpu.memory_space<vmem>>, %arg19: memref<1x32xf32, #tpu.memory_space<vmem>>, %arg20: memref<1x32xf32, #tpu.memory_space<vmem>>, %arg21: memref<1x16x32xf32, #tpu.memory_space<vmem>>) attributes {dimension_semantics = [#tpu.dimension_semantics<parallel>], iteration_bounds = array<i64: 2>, scalar_prefetch = 0 : i64, scratch_operands = 0 : i64, tpu.core_type = #tpu.core_type<tc>, window_params = [{transform_indices = @transform_0, window_bounds = array<i64: 1, 16, 32>}, {transform_indices = @transform_1, window_bounds = array<i64: 1, 16, 32>}, {transform_indices = @transform_2, window_bounds = array<i64: 1, 16, 32>}, {transform_indices = @transform_3, window_bounds = array<i64: 1, 16, 32>}, {pipeline_mode = #tpu.pipeline_mode<synchronous>, transform_indices = @transform_4, window_bounds = array<i64: 32, 32>}, {pipeline_mode = #tpu.pipeline_mode<synchronous>, transform_indices = @transform_5, window_bounds = array<i64: 1, 32>}, {pipeline_mode = #tpu.pipeline_mode<synchronous>, transform_indices = @transform_6, window_bounds = array<i64: 32, 32>}, {pipeline_mode = #tpu.pipeline_mode<synchronous>, transform_indices = @transform_7, window_bounds = array<i64: 1, 32>}, {pipeline_mode = #tpu.pipeline_mode<synchronous>, transform_indices = @transform_8, window_bounds = array<i64: 32, 32>}, {pipeline_mode = #tpu.pipeline_mode<synchronous>, transform_indices = @transform_9, window_bounds = array<i64: 1, 32>}, {pipeline_mode = #tpu.pipeline_mode<synchronous>, transform_indices = @transform_10, window_bounds = array<i64: 32, 32>}, {pipeline_mode = #tpu.pipeline_mode<synchronous>, transform_indices = @transform_11, window_bounds = array<i64: 1, 32>}, {pipeline_mode = #tpu.pipeline_mode<synchronous>, transform_indices = @transform_12, window_bounds = array<i64: 1, 32>}, {pipeline_mode = #tpu.pipeline_mode<synchronous>, transform_indices = @transform_13, window_bounds = array<i64: 1, 32>}, {pipeline_mode = #tpu.pipeline_mode<synchronous>, transform_indices = @transform_14, window_bounds = array<i64: 32, 64>}, {pipeline_mode = #tpu.pipeline_mode<synchronous>, transform_indices = @transform_15, window_bounds = array<i64: 1, 64>}, {pipeline_mode = #tpu.pipeline_mode<synchronous>, transform_indices = @transform_16, window_bounds = array<i64: 64, 32>}, {pipeline_mode = #tpu.pipeline_mode<synchronous>, transform_indices = @transform_17, window_bounds = array<i64: 1, 32>}, {pipeline_mode = #tpu.pipeline_mode<synchronous>, transform_indices = @transform_18, window_bounds = array<i64: 1, 32>}, {pipeline_mode = #tpu.pipeline_mode<synchronous>, transform_indices = @transform_19, window_bounds = array<i64: 1, 32>}, {transform_indices = @transform_20, window_bounds = array<i64: 1, 16, 32>}]} {
    %c0 = arith.constant 0 : index
    %c0_0 = arith.constant 0 : index
    %c0_1 = arith.constant 0 : index
    %0 = vector.load %arg1[%c0, %c0_0, %c0_1] : memref<1x16x32xf32, #tpu.memory_space<vmem>>, vector<1x16x32xf32>
    %1 = vector.shape_cast %0 : vector<1x16x32xf32> to vector<16x32xf32>
    %c0_2 = arith.constant 0 : index
    %c0_3 = arith.constant 0 : index
    %c0_4 = arith.constant 0 : index
    %2 = vector.load %arg3[%c0_2, %c0_3, %c0_4] : memref<1x16x32xf32, #tpu.memory_space<vmem>>, vector<1x16x32xf32>
    %3 = vector.shape_cast %2 : vector<1x16x32xf32> to vector<16x32xf32>
    %c0_5 = arith.constant 0 : index
    %c0_6 = arith.constant 0 : index
    %c0_7 = arith.constant 0 : index
    %4 = vector.load %arg2[%c0_5, %c0_6, %c0_7] : memref<1x16x32xf32, #tpu.memory_space<vmem>>, vector<1x16x32xf32>
    %5 = vector.shape_cast %4 : vector<1x16x32xf32> to vector<16x32xf32>
    %6 = arith.addf %1, %5 : vector<16x32xf32>
    %7 = arith.truncf %6 : vector<16x32xf32> to vector<16x32xbf16>
    %c0_8 = arith.constant 0 : index
    %c0_9 = arith.constant 0 : index
    %c0_10 = arith.constant 0 : index
    %8 = vector.load %arg4[%c0_8, %c0_9, %c0_10] : memref<1x16x32xf32, #tpu.memory_space<vmem>>, vector<1x16x32xf32>
    %9 = vector.shape_cast %8 : vector<1x16x32xf32> to vector<16x32xf32>
    %10 = arith.addf %3, %9 : vector<16x32xf32>
    %11 = arith.truncf %10 : vector<16x32xf32> to vector<16x32xbf16>
    %12 = arith.truncf %3 : vector<16x32xf32> to vector<16x32xbf16>
    %c0_11 = arith.constant 0 : index
    %c0_12 = arith.constant 0 : index
    %13 = vector.load %arg5[%c0_11, %c0_12] : memref<32x32xbf16, #tpu.memory_space<vmem>>, vector<32x32xbf16>
    %cst = arith.constant dense<0.000000e+00> : vector<16x32xf32>
    %14 = tpu.matmul %7, %13, %cst {dimension_numbers = #tpu.dot_dimension_numbers<[1], [0], [0], [1], [0, 0, 1, 1], [], []>} : vector<16x32xbf16>, vector<32x32xbf16>, vector<16x32xf32> -> vector<16x32xf32>
    %c0_13 = arith.constant 0 : index
    %c0_14 = arith.constant 0 : index
    %15 = vector.load %arg6[%c0_13, %c0_14] : memref<1x32xf32, #tpu.memory_space<vmem>>, vector<1x32xf32>
    %16 = vector.broadcast %15 : vector<1x32xf32> to vector<16x32xf32>
    %17 = arith.addf %14, %16 : vector<16x32xf32>
    %c0_15 = arith.constant 0 : index
    %c0_16 = arith.constant 0 : index
    %18 = vector.load %arg7[%c0_15, %c0_16] : memref<32x32xbf16, #tpu.memory_space<vmem>>, vector<32x32xbf16>
    %cst_17 = arith.constant dense<0.000000e+00> : vector<16x32xf32>
    %19 = tpu.matmul %11, %18, %cst_17 {dimension_numbers = #tpu.dot_dimension_numbers<[1], [0], [0], [1], [0, 0, 1, 1], [], []>} : vector<16x32xbf16>, vector<32x32xbf16>, vector<16x32xf32> -> vector<16x32xf32>
    %c0_18 = arith.constant 0 : index
    %c0_19 = arith.constant 0 : index
    %20 = vector.load %arg8[%c0_18, %c0_19] : memref<1x32xf32, #tpu.memory_space<vmem>>, vector<1x32xf32>
    %21 = vector.broadcast %20 : vector<1x32xf32> to vector<16x32xf32>
    %22 = arith.addf %19, %21 : vector<16x32xf32>
    %c0_20 = arith.constant 0 : index
    %c0_21 = arith.constant 0 : index
    %23 = vector.load %arg9[%c0_20, %c0_21] : memref<32x32xbf16, #tpu.memory_space<vmem>>, vector<32x32xbf16>
    %cst_22 = arith.constant dense<0.000000e+00> : vector<16x32xf32>
    %24 = tpu.matmul %12, %23, %cst_22 {dimension_numbers = #tpu.dot_dimension_numbers<[1], [0], [0], [1], [0, 0, 1, 1], [], []>} : vector<16x32xbf16>, vector<32x32xbf16>, vector<16x32xf32> -> vector<16x32xf32>
    %c0_23 = arith.constant 0 : index
    %c0_24 = arith.constant 0 : index
    %25 = vector.load %arg10[%c0_23, %c0_24] : memref<1x32xf32, #tpu.memory_space<vmem>>, vector<1x32xf32>
    %26 = vector.broadcast %25 : vector<1x32xf32> to vector<16x32xf32>
    %27 = arith.addf %24, %26 : vector<16x32xf32>
    %cst_25 = arith.constant 0.353553385 : f32
    %28 = vector.broadcast %cst_25 : f32 to vector<16x32xf32>
    %29 = arith.mulf %17, %28 : vector<16x32xf32>
    %30 = arith.truncf %29 : vector<16x32xf32> to vector<16x32xbf16>
    %31 = arith.truncf %22 : vector<16x32xf32> to vector<16x32xbf16>
    %32 = arith.truncf %27 : vector<16x32xf32> to vector<16x32xbf16>
    %33 = vector.extract_strided_slice %30 {offsets = [0, 0], sizes = [16, 8], strides = [1, 1]} : vector<16x32xbf16> to vector<16x8xbf16>
    %34 = vector.extract_strided_slice %31 {offsets = [0, 0], sizes = [16, 8], strides = [1, 1]} : vector<16x32xbf16> to vector<16x8xbf16>
    %cst_26 = arith.constant dense<0.000000e+00> : vector<16x16xf32>
    %35 = tpu.matmul %33, %34, %cst_26 {dimension_numbers = #tpu.dot_dimension_numbers<[1], [1], [0], [0], [0, 0, 1, 0], [], []>} : vector<16x8xbf16>, vector<16x8xbf16>, vector<16x16xf32> -> vector<16x16xf32>
    %cst_27 = arith.constant dense<0xFF800000> : vector<16xf32>
    %36 = vector.multi_reduction <maximumf>, %35, %cst_27 [1] : vector<16x16xf32> to vector<16xf32>
    %37 = vector.shape_cast %36 : vector<16xf32> to vector<16x1xf32>
    %38 = vector.broadcast %37 : vector<16x1xf32> to vector<16x16xf32>
    %39 = arith.subf %35, %38 : vector<16x16xf32>
    %40 = math.exp %39 : vector<16x16xf32>
    %cst_28 = arith.constant dense<0.000000e+00> : vector<16xf32>
    %41 = vector.multi_reduction <add>, %40, %cst_28 [1] : vector<16x16xf32> to vector<16xf32>
    %42 = vector.shape_cast %41 : vector<16xf32> to vector<16x1xf32>
    %43 = vector.broadcast %42 : vector<16x1xf32> to vector<16x16xf32>
    %44 = arith.divf %40, %43 : vector<16x16xf32>
    %45 = arith.truncf %44 : vector<16x16xf32> to vector<16x16xbf16>
    %46 = vector.extract_strided_slice %32 {offsets = [0, 0], sizes = [16, 8], strides = [1, 1]} : vector<16x32xbf16> to vector<16x8xbf16>
    %cst_29 = arith.constant dense<0.000000e+00> : vector<16x8xf32>
    %47 = tpu.matmul %45, %46, %cst_29 {dimension_numbers = #tpu.dot_dimension_numbers<[1], [0], [0], [1], [0, 0, 1, 1], [], []>} : vector<16x16xbf16>, vector<16x8xbf16>, vector<16x8xf32> -> vector<16x8xf32>
    %48 = vector.extract_strided_slice %30 {offsets = [0, 8], sizes = [16, 8], strides = [1, 1]} : vector<16x32xbf16> to vector<16x8xbf16>
    %49 = vector.extract_strided_slice %31 {offsets = [0, 8], sizes = [16, 8], strides = [1, 1]} : vector<16x32xbf16> to vector<16x8xbf16>
    %cst_30 = arith.constant dense<0.000000e+00> : vector<16x16xf32>
    %50 = tpu.matmul %48, %49, %cst_30 {dimension_numbers = #tpu.dot_dimension_numbers<[1], [1], [0], [0], [0, 0, 1, 0], [], []>} : vector<16x8xbf16>, vector<16x8xbf16>, vector<16x16xf32> -> vector<16x16xf32>
    %cst_31 = arith.constant dense<0xFF800000> : vector<16xf32>
    %51 = vector.multi_reduction <maximumf>, %50, %cst_31 [1] : vector<16x16xf32> to vector<16xf32>
    %52 = vector.shape_cast %51 : vector<16xf32> to vector<16x1xf32>
    %53 = vector.broadcast %52 : vector<16x1xf32> to vector<16x16xf32>
    %54 = arith.subf %50, %53 : vector<16x16xf32>
    %55 = math.exp %54 : vector<16x16xf32>
    %cst_32 = arith.constant dense<0.000000e+00> : vector<16xf32>
    %56 = vector.multi_reduction <add>, %55, %cst_32 [1] : vector<16x16xf32> to vector<16xf32>
    %57 = vector.shape_cast %56 : vector<16xf32> to vector<16x1xf32>
    %58 = vector.broadcast %57 : vector<16x1xf32> to vector<16x16xf32>
    %59 = arith.divf %55, %58 : vector<16x16xf32>
    %60 = arith.truncf %59 : vector<16x16xf32> to vector<16x16xbf16>
    %61 = vector.extract_strided_slice %32 {offsets = [0, 8], sizes = [16, 8], strides = [1, 1]} : vector<16x32xbf16> to vector<16x8xbf16>
    %cst_33 = arith.constant dense<0.000000e+00> : vector<16x8xf32>
    %62 = tpu.matmul %60, %61, %cst_33 {dimension_numbers = #tpu.dot_dimension_numbers<[1], [0], [0], [1], [0, 0, 1, 1], [], []>} : vector<16x16xbf16>, vector<16x8xbf16>, vector<16x8xf32> -> vector<16x8xf32>
    %63 = vector.extract_strided_slice %30 {offsets = [0, 16], sizes = [16, 8], strides = [1, 1]} : vector<16x32xbf16> to vector<16x8xbf16>
    %64 = vector.extract_strided_slice %31 {offsets = [0, 16], sizes = [16, 8], strides = [1, 1]} : vector<16x32xbf16> to vector<16x8xbf16>
    %cst_34 = arith.constant dense<0.000000e+00> : vector<16x16xf32>
    %65 = tpu.matmul %63, %64, %cst_34 {dimension_numbers = #tpu.dot_dimension_numbers<[1], [1], [0], [0], [0, 0, 1, 0], [], []>} : vector<16x8xbf16>, vector<16x8xbf16>, vector<16x16xf32> -> vector<16x16xf32>
    %cst_35 = arith.constant dense<0xFF800000> : vector<16xf32>
    %66 = vector.multi_reduction <maximumf>, %65, %cst_35 [1] : vector<16x16xf32> to vector<16xf32>
    %67 = vector.shape_cast %66 : vector<16xf32> to vector<16x1xf32>
    %68 = vector.broadcast %67 : vector<16x1xf32> to vector<16x16xf32>
    %69 = arith.subf %65, %68 : vector<16x16xf32>
    %70 = math.exp %69 : vector<16x16xf32>
    %cst_36 = arith.constant dense<0.000000e+00> : vector<16xf32>
    %71 = vector.multi_reduction <add>, %70, %cst_36 [1] : vector<16x16xf32> to vector<16xf32>
    %72 = vector.shape_cast %71 : vector<16xf32> to vector<16x1xf32>
    %73 = vector.broadcast %72 : vector<16x1xf32> to vector<16x16xf32>
    %74 = arith.divf %70, %73 : vector<16x16xf32>
    %75 = arith.truncf %74 : vector<16x16xf32> to vector<16x16xbf16>
    %76 = vector.extract_strided_slice %32 {offsets = [0, 16], sizes = [16, 8], strides = [1, 1]} : vector<16x32xbf16> to vector<16x8xbf16>
    %cst_37 = arith.constant dense<0.000000e+00> : vector<16x8xf32>
    %77 = tpu.matmul %75, %76, %cst_37 {dimension_numbers = #tpu.dot_dimension_numbers<[1], [0], [0], [1], [0, 0, 1, 1], [], []>} : vector<16x16xbf16>, vector<16x8xbf16>, vector<16x8xf32> -> vector<16x8xf32>
    %78 = vector.extract_strided_slice %30 {offsets = [0, 24], sizes = [16, 8], strides = [1, 1]} : vector<16x32xbf16> to vector<16x8xbf16>
    %79 = vector.extract_strided_slice %31 {offsets = [0, 24], sizes = [16, 8], strides = [1, 1]} : vector<16x32xbf16> to vector<16x8xbf16>
    %cst_38 = arith.constant dense<0.000000e+00> : vector<16x16xf32>
    %80 = tpu.matmul %78, %79, %cst_38 {dimension_numbers = #tpu.dot_dimension_numbers<[1], [1], [0], [0], [0, 0, 1, 0], [], []>} : vector<16x8xbf16>, vector<16x8xbf16>, vector<16x16xf32> -> vector<16x16xf32>
    %cst_39 = arith.constant dense<0xFF800000> : vector<16xf32>
    %81 = vector.multi_reduction <maximumf>, %80, %cst_39 [1] : vector<16x16xf32> to vector<16xf32>
    %82 = vector.shape_cast %81 : vector<16xf32> to vector<16x1xf32>
    %83 = vector.broadcast %82 : vector<16x1xf32> to vector<16x16xf32>
    %84 = arith.subf %80, %83 : vector<16x16xf32>
    %85 = math.exp %84 : vector<16x16xf32>
    %cst_40 = arith.constant dense<0.000000e+00> : vector<16xf32>
    %86 = vector.multi_reduction <add>, %85, %cst_40 [1] : vector<16x16xf32> to vector<16xf32>
    %87 = vector.shape_cast %86 : vector<16xf32> to vector<16x1xf32>
    %88 = vector.broadcast %87 : vector<16x1xf32> to vector<16x16xf32>
    %89 = arith.divf %85, %88 : vector<16x16xf32>
    %90 = arith.truncf %89 : vector<16x16xf32> to vector<16x16xbf16>
    %91 = vector.extract_strided_slice %32 {offsets = [0, 24], sizes = [16, 8], strides = [1, 1]} : vector<16x32xbf16> to vector<16x8xbf16>
    %cst_41 = arith.constant dense<0.000000e+00> : vector<16x8xf32>
    %92 = tpu.matmul %90, %91, %cst_41 {dimension_numbers = #tpu.dot_dimension_numbers<[1], [0], [0], [1], [0, 0, 1, 1], [], []>} : vector<16x16xbf16>, vector<16x8xbf16>, vector<16x8xf32> -> vector<16x8xf32>
    %93 = tpu.concatenate %47, %62, %77, %92 in 1 : vector<16x8xf32>, vector<16x8xf32>, vector<16x8xf32>, vector<16x8xf32> -> vector<16x32xf32>
    %94 = arith.truncf %93 : vector<16x32xf32> to vector<16x32xbf16>
    %c0_42 = arith.constant 0 : index
    %c0_43 = arith.constant 0 : index
    %95 = vector.load %arg11[%c0_42, %c0_43] : memref<32x32xbf16, #tpu.memory_space<vmem>>, vector<32x32xbf16>
    %cst_44 = arith.constant dense<0.000000e+00> : vector<16x32xf32>
    %96 = tpu.matmul %94, %95, %cst_44 {dimension_numbers = #tpu.dot_dimension_numbers<[1], [0], [0], [1], [0, 0, 1, 1], [], []>} : vector<16x32xbf16>, vector<32x32xbf16>, vector<16x32xf32> -> vector<16x32xf32>
    %c0_45 = arith.constant 0 : index
    %c0_46 = arith.constant 0 : index
    %97 = vector.load %arg12[%c0_45, %c0_46] : memref<1x32xf32, #tpu.memory_space<vmem>>, vector<1x32xf32>
    %98 = vector.broadcast %97 : vector<1x32xf32> to vector<16x32xf32>
    %99 = arith.addf %96, %98 : vector<16x32xf32>
    %100 = arith.addf %1, %99 : vector<16x32xf32>
    %cst_47 = arith.constant dense<0.000000e+00> : vector<16xf32>
    %101 = vector.multi_reduction <add>, %100, %cst_47 [1] : vector<16x32xf32> to vector<16xf32>
    %102 = vector.shape_cast %101 : vector<16xf32> to vector<16x1xf32>
    %cst_48 = arith.constant 3.200000e+01 : f32
    %103 = vector.broadcast %cst_48 : f32 to vector<16x1xf32>
    %104 = arith.divf %102, %103 : vector<16x1xf32>
    %105 = vector.broadcast %104 : vector<16x1xf32> to vector<16x32xf32>
    %106 = arith.subf %100, %105 : vector<16x32xf32>
    %107 = arith.mulf %106, %106 : vector<16x32xf32>
    %cst_49 = arith.constant dense<0.000000e+00> : vector<16xf32>
    %108 = vector.multi_reduction <add>, %107, %cst_49 [1] : vector<16x32xf32> to vector<16xf32>
    %109 = vector.shape_cast %108 : vector<16xf32> to vector<16x1xf32>
    %cst_50 = arith.constant 3.200000e+01 : f32
    %110 = vector.broadcast %cst_50 : f32 to vector<16x1xf32>
    %111 = arith.divf %109, %110 : vector<16x1xf32>
    %cst_51 = arith.constant 9.99999974E-6 : f32
    %112 = vector.broadcast %cst_51 : f32 to vector<16x1xf32>
    %113 = arith.addf %111, %112 : vector<16x1xf32>
    %114 = math.rsqrt %113 : vector<16x1xf32>
    %115 = vector.broadcast %114 : vector<16x1xf32> to vector<16x32xf32>
    %116 = arith.mulf %106, %115 : vector<16x32xf32>
    %c0_52 = arith.constant 0 : index
    %c0_53 = arith.constant 0 : index
    %117 = vector.load %arg13[%c0_52, %c0_53] : memref<1x32xf32, #tpu.memory_space<vmem>>, vector<1x32xf32>
    %118 = vector.broadcast %117 : vector<1x32xf32> to vector<16x32xf32>
    %119 = arith.mulf %116, %118 : vector<16x32xf32>
    %c0_54 = arith.constant 0 : index
    %c0_55 = arith.constant 0 : index
    %120 = vector.load %arg14[%c0_54, %c0_55] : memref<1x32xf32, #tpu.memory_space<vmem>>, vector<1x32xf32>
    %121 = vector.broadcast %120 : vector<1x32xf32> to vector<16x32xf32>
    %122 = arith.addf %119, %121 : vector<16x32xf32>
    %123 = arith.truncf %122 : vector<16x32xf32> to vector<16x32xbf16>
    %c0_56 = arith.constant 0 : index
    %c0_57 = arith.constant 0 : index
    %124 = vector.load %arg15[%c0_56, %c0_57] : memref<32x64xbf16, #tpu.memory_space<vmem>>, vector<32x64xbf16>
    %cst_58 = arith.constant dense<0.000000e+00> : vector<16x64xf32>
    %125 = tpu.matmul %123, %124, %cst_58 {dimension_numbers = #tpu.dot_dimension_numbers<[1], [0], [0], [1], [0, 0, 1, 1], [], []>} : vector<16x32xbf16>, vector<32x64xbf16>, vector<16x64xf32> -> vector<16x64xf32>
    %c0_59 = arith.constant 0 : index
    %c0_60 = arith.constant 0 : index
    %126 = vector.load %arg16[%c0_59, %c0_60] : memref<1x64xf32, #tpu.memory_space<vmem>>, vector<1x64xf32>
    %127 = vector.broadcast %126 : vector<1x64xf32> to vector<16x64xf32>
    %128 = arith.addf %125, %127 : vector<16x64xf32>
    %cst_61 = arith.constant 0.000000e+00 : f32
    %129 = vector.broadcast %cst_61 : f32 to vector<16x64xf32>
    %130 = arith.maximumf %128, %129 : vector<16x64xf32>
    %131 = arith.truncf %130 : vector<16x64xf32> to vector<16x64xbf16>
    %c0_62 = arith.constant 0 : index
    %c0_63 = arith.constant 0 : index
    %132 = vector.load %arg17[%c0_62, %c0_63] : memref<64x32xbf16, #tpu.memory_space<vmem>>, vector<64x32xbf16>
    %cst_64 = arith.constant dense<0.000000e+00> : vector<16x32xf32>
    %133 = tpu.matmul %131, %132, %cst_64 {dimension_numbers = #tpu.dot_dimension_numbers<[1], [0], [0], [1], [0, 0, 1, 1], [], []>} : vector<16x64xbf16>, vector<64x32xbf16>, vector<16x32xf32> -> vector<16x32xf32>
    %c0_65 = arith.constant 0 : index
    %c0_66 = arith.constant 0 : index
    %134 = vector.load %arg18[%c0_65, %c0_66] : memref<1x32xf32, #tpu.memory_space<vmem>>, vector<1x32xf32>
    %135 = vector.broadcast %134 : vector<1x32xf32> to vector<16x32xf32>
    %136 = arith.addf %133, %135 : vector<16x32xf32>
    %137 = arith.addf %122, %136 : vector<16x32xf32>
    %cst_67 = arith.constant dense<0.000000e+00> : vector<16xf32>
    %138 = vector.multi_reduction <add>, %137, %cst_67 [1] : vector<16x32xf32> to vector<16xf32>
    %139 = vector.shape_cast %138 : vector<16xf32> to vector<16x1xf32>
    %cst_68 = arith.constant 3.200000e+01 : f32
    %140 = vector.broadcast %cst_68 : f32 to vector<16x1xf32>
    %141 = arith.divf %139, %140 : vector<16x1xf32>
    %142 = vector.broadcast %141 : vector<16x1xf32> to vector<16x32xf32>
    %143 = arith.subf %137, %142 : vector<16x32xf32>
    %144 = arith.mulf %143, %143 : vector<16x32xf32>
    %cst_69 = arith.constant dense<0.000000e+00> : vector<16xf32>
    %145 = vector.multi_reduction <add>, %144, %cst_69 [1] : vector<16x32xf32> to vector<16xf32>
    %146 = vector.shape_cast %145 : vector<16xf32> to vector<16x1xf32>
    %cst_70 = arith.constant 3.200000e+01 : f32
    %147 = vector.broadcast %cst_70 : f32 to vector<16x1xf32>
    %148 = arith.divf %146, %147 : vector<16x1xf32>
    %cst_71 = arith.constant 9.99999974E-6 : f32
    %149 = vector.broadcast %cst_71 : f32 to vector<16x1xf32>
    %150 = arith.addf %148, %149 : vector<16x1xf32>
    %151 = math.rsqrt %150 : vector<16x1xf32>
    %152 = vector.broadcast %151 : vector<16x1xf32> to vector<16x32xf32>
    %153 = arith.mulf %143, %152 : vector<16x32xf32>
    %c0_72 = arith.constant 0 : index
    %c0_73 = arith.constant 0 : index
    %154 = vector.load %arg19[%c0_72, %c0_73] : memref<1x32xf32, #tpu.memory_space<vmem>>, vector<1x32xf32>
    %155 = vector.broadcast %154 : vector<1x32xf32> to vector<16x32xf32>
    %156 = arith.mulf %153, %155 : vector<16x32xf32>
    %c0_74 = arith.constant 0 : index
    %c0_75 = arith.constant 0 : index
    %157 = vector.load %arg20[%c0_74, %c0_75] : memref<1x32xf32, #tpu.memory_space<vmem>>, vector<1x32xf32>
    %158 = vector.broadcast %157 : vector<1x32xf32> to vector<16x32xf32>
    %159 = arith.addf %156, %158 : vector<16x32xf32>
    %c0_76 = arith.constant 0 : index
    %c0_77 = arith.constant 0 : index
    %c0_78 = arith.constant 0 : index
    %160 = vector.load %arg21[%c0_76, %c0_77, %c0_78] : memref<1x16x32xf32, #tpu.memory_space<vmem>>, vector<1x16x32xf32>
    %161 = vector.shape_cast %160 : vector<1x16x32xf32> to vector<16x32xf32>
    %162 = vector.shape_cast %159 : vector<16x32xf32> to vector<1x16x32xf32>
    tpu.vector_store %arg21[%c0_76, %c0_77, %c0_78], %162 {strides = array<i32>} : memref<1x16x32xf32, #tpu.memory_space<vmem>>, vector<1x16x32xf32>,
    return
  }
  func.func @transform_0(%arg0: i32) -> (i32, i32, i32) {
    %c0_i32 = arith.constant 0 : i32
    %c0_i32_0 = arith.constant 0 : i32
    %c0_i32_1 = arith.constant 0 : i32
    return %arg0, %c0_i32, %c0_i32_0 : i32, i32, i32
  }
  func.func @transform_1(%arg0: i32) -> (i32, i32, i32) {
    %c0_i32 = arith.constant 0 : i32
    %c0_i32_0 = arith.constant 0 : i32
    %c0_i32_1 = arith.constant 0 : i32
    return %arg0, %c0_i32, %c0_i32_0 : i32, i32, i32
  }
  func.func @transform_2(%arg0: i32) -> (i32, i32, i32) {
    %c0_i32 = arith.constant 0 : i32
    %c0_i32_0 = arith.constant 0 : i32
    %c0_i32_1 = arith.constant 0 : i32
    return %arg0, %c0_i32, %c0_i32_0 : i32, i32, i32
  }
  func.func @transform_3(%arg0: i32) -> (i32, i32, i32) {
    %c0_i32 = arith.constant 0 : i32
    %c0_i32_0 = arith.constant 0 : i32
    %c0_i32_1 = arith.constant 0 : i32
    return %arg0, %c0_i32, %c0_i32_0 : i32, i32, i32
  }
  func.func @transform_4(%arg0: i32) -> (i32, i32) {
    %c0_i32 = arith.constant 0 : i32
    %c0_i32_0 = arith.constant 0 : i32
    %c0_i32_1 = arith.constant 0 : i32
    return %c0_i32, %c0_i32_0 : i32, i32
  }
  func.func @transform_5(%arg0: i32) -> (i32, i32) {
    %c0_i32 = arith.constant 0 : i32
    %c0_i32_0 = arith.constant 0 : i32
    %c0_i32_1 = arith.constant 0 : i32
    return %c0_i32, %c0_i32_0 : i32, i32
  }
  func.func @transform_6(%arg0: i32) -> (i32, i32) {
    %c0_i32 = arith.constant 0 : i32
    %c0_i32_0 = arith.constant 0 : i32
    %c0_i32_1 = arith.constant 0 : i32
    return %c0_i32, %c0_i32_0 : i32, i32
  }
  func.func @transform_7(%arg0: i32) -> (i32, i32) {
    %c0_i32 = arith.constant 0 : i32
    %c0_i32_0 = arith.constant 0 : i32
    %c0_i32_1 = arith.constant 0 : i32
    return %c0_i32, %c0_i32_0 : i32, i32
  }
  func.func @transform_8(%arg0: i32) -> (i32, i32) {
    %c0_i32 = arith.constant 0 : i32
    %c0_i32_0 = arith.constant 0 : i32
    %c0_i32_1 = arith.constant 0 : i32
    return %c0_i32, %c0_i32_0 : i32, i32
  }
  func.func @transform_9(%arg0: i32) -> (i32, i32) {
    %c0_i32 = arith.constant 0 : i32
    %c0_i32_0 = arith.constant 0 : i32
    %c0_i32_1 = arith.constant 0 : i32
    return %c0_i32, %c0_i32_0 : i32, i32
  }
  func.func @transform_10(%arg0: i32) -> (i32, i32) {
    %c0_i32 = arith.constant 0 : i32
    %c0_i32_0 = arith.constant 0 : i32
    %c0_i32_1 = arith.constant 0 : i32
    return %c0_i32, %c0_i32_0 : i32, i32
  }
  func.func @transform_11(%arg0: i32) -> (i32, i32) {
    %c0_i32 = arith.constant 0 : i32
    %c0_i32_0 = arith.constant 0 : i32
    %c0_i32_1 = arith.constant 0 : i32
    return %c0_i32, %c0_i32_0 : i32, i32
  }
  func.func @transform_12(%arg0: i32) -> (i32, i32) {
    %c0_i32 = arith.constant 0 : i32
    %c0_i32_0 = arith.constant 0 : i32
    %c0_i32_1 = arith.constant 0 : i32
    return %c0_i32, %c0_i32_0 : i32, i32
  }
  func.func @transform_13(%arg0: i32) -> (i32, i32) {
    %c0_i32 = arith.constant 0 : i32
    %c0_i32_0 = arith.constant 0 : i32
    %c0_i32_1 = arith.constant 0 : i32
    return %c0_i32, %c0_i32_0 : i32, i32
  }
  func.func @transform_14(%arg0: i32) -> (i32, i32) {
    %c0_i32 = arith.constant 0 : i32
    %c0_i32_0 = arith.constant 0 : i32
    %c0_i32_1 = arith.constant 0 : i32
    return %c0_i32, %c0_i32_0 : i32, i32
  }
  func.func @transform_15(%arg0: i32) -> (i32, i32) {
    %c0_i32 = arith.constant 0 : i32
    %c0_i32_0 = arith.constant 0 : i32
    %c0_i32_1 = arith.constant 0 : i32
    return %c0_i32, %c0_i32_0 : i32, i32
  }
  func.func @transform_16(%arg0: i32) -> (i32, i32) {
    %c0_i32 = arith.constant 0 : i32
    %c0_i32_0 = arith.constant 0 : i32
    %c0_i32_1 = arith.constant 0 : i32
    return %c0_i32, %c0_i32_0 : i32, i32
  }
  func.func @transform_17(%arg0: i32) -> (i32, i32) {
    %c0_i32 = arith.constant 0 : i32
    %c0_i32_0 = arith.constant 0 : i32
    %c0_i32_1 = arith.constant 0 : i32
    return %c0_i32, %c0_i32_0 : i32, i32
  }
  func.func @transform_18(%arg0: i32) -> (i32, i32) {
    %c0_i32 = arith.constant 0 : i32
    %c0_i32_0 = arith.constant 0 : i32
    %c0_i32_1 = arith.constant 0 : i32
    return %c0_i32, %c0_i32_0 : i32, i32
  }
  func.func @transform_19(%arg0: i32) -> (i32, i32) {
    %c0_i32 = arith.constant 0 : i32
    %c0_i32_0 = arith.constant 0 : i32
    %c0_i32_1 = arith.constant 0 : i32
    return %c0_i32, %c0_i32_0 : i32, i32
  }
  func.func @transform_20(%arg0: i32) -> (i32, i32, i32) {
    %c0_i32 = arith.constant 0 : i32
    %c0_i32_0 = arith.constant 0 : i32
    %c0_i32_1 = arith.constant 0 : i32
    return %arg0, %c0_i32, %c0_i32_0 : i32, i32, i32
  }
}

module attributes {stable_mosaic.version = 11 : i64} {
  func.func @_conv3x3_kernel(%arg0: i32, %arg1: memref<1x42x32xf32, #tpu.memory_space<vmem>>, %arg2: memref<288x16xbf16, #tpu.memory_space<vmem>>, %arg3: memref<1x16xf32, #tpu.memory_space<vmem>>, %arg4: memref<1x24x16xf32, #tpu.memory_space<vmem>>) attributes {dimension_semantics = [#tpu.dimension_semantics<parallel>], iteration_bounds = array<i64: 2>, scalar_prefetch = 0 : i64, scratch_operands = 0 : i64, tpu.core_type = #tpu.core_type<tc>, window_params = [{transform_indices = @transform_0, window_bounds = array<i64: 1, 42, 32>}, {pipeline_mode = #tpu.pipeline_mode<synchronous>, transform_indices = @transform_1, window_bounds = array<i64: 288, 16>}, {pipeline_mode = #tpu.pipeline_mode<synchronous>, transform_indices = @transform_2, window_bounds = array<i64: 1, 16>}, {transform_indices = @transform_3, window_bounds = array<i64: 1, 24, 16>}]} {
    %c0 = arith.constant 0 : index
    %c0_0 = arith.constant 0 : index
    %c0_1 = arith.constant 0 : index
    %0 = vector.load %arg1[%c0, %c0_0, %c0_1] : memref<1x42x32xf32, #tpu.memory_space<vmem>>, vector<1x42x32xf32>
    %1 = vector.shape_cast %0 : vector<1x42x32xf32> to vector<42x32xf32>
    %2 = vector.extract_strided_slice %1 {offsets = [0, 0], sizes = [24, 32], strides = [1, 1]} : vector<42x32xf32> to vector<24x32xf32>
    %3 = vector.extract_strided_slice %1 {offsets = [1, 0], sizes = [24, 32], strides = [1, 1]} : vector<42x32xf32> to vector<24x32xf32>
    %4 = vector.extract_strided_slice %1 {offsets = [2, 0], sizes = [24, 32], strides = [1, 1]} : vector<42x32xf32> to vector<24x32xf32>
    %5 = vector.extract_strided_slice %1 {offsets = [6, 0], sizes = [24, 32], strides = [1, 1]} : vector<42x32xf32> to vector<24x32xf32>
    %6 = vector.extract_strided_slice %1 {offsets = [7, 0], sizes = [24, 32], strides = [1, 1]} : vector<42x32xf32> to vector<24x32xf32>
    %7 = vector.extract_strided_slice %1 {offsets = [8, 0], sizes = [24, 32], strides = [1, 1]} : vector<42x32xf32> to vector<24x32xf32>
    %8 = vector.extract_strided_slice %1 {offsets = [12, 0], sizes = [24, 32], strides = [1, 1]} : vector<42x32xf32> to vector<24x32xf32>
    %9 = vector.extract_strided_slice %1 {offsets = [13, 0], sizes = [24, 32], strides = [1, 1]} : vector<42x32xf32> to vector<24x32xf32>
    %10 = vector.extract_strided_slice %1 {offsets = [14, 0], sizes = [24, 32], strides = [1, 1]} : vector<42x32xf32> to vector<24x32xf32>
    %11 = tpu.concatenate %2, %3, %4, %5, %6, %7, %8, %9, %10 in 1 : vector<24x32xf32>, vector<24x32xf32>, vector<24x32xf32>, vector<24x32xf32>, vector<24x32xf32>, vector<24x32xf32>, vector<24x32xf32>, vector<24x32xf32>, vector<24x32xf32> -> vector<24x288xf32>
    %12 = arith.truncf %11 : vector<24x288xf32> to vector<24x288xbf16>
    %c0_2 = arith.constant 0 : index
    %c0_3 = arith.constant 0 : index
    %13 = vector.load %arg2[%c0_2, %c0_3] : memref<288x16xbf16, #tpu.memory_space<vmem>>, vector<288x16xbf16>
    %cst = arith.constant dense<0.000000e+00> : vector<24x16xf32>
    %14 = tpu.matmul %12, %13, %cst {dimension_numbers = #tpu.dot_dimension_numbers<[1], [0], [0], [1], [0, 0, 1, 1], [], []>} : vector<24x288xbf16>, vector<288x16xbf16>, vector<24x16xf32> -> vector<24x16xf32>
    %c0_4 = arith.constant 0 : index
    %c0_5 = arith.constant 0 : index
    %15 = vector.load %arg3[%c0_4, %c0_5] : memref<1x16xf32, #tpu.memory_space<vmem>>, vector<1x16xf32>
    %16 = vector.broadcast %15 : vector<1x16xf32> to vector<24x16xf32>
    %17 = arith.addf %14, %16 : vector<24x16xf32>
    %cst_6 = arith.constant 0.000000e+00 : f32
    %18 = vector.broadcast %cst_6 : f32 to vector<24x16xf32>
    %19 = arith.maximumf %17, %18 : vector<24x16xf32>
    %c0_7 = arith.constant 0 : index
    %c0_8 = arith.constant 0 : index
    %c0_9 = arith.constant 0 : index
    %20 = vector.load %arg4[%c0_7, %c0_8, %c0_9] : memref<1x24x16xf32, #tpu.memory_space<vmem>>, vector<1x24x16xf32>
    %21 = vector.shape_cast %20 : vector<1x24x16xf32> to vector<24x16xf32>
    %22 = vector.shape_cast %19 : vector<24x16xf32> to vector<1x24x16xf32>
    tpu.vector_store %arg4[%c0_7, %c0_8, %c0_9], %22 {strides = array<i32>} : memref<1x24x16xf32, #tpu.memory_space<vmem>>, vector<1x24x16xf32>,
    return
  }
  func.func @transform_0(%arg0: i32) -> (i32, i32, i32) {
    %c0_i32 = arith.constant 0 : i32
    %c0_i32_0 = arith.constant 0 : i32
    %c0_i32_1 = arith.constant 0 : i32
    return %arg0, %c0_i32, %c0_i32_0 : i32, i32, i32
  }
  func.func @transform_1(%arg0: i32) -> (i32, i32) {
    %c0_i32 = arith.constant 0 : i32
    %c0_i32_0 = arith.constant 0 : i32
    %c0_i32_1 = arith.constant 0 : i32
    return %c0_i32, %c0_i32_0 : i32, i32
  }
  func.func @transform_2(%arg0: i32) -> (i32, i32) {
    %c0_i32 = arith.constant 0 : i32
    %c0_i32_0 = arith.constant 0 : i32
    %c0_i32_1 = arith.constant 0 : i32
    return %c0_i32, %c0_i32_0 : i32, i32
  }
  func.func @transform_3(%arg0: i32) -> (i32, i32, i32) {
    %c0_i32 = arith.constant 0 : i32
    %c0_i32_0 = arith.constant 0 : i32
    %c0_i32_1 = arith.constant 0 : i32
    return %arg0, %c0_i32, %c0_i32_0 : i32, i32, i32
  }
}

module attributes {stable_mosaic.version = 11 : i64} {
  func.func @_conv3x3_kernel(%arg0: i32, %arg1: memref<1x42x16xf32, #tpu.memory_space<vmem>>, %arg2: memref<1x24x32xf32, #tpu.memory_space<vmem>>, %arg3: memref<144x32xbf16, #tpu.memory_space<vmem>>, %arg4: memref<1x32xf32, #tpu.memory_space<vmem>>, %arg5: memref<1x24x32xf32, #tpu.memory_space<vmem>>) attributes {dimension_semantics = [#tpu.dimension_semantics<parallel>], iteration_bounds = array<i64: 2>, scalar_prefetch = 0 : i64, scratch_operands = 0 : i64, tpu.core_type = #tpu.core_type<tc>, window_params = [{transform_indices = @transform_0, window_bounds = array<i64: 1, 42, 16>}, {transform_indices = @transform_1, window_bounds = array<i64: 1, 24, 32>}, {pipeline_mode = #tpu.pipeline_mode<synchronous>, transform_indices = @transform_2, window_bounds = array<i64: 144, 32>}, {pipeline_mode = #tpu.pipeline_mode<synchronous>, transform_indices = @transform_3, window_bounds = array<i64: 1, 32>}, {transform_indices = @transform_4, window_bounds = array<i64: 1, 24, 32>}]} {
    %c0 = arith.constant 0 : index
    %c0_0 = arith.constant 0 : index
    %c0_1 = arith.constant 0 : index
    %0 = vector.load %arg1[%c0, %c0_0, %c0_1] : memref<1x42x16xf32, #tpu.memory_space<vmem>>, vector<1x42x16xf32>
    %1 = vector.shape_cast %0 : vector<1x42x16xf32> to vector<42x16xf32>
    %2 = vector.extract_strided_slice %1 {offsets = [0, 0], sizes = [24, 16], strides = [1, 1]} : vector<42x16xf32> to vector<24x16xf32>
    %3 = vector.extract_strided_slice %1 {offsets = [1, 0], sizes = [24, 16], strides = [1, 1]} : vector<42x16xf32> to vector<24x16xf32>
    %4 = vector.extract_strided_slice %1 {offsets = [2, 0], sizes = [24, 16], strides = [1, 1]} : vector<42x16xf32> to vector<24x16xf32>
    %5 = vector.extract_strided_slice %1 {offsets = [6, 0], sizes = [24, 16], strides = [1, 1]} : vector<42x16xf32> to vector<24x16xf32>
    %6 = vector.extract_strided_slice %1 {offsets = [7, 0], sizes = [24, 16], strides = [1, 1]} : vector<42x16xf32> to vector<24x16xf32>
    %7 = vector.extract_strided_slice %1 {offsets = [8, 0], sizes = [24, 16], strides = [1, 1]} : vector<42x16xf32> to vector<24x16xf32>
    %8 = vector.extract_strided_slice %1 {offsets = [12, 0], sizes = [24, 16], strides = [1, 1]} : vector<42x16xf32> to vector<24x16xf32>
    %9 = vector.extract_strided_slice %1 {offsets = [13, 0], sizes = [24, 16], strides = [1, 1]} : vector<42x16xf32> to vector<24x16xf32>
    %10 = vector.extract_strided_slice %1 {offsets = [14, 0], sizes = [24, 16], strides = [1, 1]} : vector<42x16xf32> to vector<24x16xf32>
    %11 = tpu.concatenate %2, %3, %4, %5, %6, %7, %8, %9, %10 in 1 : vector<24x16xf32>, vector<24x16xf32>, vector<24x16xf32>, vector<24x16xf32>, vector<24x16xf32>, vector<24x16xf32>, vector<24x16xf32>, vector<24x16xf32>, vector<24x16xf32> -> vector<24x144xf32>
    %12 = arith.truncf %11 : vector<24x144xf32> to vector<24x144xbf16>
    %c0_2 = arith.constant 0 : index
    %c0_3 = arith.constant 0 : index
    %13 = vector.load %arg3[%c0_2, %c0_3] : memref<144x32xbf16, #tpu.memory_space<vmem>>, vector<144x32xbf16>
    %cst = arith.constant dense<0.000000e+00> : vector<24x32xf32>
    %14 = tpu.matmul %12, %13, %cst {dimension_numbers = #tpu.dot_dimension_numbers<[1], [0], [0], [1], [0, 0, 1, 1], [], []>} : vector<24x144xbf16>, vector<144x32xbf16>, vector<24x32xf32> -> vector<24x32xf32>
    %c0_4 = arith.constant 0 : index
    %c0_5 = arith.constant 0 : index
    %15 = vector.load %arg4[%c0_4, %c0_5] : memref<1x32xf32, #tpu.memory_space<vmem>>, vector<1x32xf32>
    %16 = vector.broadcast %15 : vector<1x32xf32> to vector<24x32xf32>
    %17 = arith.addf %14, %16 : vector<24x32xf32>
    %c0_6 = arith.constant 0 : index
    %c0_7 = arith.constant 0 : index
    %c0_8 = arith.constant 0 : index
    %18 = vector.load %arg2[%c0_6, %c0_7, %c0_8] : memref<1x24x32xf32, #tpu.memory_space<vmem>>, vector<1x24x32xf32>
    %19 = vector.shape_cast %18 : vector<1x24x32xf32> to vector<24x32xf32>
    %20 = arith.addf %17, %19 : vector<24x32xf32>
    %c0_9 = arith.constant 0 : index
    %c0_10 = arith.constant 0 : index
    %c0_11 = arith.constant 0 : index
    %21 = vector.load %arg5[%c0_9, %c0_10, %c0_11] : memref<1x24x32xf32, #tpu.memory_space<vmem>>, vector<1x24x32xf32>
    %22 = vector.shape_cast %21 : vector<1x24x32xf32> to vector<24x32xf32>
    %23 = vector.shape_cast %20 : vector<24x32xf32> to vector<1x24x32xf32>
    tpu.vector_store %arg5[%c0_9, %c0_10, %c0_11], %23 {strides = array<i32>} : memref<1x24x32xf32, #tpu.memory_space<vmem>>, vector<1x24x32xf32>,
    return
  }
  func.func @transform_0(%arg0: i32) -> (i32, i32, i32) {
    %c0_i32 = arith.constant 0 : i32
    %c0_i32_0 = arith.constant 0 : i32
    %c0_i32_1 = arith.constant 0 : i32
    return %arg0, %c0_i32, %c0_i32_0 : i32, i32, i32
  }
  func.func @transform_1(%arg0: i32) -> (i32, i32, i32) {
    %c0_i32 = arith.constant 0 : i32
    %c0_i32_0 = arith.constant 0 : i32
    %c0_i32_1 = arith.constant 0 : i32
    return %arg0, %c0_i32, %c0_i32_0 : i32, i32, i32
  }
  func.func @transform_2(%arg0: i32) -> (i32, i32) {
    %c0_i32 = arith.constant 0 : i32
    %c0_i32_0 = arith.constant 0 : i32
    %c0_i32_1 = arith.constant 0 : i32
    return %c0_i32, %c0_i32_0 : i32, i32
  }
  func.func @transform_3(%arg0: i32) -> (i32, i32) {
    %c0_i32 = arith.constant 0 : i32
    %c0_i32_0 = arith.constant 0 : i32
    %c0_i32_1 = arith.constant 0 : i32
    return %c0_i32, %c0_i32_0 : i32, i32
  }
  func.func @transform_4(%arg0: i32) -> (i32, i32, i32) {
    %c0_i32 = arith.constant 0 : i32
    %c0_i32_0 = arith.constant 0 : i32
    %c0_i32_1 = arith.constant 0 : i32
    return %arg0, %c0_i32, %c0_i32_0 : i32, i32, i32
  }
}

module attributes {stable_mosaic.version = 11 : i64} {
  func.func @_conv3x3_kernel(%arg0: i32, %arg1: memref<1x110x32xf32, #tpu.memory_space<vmem>>, %arg2: memref<288x16xbf16, #tpu.memory_space<vmem>>, %arg3: memref<1x16xf32, #tpu.memory_space<vmem>>, %arg4: memref<1x80x16xf32, #tpu.memory_space<vmem>>) attributes {dimension_semantics = [#tpu.dimension_semantics<parallel>], iteration_bounds = array<i64: 2>, scalar_prefetch = 0 : i64, scratch_operands = 0 : i64, tpu.core_type = #tpu.core_type<tc>, window_params = [{transform_indices = @transform_0, window_bounds = array<i64: 1, 110, 32>}, {pipeline_mode = #tpu.pipeline_mode<synchronous>, transform_indices = @transform_1, window_bounds = array<i64: 288, 16>}, {pipeline_mode = #tpu.pipeline_mode<synchronous>, transform_indices = @transform_2, window_bounds = array<i64: 1, 16>}, {transform_indices = @transform_3, window_bounds = array<i64: 1, 80, 16>}]} {
    %c0 = arith.constant 0 : index
    %c0_0 = arith.constant 0 : index
    %c0_1 = arith.constant 0 : index
    %0 = vector.load %arg1[%c0, %c0_0, %c0_1] : memref<1x110x32xf32, #tpu.memory_space<vmem>>, vector<1x110x32xf32>
    %1 = vector.shape_cast %0 : vector<1x110x32xf32> to vector<110x32xf32>
    %2 = vector.extract_strided_slice %1 {offsets = [0, 0], sizes = [80, 32], strides = [1, 1]} : vector<110x32xf32> to vector<80x32xf32>
    %3 = vector.extract_strided_slice %1 {offsets = [1, 0], sizes = [80, 32], strides = [1, 1]} : vector<110x32xf32> to vector<80x32xf32>
    %4 = vector.extract_strided_slice %1 {offsets = [2, 0], sizes = [80, 32], strides = [1, 1]} : vector<110x32xf32> to vector<80x32xf32>
    %5 = vector.extract_strided_slice %1 {offsets = [10, 0], sizes = [80, 32], strides = [1, 1]} : vector<110x32xf32> to vector<80x32xf32>
    %6 = vector.extract_strided_slice %1 {offsets = [11, 0], sizes = [80, 32], strides = [1, 1]} : vector<110x32xf32> to vector<80x32xf32>
    %7 = vector.extract_strided_slice %1 {offsets = [12, 0], sizes = [80, 32], strides = [1, 1]} : vector<110x32xf32> to vector<80x32xf32>
    %8 = vector.extract_strided_slice %1 {offsets = [20, 0], sizes = [80, 32], strides = [1, 1]} : vector<110x32xf32> to vector<80x32xf32>
    %9 = vector.extract_strided_slice %1 {offsets = [21, 0], sizes = [80, 32], strides = [1, 1]} : vector<110x32xf32> to vector<80x32xf32>
    %10 = vector.extract_strided_slice %1 {offsets = [22, 0], sizes = [80, 32], strides = [1, 1]} : vector<110x32xf32> to vector<80x32xf32>
    %11 = tpu.concatenate %2, %3, %4, %5, %6, %7, %8, %9, %10 in 1 : vector<80x32xf32>, vector<80x32xf32>, vector<80x32xf32>, vector<80x32xf32>, vector<80x32xf32>, vector<80x32xf32>, vector<80x32xf32>, vector<80x32xf32>, vector<80x32xf32> -> vector<80x288xf32>
    %12 = arith.truncf %11 : vector<80x288xf32> to vector<80x288xbf16>
    %c0_2 = arith.constant 0 : index
    %c0_3 = arith.constant 0 : index
    %13 = vector.load %arg2[%c0_2, %c0_3] : memref<288x16xbf16, #tpu.memory_space<vmem>>, vector<288x16xbf16>
    %cst = arith.constant dense<0.000000e+00> : vector<80x16xf32>
    %14 = tpu.matmul %12, %13, %cst {dimension_numbers = #tpu.dot_dimension_numbers<[1], [0], [0], [1], [0, 0, 1, 1], [], []>} : vector<80x288xbf16>, vector<288x16xbf16>, vector<80x16xf32> -> vector<80x16xf32>
    %c0_4 = arith.constant 0 : index
    %c0_5 = arith.constant 0 : index
    %15 = vector.load %arg3[%c0_4, %c0_5] : memref<1x16xf32, #tpu.memory_space<vmem>>, vector<1x16xf32>
    %16 = vector.broadcast %15 : vector<1x16xf32> to vector<80x16xf32>
    %17 = arith.addf %14, %16 : vector<80x16xf32>
    %c0_6 = arith.constant 0 : index
    %c0_7 = arith.constant 0 : index
    %c0_8 = arith.constant 0 : index
    %18 = vector.load %arg4[%c0_6, %c0_7, %c0_8] : memref<1x80x16xf32, #tpu.memory_space<vmem>>, vector<1x80x16xf32>
    %19 = vector.shape_cast %18 : vector<1x80x16xf32> to vector<80x16xf32>
    %20 = vector.shape_cast %17 : vector<80x16xf32> to vector<1x80x16xf32>
    tpu.vector_store %arg4[%c0_6, %c0_7, %c0_8], %20 {strides = array<i32>} : memref<1x80x16xf32, #tpu.memory_space<vmem>>, vector<1x80x16xf32>,
    return
  }
  func.func @transform_0(%arg0: i32) -> (i32, i32, i32) {
    %c0_i32 = arith.constant 0 : i32
    %c0_i32_0 = arith.constant 0 : i32
    %c0_i32_1 = arith.constant 0 : i32
    return %arg0, %c0_i32, %c0_i32_0 : i32, i32, i32
  }
  func.func @transform_1(%arg0: i32) -> (i32, i32) {
    %c0_i32 = arith.constant 0 : i32
    %c0_i32_0 = arith.constant 0 : i32
    %c0_i32_1 = arith.constant 0 : i32
    return %c0_i32, %c0_i32_0 : i32, i32
  }
  func.func @transform_2(%arg0: i32) -> (i32, i32) {
    %c0_i32 = arith.constant 0 : i32
    %c0_i32_0 = arith.constant 0 : i32
    %c0_i32_1 = arith.constant 0 : i32
    return %c0_i32, %c0_i32_0 : i32, i32
  }
  func.func @transform_3(%arg0: i32) -> (i32, i32, i32) {
    %c0_i32 = arith.constant 0 : i32
    %c0_i32_0 = arith.constant 0 : i32
    %c0_i32_1 = arith.constant 0 : i32
    return %arg0, %c0_i32, %c0_i32_0 : i32, i32, i32
  }
}

module attributes {stable_mosaic.version = 11 : i64} {
  func.func @_conv3x3_kernel(%arg0: i32, %arg1: memref<1x110x16xf32, #tpu.memory_space<vmem>>, %arg2: memref<144x8xbf16, #tpu.memory_space<vmem>>, %arg3: memref<1x8xf32, #tpu.memory_space<vmem>>, %arg4: memref<1x80x8xf32, #tpu.memory_space<vmem>>) attributes {dimension_semantics = [#tpu.dimension_semantics<parallel>], iteration_bounds = array<i64: 2>, scalar_prefetch = 0 : i64, scratch_operands = 0 : i64, tpu.core_type = #tpu.core_type<tc>, window_params = [{transform_indices = @transform_0, window_bounds = array<i64: 1, 110, 16>}, {pipeline_mode = #tpu.pipeline_mode<synchronous>, transform_indices = @transform_1, window_bounds = array<i64: 144, 8>}, {pipeline_mode = #tpu.pipeline_mode<synchronous>, transform_indices = @transform_2, window_bounds = array<i64: 1, 8>}, {transform_indices = @transform_3, window_bounds = array<i64: 1, 80, 8>}]} {
    %c0 = arith.constant 0 : index
    %c0_0 = arith.constant 0 : index
    %c0_1 = arith.constant 0 : index
    %0 = vector.load %arg1[%c0, %c0_0, %c0_1] : memref<1x110x16xf32, #tpu.memory_space<vmem>>, vector<1x110x16xf32>
    %1 = vector.shape_cast %0 : vector<1x110x16xf32> to vector<110x16xf32>
    %2 = vector.extract_strided_slice %1 {offsets = [0, 0], sizes = [80, 16], strides = [1, 1]} : vector<110x16xf32> to vector<80x16xf32>
    %3 = vector.extract_strided_slice %1 {offsets = [1, 0], sizes = [80, 16], strides = [1, 1]} : vector<110x16xf32> to vector<80x16xf32>
    %4 = vector.extract_strided_slice %1 {offsets = [2, 0], sizes = [80, 16], strides = [1, 1]} : vector<110x16xf32> to vector<80x16xf32>
    %5 = vector.extract_strided_slice %1 {offsets = [10, 0], sizes = [80, 16], strides = [1, 1]} : vector<110x16xf32> to vector<80x16xf32>
    %6 = vector.extract_strided_slice %1 {offsets = [11, 0], sizes = [80, 16], strides = [1, 1]} : vector<110x16xf32> to vector<80x16xf32>
    %7 = vector.extract_strided_slice %1 {offsets = [12, 0], sizes = [80, 16], strides = [1, 1]} : vector<110x16xf32> to vector<80x16xf32>
    %8 = vector.extract_strided_slice %1 {offsets = [20, 0], sizes = [80, 16], strides = [1, 1]} : vector<110x16xf32> to vector<80x16xf32>
    %9 = vector.extract_strided_slice %1 {offsets = [21, 0], sizes = [80, 16], strides = [1, 1]} : vector<110x16xf32> to vector<80x16xf32>
    %10 = vector.extract_strided_slice %1 {offsets = [22, 0], sizes = [80, 16], strides = [1, 1]} : vector<110x16xf32> to vector<80x16xf32>
    %11 = tpu.concatenate %2, %3, %4, %5, %6, %7, %8, %9, %10 in 1 : vector<80x16xf32>, vector<80x16xf32>, vector<80x16xf32>, vector<80x16xf32>, vector<80x16xf32>, vector<80x16xf32>, vector<80x16xf32>, vector<80x16xf32>, vector<80x16xf32> -> vector<80x144xf32>
    %12 = arith.truncf %11 : vector<80x144xf32> to vector<80x144xbf16>
    %c0_2 = arith.constant 0 : index
    %c0_3 = arith.constant 0 : index
    %13 = vector.load %arg2[%c0_2, %c0_3] : memref<144x8xbf16, #tpu.memory_space<vmem>>, vector<144x8xbf16>
    %cst = arith.constant dense<0.000000e+00> : vector<80x8xf32>
    %14 = tpu.matmul %12, %13, %cst {dimension_numbers = #tpu.dot_dimension_numbers<[1], [0], [0], [1], [0, 0, 1, 1], [], []>} : vector<80x144xbf16>, vector<144x8xbf16>, vector<80x8xf32> -> vector<80x8xf32>
    %c0_4 = arith.constant 0 : index
    %c0_5 = arith.constant 0 : index
    %15 = vector.load %arg3[%c0_4, %c0_5] : memref<1x8xf32, #tpu.memory_space<vmem>>, vector<1x8xf32>
    %16 = vector.broadcast %15 : vector<1x8xf32> to vector<80x8xf32>
    %17 = arith.addf %14, %16 : vector<80x8xf32>
    %cst_6 = arith.constant 0.000000e+00 : f32
    %18 = vector.broadcast %cst_6 : f32 to vector<80x8xf32>
    %19 = arith.maximumf %17, %18 : vector<80x8xf32>
    %c0_7 = arith.constant 0 : index
    %c0_8 = arith.constant 0 : index
    %c0_9 = arith.constant 0 : index
    %20 = vector.load %arg4[%c0_7, %c0_8, %c0_9] : memref<1x80x8xf32, #tpu.memory_space<vmem>>, vector<1x80x8xf32>
    %21 = vector.shape_cast %20 : vector<1x80x8xf32> to vector<80x8xf32>
    %22 = vector.shape_cast %19 : vector<80x8xf32> to vector<1x80x8xf32>
    tpu.vector_store %arg4[%c0_7, %c0_8, %c0_9], %22 {strides = array<i32>} : memref<1x80x8xf32, #tpu.memory_space<vmem>>, vector<1x80x8xf32>,
    return
  }
  func.func @transform_0(%arg0: i32) -> (i32, i32, i32) {
    %c0_i32 = arith.constant 0 : i32
    %c0_i32_0 = arith.constant 0 : i32
    %c0_i32_1 = arith.constant 0 : i32
    return %arg0, %c0_i32, %c0_i32_0 : i32, i32, i32
  }
  func.func @transform_1(%arg0: i32) -> (i32, i32) {
    %c0_i32 = arith.constant 0 : i32
    %c0_i32_0 = arith.constant 0 : i32
    %c0_i32_1 = arith.constant 0 : i32
    return %c0_i32, %c0_i32_0 : i32, i32
  }
  func.func @transform_2(%arg0: i32) -> (i32, i32) {
    %c0_i32 = arith.constant 0 : i32
    %c0_i32_0 = arith.constant 0 : i32
    %c0_i32_1 = arith.constant 0 : i32
    return %c0_i32, %c0_i32_0 : i32, i32
  }
  func.func @transform_3(%arg0: i32) -> (i32, i32, i32) {
    %c0_i32 = arith.constant 0 : i32
    %c0_i32_0 = arith.constant 0 : i32
    %c0_i32_1 = arith.constant 0 : i32
    return %arg0, %c0_i32, %c0_i32_0 : i32, i32, i32
  }
}

module attributes {stable_mosaic.version = 11 : i64} {
  func.func @_conv3x3_kernel(%arg0: i32, %arg1: memref<1x110x8xf32, #tpu.memory_space<vmem>>, %arg2: memref<1x80x16xf32, #tpu.memory_space<vmem>>, %arg3: memref<72x16xbf16, #tpu.memory_space<vmem>>, %arg4: memref<1x16xf32, #tpu.memory_space<vmem>>, %arg5: memref<1x80x16xf32, #tpu.memory_space<vmem>>) attributes {dimension_semantics = [#tpu.dimension_semantics<parallel>], iteration_bounds = array<i64: 2>, scalar_prefetch = 0 : i64, scratch_operands = 0 : i64, tpu.core_type = #tpu.core_type<tc>, window_params = [{transform_indices = @transform_0, window_bounds = array<i64: 1, 110, 8>}, {transform_indices = @transform_1, window_bounds = array<i64: 1, 80, 16>}, {pipeline_mode = #tpu.pipeline_mode<synchronous>, transform_indices = @transform_2, window_bounds = array<i64: 72, 16>}, {pipeline_mode = #tpu.pipeline_mode<synchronous>, transform_indices = @transform_3, window_bounds = array<i64: 1, 16>}, {transform_indices = @transform_4, window_bounds = array<i64: 1, 80, 16>}]} {
    %c0 = arith.constant 0 : index
    %c0_0 = arith.constant 0 : index
    %c0_1 = arith.constant 0 : index
    %0 = vector.load %arg1[%c0, %c0_0, %c0_1] : memref<1x110x8xf32, #tpu.memory_space<vmem>>, vector<1x110x8xf32>
    %1 = vector.shape_cast %0 : vector<1x110x8xf32> to vector<110x8xf32>
    %2 = vector.extract_strided_slice %1 {offsets = [0, 0], sizes = [80, 8], strides = [1, 1]} : vector<110x8xf32> to vector<80x8xf32>
    %3 = vector.extract_strided_slice %1 {offsets = [1, 0], sizes = [80, 8], strides = [1, 1]} : vector<110x8xf32> to vector<80x8xf32>
    %4 = vector.extract_strided_slice %1 {offsets = [2, 0], sizes = [80, 8], strides = [1, 1]} : vector<110x8xf32> to vector<80x8xf32>
    %5 = vector.extract_strided_slice %1 {offsets = [10, 0], sizes = [80, 8], strides = [1, 1]} : vector<110x8xf32> to vector<80x8xf32>
    %6 = vector.extract_strided_slice %1 {offsets = [11, 0], sizes = [80, 8], strides = [1, 1]} : vector<110x8xf32> to vector<80x8xf32>
    %7 = vector.extract_strided_slice %1 {offsets = [12, 0], sizes = [80, 8], strides = [1, 1]} : vector<110x8xf32> to vector<80x8xf32>
    %8 = vector.extract_strided_slice %1 {offsets = [20, 0], sizes = [80, 8], strides = [1, 1]} : vector<110x8xf32> to vector<80x8xf32>
    %9 = vector.extract_strided_slice %1 {offsets = [21, 0], sizes = [80, 8], strides = [1, 1]} : vector<110x8xf32> to vector<80x8xf32>
    %10 = vector.extract_strided_slice %1 {offsets = [22, 0], sizes = [80, 8], strides = [1, 1]} : vector<110x8xf32> to vector<80x8xf32>
    %11 = tpu.concatenate %2, %3, %4, %5, %6, %7, %8, %9, %10 in 1 : vector<80x8xf32>, vector<80x8xf32>, vector<80x8xf32>, vector<80x8xf32>, vector<80x8xf32>, vector<80x8xf32>, vector<80x8xf32>, vector<80x8xf32>, vector<80x8xf32> -> vector<80x72xf32>
    %12 = arith.truncf %11 : vector<80x72xf32> to vector<80x72xbf16>
    %c0_2 = arith.constant 0 : index
    %c0_3 = arith.constant 0 : index
    %13 = vector.load %arg3[%c0_2, %c0_3] : memref<72x16xbf16, #tpu.memory_space<vmem>>, vector<72x16xbf16>
    %cst = arith.constant dense<0.000000e+00> : vector<80x16xf32>
    %14 = tpu.matmul %12, %13, %cst {dimension_numbers = #tpu.dot_dimension_numbers<[1], [0], [0], [1], [0, 0, 1, 1], [], []>} : vector<80x72xbf16>, vector<72x16xbf16>, vector<80x16xf32> -> vector<80x16xf32>
    %c0_4 = arith.constant 0 : index
    %c0_5 = arith.constant 0 : index
    %15 = vector.load %arg4[%c0_4, %c0_5] : memref<1x16xf32, #tpu.memory_space<vmem>>, vector<1x16xf32>
    %16 = vector.broadcast %15 : vector<1x16xf32> to vector<80x16xf32>
    %17 = arith.addf %14, %16 : vector<80x16xf32>
    %c0_6 = arith.constant 0 : index
    %c0_7 = arith.constant 0 : index
    %c0_8 = arith.constant 0 : index
    %18 = vector.load %arg2[%c0_6, %c0_7, %c0_8] : memref<1x80x16xf32, #tpu.memory_space<vmem>>, vector<1x80x16xf32>
    %19 = vector.shape_cast %18 : vector<1x80x16xf32> to vector<80x16xf32>
    %20 = arith.addf %17, %19 : vector<80x16xf32>
    %c0_9 = arith.constant 0 : index
    %c0_10 = arith.constant 0 : index
    %c0_11 = arith.constant 0 : index
    %21 = vector.load %arg5[%c0_9, %c0_10, %c0_11] : memref<1x80x16xf32, #tpu.memory_space<vmem>>, vector<1x80x16xf32>
    %22 = vector.shape_cast %21 : vector<1x80x16xf32> to vector<80x16xf32>
    %23 = vector.shape_cast %20 : vector<80x16xf32> to vector<1x80x16xf32>
    tpu.vector_store %arg5[%c0_9, %c0_10, %c0_11], %23 {strides = array<i32>} : memref<1x80x16xf32, #tpu.memory_space<vmem>>, vector<1x80x16xf32>,
    return
  }
  func.func @transform_0(%arg0: i32) -> (i32, i32, i32) {
    %c0_i32 = arith.constant 0 : i32
    %c0_i32_0 = arith.constant 0 : i32
    %c0_i32_1 = arith.constant 0 : i32
    return %arg0, %c0_i32, %c0_i32_0 : i32, i32, i32
  }
  func.func @transform_1(%arg0: i32) -> (i32, i32, i32) {
    %c0_i32 = arith.constant 0 : i32
    %c0_i32_0 = arith.constant 0 : i32
    %c0_i32_1 = arith.constant 0 : i32
    return %arg0, %c0_i32, %c0_i32_0 : i32, i32, i32
  }
  func.func @transform_2(%arg0: i32) -> (i32, i32) {
    %c0_i32 = arith.constant 0 : i32
    %c0_i32_0 = arith.constant 0 : i32
    %c0_i32_1 = arith.constant 0 : i32
    return %c0_i32, %c0_i32_0 : i32, i32
  }
  func.func @transform_3(%arg0: i32) -> (i32, i32) {
    %c0_i32 = arith.constant 0 : i32
    %c0_i32_0 = arith.constant 0 : i32
    %c0_i32_1 = arith.constant 0 : i32
    return %c0_i32, %c0_i32_0 : i32, i32
  }
  func.func @transform_4(%arg0: i32) -> (i32, i32, i32) {
    %c0_i32 = arith.constant 0 : i32
    %c0_i32_0 = arith.constant 0 : i32
    %c0_i32_1 = arith.constant 0 : i32
    return %arg0, %c0_i32, %c0_i32_0 : i32, i32, i32
  }
}

module attributes {stable_mosaic.version = 11 : i64} {
  func.func @_conv3x3_kernel(%arg0: i32, %arg1: memref<1x342x16xf32, #tpu.memory_space<vmem>>, %arg2: memref<144x3xbf16, #tpu.memory_space<vmem>>, %arg3: memref<1x3xf32, #tpu.memory_space<vmem>>, %arg4: memref<1x288x3xf32, #tpu.memory_space<vmem>>) attributes {dimension_semantics = [#tpu.dimension_semantics<parallel>], iteration_bounds = array<i64: 2>, scalar_prefetch = 0 : i64, scratch_operands = 0 : i64, tpu.core_type = #tpu.core_type<tc>, window_params = [{transform_indices = @transform_0, window_bounds = array<i64: 1, 342, 16>}, {pipeline_mode = #tpu.pipeline_mode<synchronous>, transform_indices = @transform_1, window_bounds = array<i64: 144, 3>}, {pipeline_mode = #tpu.pipeline_mode<synchronous>, transform_indices = @transform_2, window_bounds = array<i64: 1, 3>}, {transform_indices = @transform_3, window_bounds = array<i64: 1, 288, 3>}]} {
    %c0 = arith.constant 0 : index
    %c0_0 = arith.constant 0 : index
    %c0_1 = arith.constant 0 : index
    %0 = vector.load %arg1[%c0, %c0_0, %c0_1] : memref<1x342x16xf32, #tpu.memory_space<vmem>>, vector<1x342x16xf32>
    %1 = vector.shape_cast %0 : vector<1x342x16xf32> to vector<342x16xf32>
    %2 = vector.extract_strided_slice %1 {offsets = [0, 0], sizes = [288, 16], strides = [1, 1]} : vector<342x16xf32> to vector<288x16xf32>
    %3 = vector.extract_strided_slice %1 {offsets = [1, 0], sizes = [288, 16], strides = [1, 1]} : vector<342x16xf32> to vector<288x16xf32>
    %4 = vector.extract_strided_slice %1 {offsets = [2, 0], sizes = [288, 16], strides = [1, 1]} : vector<342x16xf32> to vector<288x16xf32>
    %5 = vector.extract_strided_slice %1 {offsets = [18, 0], sizes = [288, 16], strides = [1, 1]} : vector<342x16xf32> to vector<288x16xf32>
    %6 = vector.extract_strided_slice %1 {offsets = [19, 0], sizes = [288, 16], strides = [1, 1]} : vector<342x16xf32> to vector<288x16xf32>
    %7 = vector.extract_strided_slice %1 {offsets = [20, 0], sizes = [288, 16], strides = [1, 1]} : vector<342x16xf32> to vector<288x16xf32>
    %8 = vector.extract_strided_slice %1 {offsets = [36, 0], sizes = [288, 16], strides = [1, 1]} : vector<342x16xf32> to vector<288x16xf32>
    %9 = vector.extract_strided_slice %1 {offsets = [37, 0], sizes = [288, 16], strides = [1, 1]} : vector<342x16xf32> to vector<288x16xf32>
    %10 = vector.extract_strided_slice %1 {offsets = [38, 0], sizes = [288, 16], strides = [1, 1]} : vector<342x16xf32> to vector<288x16xf32>
    %11 = tpu.concatenate %2, %3, %4, %5, %6, %7, %8, %9, %10 in 1 : vector<288x16xf32>, vector<288x16xf32>, vector<288x16xf32>, vector<288x16xf32>, vector<288x16xf32>, vector<288x16xf32>, vector<288x16xf32>, vector<288x16xf32>, vector<288x16xf32> -> vector<288x144xf32>
    %12 = arith.truncf %11 : vector<288x144xf32> to vector<288x144xbf16>
    %c0_2 = arith.constant 0 : index
    %c0_3 = arith.constant 0 : index
    %13 = vector.load %arg2[%c0_2, %c0_3] : memref<144x3xbf16, #tpu.memory_space<vmem>>, vector<144x3xbf16>
    %cst = arith.constant dense<0.000000e+00> : vector<288x3xf32>
    %14 = tpu.matmul %12, %13, %cst {dimension_numbers = #tpu.dot_dimension_numbers<[1], [0], [0], [1], [0, 0, 1, 1], [], []>} : vector<288x144xbf16>, vector<144x3xbf16>, vector<288x3xf32> -> vector<288x3xf32>
    %c0_4 = arith.constant 0 : index
    %c0_5 = arith.constant 0 : index
    %15 = vector.load %arg3[%c0_4, %c0_5] : memref<1x3xf32, #tpu.memory_space<vmem>>, vector<1x3xf32>
    %16 = vector.broadcast %15 : vector<1x3xf32> to vector<288x3xf32>
    %17 = arith.addf %14, %16 : vector<288x3xf32>
    %c0_6 = arith.constant 0 : index
    %c0_7 = arith.constant 0 : index
    %c0_8 = arith.constant 0 : index
    %18 = vector.load %arg4[%c0_6, %c0_7, %c0_8] : memref<1x288x3xf32, #tpu.memory_space<vmem>>, vector<1x288x3xf32>
    %19 = vector.shape_cast %18 : vector<1x288x3xf32> to vector<288x3xf32>
    %20 = vector.shape_cast %17 : vector<288x3xf32> to vector<1x288x3xf32>
    tpu.vector_store %arg4[%c0_6, %c0_7, %c0_8], %20 {strides = array<i32>} : memref<1x288x3xf32, #tpu.memory_space<vmem>>, vector<1x288x3xf32>,
    return
  }
  func.func @transform_0(%arg0: i32) -> (i32, i32, i32) {
    %c0_i32 = arith.constant 0 : i32
    %c0_i32_0 = arith.constant 0 : i32
    %c0_i32_1 = arith.constant 0 : i32
    return %arg0, %c0_i32, %c0_i32_0 : i32, i32, i32
  }
  func.func @transform_1(%arg0: i32) -> (i32, i32) {
    %c0_i32 = arith.constant 0 : i32
    %c0_i32_0 = arith.constant 0 : i32
    %c0_i32_1 = arith.constant 0 : i32
    return %c0_i32, %c0_i32_0 : i32, i32
  }
  func.func @transform_2(%arg0: i32) -> (i32, i32) {
    %c0_i32 = arith.constant 0 : i32
    %c0_i32_0 = arith.constant 0 : i32
    %c0_i32_1 = arith.constant 0 : i32
    return %c0_i32, %c0_i32_0 : i32, i32
  }
  func.func @transform_3(%arg0: i32) -> (i32, i32, i32) {
    %c0_i32 = arith.constant 0 : i32
    %c0_i32_0 = arith.constant 0 : i32
    %c0_i32_1 = arith.constant 0 : i32
    return %arg0, %c0_i32, %c0_i32_0 : i32, i32, i32
  }
}

</mosaic_0001>

<bundles_post_ra>
// kernel: istt_nofold_forward.17
= control target key start
LH: loop header
LB: loop body
LE: loop exit
PB: predicated region body
PF: predicated region fallthrough
CT: control target
= control target key end

     0   :  { %s447_s12 = smov 0   ;;  %s484_s0 = inlined_call_operand.vmem [shape: f32[128,27], index: 0, kind: input, shape index: {}]   ;;  %s485_s1 = inlined_call_operand.vmem [shape: bf16[27,16], index: 1, kind: input, shape index: {}]   ;;  %s486_s2 = inlined_call_operand.vmem [shape: f32[1,16], index: 2, kind: input, shape index: {}]   ;;  %s487_s3 = inlined_call_operand.vmem [shape: f32[128,16], index: 3, kind: output, shape index: {}]  }
   0x1 LB: > { %s367_s13 = sadd.s32 4294967295, %s424_s12   ;;  %p371_p0 = scmp.ge.s32.totalorder %s424_s12, 1  ;;  %s424_s12 = sphi %s447_s12, %s13_s12  }
   0x2   : > { %p138_p1 = scmp.lt.s32.totalorder %s424_s12, 3 }
   0x4   : > { %p139_p2 = pnand %p371_p0, %p138_p1 }
   0x5   : > { %v416_v0 = vld [vmem:[%s485_s1] sm:$0xff] (!%p139_p2)   ;;  %vm222_vm0 = vcmask (!%p139_p2), 1044480   ;;  %v417_v1 = vld [vmem:[%s485_s1 + $0x8] sm:$0x3f] (!%p139_p2)   ;;  %vm223_vm1 = vcmask (!%p139_p2), 1045504   ;;  %s372_s18 = sshll.u32 (!%p139_p2), %s367_s13, 3 }
   0x6   : > { %142 = sbr.rel (%p139_p2) target bundleno = 241 (0xf1), region = 32  ;;  %391 = vmatprep.subr.bf16.mxu0 (!%p139_p2), %v416_v0  ;;  %403 = vmatprep.subr.bf16.mxu1 (!%p139_p2), %v416_v0  ;;  %v426_v2 = vmov (!%p139_p2), 65535   ;;  %p163_p3 = scmp.lt.s32.totalorder (!%p139_p2), %s372_s18, 15  ;;  %vm209_vm2 = vcmask (!%p139_p2), 220160   ;;  %v376_v18 = vld [vmem:[%s486_s2] ss:$0 sm:$0xff] (!%p139_p2) }
   0x7   : > { %392 = vmatpush3.bf16.msra.mxu0 (!%p139_p2), %v416_v0  ;;  %405 = vmatpush3.bf16.msra.mxu1 (!%p139_p2), %v416_v0  ;;  %v224_v3 = vsel (!%p139_p2), %vm222_vm0, 4294967295, %v426_v2  ;;  %vm302_vm3 = vcmask (!%p139_p2), 130048  }
   0x8   : > { %v225_v4 = vsel (!%p139_p2), %vm223_vm1, %v224_v3, 0 }
   0x9   : > { %v227_v5 = vand.u32 (!%p139_p2), %v417_v1, %v225_v4 }
   0xb   : > { %393 = vmatprep.subr.bf16.mxu0 (!%p139_p2), %v227_v5  ;;  %404 = vmatprep.subr.bf16.mxu1 (!%p139_p2), %v227_v5 }
   0xc   : > { %394 = vmatpush3.bf16.msra.mxu0 (!%p139_p2), %v227_v5  ;;  %406 = vmatpush3.bf16.msra.mxu1 (!%p139_p2), %v227_v5 }
   0xd   : > { %s489_s18 = smov (!%p163_p3, %s372_s18), 15 }
   0xe   : > { %s373_s19 = sshll.u32 %s489_s18, 3 }
   0xf   : > { %s166_s22 = scalar_lea.vmem %s484_s0, %s373_s19  ;;  %s172_s27 = scalar_lea.vmem %s487_s3, %s373_s19 }
  0x10   : > { %v175_v6 = vld [vmem:[%s166_s22] sm:$0xff]  ;;  %v176_v7 = vld [vmem:[%s166_s22 + $0x8] sm:$0xff]  ;;  %v177_v11 = vld [vmem:[%s166_s22 + $0x10] sm:$0xff] }
  0x11   : > { %v179_v8 = vld [vmem:[%s166_s22 + $0x20] sm:$0xff]  ;;  %v183_v9 = vpack.c.bf16 %v176_v7, %v175_v6  ;;  %v180_v10 = vld [vmem:[%s166_s22 + $0x28] sm:$0xff]  ;;  %v178_v12 = vld [vmem:[%s166_s22 + $0x18] sm:$0xff] }
  0x12   : > { %v185_v13 = vpack.c.bf16 %v180_v10, %v179_v8  ;;  %v184_v14 = vpack.c.bf16 %v178_v12, %v177_v11  ;;  %v181_v15 = vld [vmem:[%s166_s22 + $0x30] sm:$0xff]  ;;  %v182_v16 = vld [vmem:[%s166_s22 + $0x38] sm:$0xff] }
  0x13   : > { %395 = vmatprep.mubr.msk.bf16.mxu0 %vm209_vm2, %v183_v9  ;;  %v186_v17 = vpack.c.bf16 %v182_v16, %v181_v15 }
  0x14   : > { %399 = vmatprep.mubr.msk.bf16.mxu1 %vm209_vm2, %v185_v13  ;;  %396 = vmatmul.mubr.msk.bf16.vlgmr.msra.gmra.mrb[0].mxu0 %vm209_vm2, %v184_v14 }
  0x15   : > { %400 = vmatmul.mubr.msk.bf16.vlgmr.msra.gmra.mrb[0].mxu1 %vm209_vm2, %v186_v17 }
  0xe7   : > { %v397_v19 = vpop.f32.mrb[0].mxu0 }
  0xe8   : > { %v272_v20 = vadd.f32 %v397_v19, %v376_v18  ;;  %v401_v21 = vpop.f32.mrb[0].mxu1  ;;  %v263_v22 = vpop.f32.mrb[1].mxu0 }
  0xe9   : > { %v288_v23 = vadd.f32 %v401_v21, %v376_v18  ;;  %v264_v24 = vadd.f32 %v376_v18, %v263_v22  ;;  %v279_v25 = vpop.f32.mrb[1].mxu1  ;;  %v398_v26 = vpop.f32.mrb[2].mxu0 }
  0xea   : > { %v296_v27 = vmax.f32 %v272_v20, 0.0  ;;  %v280_v28 = vadd.f32 %v376_v18, %v279_v25  ;;  %v275_v29 = vadd.f32 %v398_v26, %v376_v18  ;;  %v402_v30 = vpop.f32.mrb[2].mxu1  ;;  %v266_v31 = vpop.f32.mrb[3].mxu0 }
  0xeb   : > { %v300_v32 = vmax.f32 %v288_v23, 0.0  ;;  %v294_v33 = vmax.f32 %v264_v24, 0.0  ;;  %v291_v34 = vadd.f32 %v402_v30, %v376_v18  ;;  %v267_v35 = vadd.f32 %v376_v18, %v266_v31  ;;  %v282_v36 = vpop.f32.mrb[3].mxu1 }
  0xec   : > { %305 = vst.msk [vmem:[%s172_s27 + $0x10] sm:$0xff] %vm302_vm3, %v296_v27  ;;  %v298_v37 = vmax.f32 %v280_v28, 0.0  ;;  %v297_v38 = vmax.f32 %v275_v29, 0.0  ;;  %v283_v39 = vadd.f32 %v376_v18, %v282_v36 }
  0xed   : > { %309 = vst.msk [vmem:[%s172_s27 + $0x30] sm:$0xff] %vm302_vm3, %v300_v32  ;;  %303 = vst.msk [vmem:[%s172_s27] sm:$0xff] %vm302_vm3, %v294_v33  ;;  %v301_v40 = vmax.f32 %v291_v34, 0.0  ;;  %v295_v41 = vmax.f32 %v267_v35, 0.0 }
  0xee   : > { %307 = vst.msk [vmem:[%s172_s27 + $0x20] sm:$0xff] %vm302_vm3, %v298_v37  ;;  %306 = vst.msk [vmem:[%s172_s27 + $0x18] sm:$0xff] %vm302_vm3, %v297_v38  ;;  %v299_v42 = vmax.f32 %v283_v39, 0.0 }
  0xef   : > { %310 = vst.msk [vmem:[%s172_s27 + $0x38] sm:$0xff] %vm302_vm3, %v301_v40  ;;  %304 = vst.msk [vmem:[%s172_s27 + $0x8] sm:$0xff] %vm302_vm3, %v295_v41 }
  0xf0   : > { %308 = vst.msk [vmem:[%s172_s27 + $0x28] sm:$0xff] %vm302_vm3, %v299_v42 }
  0xf1 PF: > { %s13_s12 = sadd.s32 1, %s424_s12  }
  0xf2   : > { %p10_p4 = scmp.ge.s32.totalorder %s13_s12, 4  }
  0xf4   :  { %12 = sbr.rel (!%p10_p4) target bundleno = 1 (0x1), region = 62 }

// kernel: istt_nofold_forward.20
= control target key start
LH: loop header
LB: loop body
LE: loop exit
PB: predicated region body
PF: predicated region fallthrough
CT: control target
= control target key end

     0   :  { %s372_s12 = smov 0   ;;  %s398_s0 = inlined_call_operand.vmem [shape: f32[32,32], index: 0, kind: input, shape index: {}]   ;;  %s399_s1 = inlined_call_operand.vmem [shape: bf16[32,32], index: 1, kind: input, shape index: {}]   ;;  %s400_s2 = inlined_call_operand.vmem [shape: f32[1,32], index: 2, kind: input, shape index: {}]   ;;  %s401_s3 = inlined_call_operand.vmem [shape: f32[32,32], index: 3, kind: output, shape index: {}]  }
   0x1 LB: > { %s304_s13 = sadd.s32 4294967295, %s348_s12   ;;  %p308_p0 = scmp.ge.s32.totalorder %s348_s12, 1  ;;  %s348_s12 = sphi %s372_s12, %s13_s12  }
   0x2   : > { %p138_p1 = scmp.lt.s32.totalorder %s348_s12, 3 }
   0x4   : > { %p139_p2 = pnand %p308_p0, %p138_p1 }
   0x5   : > { %v340_v0 = vld [vmem:[%s399_s1] sm:$0xff] (!%p139_p2)   ;;  %v350_v1 = vmov (!%p139_p2), 0.0   ;;  %v341_v2 = vld [vmem:[%s399_s1 + $0x8] sm:$0xff] (!%p139_p2)   ;;  %vm351_vm0 = vmmov (!%p139_p2), 0   ;;  %s309_s18 = sshll.u32 (!%p139_p2), %s304_s13, 1  ;;  %vm201_vm1 = vcmask (!%p139_p2), 261120  }
   0x6   : > { %142 = sbr.rel (%p139_p2) target bundleno = 236 (0xec), region = 32  ;;  %322 = vmatprep.subr.bf16.mxu0 (!%p139_p2), %v350_v1  ;;  %326 = vmatprep.mubr.msk.bf16.mxu0 (!%p139_p2), %vm351_vm0, %v350_v1  ;;  %p163_p3 = scmp.lt.s32.totalorder (!%p139_p2), %s309_s18, 3  ;;  %v313_v6 = vld [vmem:[%s400_s2] ss:$0 sm:$0xff] (!%p139_p2) }
   0x7   : > { %323 = vmatpush3.bf16.msra.mxu0 (!%p139_p2), %v340_v0 }
   0x8   : > { %324 = vmatprep.subr.bf16.mxu0 (!%p139_p2), %v350_v1 }
   0xb   : > { %325 = vmatpush3.bf16.msra.mxu0 (!%p139_p2), %v341_v2 }
   0xd   : > { %s403_s18 = smov (!%p163_p3, %s309_s18), 3 }
   0xe   : > { %s310_s19 = sshll.u32 %s403_s18, 3 }
   0xf   : > { %s166_s22 = scalar_lea.vmem %s398_s0, %s310_s19  ;;  %s172_s27 = scalar_lea.vmem %s401_s3, %s310_s19 }
  0x10   : > { %v175_v3 = vld [vmem:[%s166_s22] sm:$0xff]  ;;  %v176_v4 = vld [vmem:[%s166_s22 + $0x8] sm:$0xff] }
  0x11   : > { %v177_v5 = vpack.c.bf16 %v176_v4, %v175_v3 }
  0x13   : > { %327 = vmatmul.mubr.msk.bf16.vlgmr.msra.gmra.mrb[0].mxu0 %vm201_vm1, %v177_v5 }
  0xe6   : > { %v239_v7 = vpop.f32.mrb[0].mxu0 }
  0xe7   : > { %v240_v8 = vadd.f32 %v313_v6, %v239_v7  ;;  %v328_v9 = vpop.f32.mrb[1].mxu0 }
  0xe8   : > { %v242_v10 = vpop.f32.mrb[2].mxu0 }
  0xe9   : > { %246 = vst.msk [vmem:[%s172_s27] sm:$0xff] %vm201_vm1, %v240_v8  ;;  %v243_v11 = vadd.f32 %v313_v6, %v242_v10  ;;  %v329_v12 = vpop.f32.mrb[3].mxu0 }
  0xeb   : > { %247 = vst.msk [vmem:[%s172_s27 + $0x8] sm:$0xff] %vm201_vm1, %v243_v11 }
  0xec PF: > { %s13_s12 = sadd.s32 1, %s348_s12  }
  0xed   : > { %p10_p4 = scmp.ge.s32.totalorder %s13_s12, 4  }
  0xef   :  { %12 = sbr.rel (!%p10_p4) target bundleno = 1 (0x1), region = 62 }

// kernel: istt_nofold_forward.18
= control target key start
LH: loop header
LB: loop body
LE: loop exit
PB: predicated region body
PF: predicated region fallthrough
CT: control target
= control target key end

     0   :  { %s440_s12 = smov 0   ;;  %s491_s0 = inlined_call_operand.vmem [shape: f32[32,144], index: 0, kind: input, shape index: {}]   ;;  %s492_s1 = inlined_call_operand.vmem [shape: bf16[144,32], index: 1, kind: input, shape index: {}]   ;;  %s493_s2 = inlined_call_operand.vmem [shape: f32[1,32], index: 2, kind: input, shape index: {}]   ;;  %s494_s3 = inlined_call_operand.vmem [shape: f32[32,32], index: 3, kind: output, shape index: {}]  }
   0x1 LB: > { %s369_s13 = sadd.s32 4294967295, %s417_s12   ;;  %p373_p0 = scmp.ge.s32.totalorder %s417_s12, 1  ;;  %s417_s12 = sphi %s440_s12, %s13_s12  }
   0x2   : > { %p139_p1 = scmp.lt.s32.totalorder %s417_s12, 3 }
   0x4   : > { %p140_p2 = pnand %p373_p0, %p139_p1 }
   0x5   : > { %v402_v0 = vld [vmem:[%s492_s1] sm:$0xff] (!%p140_p2)   ;;  %v419_v1 = vmov (!%p140_p2), 0   ;;  %s374_s16 = sshll.u32 (!%p140_p2), %s369_s13, 1  ;;  %v403_v2 = vld [vmem:[%s492_s1 + $0x8] sm:$0xff] (!%p140_p2)   ;;  %v404_v3 = vld [vmem:[%s492_s1 + $0x10] sm:$0xff] (!%p140_p2)   ;;  %vm263_vm0 = vcmask (!%p140_p2), 130048  }
   0x6   : > { %143 = sbr.rel (%p140_p2) target bundleno = 261 (0x105), region = 32  ;;  %267 = vmatprep.subr.bf16.mxu0 (!%p140_p2), %v419_v1  ;;  %p165_p3 = scmp.lt.s32.totalorder (!%p140_p2), %s374_s16, 3  ;;  %v405_v6 = vld [vmem:[%s492_s1 + $0x18] sm:$0xff] (!%p140_p2)   ;;  %v406_v8 = vld [vmem:[%s492_s1 + $0x20] sm:$0xff] (!%p140_p2)   ;;  %v407_v9 = vld [vmem:[%s492_s1 + $0x28] sm:$0xff] (!%p140_p2)   ;;  %vm310_vm1 = vcmask (!%p140_p2), 261120  }
   0x7   : > { %268 = vmatpush1.bf16.msra.mxu0 (!%p140_p2), %v402_v0  ;;  %v408_v10 = vld [vmem:[%s492_s1 + $0x30] sm:$0xff] (!%p140_p2)   ;;  %v409_v11 = vld [vmem:[%s492_s1 + $0x38] sm:$0xff] (!%p140_p2)   ;;  %v410_v12 = vld [vmem:[%s492_s1 + $0x40] sm:$0xff] (!%p140_p2)  }
   0x8   : > { %269 = vmatprep.subr.bf16.mxu0 (!%p140_p2), %v419_v1  ;;  %v379_v16 = vld [vmem:[%s493_s2] ss:$0 sm:$0xff] (!%p140_p2) }
   0xb   : > { %270 = vmatpush1.bf16.msra.mxu0 (!%p140_p2), %v403_v2 }
   0xc   : > { %271 = vmatprep.subr.bf16.mxu0 (!%p140_p2), %v419_v1 }
   0xd   : > { %s496_s16 = smov (!%p165_p3, %s374_s16), 3 }
   0xe   : > { %s392_s21 = sshll.u32 %s496_s16, 4  ;;  %s378_s13 = sshll.u32 %s496_s16, 3 }
   0xf   : > { %s169_s24 = scalar_lea.vmem %s491_s0, %s392_s21  ;;  %272 = vmatpush1.bf16.msra.mxu0 %v404_v3  ;;  %s175_s17 = scalar_lea.vmem %s494_s3, %s378_s13 }
  0x10   : > { %v179_v4 = vld [vmem:[%s169_s24 + $0x8] sm:$0xff]  ;;  %v181_v5 = vld [vmem:[%s169_s24 + $0x18] sm:$0xff]  ;;  %273 = vmatprep.subr.bf16.mxu0 %v419_v1  ;;  %v178_v13 = vld [vmem:[%s169_s24] sm:$0xff] }
  0x11   : > { %v183_v7 = vpack.c.bf16 %v181_v5, %v179_v4  ;;  %v180_v14 = vld [vmem:[%s169_s24 + $0x10] sm:$0xff] }
  0x12   : > { %v182_v15 = vpack.c.bf16 %v180_v14, %v178_v13 }
  0x13   : > { %389 = vmatprep.mubr.msk.bf16.mxu0 %vm263_vm0, %v183_v7  ;;  %274 = vmatpush1.bf16.msra.mxu0 %v405_v6 }
  0x14   : > { %275 = vmatprep.subr.bf16.mxu0 %v419_v1 }
  0x17   : > { %276 = vmatpush1.bf16.msra.mxu0 %v406_v8 }
  0x18   : > { %277 = vmatprep.subr.bf16.mxu0 %v419_v1 }
  0x1b   : > { %278 = vmatpush1.bf16.msra.mxu0 %v407_v9 }
  0x1c   : > { %279 = vmatprep.subr.bf16.mxu0 %v419_v1 }
  0x1f   : > { %280 = vmatpush1.bf16.msra.mxu0 %v408_v10 }
  0x20   : > { %281 = vmatprep.subr.bf16.mxu0 %v419_v1 }
  0x23   : > { %282 = vmatpush1.bf16.msra.mxu0 %v409_v11 }
  0x24   : > { %283 = vmatprep.subr.bf16.mxu0 %v419_v1 }
  0x27   : > { %284 = vmatpush1.bf16.msra.mxu0 %v410_v12 }
  0x2a   : > { %300 = vmatmul.mubr.bf16.vlgmr.msra.gmra.mrb[0].mxu0 %v182_v15 }
  0xfd   : > { %v301_v17 = vpop.f32.mrb[0].mxu0 }
  0xfe   : > { %v302_v18 = vadd.f32 %v379_v16, %v301_v17  ;;  %v303_v19 = vpop.f32.mrb[1].mxu0 }
  0xff   : > { %v304_v20 = vpop.f32.mrb[2].mxu0 }
 0x100   : > { %v308_v21 = vmax.f32 %v302_v18, 0.0  ;;  %v305_v22 = vadd.f32 %v379_v16, %v304_v20  ;;  %v306_v23 = vpop.f32.mrb[3].mxu0 }
 0x102   : > { %311 = vst.msk [vmem:[%s175_s17] sm:$0xff] %vm310_vm1, %v308_v21  ;;  %v309_v24 = vmax.f32 %v305_v22, 0.0 }
 0x104   : > { %312 = vst.msk [vmem:[%s175_s17 + $0x8] sm:$0xff] %vm310_vm1, %v309_v24 }
 0x105 PF: > { %s13_s12 = sadd.s32 1, %s417_s12  }
 0x106   : > { %p10_p4 = scmp.ge.s32.totalorder %s13_s12, 4  }
 0x108   :  { %12 = sbr.rel (!%p10_p4) target bundleno = 1 (0x1), region = 62 }

// kernel: istt_nofold_forward.24
= control target key start
LH: loop header
LB: loop body
LE: loop exit
PB: predicated region body
PF: predicated region fallthrough
CT: control target
= control target key end

     0   :  { %s811_s12 = smov 0   ;;  %s980_s0 = inlined_call_operand.vmem [shape: f32[2,42,32], index: 0, kind: input, shape index: {}]   ;;  %s981_s1 = inlined_call_operand.vmem [shape: bf16[288,16], index: 1, kind: input, shape index: {}]   ;;  %s982_s2 = inlined_call_operand.vmem [shape: f32[1,16], index: 2, kind: input, shape index: {}]   ;;  %s983_s3 = inlined_call_operand.vmem [shape: f32[2,24,16], index: 3, kind: output, shape index: {}]  }
   0x1 LB: > { %s634_s13 = sadd.s32 4294967295, %s786_s12   ;;  %p638_p0 = scmp.ge.s32.totalorder %s786_s12, 1  ;;  %s786_s12 = sphi %s811_s12, %s13_s12  }
   0x2   : > { %p137_p1 = scmp.lt.s32.totalorder %s786_s12, 3 }
   0x4   : > { %p138_p2 = pnand %p638_p0, %p137_p1 }
   0x5   : > { %p161_p3 = scmp.lt.s32.totalorder (!%p138_p2), %s634_s13, 1  ;;  %v762_v0 = vld [vmem:[%s981_s1 + $0x40] sm:$0xff] (!%p138_p2)   ;;  %v764_v2 = vld [vmem:[%s981_s1 + $0x48] sm:$0xff] (!%p138_p2)   ;;  %vm253_vm0 = vcmask (!%p138_p2), 1043456   ;;  %vm181_vm1 = vcmask (!%p138_p2), 1046528   ;;  %v766_v4 = vld [vmem:[%s981_s1 + $0x50] sm:$0xff] (!%p138_p2)  }
   0x6   : > { %141 = sbr.rel (%p138_p2) target bundleno = 381 (0x17d), region = 32  ;;  %v763_v1 = vld [vmem:[%s981_s1] sm:$0xff] (!%p138_p2)   ;;  %664 = vmatprep.subr.bf16.mxu0 (!%p138_p2), %v762_v0  ;;  %v765_v3 = vld [vmem:[%s981_s1 + $0x8] sm:$0xff] (!%p138_p2)   ;;  %vm198_vm2 = vcmask (!%p138_p2), 1045504   ;;  %vm270_vm3 = vcmask (!%p138_p2), 1042432   ;;  %vm215_vm4 = vcmask (!%p138_p2), 1041408  }
   0x7   : > { %665 = vmatpush3.bf16.msra.mxu0 (!%p138_p2), %v763_v1  ;;  %v767_v13 = vld [vmem:[%s981_s1 + $0x10] sm:$0xff] (!%p138_p2)   ;;  %s788_s30 = smov (!%p138_p2), 32   ;;  %v768_v22 = vld [vmem:[%s981_s1 + $0x58] sm:$0xff] (!%p138_p2)   ;;  %s789_s8 = smov (!%p138_p2), 64   ;;  %v770_v37 = vld [vmem:[%s981_s1 + $0x60] sm:$0xff] (!%p138_p2)   ;;  %vm292_vm5 = vcmask (!%p138_p2), 261120  }
   0x8   : > { %666 = vmatprep.subr.bf16.mxu0 (!%p138_p2), %v764_v2  ;;  %v769_v32 = vld [vmem:[%s981_s1 + $0x18] sm:$0xff] (!%p138_p2)   ;;  %v771_v42 = vld [vmem:[%s981_s1 + $0x20] sm:$0xff] (!%p138_p2)   ;;  %v772_v52 = vld [vmem:[%s981_s1 + $0x68] sm:$0xff] (!%p138_p2)   ;;  %s790_s17 = smov (!%p138_p2), 96   ;;  %vm232_vm6 = vcmask (!%p138_p2), 1040384   ;;  %vm296_vm7 = vcmask (!%p138_p2), 523264  }
   0x9   : > { %v773_v57 = vld [vmem:[%s981_s1 + $0x28] sm:$0xff] (!%p138_p2)   ;;  %v777_v60 = vld [vmem:[%s981_s1 + $0x80] sm:$0xff] (!%p138_p2)   ;;  %v774_v62 = vld [vmem:[%s981_s1 + $0x70] sm:$0xff] (!%p138_p2)   ;;  %vm300_vm8 = vcmask (!%p138_p2), 785408   ;;  %vm575_vm9 = vcmask (!%p138_p2), 130048  }
   0xa   : > { %696 = vmatprep.subr.bf16.mxu1 (!%p138_p2), %v777_v60  ;;  %v779_v1 = vld [vmem:[%s981_s1 + $0x88] sm:$0xff] (!%p138_p2)  }
   0xb   : > { %667 = vmatpush3.bf16.msra.mxu0 (!%p138_p2), %v765_v3  ;;  %697 = vmatpush3.bf16.msra.mxu1 (!%p138_p2), %v777_v60  ;;  %v775_v3 = vld [vmem:[%s981_s1 + $0x30] sm:$0xff] (!%p138_p2)  }
   0xc   : > { %668 = vmatprep.subr.bf16.mxu0 (!%p138_p2), %v766_v4  ;;  %698 = vmatprep.subr.bf16.mxu1 (!%p138_p2), %v779_v1  ;;  %v776_v4 = vld [vmem:[%s981_s1 + $0x78] sm:$0xff] (!%p138_p2)  }
   0xd   : > { %s985_s13 = smov (!%p161_p3, %s634_s13), 1 }
   0xe   : > { %s704_s18 = smul.u32 48, %s985_s13 }
   0xf   : > { %669 = vmatpush3.bf16.msra.mxu0 %v767_v13  ;;  %699 = vmatpush3.bf16.msra.mxu1 %v779_v1  ;;  %s705_s7 = smul.u32 24, %s985_s13 }
  0x10   : > { %s837_s25 = scalar_lea.vmem %s980_s0, %s704_s18  ;;  %670 = vmatprep.subr.bf16.mxu0 %v768_v22 }
  0x11   : > { %v843_v5 = vld [vmem:[%s837_s25 + $0x8] sm:$0xff]  ;;  %v846_v6 = vld [vmem:[%s837_s25 + $0x10] sm:$0xff]  ;;  %v849_v7 = vld [vmem:[%s837_s25 + $0x18] sm:$0xff]  ;;  %s170_s10 = scalar_lea.vmem %s983_s3, %s705_s7 }
  0x12   : > { %v717_v8 = vpack.i.bf16 %v846_v6, %v843_v5  ;;  %v254_v9 = vrot.slane %v843_v5, 4  ;;  %v255_v10 = vrot.slane %v846_v6, 4  ;;  %v257_v11 = vrot.slane %v849_v7, 4  ;;  %v857_v12 = vld [vmem:[%s837_s25] sm:$0xff] }
  0x13   : > { %v182_v14 = vrot.slane %v857_v12, 1  ;;  %v183_v15 = vrot.slane %v843_v5, 1  ;;  %v185_v16 = vrot.slane %v846_v6, 1  ;;  %v199_v17 = vrot.slane %v857_v12, 2  ;;  %v176_v27 = vld [vmem:[%s837_s25 + $0x20] sm:$0xff]  ;;  %671 = vmatpush3.bf16.msra.mxu0 %v769_v32 }
  0x14   : > { %718 = vrot.lane.b32.xlu0 %v717_v8, %s788_s30  ;;  %v256_v18 = vsel %vm253_vm0, %v254_v9, %v255_v10  ;;  %v258_v19 = vsel %vm253_vm0, %v255_v10, %v257_v11  ;;  %v200_v20 = vrot.slane %v843_v5, 2  ;;  %v202_v21 = vrot.slane %v846_v6, 2  ;;  %672 = vmatprep.subr.bf16.mxu0 %v770_v37  ;;  %v778_v9 = vld [vmem:[%s981_s1 + $0x38] sm:$0xff]  }
  0x15   : > { %v727_v23 = vpack.i.bf16 %v258_v19, %v256_v18  ;;  %v184_v24 = vsel %vm181_vm1, %v182_v14, %v183_v15  ;;  %v186_v25 = vsel %vm181_vm1, %v183_v15, %v185_v16  ;;  %v271_v26 = vrot.slane %v843_v5, 5 }
  0x16   : > { %v722_v28 = vpack.i.bf16 %v186_v25, %v184_v24  ;;  %v201_v29 = vsel %vm198_vm2, %v199_v17, %v200_v20  ;;  %v203_v30 = vsel %vm198_vm2, %v200_v20, %v202_v21  ;;  %v272_v31 = vrot.slane %v846_v6, 5 }
  0x17   : > { %728 = vrot.lane.b32.xlu1 %v727_v23, %s789_s8  ;;  %v732_v33 = vpack.i.bf16 %v203_v30, %v201_v29  ;;  %v274_v34 = vrot.slane %v849_v7, 5  ;;  %v216_v35 = vrot.slane %v857_v12, 6  ;;  %v217_v36 = vrot.slane %v843_v5, 6  ;;  %673 = vmatpush3.bf16.msra.mxu0 %v771_v42 }
  0x18   : > { %723 = vrot.lane.b32.xlu0 %v722_v28, %s788_s30  ;;  %v273_v38 = vsel %vm270_vm3, %v271_v26, %v272_v31  ;;  %v219_v39 = vrot.slane %v846_v6, 6  ;;  %v187_v40 = vrot.slane %v849_v7, 1  ;;  %v204_v41 = vrot.slane %v849_v7, 2  ;;  %674 = vmatprep.subr.bf16.mxu0 %v772_v52 }
  0x19   : > { %v275_v43 = vsel %vm270_vm3, %v272_v31, %v274_v34  ;;  %v218_v44 = vsel %vm215_vm4, %v216_v35, %v217_v36  ;;  %v259_v45 = vrot.slane %v176_v27, 4  ;;  %v221_v46 = vrot.slane %v849_v7, 6 }
  0x1a   : > { %v737_v47 = vpack.i.bf16 %v275_v43, %v273_v38  ;;  %v220_v48 = vsel %vm215_vm4, %v217_v36, %v219_v39  ;;  %v188_v49 = vsel %vm181_vm1, %v185_v16, %v187_v40  ;;  %v205_v51 = vsel %vm198_vm2, %v202_v21, %v204_v41 }
  0x1b   : > { %733 = vrot.lane.b32.xlu1 %v732_v33, %s789_s8  ;;  %v742_v50 = vpack.i.bf16 %v220_v48, %v218_v44  ;;  %v747_v53 = vpack.i.bf16 %v188_v49, %v849_v7  ;;  %v260_v54 = vsel %vm253_vm0, %v257_v11, %v259_v45  ;;  %v222_v55 = vsel %vm215_vm4, %v219_v39, %v221_v46 }
  0x1c   : > { %738 = vrot.lane.b32.xlu0 %v737_v47, %s790_s17  ;;  %v276_v56 = vrot.slane %v176_v27, 5  ;;  %v315_v58 = vpack.c.bf16 %v222_v55, %v220_v48  ;;  %v752_v61 = vpack.i.bf16 %v205_v51, %v260_v54  ;;  %v287_v63 = vrot.slane %v176_v27, 6  ;;  %675 = vmatpush3.bf16.msra.mxu0 %v773_v57 }
  0x1d   : > { %676 = vmatprep.subr.bf16.mxu0 %v774_v62  ;;  %v236_v11 = vrot.slane %v846_v6, 7  ;;  %v233_v13 = vrot.slane %v857_v12, 7  ;;  %v234_v14 = vrot.slane %v843_v5, 7  ;;  %v238_v29 = vrot.slane %v849_v7, 7 }
  0x1e   : > { %v277_v59 = vsel %vm270_vm3, %v274_v34, %v276_v56  ;;  %700 = vmatprep.mubr.msk.bf16.mxu1 %vm292_vm5, %v315_v58  ;;  %v288_v2 = vsel %vm215_vm4, %v221_v46, %v287_v63 }
  0x1f   : > { %743 = vrot.lane.b32.xlu1 %v742_v50, %s790_s17  ;;  %v757_v0 = vpack.i.bf16 %v222_v55, %v277_v59  ;;  %v318_v8 = vpack.c.bf16 %v288_v2, %v288_v2  ;;  %v235_v19 = vsel %vm232_vm6, %v233_v13, %v234_v14  ;;  %v237_v20 = vsel %vm232_vm6, %v234_v14, %v236_v11 }
  0x20   : > { %748 = vrot.lane.b32.xlu0 %v747_v53, %s788_s30  ;;  %677 = vmatpush3.bf16.msra.mxu0 %v775_v3  ;;  %v239_v42 = vsel %vm232_vm6, %v236_v11, %v238_v29 }
  0x21   : > { %678 = vmatprep.subr.bf16.mxu0 %v776_v4  ;;  %701 = vmatmul.mubr.msk.bf16.vlgmr.msra.gmra.mrb[0].mxu1 %vm292_vm5, %v318_v8  ;;  %v641_v8 = vld [vmem:[%s982_s2] ss:$0 sm:$0xff] }
  0x23   : > { %753 = vrot.lane.b32.xlu1 %v752_v61, %s789_s8 }
  0x24   : > { %758 = vrot.lane.b32.xlu0 %v757_v0, %s790_s17  ;;  %679 = vmatpush3.bf16.msra.mxu0 %v778_v9 }
  0x86   : > { %v719_v10 = vpop.permute.xlu0 %718 }
  0x87   : > { %v721_v15 = vunpack.i.h.bf16 %v719_v10  ;;  %v720_v16 = vunpack.i.l.bf16 %v719_v10 }
  0x89   : > { %v729_v17 = vpop.permute.xlu1 %728  ;;  %v304_v26 = vsel %vm292_vm5, %v235_v19, %v720_v16  ;;  %v305_v27 = vsel %vm292_vm5, %v237_v20, %v721_v15 }
  0x8a   : > { %v724_v18 = vpop.permute.xlu0 %723  ;;  %v731_v21 = vunpack.i.h.bf16 %v729_v17  ;;  %v730_v22 = vunpack.i.l.bf16 %v729_v17 }
  0x8b   : > { %v726_v23 = vunpack.i.h.bf16 %v724_v18  ;;  %v725_v24 = vunpack.i.l.bf16 %v724_v18 }
  0x8c   : > { %v307_v36 = vsel %vm296_vm7, %v304_v26, %v730_v22  ;;  %v308_v37 = vsel %vm296_vm7, %v305_v27, %v731_v21 }
  0x8d   : > { %v734_v25 = vpop.permute.xlu1 %733  ;;  %v294_v34 = vsel %vm292_vm5, %v843_v5, %v726_v23  ;;  %v293_v35 = vsel %vm292_vm5, %v857_v12, %v725_v24 }
  0x8e   : > { %v739_v28 = vpop.permute.xlu0 %738  ;;  %v736_v30 = vunpack.i.h.bf16 %v734_v25  ;;  %v735_v31 = vunpack.i.l.bf16 %v734_v25 }
  0x8f   : > { %v741_v32 = vunpack.i.h.bf16 %v739_v28  ;;  %v740_v33 = vunpack.i.l.bf16 %v739_v28 }
  0x90   : > { %v297_v5 = vsel %vm296_vm7, %v293_v35, %v735_v31  ;;  %v298_v45 = vsel %vm296_vm7, %v294_v34, %v736_v30 }
  0x91   : > { %v744_v38 = vpop.permute.xlu1 %743  ;;  %v310_v39 = vsel %vm300_vm8, %v307_v36, %v740_v33  ;;  %v311_v7 = vsel %vm300_vm8, %v308_v37, %v741_v32 }
  0x92   : > { %v746_v40 = vunpack.i.h.bf16 %v744_v38  ;;  %v745_v41 = vunpack.i.l.bf16 %v744_v38  ;;  %v749_v43 = vpop.permute.xlu0 %748  ;;  %v314_v44 = vpack.c.bf16 %v311_v7, %v310_v39 }
  0x93   : > { %v751_v12 = vunpack.i.h.bf16 %v749_v43  ;;  %v750_v46 = vunpack.i.l.bf16 %v749_v43 }
  0x94   : > { %508 = vmatprep.mubr.bf16.mxu0 %v314_v44  ;;  %v301_v47 = vsel %vm300_vm8, %v297_v5, %v745_v41  ;;  %v302_v48 = vsel %vm300_vm8, %v298_v45, %v746_v40 }
  0x95   : > { %v295_v49 = vsel %vm292_vm5, %v846_v6, %v751_v12  ;;  %v306_v50 = vsel %vm292_vm5, %v239_v42, %v750_v46  ;;  %v754_v51 = vpop.permute.xlu1 %753  ;;  %v313_v52 = vpack.c.bf16 %v302_v48, %v301_v47 }
  0x96   : > { %v756_v53 = vunpack.i.h.bf16 %v754_v51  ;;  %v755_v54 = vunpack.i.l.bf16 %v754_v51  ;;  %v759_v55 = vpop.permute.xlu0 %758 }
  0x97   : > { %v761_v56 = vunpack.i.h.bf16 %v759_v55  ;;  %v760_v57 = vunpack.i.l.bf16 %v759_v55  ;;  %509 = vmatmul.mubr.bf16.vlgmr.msra.gmra.mrb[0].mxu0 %v313_v52 }
  0x98   : > { %v299_v58 = vsel %vm296_vm7, %v295_v49, %v756_v53  ;;  %v309_v59 = vsel %vm296_vm7, %v306_v50, %v755_v54 }
  0x99   : > { %v312_v60 = vsel %vm300_vm8, %v309_v59, %v760_v57  ;;  %v303_v6 = vsel %vm300_vm8, %v299_v58, %v761_v56 }
  0x9a   : > { %v317_v61 = vpack.c.bf16 %v312_v60, %v312_v60  ;;  %v316_v62 = vpack.c.bf16 %v303_v6, %v303_v6 }
  0x9c   : > { %516 = vmatprep.mubr.bf16.mxu0 %v317_v61 }
  0x9f   : > { %517 = vmatmul.mubr.bf16.gmra.mrb[4].mxu0 %v316_v62 }
  0xf4   : > { %v702_v63 = vpop.f32.mrb[0].mxu1 }
  0xf5   : > { %v558_v0 = vpop.f32.mrb[1].mxu1 }
  0xf6   : > { %v703_v1 = vpop.f32.mrb[2].mxu1 }
  0xf7   : > { %v561_v2 = vpop.f32.mrb[3].mxu1 }
 0x16a   : > { %v680_v3 = vpop.f32.mrb[0].mxu0 }
 0x16b   : > { %v681_v4 = vpop.f32.mrb[1].mxu0 }
 0x16c   : > { %v682_v9 = vadd.f32 %v681_v4, %v680_v3  ;;  %v683_v10 = vpop.f32.mrb[2].mxu0 }
 0x16d   : > { %v684_v11 = vpop.f32.mrb[3].mxu0 }
 0x16e   : > { %v685_v13 = vadd.f32 %v684_v11, %v683_v10  ;;  %v511_v14 = vadd.f32 %v682_v9, %v641_v8 }
 0x170   : > { %v559_v15 = vadd.f32 %v558_v0, %v511_v14  ;;  %v514_v16 = vadd.f32 %v685_v13, %v641_v8 }
 0x172   : > { %v572_v17 = vmax.f32 %v559_v15, 0.0  ;;  %v562_v18 = vadd.f32 %v561_v2, %v514_v16  ;;  %v686_v19 = vpop.f32.mrb[4].mxu0 }
 0x173   : > { %v687_v20 = vpop.f32.mrb[5].mxu0 }
 0x174   : > { %576 = vst.msk [vmem:[%s170_s10] sm:$0xff] %vm575_vm9, %v572_v17  ;;  %v573_v21 = vmax.f32 %v562_v18, 0.0  ;;  %v688_v22 = vadd.f32 %v687_v20, %v686_v19  ;;  %v689_v23 = vpop.f32.mrb[6].mxu0 }
 0x175   : > { %v690_v24 = vpop.f32.mrb[7].mxu0 }
 0x176   : > { %577 = vst.msk [vmem:[%s170_s10 + $0x8] sm:$0xff] %vm575_vm9, %v573_v21  ;;  %v519_v25 = vadd.f32 %v688_v22, %v641_v8 }
 0x178   : > { %v567_v26 = vadd.f32 %v702_v63, %v519_v25 }
 0x17a   : > { %v574_v27 = vmax.f32 %v567_v26, 0.0 }
 0x17c   : > { %578 = vst.msk [vmem:[%s170_s10 + $0x10] sm:$0xff] %vm575_vm9, %v574_v27 }
 0x17d PF: > { %s13_s12 = sadd.s32 1, %s786_s12  }
 0x17e   : > { %p10_p4 = scmp.ge.s32.totalorder %s13_s12, 4  }
 0x180   :  { %12 = sbr.rel (!%p10_p4) target bundleno = 1 (0x1), region = 62 }

// kernel: istt_nofold_forward.25
= control target key start
LH: loop header
LB: loop body
LE: loop exit
PB: predicated region body
PF: predicated region fallthrough
CT: control target
= control target key end

     0   :  { %s729_s15 = smov 0   ;;  %s903_s0 = inlined_call_operand.vmem [shape: f32[2,42,16], index: 0, kind: input, shape index: {}]   ;;  %s904_s1 = inlined_call_operand.vmem [shape: f32[2,24,32], index: 1, kind: input, shape index: {}]   ;;  %s905_s2 = inlined_call_operand.vmem [shape: bf16[144,32], index: 2, kind: input, shape index: {}]   ;;  %s906_s3 = inlined_call_operand.vmem [shape: f32[1,32], index: 3, kind: input, shape index: {}]   ;;  %s907_s4 = inlined_call_operand.vmem [shape: f32[2,24,32], index: 4, kind: output, shape index: {}]  }
   0x1 LB: > { %s586_s16 = sadd.s32 4294967295, %s694_s15   ;;  %p590_p0 = scmp.ge.s32.totalorder %s694_s15, 1  ;;  %s694_s15 = sphi %s729_s15, %s14_s15  }
   0x2   : > { %p172_p1 = scmp.lt.s32.totalorder %s694_s15, 3 }
   0x4   : > { %p173_p2 = pnand %p590_p0, %p172_p1 }
   0x5   : > { %p203_p3 = scmp.lt.s32.totalorder (!%p173_p2), %s586_s16, 1  ;;  %v679_v0 = vld [vmem:[%s905_s2] sm:$0xff] (!%p173_p2)   ;;  %v696_v1 = vmov (!%p173_p2), 0   ;;  %v680_v2 = vld [vmem:[%s905_s2 + $0x8] sm:$0xff] (!%p173_p2)   ;;  %vm228_vm0 = vcmask (!%p173_p2), 1046528   ;;  %vm262_vm1 = vcmask (!%p173_p2), 1041408  }
   0x6   : > { %176 = sbr.rel (%p173_p2) target bundleno = 384 (0x180), region = 36  ;;  %462 = vmatprep.subr.bf16.mxu0 (!%p173_p2), %v696_v1  ;;  %608 = vmatprep.subr.bf16.mxu1 (!%p173_p2), %v696_v1  ;;  %vm245_vm2 = vcmask (!%p173_p2), 1045504   ;;  %vm279_vm3 = vcmask (!%p173_p2), 1040384   ;;  %v681_v11 = vld [vmem:[%s905_s2 + $0x10] sm:$0xff] (!%p173_p2)   ;;  %s697_s27 = smov (!%p173_p2), 16   ;;  %v682_v28 = vld [vmem:[%s905_s2 + $0x18] sm:$0xff] (!%p173_p2)  }
   0x7   : > { %463 = vmatpush1.bf16.msra.mxu0 (!%p173_p2), %v679_v0  ;;  %617 = vmatpush1.bf16.msra.mxu1 (!%p173_p2), %v679_v0  ;;  %s698_s30 = smov (!%p173_p2), 48   ;;  %vm306_vm4 = vcmask (!%p173_p2), 1043456   ;;  %v683_v40 = vld [vmem:[%s905_s2 + $0x20] sm:$0xff] (!%p173_p2)   ;;  %s699_s7 = smov (!%p173_p2), 32   ;;  %v684_v49 = vld [vmem:[%s905_s2 + $0x28] sm:$0xff] (!%p173_p2)   ;;  %vm323_vm5 = vcmask (!%p173_p2), 1042432  }
   0x8   : > { %464 = vmatprep.subr.bf16.mxu0 (!%p173_p2), %v696_v1  ;;  %609 = vmatprep.subr.bf16.mxu1 (!%p173_p2), %v696_v1  ;;  %s700_s8 = smov (!%p173_p2), 64   ;;  %vm345_vm6 = vcmask (!%p173_p2), 130048   ;;  %s701_s11 = smov (!%p173_p2), 80   ;;  %v685_v57 = vld [vmem:[%s905_s2 + $0x30] sm:$0xff] (!%p173_p2)   ;;  %v686_v63 = vld [vmem:[%s905_s2 + $0x38] sm:$0xff] (!%p173_p2)   ;;  %vm349_vm7 = vcmask (!%p173_p2), 261120  }
   0x9   : > { %s702_s14 = smov (!%p173_p2), 96   ;;  %s703_s19 = smov (!%p173_p2), 112   ;;  %vm353_vm8 = vcmask (!%p173_p2), 392192   ;;  %vm357_vm9 = vcmask (!%p173_p2), 523264   ;;  %vm361_vm10 = vcmask (!%p173_p2), 654336   ;;  %vm365_vm11 = vcmask (!%p173_p2), 785408  }
   0xa   : > { %vm369_vm12 = vcmask (!%p173_p2), 916480  }
   0xb   : > { %465 = vmatpush1.bf16.msra.mxu0 (!%p173_p2), %v680_v2  ;;  %618 = vmatpush1.bf16.msra.mxu1 (!%p173_p2), %v680_v2 }
   0xc   : > { %466 = vmatprep.subr.bf16.mxu0 (!%p173_p2), %v696_v1  ;;  %610 = vmatprep.subr.bf16.mxu1 (!%p173_p2), %v696_v1 }
   0xd   : > { %s909_s16 = smov (!%p203_p3, %s586_s16), 1 }
   0xe   : > { %s626_s21 = smul.u32 48, %s909_s16 }
   0xf   : > { %467 = vmatpush1.bf16.msra.mxu0 %v681_v11  ;;  %619 = vmatpush1.bf16.msra.mxu1 %v681_v11  ;;  %s627_s22 = smul.u32 24, %s909_s16 }
  0x10   : > { %s753_s24 = scalar_lea.vmem %s903_s0, %s626_s21  ;;  %468 = vmatprep.subr.bf16.mxu0 %v696_v1  ;;  %611 = vmatprep.subr.bf16.mxu1 %v696_v1 }
  0x11   : > { %v756_v3 = vld [vmem:[%s753_s24 + $0x10] sm:$0xff]  ;;  %v759_v4 = vld [vmem:[%s753_s24 + $0x18] sm:$0xff]  ;;  %v762_v5 = vld [vmem:[%s753_s24] sm:$0xff]  ;;  %s212_s25 = scalar_lea.vmem %s904_s1, %s627_s22 }
  0x12   : > { %v232_v6 = vrot.slane %v756_v3, 1  ;;  %v234_v7 = vrot.slane %v759_v4, 1  ;;  %v767_v8 = vld [vmem:[%s753_s24 + $0x8] sm:$0xff]  ;;  %v229_v9 = vrot.slane %v762_v5, 1  ;;  %v263_v10 = vrot.slane %v762_v5, 6  ;;  %v223_v51 = vld [vmem:[%s753_s24 + $0x20] sm:$0xff] }
  0x13   : > { %v230_v12 = vrot.slane %v767_v8, 1  ;;  %v264_v13 = vrot.slane %v767_v8, 6  ;;  %v266_v14 = vrot.slane %v756_v3, 6  ;;  %v246_v15 = vrot.slane %v762_v5, 2  ;;  %469 = vmatpush1.bf16.msra.mxu0 %v682_v28  ;;  %620 = vmatpush1.bf16.msra.mxu1 %v682_v28 }
  0x14   : > { %v235_v16 = vsel %vm228_vm0, %v232_v6, %v234_v7  ;;  %v247_v17 = vrot.slane %v767_v8, 2  ;;  %v249_v18 = vrot.slane %v756_v3, 2  ;;  %v280_v19 = vrot.slane %v762_v5, 7  ;;  %470 = vmatprep.subr.bf16.mxu0 %v696_v1  ;;  %612 = vmatprep.subr.bf16.mxu1 %v696_v1 }
  0x15   : > { %240 = vrot.lane.b32.xlu1 %v235_v16, %s697_s27  ;;  %v231_v20 = vsel %vm228_vm0, %v229_v9, %v230_v12  ;;  %v233_v21 = vsel %vm228_vm0, %v230_v12, %v232_v6  ;;  %v265_v22 = vsel %vm262_vm1, %v263_v10, %v264_v13  ;;  %v267_v23 = vsel %vm262_vm1, %v264_v13, %v266_v14  ;;  %v687_v6 = vld [vmem:[%s905_s2 + $0x40] sm:$0xff]  }
  0x16   : > { %v644_v24 = vpack.i.bf16 %v233_v21, %v231_v20  ;;  %v654_v25 = vpack.i.bf16 %v267_v23, %v265_v22  ;;  %v248_v26 = vsel %vm245_vm2, %v246_v15, %v247_v17  ;;  %v250_v27 = vsel %vm245_vm2, %v247_v17, %v249_v18 }
  0x17   : > { %v281_v29 = vrot.slane %v767_v8, 7  ;;  %v283_v30 = vrot.slane %v756_v3, 7  ;;  %v649_v31 = vpack.i.bf16 %v250_v27, %v248_v26  ;;  %v251_v32 = vrot.slane %v759_v4, 2  ;;  %471 = vmatpush1.bf16.msra.mxu0 %v683_v40  ;;  %621 = vmatpush1.bf16.msra.mxu1 %v683_v40 }
  0x18   : > { %645 = vrot.lane.b32.xlu0 %v644_v24, %s697_s27  ;;  %v268_v33 = vrot.slane %v759_v4, 6  ;;  %v307_v36 = vrot.slane %v767_v8, 4  ;;  %v308_v37 = vrot.slane %v756_v3, 4  ;;  %v310_v39 = vrot.slane %v759_v4, 4  ;;  %472 = vmatprep.subr.bf16.mxu0 %v696_v1 }
  0x19   : > { %655 = vrot.lane.b32.xlu1 %v654_v25, %s698_s30  ;;  %v282_v34 = vsel %vm279_vm3, %v280_v19, %v281_v29  ;;  %v284_v35 = vsel %vm279_vm3, %v281_v29, %v283_v30  ;;  %v252_v41 = vsel %vm245_vm2, %v249_v18, %v251_v32  ;;  %v664_v42 = vpack.i.bf16 %v756_v3, %v767_v8 }
  0x1a   : > { %v659_v38 = vpack.i.bf16 %v284_v35, %v282_v34  ;;  %v269_v43 = vsel %vm262_vm1, %v266_v14, %v268_v33  ;;  %v309_v44 = vsel %vm306_vm4, %v307_v36, %v308_v37  ;;  %v311_v45 = vsel %vm306_vm4, %v308_v37, %v310_v39  ;;  %613 = vmatprep.subr.bf16.mxu1 %v696_v1 }
  0x1b   : > { %v324_v46 = vrot.slane %v767_v8, 5  ;;  %v325_v47 = vrot.slane %v756_v3, 5  ;;  %v327_v48 = vrot.slane %v759_v4, 5  ;;  %v374_v50 = vpack.c.bf16 %v269_v43, %v267_v23  ;;  %473 = vmatpush1.bf16.msra.mxu0 %v684_v49  ;;  %622 = vmatpush1.bf16.msra.mxu1 %v684_v49 }
  0x1c   : > { %650 = vrot.lane.b32.xlu0 %v649_v31, %s699_s7  ;;  %v669_v52 = vpack.i.bf16 %v311_v45, %v309_v44  ;;  %v285_v53 = vrot.slane %v759_v4, 7  ;;  %v340_v54 = vrot.slane %v223_v51, 6  ;;  %474 = vmatprep.subr.bf16.mxu0 %v696_v1  ;;  %v329_v62 = vrot.slane %v223_v51, 5 }
  0x1d   : > { %660 = vrot.lane.b32.xlu1 %v659_v38, %s700_s8  ;;  %604 = vmatprep.mubr.msk.bf16.mxu0 %vm345_vm6, %v374_v50  ;;  %v326_v55 = vsel %vm323_vm5, %v324_v46, %v325_v47  ;;  %v328_v56 = vsel %vm323_vm5, %v325_v47, %v327_v48  ;;  %v312_v0 = vrot.slane %v223_v51, 4 }
  0x1e   : > { %v341_v58 = vsel %vm262_vm1, %v268_v33, %v340_v54  ;;  %614 = vmatprep.subr.bf16.mxu1 %v696_v1  ;;  %v286_v60 = vsel %vm279_vm3, %v283_v30, %v285_v53  ;;  %v674_v61 = vpack.i.bf16 %v328_v56, %v326_v55  ;;  %v330_v2 = vsel %vm323_vm5, %v327_v48, %v329_v62  ;;  %v594_v55 = vld [vmem:[%s906_s3] ss:$0 sm:$0xff] }
  0x1f   : > { %v376_v59 = vpack.c.bf16 %v341_v58, %v341_v58  ;;  %475 = vmatpush1.bf16.msra.mxu0 %v685_v57  ;;  %623 = vmatpush1.bf16.msra.mxu1 %v685_v57  ;;  %v313_v7 = vsel %vm306_vm4, %v310_v39, %v312_v0  ;;  %v510_v57 = vld [vmem:[%s212_s25] sm:$0xff] }
  0x20   : > { %257 = vrot.lane.b32.xlu0 %v252_v41, %s699_s7  ;;  %476 = vmatprep.subr.bf16.mxu0 %v696_v1 }
  0x21   : > { %665 = vrot.lane.b32.xlu1 %v664_v42, %s701_s11  ;;  %605 = vmatprep.mubr.msk.bf16.mxu1 %vm345_vm6, %v376_v59 }
  0x22   : > { %615 = vmatprep.subr.bf16.mxu1 %v696_v1 }
  0x23   : > { %477 = vmatpush1.bf16.msra.mxu0 %v686_v63  ;;  %624 = vmatpush1.bf16.msra.mxu1 %v686_v63 }
  0x24   : > { %274 = vrot.lane.b32.xlu0 %v269_v43, %s698_s30  ;;  %478 = vmatprep.subr.bf16.mxu0 %v696_v1  ;;  %s217_s30 = scalar_lea.vmem %s907_s4, %s627_s22 }
  0x25   : > { %670 = vrot.lane.b32.xlu1 %v669_v52, %s702_s14  ;;  %616 = vmatprep.subr.bf16.mxu1 %v696_v1 }
  0x27   : > { %479 = vmatpush1.bf16.msra.mxu0 %v687_v6  ;;  %625 = vmatpush1.bf16.msra.mxu1 %v687_v6 }
  0x28   : > { %291 = vrot.lane.b32.xlu0 %v286_v60, %s700_s8 }
  0x29   : > { %675 = vrot.lane.b32.xlu1 %v674_v61, %s703_s19  ;;  %v511_v61 = vld [vmem:[%s212_s25 + $0x8] sm:$0xff] }
  0x2c   : > { %300 = vrot.lane.b32.xlu0 %v759_v4, %s701_s11 }
  0x2d   : > { %335 = vrot.lane.b32.xlu1 %v330_v2, %s703_s19 }
  0x30   : > { %318 = vrot.lane.b32.xlu0 %v313_v7, %s702_s14  ;;  %v512_v7 = vld [vmem:[%s212_s25 + $0x10] sm:$0xff] }
  0x87   : > { %v241_v9 = vpop.permute.xlu1 %240 }
  0x88   : > { %v348_v42 = vsel %vm345_vm6, %v756_v3, %v241_v9 }
  0x8a   : > { %v646_v10 = vpop.permute.xlu0 %645 }
  0x8b   : > { %v656_v11 = vpop.permute.xlu1 %655  ;;  %v648_v14 = vunpack.i.h.bf16 %v646_v10  ;;  %v647_v15 = vunpack.i.l.bf16 %v646_v10 }
  0x8c   : > { %v658_v20 = vunpack.i.h.bf16 %v656_v11  ;;  %v657_v21 = vunpack.i.l.bf16 %v656_v11 }
  0x8d   : > { %v347_v4 = vsel %vm345_vm6, %v767_v8, %v648_v14  ;;  %v346_v19 = vsel %vm345_vm6, %v762_v5, %v647_v15 }
  0x8e   : > { %v651_v12 = vpop.permute.xlu0 %650 }
  0x8f   : > { %v661_v13 = vpop.permute.xlu1 %660  ;;  %v653_v16 = vunpack.i.h.bf16 %v651_v12  ;;  %v652_v17 = vunpack.i.l.bf16 %v651_v12 }
  0x90   : > { %v663_v25 = vunpack.i.h.bf16 %v661_v13  ;;  %v662_v26 = vunpack.i.l.bf16 %v661_v13 }
  0x91   : > { %v350_v22 = vsel %vm349_vm7, %v346_v19, %v652_v17  ;;  %v351_v23 = vsel %vm349_vm7, %v347_v4, %v653_v16 }
  0x92   : > { %v258_v18 = vpop.permute.xlu0 %257  ;;  %v354_v30 = vsel %vm353_vm8, %v350_v22, %v657_v21  ;;  %v355_v8 = vsel %vm353_vm8, %v351_v23, %v658_v20 }
  0x93   : > { %v666_v1 = vpop.permute.xlu1 %665  ;;  %v358_v33 = vsel %vm357_vm9, %v354_v30, %v662_v26  ;;  %v359_v34 = vsel %vm357_vm9, %v355_v8, %v663_v25  ;;  %v352_v46 = vsel %vm349_vm7, %v348_v42, %v258_v18 }
  0x94   : > { %v668_v28 = vunpack.i.h.bf16 %v666_v1  ;;  %v667_v29 = vunpack.i.l.bf16 %v666_v1 }
  0x96   : > { %v275_v24 = vpop.permute.xlu0 %274  ;;  %v362_v38 = vsel %vm361_vm10, %v358_v33, %v667_v29  ;;  %v363_v39 = vsel %vm361_vm10, %v359_v34, %v668_v28 }
  0x97   : > { %v671_v27 = vpop.permute.xlu1 %670  ;;  %v356_v48 = vsel %vm353_vm8, %v352_v46, %v275_v24 }
  0x98   : > { %v673_v31 = vunpack.i.h.bf16 %v671_v27  ;;  %v672_v5 = vunpack.i.l.bf16 %v671_v27 }
  0x9a   : > { %v292_v32 = vpop.permute.xlu0 %291  ;;  %v366_v40 = vsel %vm365_vm11, %v362_v38, %v672_v5  ;;  %v367_v41 = vsel %vm365_vm11, %v363_v39, %v673_v31 }
  0x9b   : > { %v676_v35 = vpop.permute.xlu1 %675  ;;  %v360_v49 = vsel %vm357_vm9, %v356_v48, %v292_v32 }
  0x9c   : > { %v678_v36 = vunpack.i.h.bf16 %v676_v35  ;;  %v677_v37 = vunpack.i.l.bf16 %v676_v35 }
  0x9e   : > { %v301_v43 = vpop.permute.xlu0 %300  ;;  %v370_v44 = vsel %vm369_vm12, %v366_v40, %v677_v37  ;;  %v371_v45 = vsel %vm369_vm12, %v367_v41, %v678_v36 }
  0x9f   : > { %v373_v47 = vpack.c.bf16 %v371_v45, %v370_v44  ;;  %v336_v50 = vpop.permute.xlu1 %335  ;;  %v364_v51 = vsel %vm361_vm10, %v360_v49, %v301_v43 }
  0xa1   : > { %495 = vmatmul.mubr.bf16.vlgmr.msra.gmra.mrb[0].mxu0 %v373_v47 }
  0xa2   : > { %v319_v52 = vpop.permute.xlu0 %318 }
  0xa3   : > { %v368_v3 = vsel %vm365_vm11, %v364_v51, %v319_v52 }
  0xa4   : > { %v372_v53 = vsel %vm369_vm12, %v368_v3, %v336_v50 }
  0xa5   : > { %v375_v54 = vpack.c.bf16 %v372_v53, %v372_v53 }
  0xa7   : > { %503 = vmatmul.mubr.bf16.vlgmr.msra.gmra.mrb[0].mxu1 %v375_v54 }
 0x174   : > { %v496_v56 = vpop.f32.mrb[0].mxu0 }
 0x175   : > { %v497_v58 = vadd.f32 %v594_v55, %v496_v56  ;;  %v498_v59 = vpop.f32.mrb[1].mxu0 }
 0x176   : > { %v499_v60 = vpop.f32.mrb[2].mxu0 }
 0x177   : > { %v513_v62 = vadd.f32 %v510_v57, %v497_v58  ;;  %v500_v63 = vadd.f32 %v594_v55, %v499_v60  ;;  %v501_v0 = vpop.f32.mrb[3].mxu0 }
 0x179   : > { %516 = vst.msk [vmem:[%s217_s30] sm:$0xff] %vm349_vm7, %v513_v62  ;;  %v514_v2 = vadd.f32 %v511_v61, %v500_v63 }
 0x17a   : > { %v504_v6 = vpop.f32.mrb[0].mxu1 }
 0x17b   : > { %517 = vst.msk [vmem:[%s217_s30 + $0x8] sm:$0xff] %vm349_vm7, %v514_v2  ;;  %v505_v9 = vadd.f32 %v594_v55, %v504_v6  ;;  %v506_v10 = vpop.f32.mrb[1].mxu1 }
 0x17c   : > { %v507_v11 = vpop.f32.mrb[2].mxu1 }
 0x17d   : > { %v515_v12 = vadd.f32 %v512_v7, %v505_v9  ;;  %v508_v13 = vpop.f32.mrb[3].mxu1 }
 0x17f   : > { %518 = vst.msk [vmem:[%s217_s30 + $0x10] sm:$0xff] %vm349_vm7, %v515_v12 }
 0x180 PF: > { %s14_s15 = sadd.s32 1, %s694_s15  }
 0x181   : > { %p11_p4 = scmp.ge.s32.totalorder %s14_s15, 4  }
 0x183   :  { %13 = sbr.rel (!%p11_p4) target bundleno = 1 (0x1), region = 69 }

// kernel: istt_nofold_forward.21
= control target key start
LH: loop header
LB: loop body
LE: loop exit
PB: predicated region body
PF: predicated region fallthrough
CT: control target
= control target key end

     0   :  { %s2466_s0 = inlined_call_operand.vmem [shape: f32[2,16,32], index: 0, kind: input, shape index: {}, may-alias: {0,2}]   ;;  %s2467_s1 = inlined_call_operand.vmem [shape: f32[2,16,32], index: 1, kind: input, shape index: {}, may-alias: {1,3}]   ;;  %s2468_s2 = inlined_call_operand.vmem [shape: f32[2,16,32], index: 2, kind: input, shape index: {}, may-alias: {0,2}]   ;;  %s2469_s3 = inlined_call_operand.vmem [shape: f32[2,16,32], index: 3, kind: input, shape index: {}, may-alias: {1,3}]   ;;  %s2470_s4 = inlined_call_operand.vmem [shape: bf16[32,32], index: 4, kind: input, shape index: {}]   ;;  %s2471_s5 = inlined_call_operand.vmem [shape: f32[1,32], index: 5, kind: input, shape index: {}]   ;;  %s2472_s6 = inlined_call_operand.vmem [shape: bf16[32,32], index: 6, kind: input, shape index: {}]   ;;  %s2473_s7 = inlined_call_operand.vmem [shape: f32[1,32], index: 7, kind: input, shape index: {}]   ;;  %s2474_s8 = inlined_call_operand.vmem [shape: bf16[32,32], index: 8, kind: input, shape index: {}]   ;;  %s2475_s9 = inlined_call_operand.vmem [shape: f32[1,32], index: 9, kind: input, shape index: {}]   ;;  %s2476_s10 = inlined_call_operand.vmem [shape: bf16[32,32], index: 10, kind: input, shape index: {}]   ;;  %s2477_s11 = inlined_call_operand.vmem [shape: f32[1,32], index: 11, kind: input, shape index: {}]   ;;  %s2478_s12 = inlined_call_operand.vmem [shape: f32[1,32], index: 12, kind: input, shape index: {}]   ;;  %s2479_s13 = inlined_call_operand.vmem [shape: f32[1,32], index: 13, kind: input, shape index: {}]   ;;  %s2480_s14 = inlined_call_operand.vmem [shape: bf16[32,64], index: 14, kind: input, shape index: {}]   ;;  %s2481_s15 = inlined_call_operand.vmem [shape: f32[1,64], index: 15, kind: input, shape index: {}]   ;;  %s2482_s16 = inlined_call_operand.vmem [shape: bf16[64,32], index: 16, kind: input, shape index: {}]   ;;  %s2483_s17 = inlined_call_operand.vmem [shape: f32[1,32], index: 17, kind: input, shape index: {}]   ;;  %s2484_s18 = inlined_call_operand.vmem [shape: f32[1,32], index: 18, kind: input, shape index: {}]   ;;  %s2485_s19 = inlined_call_operand.vmem [shape: f32[1,32], index: 19, kind: input, shape index: {}]   ;;  %s2486_s20 = inlined_call_operand.vmem [shape: f32[2,16,32], index: 20, kind: output, shape index: {}]  }
   0x1   :  { %2490 = sst [smem:[#allocation3_spill]] %s2466_s0 }
   0x2   :  { %2491 = sst [smem:[#allocation4_spill]] %s2467_s1  ;;  %s2237_s1 = smov 0  }
   0x3   :  { %2492 = sst [smem:[#allocation5_spill]] %s2468_s2 }
   0x4   :  { %2493 = sst [smem:[#allocation6_spill]] %s2469_s3 }
   0x5   :  { %2494 = sst [smem:[#allocation7_spill]] %s2470_s4 }
   0x6   :  { %2495 = sst [smem:[#allocation8_spill]] %s2472_s6 }
   0x7   :  { %2496 = sst [smem:[#allocation9_spill]] %s2486_s20 }
   0x8 LB: > { %2497 = sst [smem:[#allocation2_spill]] %s2122_s1  ;;  %s1835_s22 = sadd.s32 4294967295, %s2122_s1   ;;  %s2122_s1 = sphi %s2237_s1, %s30_s1  }
   0x9   : > { %p1839_p0 = scmp.ge.s32.totalorder %s2122_s1, 1  ;;  %p592_p1 = scmp.lt.s32.totalorder %s2122_s1, 3 }
   0xb   : > { %p593_p2 = pnand %p1839_p0, %p592_p1 }
   0xc   : > { %s2498_s6 = sld [smem:[#allocation8_spill]] (!%p593_p2)  ;;  %v2124_v1 = vmov (!%p593_p2), 0.0   ;;  %s2499_s3 = sld [smem:[#allocation7_spill]] (!%p593_p2)  ;;  %vm2125_vm0 = vmmov (!%p593_p2), 0   ;;  %vm729_vm1 = vcmask (!%p593_p2), 261120   ;;  %vm913_vm2 = vcmask (!%p593_p2), 64512  }
   0xd   : > { %596 = sbr.rel (%p593_p2) target bundleno = 2541 (0x9ed), region = 100  ;;  %1939 = vmatprep.subr.bf16.mxu1 (!%p593_p2), %v2124_v1  ;;  %1931 = vmatprep.subr.bf16.mxu0 (!%p593_p2), %v2124_v1  ;;  %p665_p3 = scmp.lt.s32.totalorder (!%p593_p2), %s1835_s22, 1  ;;  %v1850_v20 = vld [vmem:[%s2471_s5] ss:$0 sm:$0xff] (!%p593_p2)  ;;  %v2067_v40 = vld [vmem:[%s2474_s8 + $0x8] sm:$0xff] (!%p593_p2)   ;;  %vm961_vm3 = vcmask (!%p593_p2), 130048  }
   0xe   : > { %1943 = vmatprep.mubr.msk.bf16.mxu1 (!%p593_p2), %vm2125_vm0, %v2124_v1  ;;  %1935 = vmatprep.mubr.msk.bf16.mxu0 (!%p593_p2), %vm2125_vm0, %v2124_v1  ;;  %s2500_s21 = sld [smem:[#allocation5_spill]] (!%p593_p2)  ;;  %s2501_s25 = sld [smem:[#allocation6_spill]] (!%p593_p2)  ;;  %v1854_v21 = vld [vmem:[%s2473_s7] ss:$0 sm:$0xff] (!%p593_p2)  ;;  %vm1423_vm4 = vcmask (!%p593_p2), 195584   ;;  %vm1651_vm5 = vcmask (!%p593_p2), 523264  }
   0xf   : > { %s2502_s28 = sld [smem:[#allocation3_spill]] (!%p593_p2)  ;;  %s2503_s1 = sld [smem:[#allocation4_spill]] (!%p593_p2)  ;;  %v2066_v39 = vld [vmem:[%s2474_s8] sm:$0xff] (!%p593_p2)  }
  0x10   : > { %s2126_s30 = smov (!%p593_p2), 112   ;;  %s2127_s0 = smov (!%p593_p2), 120   ;;  %v1858_v56 = vld [vmem:[%s2475_s9] ss:$0 sm:$0xff] (!%p593_p2) }
  0x12   : > { %v2062_v0 = vld [vmem:[%s2498_s6] sm:$0xff] (!%p593_p2)   ;;  %v2064_v3 = vld [vmem:[%s2498_s6 + $0x8] sm:$0xff] (!%p593_p2)   ;;  %s2504_s6 = sld [smem:[#allocation9_spill]] (!%p593_p2) }
  0x13   : > { %v2063_v2 = vld [vmem:[%s2499_s3] sm:$0xff] (!%p593_p2)   ;;  %1940 = vmatpush3.bf16.msra.mxu1 (!%p593_p2), %v2062_v0  ;;  %v2065_v4 = vld [vmem:[%s2499_s3 + $0x8] sm:$0xff] (!%p593_p2)   ;;  %s2131_s3 = smov (!%p593_p2), 24  }
  0x14   : > { %1932 = vmatpush3.bf16.msra.mxu0 %v2063_v2  ;;  %1941 = vmatprep.subr.bf16.mxu1 %v2124_v1  ;;  %s2507_s22 = smov (!%p665_p3, %s1835_s22), 1 }
  0x15   : > { %1933 = vmatprep.subr.bf16.mxu0 %v2124_v1  ;;  %s2265_s29 = sshll.u32 %s2507_s22, 4 }
  0x16   : > { %s679_s23 = scalar_lea.vmem %s2500_s21, %s2265_s29  ;;  %s684_s26 = scalar_lea.vmem %s2501_s25, %s2265_s29 }
  0x17   : > { %1942 = vmatpush3.bf16.msra.mxu1 %v2064_v3  ;;  %v2276_v5 = vld [vmem:[%s679_s23] sm:$0xff]  ;;  %v694_v6 = vld [vmem:[%s679_s23 + $0x8] sm:$0xff]  ;;  %s669_s4 = scalar_lea.vmem %s2502_s28, %s2265_s29  ;;  %s674_s20 = scalar_lea.vmem %s2503_s1, %s2265_s29 }
  0x18   : > { %1934 = vmatpush3.bf16.msra.mxu0 %v2065_v4  ;;  %1955 = vmatprep.subr.bf16.mxu1 %v2124_v1  ;;  %v700_v7 = vld [vmem:[%s684_s26] sm:$0xff]  ;;  %v701_v8 = vld [vmem:[%s684_s26 + $0x8] sm:$0xff]  ;;  %v705_v10 = vpack.c.bf16 %v694_v6, %v2276_v5  ;;  %s2128_s21 = smov 104   ;;  %s689_s1 = scalar_lea.vmem %s2504_s6, %s2265_s29 }
  0x19   : > { %1947 = vmatprep.subr.bf16.mxu0 %v2124_v1  ;;  %v702_v9 = vadd.f32 %v700_v7, %v2276_v5  ;;  %v2289_v11 = vld [vmem:[%s669_s4] sm:$0xff]  ;;  %v2291_v12 = vld [vmem:[%s669_s4 + $0x8] sm:$0xff]  ;;  %v703_v13 = vadd.f32 %v701_v8, %v694_v6  ;;  %s2129_s4 = smov 8  }
  0x1a   : > { %v695_v14 = vld [vmem:[%s674_s20] sm:$0xff]  ;;  %v696_v15 = vld [vmem:[%s674_s20 + $0x8] sm:$0xff]  ;;  %s2130_s20 = smov 16  }
  0x1b   : > { %v697_v16 = vadd.f32 %v695_v14, %v2289_v11  ;;  %v698_v17 = vadd.f32 %v696_v15, %v2291_v12  ;;  %v704_v18 = vpack.c.bf16 %v703_v13, %v702_v9 }
  0x1d   : > { %v699_v19 = vpack.c.bf16 %v698_v17, %v697_v16  ;;  %1944 = vmatmul.mubr.msk.bf16.vlgmr.msra.gmra.mrb[0].mxu1 %vm729_vm1, %v704_v18 }
  0x1e   : > { %1957 = vmatprep.mubr.msk.bf16.mxu1 %vm2125_vm0, %v2124_v1 }
  0x1f   : > { %1936 = vmatmul.mubr.msk.bf16.vlgmr.msra.gmra.mrb[0].mxu0 %vm729_vm1, %v699_v19 }
  0x20   : > { %1951 = vmatprep.mubr.msk.bf16.mxu0 %vm2125_vm0, %v2124_v1  ;;  %1948 = vmatpush3.bf16.msra.mxu0 %v2066_v39 }
  0x21   : > { %1949 = vmatprep.subr.bf16.mxu0 %v2124_v1 }
  0x24   : > { %1950 = vmatpush3.bf16.msra.mxu0 %v2067_v40 }
  0x25   : > { %1961 = vmatprep.subr.bf16.mxu0 %v2124_v1 }
  0x27   : > { %1952 = vmatmul.mubr.msk.bf16.vlgmr.msra.gmra.mrb[4].mxu0 %vm729_vm1, %v705_v10 }
  0x28   : > { %1963 = vmatprep.mubr.msk.bf16.mxu0 %vm2125_vm0, %v2124_v1 }
  0xf0   : > { %v834_v22 = vpop.f32.mrb[0].mxu1 }
  0xf1   : > { %v1945_v23 = vpop.f32.mrb[1].mxu1  ;;  %v835_v28 = vadd.f32 %v1854_v21, %v834_v22 }
  0xf2   : > { %v767_v24 = vpop.f32.mrb[0].mxu0  ;;  %v837_v26 = vpop.f32.mrb[2].mxu1 }
  0xf3   : > { %v768_v25 = vadd.f32 %v1850_v20, %v767_v24  ;;  %v1937_v27 = vpop.f32.mrb[1].mxu0  ;;  %v838_v29 = vadd.f32 %v1854_v21, %v837_v26  ;;  %v1946_v30 = vpop.f32.mrb[3].mxu1 }
  0xf4   : > { %v770_v31 = vpop.f32.mrb[2].mxu0 }
  0xf5   : > { %v908_v32 = vmul.f32 0.35355338, %v768_v25  ;;  %v771_v33 = vadd.f32 %v1850_v20, %v770_v31  ;;  %v1938_v34 = vpop.f32.mrb[3].mxu0  ;;  %v911_v35 = vpack.c.bf16 %v838_v29, %v835_v28 }
  0xf7   : > { %v909_v36 = vmul.f32 0.35355338, %v771_v33  ;;  %1155 = vrot.lane.b32.xlu1 %v911_v35, %s2126_s30  ;;  %1033 = vrot.lane.b32.xlu0 %v911_v35, %s2127_s0  ;;  %v918_v37 = vsel %vm913_vm2, %v911_v35, 0 }
  0xf8   : > { %1956 = vmatpush3.bf16.xpose.msra.mxu1 %v918_v37 }
  0xf9   : > { %v910_v38 = vpack.c.bf16 %v909_v36, %v908_v32  ;;  %1967 = vmatprep.subr.bf16.mxu1 %v2124_v1 }
  0xfa   : > { %v901_v57 = vpop.f32.mrb[4].mxu0 }
  0xfb   : > { %1153 = vrot.lane.b32.xlu1 %v910_v38, %s2126_s30  ;;  %1030 = vrot.lane.b32.xlu0 %v910_v38, %s2127_s0  ;;  %v902_v58 = vadd.f32 %v1858_v56, %v901_v57  ;;  %v1953_v59 = vpop.f32.mrb[5].mxu0 }
  0xfc   : > { %v904_v60 = vpop.f32.mrb[6].mxu0 }
  0xfd   : > { %v905_v61 = vadd.f32 %v1858_v56, %v904_v60  ;;  %v1954_v62 = vpop.f32.mrb[7].mxu0 }
  0xff   : > { %1274 = vrot.lane.b32.xlu1 %v910_v38, %s2128_s21  ;;  %1276 = vrot.lane.b32.xlu0 %v911_v35, %s2128_s21  ;;  %v2349_v63 = vpack.c.bf16 %v905_v61, %v902_v58 }
 0x100   : > { %1958 = vmatmul.mubr.msk.bf16.vlgmr.msra.gmra.mrb[4].mxu1 %vm913_vm2, %v910_v38 }
 0x101   : > { %1969 = vmatprep.mubr.msk.bf16.mxu1 %vm2125_vm0, %v2124_v1  ;;  %1962 = vmatpush3.bf16.msra.mxu0 %v2349_v63 }
 0x102   : > { %1973 = vmatprep.subr.bf16.mxu0 %v2124_v1 }
 0x169   : > { %v1034_v41 = vpop.permute.xlu0 %1033  ;;  %v1156_v43 = vpop.permute.xlu1 %1155 }
 0x16a   : > { %v1039_v42 = vsel %vm913_vm2, %v1034_v41, 0  ;;  %v1161_v45 = vsel %vm913_vm2, %v1156_v43, 0 }
 0x16b   : > { %1968 = vmatpush3.bf16.xpose.msra.mxu1 %v1039_v42 }
 0x16c   : > { %1979 = vmatprep.subr.bf16.mxu1 %v2124_v1 }
 0x16d   : > { %v1031_v44 = vpop.permute.xlu0 %1030  ;;  %v1154_v47 = vpop.permute.xlu1 %1153 }
 0x171   : > { %v1277_v46 = vpop.permute.xlu0 %1276  ;;  %v1275_v49 = vpop.permute.xlu1 %1274 }
 0x172   : > { %1970 = vmatmul.mubr.msk.bf16.vlgmr.msra.gmra.mrb[8].mxu1 %vm913_vm2, %v1031_v44  ;;  %v1282_v48 = vsel %vm913_vm2, %v1277_v46, 0 }
 0x173   : > { %1980 = vmatpush3.bf16.xpose.msra.mxu1 %v1161_v45  ;;  %1981 = vmatprep.mubr.msk.bf16.mxu1 %vm2125_vm0, %v2124_v1 }
 0x174   : > { %1991 = vmatprep.subr.bf16.mxu1 %v2124_v1 }
 0x17a   : > { %1982 = vmatmul.mubr.msk.bf16.vlgmr.msra.gmra.mrb[12].mxu1 %vm913_vm2, %v1154_v47 }
 0x17b   : > { %1992 = vmatpush3.bf16.xpose.msra.mxu1 %v1282_v48  ;;  %1993 = vmatprep.mubr.msk.bf16.mxu1 %vm2125_vm0, %v2124_v1 }
 0x17c   : > { %2003 = vmatprep.subr.bf16.mxu1 %v2124_v1 }
 0x182   : > { %1994 = vmatmul.mubr.msk.bf16.vlgmr.msra.gmra.mrb[16].mxu1 %vm913_vm2, %v1275_v49 }
 0x183   : > { %2007 = vmatprep.mubr.msk.bf16.mxu1 %vm2125_vm0, %v2124_v1 }
 0x1d3   : > { %v954_v50 = vpop.f32.mrb[4].mxu1 }
 0x1d4   : > { %v1959_v51 = vpop.f32.mrb[5].mxu1  ;;  %v962_v52 = vsel %vm961_vm3, %v954_v50, -inf }
 0x1d5   : > { %963 = vmax.xlane.f32.xlu0 %v962_v52  ;;  %v957_v53 = vpop.f32.mrb[6].mxu1 }
 0x1d6   : > { %v1960_v54 = vpop.f32.mrb[7].mxu1  ;;  %v965_v55 = vsel %vm961_vm3, %v957_v53, -inf }
 0x1d7   : > { %966 = vmax.xlane.f32.xlu1 %v965_v55 }
 0x245   : > { %v1075_v0 = vpop.f32.mrb[8].mxu1 }
 0x246   : > { %v1971_v2 = vpop.f32.mrb[9].mxu1  ;;  %v1082_v3 = vsel %vm961_vm3, %v1075_v0, -inf }
 0x247   : > { %1083 = vmax.xlane.f32.xlu0 %v1082_v3  ;;  %v1078_v4 = vpop.f32.mrb[10].mxu1 }
 0x248   : > { %v1972_v5 = vpop.f32.mrb[11].mxu1  ;;  %v1085_v6 = vsel %vm961_vm3, %v1078_v4, -inf }
 0x24b   : > { %1086 = vmax.xlane.f32.xlu0 %v1085_v6 }
 0x24d   : > { %v1197_v7 = vpop.f32.mrb[12].mxu1 }
 0x24e   : > { %v1983_v8 = vpop.f32.mrb[13].mxu1  ;;  %v1204_v9 = vsel %vm961_vm3, %v1197_v7, -inf }
 0x24f   : > { %1205 = vmax.xlane.f32.xlu1 %v1204_v9  ;;  %v1200_v10 = vpop.f32.mrb[14].mxu1 }
 0x250   : > { %v1984_v13 = vpop.f32.mrb[15].mxu1  ;;  %v1207_v14 = vsel %vm961_vm3, %v1200_v10, -inf }
 0x251   : > { %1208 = vmax.xlane.f32.xlu0 %v1207_v14 }
 0x255   : > { %v1318_v15 = vpop.f32.mrb[16].mxu1 }
 0x256   : > { %v1995_v16 = vpop.f32.mrb[17].mxu1  ;;  %v1325_v17 = vsel %vm961_vm3, %v1318_v15, -inf }
 0x257   : > { %1326 = vmax.xlane.f32.xlu1 %v1325_v17  ;;  %v1321_v18 = vpop.f32.mrb[18].mxu1 }
 0x258   : > { %v1996_v19 = vpop.f32.mrb[19].mxu1  ;;  %v1328_v20 = vsel %vm961_vm3, %v1321_v18, -inf }
 0x259   : > { %1329 = vmax.xlane.f32.xlu0 %v1328_v20 }
 0x262   : > { %v964_v21 = vpop.xlane.xlu0 %963 }
 0x263   : > { %v968_v22 = vsub.f32 %v954_v50, %v964_v21 }
 0x264   : > { %v967_v23 = vpop.xlane.xlu1 %966 }
 0x265   : > { %v970_v24 = vmul.f32 1.442695, %v968_v22  ;;  %v969_v25 = vsub.f32 %v957_v53, %v967_v23 }
 0x267   : > { %2076 = vpow2.f32 %v970_v24  ;;  %v972_v26 = vmul.f32 1.442695, %v969_v25 }
 0x269   : > { %2078 = vpow2.f32 %v972_v26 }
 0x271   : > { %v2077_v27 = vpop.eup %2076 }
 0x272   : > { %v974_v28 = vsel %vm961_vm3, %v2077_v27, 0.0 }
 0x273   : > { %v2079_v29 = vpop.eup %2078  ;;  %975 = vadd.xlane.f32.xlu1 %v974_v28 }
 0x274   : > { %v977_v30 = vsel %vm961_vm3, %v2079_v29, 0.0 }
 0x275   : > { %978 = vadd.xlane.f32.xlu0 %v977_v30 }
 0x284   : > { %1106 = vrot.lane.b32.xlu1 %v2349_v63, %s2127_s0 }
 0x2d4   : > { %v1084_v31 = vpop.xlane.xlu0 %1083 }
 0x2d5   : > { %v1088_v32 = vsub.f32 %v1075_v0, %v1084_v31 }
 0x2d7   : > { %v1090_v33 = vmul.f32 1.442695, %v1088_v32 }
 0x2d8   : > { %v1087_v34 = vpop.xlane.xlu0 %1086 }
 0x2d9   : > { %2080 = vpow2.f32 %v1090_v33  ;;  %v1089_v35 = vsub.f32 %v1078_v4, %v1087_v34 }
 0x2db   : > { %v1092_v36 = vmul.f32 1.442695, %v1089_v35 }
 0x2dc   : > { %v1206_v37 = vpop.xlane.xlu1 %1205 }
 0x2dd   : > { %2082 = vpow2.f32 %v1092_v36  ;;  %v1210_v38 = vsub.f32 %v1197_v7, %v1206_v37 }
 0x2de   : > { %v1209_v39 = vpop.xlane.xlu0 %1208 }
 0x2df   : > { %v1212_v40 = vmul.f32 1.442695, %v1210_v38  ;;  %v1211_v41 = vsub.f32 %v1200_v10, %v1209_v39  ;;  %v2068_v38 = vld [vmem:[%s2476_s10] sm:$0xff]  }
 0x2e0   : > { %2004 = vmatpush3.bf16.msra.mxu1 %v2068_v38  ;;  %v1874_v38 = vld [vmem:[%s2478_s12] ss:$0 sm:$0xff] }
 0x2e1   : > { %2084 = vpow2.f32 %v1212_v40  ;;  %v1214_v42 = vmul.f32 1.442695, %v1211_v41  ;;  %2005 = vmatprep.subr.bf16.mxu1 %v2124_v1 }
 0x2e3   : > { %v2081_v43 = vpop.eup %2080  ;;  %2086 = vpow2.f32 %v1214_v42 }
 0x2e4   : > { %v1327_v44 = vpop.xlane.xlu1 %1326  ;;  %v1094_v45 = vsel %vm961_vm3, %v2081_v43, 0.0 }
 0x2e5   : > { %v1331_v46 = vsub.f32 %v1318_v15, %v1327_v44  ;;  %1095 = vadd.xlane.f32.xlu1 %v1094_v45 }
 0x2e6   : > { %v1330_v47 = vpop.xlane.xlu0 %1329 }
 0x2e7   : > { %v2083_v48 = vpop.eup %2082  ;;  %v1333_v49 = vmul.f32 1.442695, %v1331_v46  ;;  %v1332_v50 = vsub.f32 %v1321_v18, %v1330_v47 }
 0x2e8   : > { %v1097_v51 = vsel %vm961_vm3, %v2083_v48, 0.0 }
 0x2e9   : > { %2088 = vpow2.f32 %v1333_v49  ;;  %v1335_v52 = vmul.f32 1.442695, %v1332_v50  ;;  %1098 = vadd.xlane.f32.xlu0 %v1097_v51 }
 0x2eb   : > { %v2085_v53 = vpop.eup %2084  ;;  %2090 = vpow2.f32 %v1335_v52 }
 0x2ec   : > { %v1216_v54 = vsel %vm961_vm3, %v2085_v53, 0.0 }
 0x2ed   : > { %v2087_v55 = vpop.eup %2086  ;;  %1217 = vadd.xlane.f32.xlu1 %v1216_v54 }
 0x2ee   : > { %v1219_v56 = vsel %vm961_vm3, %v2087_v55, 0.0 }
 0x2ef   : > { %1220 = vadd.xlane.f32.xlu0 %v1219_v56 }
 0x2f3   : > { %v2089_v57 = vpop.eup %2088 }
 0x2f4   : > { %v1337_v58 = vsel %vm961_vm3, %v2089_v57, 0.0 }
 0x2f5   : > { %v2091_v59 = vpop.eup %2090  ;;  %1338 = vadd.xlane.f32.xlu1 %v1337_v58 }
 0x2f6   : > { %v1340_v60 = vsel %vm961_vm3, %v2091_v59, 0.0 }
 0x2f7   : > { %1341 = vadd.xlane.f32.xlu0 %v1340_v60 }
 0x300   : > { %v976_v61 = vpop.xlane.xlu1 %975 }
 0x301   : > { %2092 = vrcp.f32 %v976_v61 }
 0x302   : > { %v979_v62 = vpop.xlane.xlu0 %978 }
 0x303   : > { %2094 = vrcp.f32 %v979_v62 }
 0x304   : > { %v1107_v6 = vpop.permute.xlu1 %1106 }
 0x306   : > { %1348 = vrot.lane.b32.xlu1 %v2349_v63, %s2128_s21 }
 0x30b   : > { %v2093_v0 = vpop.eup %2092 }
 0x30c   : > { %v981_v3 = vmul.f32 %v2093_v0, %v2077_v27 }
 0x30d   : > { %v2095_v2 = vpop.eup %2094  ;;  %1227 = vrot.lane.b32.xlu0 %v2349_v63, %s2126_s30 }
 0x30e   : > { %v983_v4 = vmul.f32 %v2095_v2, %v2079_v29 }
 0x310   : > { %v984_v5 = vpack.c.bf16 %v983_v4, %v981_v3 }
 0x312   : > { %1964 = vmatmul.mubr.msk.bf16.vlgmr.msra.gmra.mrb[8].mxu0 %vm961_vm3, %v984_v5 }
 0x313   : > { %1974 = vmatpush3.bf16.msra.mxu0 %v1107_v6  ;;  %1975 = vmatprep.mubr.msk.bf16.mxu0 %vm2125_vm0, %v2124_v1  ;;  %v1870_v6 = vld [vmem:[%s2477_s11] ss:$0 sm:$0xff] }
 0x314   : > { %1985 = vmatprep.subr.bf16.mxu0 %v2124_v1 }
 0x372   : > { %v1096_v7 = vpop.xlane.xlu1 %1095 }
 0x373   : > { %2096 = vrcp.f32 %v1096_v7 }
 0x376   : > { %v1099_v8 = vpop.xlane.xlu0 %1098 }
 0x377   : > { %2098 = vrcp.f32 %v1099_v8 }
 0x37a   : > { %v1218_v9 = vpop.xlane.xlu1 %1217 }
 0x37b   : > { %2100 = vrcp.f32 %v1218_v9 }
 0x37c   : > { %v1221_v10 = vpop.xlane.xlu0 %1220 }
 0x37d   : > { %2102 = vrcp.f32 %v1221_v10  ;;  %v2097_v63 = vpop.eup %2096 }
 0x37e   : > { %v1101_v14 = vmul.f32 %v2097_v63, %v2081_v43  ;;  %v2069_v43 = vld [vmem:[%s2476_s10 + $0x8] sm:$0xff]  }
 0x37f   : > { %2006 = vmatpush3.bf16.msra.mxu1 %v2069_v43 }
 0x380   : > { %2019 = vmatprep.subr.bf16.mxu1 %v2124_v1 }
 0x381   : > { %v2099_v13 = vpop.eup %2098 }
 0x382   : > { %v1103_v15 = vmul.f32 %v2099_v13, %v2083_v48  ;;  %v1339_v16 = vpop.xlane.xlu1 %1338 }
 0x383   : > { %2104 = vrcp.f32 %v1339_v16 }
 0x384   : > { %v1342_v17 = vpop.xlane.xlu0 %1341  ;;  %v1104_v18 = vpack.c.bf16 %v1103_v15, %v1101_v14 }
 0x385   : > { %2106 = vrcp.f32 %v1342_v17  ;;  %v2101_v19 = vpop.eup %2100 }
 0x386   : > { %1976 = vmatmul.mubr.msk.bf16.vlgmr.msra.gmra.mrb[12].mxu0 %vm961_vm3, %v1104_v18  ;;  %v1223_v23 = vmul.f32 %v2101_v19, %v2085_v53  ;;  %v1349_v26 = vpop.permute.xlu1 %1348 }
 0x387   : > { %v2103_v20 = vpop.eup %2102  ;;  %1987 = vmatprep.mubr.msk.bf16.mxu0 %vm2125_vm0, %v2124_v1 }
 0x388   : > { %v1225_v21 = vmul.f32 %v2103_v20, %v2087_v55  ;;  %v1228_v22 = vpop.permute.xlu0 %1227 }
 0x389   : > { %1986 = vmatpush3.bf16.msra.mxu0 %v1228_v22 }
 0x38a   : > { %1997 = vmatprep.subr.bf16.mxu0 %v2124_v1  ;;  %v1226_v24 = vpack.c.bf16 %v1225_v21, %v1223_v23 }
 0x38d   : > { %v2105_v25 = vpop.eup %2104 }
 0x38e   : > { %1988 = vmatmul.mubr.msk.bf16.vlgmr.msra.gmra.mrb[16].mxu0 %vm961_vm3, %v1226_v24  ;;  %v1344_v29 = vmul.f32 %v2105_v25, %v2089_v57 }
 0x38f   : > { %v2107_v27 = vpop.eup %2106  ;;  %1998 = vmatpush3.bf16.msra.mxu0 %v1349_v26  ;;  %1999 = vmatprep.mubr.msk.bf16.mxu0 %vm2125_vm0, %v2124_v1 }
 0x390   : > { %v1346_v28 = vmul.f32 %v2107_v27, %v2091_v59  ;;  %2011 = vmatprep.subr.bf16.mxu0 %v2124_v1  ;;  %v2071_v27 = vld [vmem:[%s2480_s14 + $0x8] sm:$0xff]  }
 0x392   : > { %v1347_v30 = vpack.c.bf16 %v1346_v28, %v1344_v29  ;;  %v2072_v28 = vld [vmem:[%s2482_s16] sm:$0xff]   ;;  %v2073_v29 = vld [vmem:[%s2482_s16 + $0x8] sm:$0xff]  }
 0x396   : > { %2000 = vmatmul.mubr.msk.bf16.vlgmr.msra.gmra.mrb[20].mxu0 %vm961_vm3, %v1347_v30 }
 0x397   : > { %2015 = vmatprep.mubr.msk.bf16.mxu0 %vm2125_vm0, %v2124_v1 }
 0x3e5   : > { %v1022_v31 = vpop.f32.mrb[8].mxu0 }
 0x3e6   : > { %v1965_v32 = vpop.f32.mrb[9].mxu0 }
 0x3e7   : > { %v1025_v33 = vpop.f32.mrb[10].mxu0 }
 0x3e8   : > { %v1966_v34 = vpop.f32.mrb[11].mxu0 }
 0x459   : > { %v1146_v35 = vpop.f32.mrb[12].mxu0 }
 0x45a   : > { %v1977_v36 = vpop.f32.mrb[13].mxu0 }
 0x45b   : > { %v1149_v37 = vpop.f32.mrb[14].mxu0 }
 0x45c   : > { %v2047_v39 = vpack.i.bf16 %v1149_v37, %v1146_v35  ;;  %v1978_v40 = vpop.f32.mrb[15].mxu0 }
 0x45e   : > { %2048 = vrot.lane.b32.xlu1 %v2047_v39, %s2129_s4 }
 0x461   : > { %v1267_v41 = vpop.f32.mrb[16].mxu0 }
 0x462   : > { %v1989_v42 = vpop.f32.mrb[17].mxu0 }
 0x463   : > { %v1270_v44 = vpop.f32.mrb[18].mxu0  ;;  %v1875_v42 = vld [vmem:[%s2479_s13] ss:$0 sm:$0xff] }
 0x464   : > { %v2052_v45 = vpack.i.bf16 %v1270_v44, %v1267_v41  ;;  %v1990_v46 = vpop.f32.mrb[19].mxu0 }
 0x466   : > { %2053 = vrot.lane.b32.xlu0 %v2052_v45, %s2130_s20 }
 0x469   : > { %v1388_v47 = vpop.f32.mrb[20].mxu0 }
 0x46a   : > { %v2001_v48 = vpop.f32.mrb[21].mxu0 }
 0x46b   : > { %v1391_v49 = vpop.f32.mrb[22].mxu0  ;;  %v2075_v48 = vld [vmem:[%s2482_s16 + $0x18] sm:$0xff]  }
 0x46c   : > { %v2057_v50 = vpack.i.bf16 %v1391_v49, %v1388_v47  ;;  %v2002_v51 = vpop.f32.mrb[23].mxu0  ;;  %v2074_v47 = vld [vmem:[%s2482_s16 + $0x10] sm:$0xff]   ;;  %v1876_v49 = vld [vmem:[%s2481_s15] ss:$0 sm:$0xff] }
 0x46e   : > { %2058 = vrot.lane.b32.xlu1 %v2057_v50, %s2131_s3 }
 0x4d0   : > { %v2049_v52 = vpop.permute.xlu1 %2048 }
 0x4d1   : > { %v2051_v54 = vunpack.i.h.bf16 %v2049_v52  ;;  %v2050_v55 = vunpack.i.l.bf16 %v2049_v52 }
 0x4d3   : > { %v1420_v59 = vsel %vm913_vm2, %v1025_v33, %v2051_v54  ;;  %v1419_v60 = vsel %vm913_vm2, %v1022_v31, %v2050_v55 }
 0x4d8   : > { %v2054_v53 = vpop.permute.xlu0 %2053 }
 0x4d9   : > { %v2056_v56 = vunpack.i.h.bf16 %v2054_v53  ;;  %v2055_v57 = vunpack.i.l.bf16 %v2054_v53 }
 0x4db   : > { %v1422_v0 = vsel %vm961_vm3, %v1420_v59, %v2056_v56  ;;  %v1421_v2 = vsel %vm961_vm3, %v1419_v60, %v2055_v57 }
 0x4e0   : > { %v2059_v58 = vpop.permute.xlu1 %2058 }
 0x4e1   : > { %v2061_v61 = vunpack.i.h.bf16 %v2059_v58  ;;  %v2060_v62 = vunpack.i.l.bf16 %v2059_v58 }
 0x4e3   : > { %v1425_v3 = vsel %vm1423_vm4, %v1422_v0, %v2061_v61  ;;  %v1424_v4 = vsel %vm1423_vm4, %v1421_v2, %v2060_v62 }
 0x4e4   : > { %v1426_v5 = vpack.c.bf16 %v1425_v3, %v1424_v4 }
 0x4e6   : > { %2008 = vmatmul.mubr.msk.bf16.vlgmr.msra.gmra.mrb[20].mxu1 %vm729_vm1, %v1426_v5 }
 0x4e7   : > { %2027 = vmatprep.mubr.msk.bf16.mxu1 %vm2125_vm0, %v2124_v1  ;;  %2020 = vmatpush3.bf16.msra.mxu1 %v2072_v28 }
 0x4e8   : > { %2021 = vmatprep.subr.bf16.mxu1 %v2124_v1 }
 0x4eb   : > { %2022 = vmatpush3.bf16.msra.mxu1 %v2073_v29 }
 0x4ec   : > { %2023 = vmatprep.subr.bf16.mxu1 %v2124_v1 }
 0x4ef   : > { %2024 = vmatpush3.bf16.msra.mxu1 %v2074_v47 }
 0x4f0   : > { %2025 = vmatprep.subr.bf16.mxu1 %v2124_v1 }
 0x4f3   : > { %2026 = vmatpush3.bf16.msra.mxu1 %v2075_v48 }
 0x5b9   : > { %v1487_v7 = vpop.f32.mrb[20].mxu1 }
 0x5ba   : > { %v1488_v8 = vadd.f32 %v1870_v6, %v1487_v7  ;;  %v2009_v9 = vpop.f32.mrb[21].mxu1 }
 0x5bb   : > { %v1490_v10 = vpop.f32.mrb[22].mxu1 }
 0x5bc   : > { %v1491_v63 = vadd.f32 %v1870_v6, %v1490_v10  ;;  %v2010_v13 = vpop.f32.mrb[23].mxu1  ;;  %v1494_v14 = vadd.f32 %v1488_v8, %v2289_v11 }
 0x5be   : > { %v1496_v15 = vsel %vm729_vm1, %v1494_v14, 0.0  ;;  %v1495_v16 = vadd.f32 %v1491_v63, %v2291_v12  ;;  %v2070_v12 = vld [vmem:[%s2480_s14] sm:$0xff]  }
 0x5bf   : > { %1497 = vadd.xlane.f32.xlu0 %v1496_v15  ;;  %2012 = vmatpush3.bf16.msra.mxu0 %v2070_v12  ;;  %v1887_v12 = vld [vmem:[%s2485_s19] ss:$0 sm:$0xff] }
 0x5c0   : > { %v1499_v17 = vsel %vm729_vm1, %v1495_v16, 0.0  ;;  %2013 = vmatprep.subr.bf16.mxu0 %v2124_v1  ;;  %v1880_v1 = vld [vmem:[%s2483_s17] ss:$0 sm:$0xff] }
 0x5c1   : > { %1500 = vadd.xlane.f32.xlu1 %v1499_v17 }
 0x5c3   : > { %2014 = vmatpush3.bf16.msra.mxu0 %v2071_v27 }
 0x64c   : > { %v1498_v18 = vpop.xlane.xlu0 %1497 }
 0x64d   : > { %v1503_v19 = vmul.f32 0.03125, %v1498_v18 }
 0x64e   : > { %v1501_v20 = vpop.xlane.xlu1 %1500 }
 0x64f   : > { %v1505_v21 = vsub.f32 %v1494_v14, %v1503_v19  ;;  %v1504_v22 = vmul.f32 0.03125, %v1501_v20 }
 0x651   : > { %v1506_v23 = vsub.f32 %v1495_v16, %v1504_v22  ;;  %v1507_v24 = vmul.f32 %v1505_v21, %v1505_v21 }
 0x653   : > { %v1509_v25 = vsel %vm729_vm1, %v1507_v24, 0.0  ;;  %v1508_v26 = vmul.f32 %v1506_v23, %v1506_v23 }
 0x654   : > { %1510 = vadd.xlane.f32.xlu0 %v1509_v25  ;;  %v1886_v25 = vld [vmem:[%s2484_s18] ss:$0 sm:$0xff] }
 0x655   : > { %v1512_v11 = vsel %vm729_vm1, %v1508_v26, 0.0 }
 0x658   : > { %1513 = vadd.xlane.f32.xlu0 %v1512_v11 }
 0x6e1   : > { %v1511_v30 = vpop.xlane.xlu0 %1510 }
 0x6e2   : > { %v1515_v31 = vmul.f32 0.03125, %v1511_v30 }
 0x6e4   : > { %v1517_v32 = vadd.f32 1e-05, %v1515_v31 }
 0x6e5   : > { %v1514_v33 = vpop.xlane.xlu0 %1513 }
 0x6e6   : > { %2108 = vrsqrt.f32 %v1517_v32  ;;  %v1516_v34 = vmul.f32 0.03125, %v1514_v33 }
 0x6e8   : > { %v1518_v35 = vadd.f32 1e-05, %v1516_v34 }
 0x6ea   : > { %2110 = vrsqrt.f32 %v1518_v35 }
 0x6f0   : > { %v2109_v36 = vpop.eup %2108 }
 0x6f1   : > { %v1521_v37 = vmul.f32 %v2109_v36, %v1505_v21 }
 0x6f3   : > { %v1530_v40 = vmul.f32 %v1874_v38, %v1521_v37 }
 0x6f4   : > { %v2111_v39 = vpop.eup %2110 }
 0x6f5   : > { %v1522_v41 = vmul.f32 %v2111_v39, %v1506_v23  ;;  %v1539_v44 = vadd.f32 %v1875_v42, %v1530_v40 }
 0x6f7   : > { %v1531_v43 = vmul.f32 %v1874_v38, %v1522_v41 }
 0x6f9   : > { %v1540_v45 = vadd.f32 %v1875_v42, %v1531_v43 }
 0x6fb   : > { %v1541_v46 = vpack.c.bf16 %v1540_v45, %v1539_v44 }
 0x6fd   : > { %2016 = vmatmul.mubr.msk.bf16.vlgmr.msra.gmra.mrb[24].mxu0 %vm729_vm1, %v1541_v46 }
 0x7d0   : > { %v1602_v50 = vpop.f32.mrb[24].mxu0 }
 0x7d1   : > { %v1603_v51 = vadd.f32 %v1876_v49, %v1602_v50  ;;  %v2017_v52 = vpop.f32.mrb[25].mxu0 }
 0x7d2   : > { %v1605_v53 = vpop.f32.mrb[26].mxu0 }
 0x7d3   : > { %v1606_v54 = vadd.f32 %v1876_v49, %v1605_v53  ;;  %v2018_v55 = vpop.f32.mrb[27].mxu0  ;;  %v1609_v56 = vmax.f32 %v1603_v51, 0.0 }
 0x7d5   : > { %v1610_v57 = vmax.f32 %v1606_v54, 0.0 }
 0x7d7   : > { %v1611_v58 = vpack.c.bf16 %v1610_v57, %v1609_v56 }
 0x7d9   : > { %2028 = vmatmul.mubr.msk.bf16.vlgmr.msra.gmra.mrb[24].mxu1 %vm1651_vm5, %v1611_v58 }
 0x8ac   : > { %v1689_v59 = vpop.f32.mrb[24].mxu1 }
 0x8ad   : > { %v1690_v60 = vadd.f32 %v1880_v1, %v1689_v59  ;;  %v2029_v61 = vpop.f32.mrb[25].mxu1 }
 0x8ae   : > { %v1692_v62 = vpop.f32.mrb[26].mxu1 }
 0x8af   : > { %v1693_v0 = vadd.f32 %v1880_v1, %v1692_v62  ;;  %v2030_v2 = vpop.f32.mrb[27].mxu1  ;;  %v1696_v3 = vadd.f32 %v1690_v60, %v1539_v44 }
 0x8b1   : > { %v1698_v4 = vsel %vm729_vm1, %v1696_v3, 0.0  ;;  %v1697_v5 = vadd.f32 %v1693_v0, %v1540_v45 }
 0x8b2   : > { %1699 = vadd.xlane.f32.xlu1 %v1698_v4 }
 0x8b3   : > { %v1701_v6 = vsel %vm729_vm1, %v1697_v5, 0.0 }
 0x8b4   : > { %1702 = vadd.xlane.f32.xlu0 %v1701_v6 }
 0x93f   : > { %v1700_v7 = vpop.xlane.xlu1 %1699 }
 0x940   : > { %v1704_v8 = vmul.f32 0.03125, %v1700_v7 }
 0x941   : > { %v1703_v9 = vpop.xlane.xlu0 %1702 }
 0x942   : > { %v1706_v10 = vsub.f32 %v1696_v3, %v1704_v8  ;;  %v1705_v63 = vmul.f32 0.03125, %v1703_v9 }
 0x944   : > { %v1707_v13 = vsub.f32 %v1697_v5, %v1705_v63  ;;  %v1708_v14 = vmul.f32 %v1706_v10, %v1706_v10 }
 0x946   : > { %v1710_v15 = vsel %vm729_vm1, %v1708_v14, 0.0  ;;  %v1709_v16 = vmul.f32 %v1707_v13, %v1707_v13 }
 0x947   : > { %1711 = vadd.xlane.f32.xlu1 %v1710_v15 }
 0x948   : > { %v1713_v17 = vsel %vm729_vm1, %v1709_v16, 0.0 }
 0x949   : > { %1714 = vadd.xlane.f32.xlu0 %v1713_v17 }
 0x9d4   : > { %v1712_v18 = vpop.xlane.xlu1 %1711 }
 0x9d5   : > { %v1716_v19 = vmul.f32 0.03125, %v1712_v18 }
 0x9d6   : > { %v1715_v20 = vpop.xlane.xlu0 %1714 }
 0x9d7   : > { %v1718_v21 = vadd.f32 1e-05, %v1716_v19  ;;  %v1717_v22 = vmul.f32 0.03125, %v1715_v20 }
 0x9d9   : > { %2112 = vrsqrt.f32 %v1718_v21  ;;  %v1719_v23 = vadd.f32 1e-05, %v1717_v22 }
 0x9db   : > { %2114 = vrsqrt.f32 %v1719_v23 }
 0x9e3   : > { %v2113_v24 = vpop.eup %2112 }
 0x9e4   : > { %v1722_v26 = vmul.f32 %v2113_v24, %v1706_v10 }
 0x9e5   : > { %v2115_v11 = vpop.eup %2114 }
 0x9e6   : > { %v1731_v27 = vmul.f32 %v1886_v25, %v1722_v26  ;;  %v1723_v28 = vmul.f32 %v2115_v11, %v1707_v13 }
 0x9e8   : > { %v1740_v29 = vadd.f32 %v1887_v12, %v1731_v27  ;;  %v1732_v30 = vmul.f32 %v1886_v25, %v1723_v28 }
 0x9ea   : > { %1742 = vst.msk [vmem:[%s689_s1] sm:$0xff] %vm729_vm1, %v1740_v29  ;;  %v1741_v31 = vadd.f32 %v1887_v12, %v1732_v30 }
 0x9ec   : > { %1743 = vst.msk [vmem:[%s689_s1 + $0x8] sm:$0xff] %vm729_vm1, %v1741_v31 }
 0x9ed PF: > { %s2505_s20 = sld [smem:[#allocation2_spill]] }
 0x9f3   : > { %s30_s1 = sadd.s32 1, %s2505_s20  }
 0x9f4   : > { %p27_p4 = scmp.ge.s32.totalorder %s30_s1, 4  }
 0x9f6   :  { %29 = sbr.rel (!%p27_p4) target bundleno = 8 (0x8), region = 139 }

// kernel: istt_nofold_forward.26
= control target key start
LH: loop header
LB: loop body
LE: loop exit
PB: predicated region body
PF: predicated region fallthrough
CT: control target
= control target key end

     0   :  { %s1316_s12 = smov 0   ;;  %s1732_s0 = inlined_call_operand.vmem [shape: f32[2,110,32], index: 0, kind: input, shape index: {}]   ;;  %s1733_s1 = inlined_call_operand.vmem [shape: bf16[288,16], index: 1, kind: input, shape index: {}]   ;;  %s1734_s2 = inlined_call_operand.vmem [shape: f32[1,16], index: 2, kind: input, shape index: {}]   ;;  %s1735_s3 = inlined_call_operand.vmem [shape: f32[2,80,16], index: 3, kind: output, shape index: {}]  }
   0x1 LB: > { %s990_s13 = sadd.s32 4294967295, %s1289_s12   ;;  %p994_p0 = scmp.ge.s32.totalorder %s1289_s12, 1  ;;  %s1289_s12 = sphi %s1316_s12, %s13_s12  }
   0x2   : > { %p137_p1 = scmp.lt.s32.totalorder %s1289_s12, 3 }
   0x4   : > { %p138_p2 = pnand %p994_p0, %p137_p1 }
   0x5   : > { %p161_p3 = scmp.lt.s32.totalorder (!%p138_p2), %s990_s13, 1  ;;  %v1265_v0 = vld [vmem:[%s1733_s1 + $0x40] sm:$0xff] (!%p138_p2)   ;;  %v1267_v2 = vld [vmem:[%s1733_s1 + $0x48] sm:$0xff] (!%p138_p2)   ;;  %v1269_v4 = vld [vmem:[%s1733_s1 + $0x50] sm:$0xff] (!%p138_p2)   ;;  %vm365_vm0 = vcmask (!%p138_p2), 1043456   ;;  %vm248_vm1 = vcmask (!%p138_p2), 1045504  }
   0x6   : > { %141 = sbr.rel (%p138_p2) target bundleno = 423 (0x1a7), region = 32  ;;  %v1266_v1 = vld [vmem:[%s1733_s1] sm:$0xff] (!%p138_p2)   ;;  %1023 = vmatprep.subr.bf16.mxu0 (!%p138_p2), %v1265_v0  ;;  %v1268_v3 = vld [vmem:[%s1733_s1 + $0x8] sm:$0xff] (!%p138_p2)   ;;  %vm196_vm2 = vcmask (!%p138_p2), 1046528   ;;  %vm450_vm3 = vcmask (!%p138_p2), 1042432   ;;  %v1270_v24 = vld [vmem:[%s1733_s1 + $0x10] sm:$0xff] (!%p138_p2)  }
   0x7   : > { %1024 = vmatpush3.bf16.msra.mxu0 (!%p138_p2), %v1266_v1  ;;  %v1271_v29 = vld [vmem:[%s1733_s1 + $0x58] sm:$0xff] (!%p138_p2)   ;;  %s1291_s7 = smov (!%p138_p2), 64   ;;  %s1292_s8 = smov (!%p138_p2), 32   ;;  %v1273_v42 = vld [vmem:[%s1733_s1 + $0x60] sm:$0xff] (!%p138_p2)   ;;  %v1275_v55 = vld [vmem:[%s1733_s1 + $0x68] sm:$0xff] (!%p138_p2)   ;;  %vm502_vm4 = vcmask (!%p138_p2), 1041408  }
   0x8   : > { %1025 = vmatprep.subr.bf16.mxu0 (!%p138_p2), %v1267_v2  ;;  %v1272_v34 = vld [vmem:[%s1733_s1 + $0x18] sm:$0xff] (!%p138_p2)   ;;  %v1274_v47 = vld [vmem:[%s1733_s1 + $0x20] sm:$0xff] (!%p138_p2)   ;;  %v1276_v56 = vld [vmem:[%s1733_s1 + $0x28] sm:$0xff] (!%p138_p2)   ;;  %s1293_s19 = smov (!%p138_p2), 96   ;;  %vm1295_vm5 = vmmov (!%p138_p2), 0   ;;  %vm534_vm6 = vcmask (!%p138_p2), 261120  }
   0x9   : > { %v1277_v0 = vld [vmem:[%s1733_s1 + $0x70] sm:$0xff] (!%p138_p2)   ;;  %vm333_vm7 = vcmask (!%p138_p2), 1044480   ;;  %vm545_vm8 = vcmask (!%p138_p2), 523264   ;;  %vm556_vm9 = vcmask (!%p138_p2), 785408   ;;  %vm924_vm10 = vcmask (!%p138_p2), 130048  }
   0xa   : > { %v1278_v2 = vld [vmem:[%s1733_s1 + $0x30] sm:$0xff] (!%p138_p2)  }
   0xb   : > { %1026 = vmatpush3.bf16.msra.mxu0 (!%p138_p2), %v1268_v3 }
   0xc   : > { %1027 = vmatprep.subr.bf16.mxu0 (!%p138_p2), %v1269_v4 }
   0xd   : > { %s1737_s13 = smov (!%p161_p3, %s990_s13), 1 }
   0xe   : > { %s1100_s18 = smul.u32 112, %s1737_s13 }
   0xf   : > { %1028 = vmatpush3.bf16.msra.mxu0 %v1270_v24 }
  0x10   : > { %s1342_s25 = scalar_lea.vmem %s1732_s0, %s1100_s18  ;;  %1029 = vmatprep.subr.bf16.mxu0 %v1271_v29 }
  0x11   : > { %v1348_v5 = vld [vmem:[%s1342_s25 + $0x18] sm:$0xff]  ;;  %v1351_v6 = vld [vmem:[%s1342_s25 + $0x20] sm:$0xff]  ;;  %v1354_v7 = vld [vmem:[%s1342_s25 + $0x28] sm:$0xff] }
  0x12   : > { %v369_v8 = vrot.slane %v1348_v5, 4  ;;  %v371_v9 = vrot.slane %v1351_v6, 4  ;;  %v1359_v10 = vld [vmem:[%s1342_s25 + $0x10] sm:$0xff]  ;;  %v1362_v11 = vld [vmem:[%s1342_s25 + $0x8] sm:$0xff]  ;;  %v1365_v12 = vld [vmem:[%s1342_s25] sm:$0xff]  ;;  %v373_v20 = vrot.slane %v1354_v7, 4 }
  0x13   : > { %v367_v13 = vrot.slane %v1359_v10, 4  ;;  %v366_v14 = vrot.slane %v1362_v11, 4  ;;  %v249_v15 = vrot.slane %v1365_v12, 2  ;;  %v250_v16 = vrot.slane %v1362_v11, 2  ;;  %v1410_v46 = vld [vmem:[%s1342_s25 + $0x30] sm:$0xff]  ;;  %1030 = vmatpush3.bf16.msra.mxu0 %v1272_v34  ;;  %v1440_v1 = vld [vmem:[%s1342_s25 + $0x38] sm:$0xff] }
  0x14   : > { %v1372_v17 = vsel %vm365_vm0, %v369_v8, %v371_v9  ;;  %v252_v18 = vrot.slane %v1359_v10, 2  ;;  %v197_v19 = vrot.slane %v1365_v12, 1  ;;  %v198_v28 = vrot.slane %v1362_v11, 1  ;;  %1031 = vmatprep.subr.bf16.mxu0 %v1273_v42  ;;  %v1479_v34 = vld [vmem:[%s1342_s25 + $0x48] sm:$0xff] }
  0x15   : > { %v370_v21 = vsel %vm365_vm0, %v367_v13, %v369_v8  ;;  %v368_v22 = vsel %vm365_vm0, %v366_v14, %v367_v13  ;;  %v251_v23 = vsel %vm248_vm1, %v249_v15, %v250_v16  ;;  %v200_v31 = vrot.slane %v1359_v10, 1 }
  0x16   : > { %v1125_v25 = vpack.i.bf16 %v1372_v17, %v370_v21  ;;  %v1115_v26 = vpack.i.bf16 %v370_v21, %v368_v22  ;;  %v253_v27 = vsel %vm248_vm1, %v250_v16, %v252_v18  ;;  %v254_v32 = vrot.slane %v1348_v5, 2 }
  0x17   : > { %v1130_v30 = vpack.i.bf16 %v253_v27, %v251_v23  ;;  %v451_v33 = vrot.slane %v1359_v10, 5  ;;  %v199_v35 = vsel %vm196_vm2, %v197_v19, %v198_v28  ;;  %v452_v36 = vrot.slane %v1348_v5, 5  ;;  %1032 = vmatpush3.bf16.msra.mxu0 %v1274_v47  ;;  %v1280_v19 = vld [vmem:[%s1733_s1 + $0x38] sm:$0xff]  }
  0x18   : > { %1126 = vrot.lane.b32.xlu1 %v1125_v25, %s1291_s7  ;;  %1116 = vrot.lane.b32.xlu0 %v1115_v26, %s1292_s8  ;;  %v454_v37 = vrot.slane %v1351_v6, 5  ;;  %v202_v38 = vrot.slane %v1348_v5, 1  ;;  %v201_v39 = vsel %vm196_vm2, %v198_v28, %v200_v31  ;;  %v255_v40 = vsel %vm248_vm1, %v252_v18, %v254_v32  ;;  %v1457_v18 = vld [vmem:[%s1342_s25 + $0x40] sm:$0xff] }
  0x19   : > { %v204_v41 = vrot.slane %v1351_v6, 1  ;;  %v1120_v43 = vpack.i.bf16 %v201_v39, %v199_v35  ;;  %v453_v44 = vsel %vm450_vm3, %v451_v33, %v452_v36  ;;  %v374_v48 = vsel %vm365_vm0, %v371_v9, %v373_v20  ;;  %1033 = vmatprep.subr.bf16.mxu0 %v1275_v55  ;;  %v1281_v35 = vld [vmem:[%s1733_s1 + $0x80] sm:$0xff]  }
  0x1a   : > { %v455_v45 = vsel %vm450_vm3, %v452_v36, %v454_v37  ;;  %v1140_v49 = vpack.i.bf16 %v255_v40, %v253_v27  ;;  %v203_v51 = vsel %vm196_vm2, %v200_v31, %v202_v38  ;;  %v256_v53 = vrot.slane %v1351_v6, 2 }
  0x1b   : > { %v1135_v50 = vpack.i.bf16 %v455_v45, %v453_v44  ;;  %v205_v52 = vsel %vm196_vm2, %v202_v38, %v204_v41  ;;  %v375_v54 = vrot.slane %v1410_v46, 4  ;;  %v1145_v57 = vpack.i.bf16 %v374_v48, %v1372_v17  ;;  %1034 = vmatpush3.bf16.msra.mxu0 %v1276_v56  ;;  %v1279_v17 = vld [vmem:[%s1733_s1 + $0x78] sm:$0xff]   ;;  %v1498_v44 = vld [vmem:[%s1342_s25 + $0x50] sm:$0xff] }
  0x1c   : > { %1131 = vrot.lane.b32.xlu1 %v1130_v30, %s1291_s7  ;;  %1121 = vrot.lane.b32.xlu0 %v1120_v43, %s1292_s8  ;;  %v1150_v58 = vpack.i.bf16 %v205_v52, %v203_v51  ;;  %v258_v59 = vrot.slane %v1354_v7, 2  ;;  %v456_v60 = vrot.slane %v1354_v7, 5  ;;  %v257_v61 = vsel %vm248_vm1, %v254_v32, %v256_v53 }
  0x1d   : > { %v376_v62 = vsel %vm365_vm0, %v373_v20, %v375_v54  ;;  %v458_v63 = vrot.slane %v1410_v46, 5  ;;  %v1160_v3 = vpack.i.bf16 %v257_v61, %v255_v40  ;;  %v206_v8 = vrot.slane %v1354_v7, 1  ;;  %1035 = vmatprep.subr.bf16.mxu0 %v1277_v0 }
  0x1e   : > { %v1155_v4 = vpack.i.bf16 %v376_v62, %v374_v48  ;;  %v208_v9 = vrot.slane %v1410_v46, 1  ;;  %v259_v13 = vsel %vm248_vm1, %v256_v53, %v258_v59  ;;  %v457_v14 = vsel %vm450_vm3, %v454_v37, %v456_v60  ;;  %v1282_v48 = vld [vmem:[%s1733_s1 + $0x88] sm:$0xff]  }
  0x1f   : > { %v459_v15 = vsel %vm450_vm3, %v456_v60, %v458_v63  ;;  %v377_v16 = vrot.slane %v1440_v1, 4  ;;  %1036 = vmatpush3.bf16.msra.mxu0 %v1278_v2  ;;  %v1170_v20 = vpack.i.bf16 %v259_v13, %v257_v61  ;;  %v260_v22 = vrot.slane %v1410_v46, 2 }
  0x20   : > { %1141 = vrot.lane.b32.xlu1 %v1140_v49, %s1293_s19  ;;  %1136 = vrot.lane.b32.xlu0 %v1135_v50, %s1293_s19  ;;  %v1165_v21 = vpack.i.bf16 %v459_v15, %v457_v14  ;;  %v207_v23 = vsel %vm196_vm2, %v204_v41, %v206_v8  ;;  %v209_v24 = vsel %vm196_vm2, %v206_v8, %v208_v9  ;;  %v379_v26 = vrot.slane %v1457_v18, 4 }
  0x21   : > { %v378_v25 = vsel %vm365_vm0, %v375_v54, %v377_v16  ;;  %1037 = vmatprep.subr.bf16.mxu0 %v1279_v17  ;;  %v262_v27 = vrot.slane %v1440_v1, 2  ;;  %v1180_v28 = vpack.i.bf16 %v209_v24, %v207_v23  ;;  %v261_v30 = vsel %vm248_vm1, %v258_v59, %v260_v22 }
  0x22   : > { %v1175_v29 = vpack.i.bf16 %v378_v25, %v376_v62  ;;  %v1474_v31 = vsel %vm365_vm0, %v377_v16, %v379_v26  ;;  %v460_v32 = vrot.slane %v1440_v1, 5  ;;  %v462_v33 = vrot.slane %v1457_v18, 5 }
  0x23   : > { %1038 = vmatpush3.bf16.msra.mxu0 %v1280_v19  ;;  %v1485_v36 = vsel %vm248_vm1, %v260_v22, %v262_v27  ;;  %v210_v37 = vrot.slane %v1440_v1, 1  ;;  %v1190_v38 = vpack.i.bf16 %v261_v30, %v259_v13  ;;  %v1185_v39 = vpack.i.bf16 %v1474_v31, %v378_v25  ;;  %v1533_v13 = vld [vmem:[%s1342_s25 + $0x58] sm:$0xff] }
  0x24   : > { %1151 = vrot.lane.b32.xlu1 %v1150_v58, %s1292_s8  ;;  %1146 = vrot.lane.b32.xlu0 %v1145_v57, %s1292_s8  ;;  %v212_v40 = vrot.slane %v1457_v18, 1  ;;  %v461_v41 = vsel %vm450_vm3, %v458_v63, %v460_v32  ;;  %v463_v42 = vsel %vm450_vm3, %v460_v32, %v462_v33  ;;  %v381_v43 = vrot.slane %v1479_v34, 4 }
  0x25   : > { %v1294_v45 = vmov 0.0   ;;  %v1200_v47 = vpack.i.bf16 %v1485_v36, %v261_v30  ;;  %v211_v49 = vsel %vm196_vm2, %v208_v9, %v210_v37  ;;  %v503_v50 = vrot.slane %v1359_v10, 6 }
  0x26   : > { %1076 = vmatprep.subr.bf16.mxu1 %v1294_v45  ;;  %1080 = vmatprep.mubr.msk.bf16.mxu1 %vm1295_vm5, %v1294_v45  ;;  %v504_v51 = vrot.slane %v1348_v5, 6  ;;  %v506_v52 = vrot.slane %v1351_v6, 6  ;;  %v1195_v53 = vpack.i.bf16 %v463_v42, %v461_v41  ;;  %v213_v54 = vsel %vm196_vm2, %v210_v37, %v212_v40 }
  0x27   : > { %1077 = vmatpush3.bf16.msra.mxu1 %v1281_v35  ;;  %v264_v55 = vrot.slane %v1457_v18, 2  ;;  %v383_v56 = vrot.slane %v1498_v44, 4  ;;  %v382_v57 = vsel %vm365_vm0, %v379_v26, %v381_v43  ;;  %v508_v61 = vrot.slane %v1354_v7, 6 }
  0x28   : > { %1161 = vrot.lane.b32.xlu1 %v1160_v3, %s1291_s7  ;;  %1156 = vrot.lane.b32.xlu0 %v1155_v4, %s1291_s7  ;;  %v505_v58 = vsel %vm502_vm4, %v503_v50, %v504_v51  ;;  %v507_v59 = vsel %vm502_vm4, %v504_v51, %v506_v52  ;;  %v510_v62 = vrot.slane %v1410_v46, 6  ;;  %v1210_v63 = vpack.i.bf16 %v213_v54, %v211_v49 }
  0x29   : > { %1078 = vmatprep.subr.bf16.mxu1 %v1294_v45  ;;  %v599_v60 = vpack.c.bf16 %v507_v59, %v505_v58  ;;  %v1205_v0 = vpack.i.bf16 %v382_v57, %v1474_v31  ;;  %v265_v2 = vsel %vm248_vm1, %v262_v27, %v264_v55  ;;  %v384_v3 = vsel %vm365_vm0, %v381_v43, %v383_v56 }
  0x2a   : > { %v266_v4 = vrot.slane %v1479_v34, 2  ;;  %v464_v8 = vrot.slane %v1479_v34, 5  ;;  %v466_v9 = vrot.slane %v1498_v44, 5  ;;  %v509_v14 = vsel %vm502_vm4, %v506_v52, %v508_v61 }
  0x2b   : > { %1079 = vmatpush3.bf16.msra.mxu1 %v1282_v48  ;;  %v511_v15 = vsel %vm502_vm4, %v508_v61, %v510_v62  ;;  %v351_v16 = vrot.slane %v1498_v44, 3  ;;  %v353_v17 = vrot.slane %v1533_v13, 3  ;;  %v1220_v19 = vpack.i.bf16 %v265_v2, %v1485_v36 }
  0x2c   : > { %1171 = vrot.lane.b32.xlu1 %v1170_v20, %s1293_s19  ;;  %1166 = vrot.lane.b32.xlu0 %v1165_v21, %s1293_s19  ;;  %v1215_v20 = vpack.i.bf16 %v384_v3, %v382_v57  ;;  %v267_v21 = vsel %vm248_vm1, %v264_v55, %v266_v4  ;;  %v214_v22 = vrot.slane %v1479_v34, 1  ;;  %v216_v23 = vrot.slane %v1498_v44, 1 }
  0x2d   : > { %v1551_v24 = vsel %vm333_vm7, %v351_v16, %v353_v17  ;;  %v465_v25 = vsel %vm450_vm3, %v462_v33, %v464_v8  ;;  %v467_v26 = vsel %vm450_vm3, %v464_v8, %v466_v9  ;;  %v385_v27 = vrot.slane %v1533_v13, 4 }
  0x2e   : > { %1081 = vmatmul.mubr.msk.bf16.vlgmr.msra.gmra.mrb[0].mxu1 %vm534_vm6, %v599_v60  ;;  %v512_v30 = vrot.slane %v1440_v1, 6  ;;  %v514_v31 = vrot.slane %v1457_v18, 6  ;;  %v1230_v32 = vpack.i.bf16 %v267_v21, %v265_v2  ;;  %v1225_v35 = vpack.i.bf16 %v467_v26, %v465_v25 }
  0x2f   : > { %1084 = vmatprep.mubr.msk.bf16.mxu1 %vm1295_vm5, %v1294_v45  ;;  %v268_v36 = vrot.slane %v1498_v44, 2  ;;  %v215_v33 = vsel %vm196_vm2, %v212_v40, %v214_v22  ;;  %v217_v37 = vsel %vm196_vm2, %v214_v22, %v216_v23  ;;  %v468_v48 = vrot.slane %v1533_v13, 5 }
  0x30   : > { %1181 = vrot.lane.b32.xlu1 %v1180_v28, %s1292_s8  ;;  %1176 = vrot.lane.b32.xlu0 %v1175_v29, %s1292_s8  ;;  %v602_v28 = vpack.c.bf16 %v511_v15, %v509_v14  ;;  %v184_v29 = vld [vmem:[%s1342_s25 + $0x60] sm:$0xff]  ;;  %v513_v41 = vsel %vm502_vm4, %v510_v62, %v512_v30  ;;  %v515_v42 = vsel %vm502_vm4, %v512_v30, %v514_v31  ;;  %v518_v54 = vrot.slane %v1498_v44, 6  ;;  %s1101_s25 = smul.u32 80, %s1737_s13 }
  0x31   : > { %v1240_v43 = vpack.i.bf16 %v217_v37, %v215_v33  ;;  %v269_v49 = vsel %vm248_vm1, %v266_v4, %v268_v36  ;;  %v470_v51 = vrot.slane %v184_v29, 5  ;;  %v605_v52 = vpack.c.bf16 %v515_v42, %v513_v41 }
  0x32   : > { %v1250_v55 = vpack.i.bf16 %v269_v49, %v267_v21  ;;  %v469_v58 = vsel %vm450_vm3, %v466_v9, %v468_v48  ;;  %v520_v2 = vrot.slane %v1533_v13, 6  ;;  %v334_v17 = vrot.slane %v1362_v11, 3  ;;  %s1705_s10 = scalar_lea.vmem %s1735_s3, %s1101_s25 }
  0x33   : > { %v471_v59 = vsel %vm450_vm3, %v468_v48, %v470_v51 }
  0x34   : > { %1191 = vrot.lane.b32.xlu1 %v1190_v38, %s1291_s7  ;;  %1186 = vrot.lane.b32.xlu0 %v1185_v39, %s1291_s7  ;;  %v386_v38 = vsel %vm365_vm0, %v383_v56, %v385_v27  ;;  %v418_v39 = vrot.slane %v184_v29, 4  ;;  %v521_v4 = vsel %vm502_vm4, %v518_v54, %v520_v2 }
  0x35   : > { %v1235_v40 = vpack.i.bf16 %v386_v38, %v384_v3  ;;  %v522_v3 = vrot.slane %v184_v29, 6 }
  0x36   : > { %1085 = vmatmul.mubr.msk.bf16.gmra.mrb[4].mxu1 %vm534_vm6, %v602_v28  ;;  %v419_v50 = vsel %vm365_vm0, %v385_v27, %v418_v39 }
  0x37   : > { %1088 = vmatprep.mubr.msk.bf16.mxu1 %vm1295_vm5, %v1294_v45  ;;  %v1245_v56 = vpack.i.bf16 %v419_v50, %v386_v38  ;;  %v523_v8 = vsel %vm502_vm4, %v520_v2, %v522_v3 }
  0x38   : > { %1201 = vrot.lane.b32.xlu1 %v1200_v47, %s1293_s19  ;;  %1196 = vrot.lane.b32.xlu0 %v1195_v53, %s1293_s19  ;;  %v301_v47 = vrot.slane %v1533_v13, 2  ;;  %v516_v53 = vrot.slane %v1479_v34, 6  ;;  %v611_v9 = vpack.c.bf16 %v523_v8, %v521_v4  ;;  %v337_v13 = vrot.slane %v1348_v5, 3 }
  0x3a   : > { %v302_v57 = vsel %vm248_vm1, %v268_v36, %v301_v47  ;;  %v517_v60 = vsel %vm502_vm4, %v514_v31, %v516_v53  ;;  %v519_v61 = vsel %vm502_vm4, %v516_v53, %v518_v54 }
  0x3b   : > { %v1260_v62 = vpack.i.bf16 %v302_v57, %v269_v49  ;;  %v341_v57 = vrot.slane %v1354_v7, 3 }
  0x3c   : > { %1211 = vrot.lane.b32.xlu1 %v1210_v63, %s1292_s8  ;;  %1206 = vrot.lane.b32.xlu0 %v1205_v0, %s1292_s8  ;;  %v1255_v63 = vpack.i.bf16 %v471_v59, %v469_v58  ;;  %v608_v0 = vpack.c.bf16 %v519_v61, %v517_v60 }
  0x3e   : > { %1089 = vmatmul.mubr.msk.bf16.gmra.mrb[8].mxu1 %vm534_vm6, %v605_v52 }
  0x3f   : > { %1092 = vmatprep.mubr.msk.bf16.mxu1 %vm1295_vm5, %v1294_v45 }
  0x40   : > { %1221 = vrot.lane.b32.xlu1 %v1220_v19, %s1291_s7  ;;  %1216 = vrot.lane.b32.xlu0 %v1215_v20, %s1291_s7  ;;  %v335_v19 = vrot.slane %v1359_v10, 3 }
  0x42   : > { %v338_v25 = vsel %vm333_vm7, %v335_v19, %v337_v13 }
  0x44   : > { %1231 = vrot.lane.b32.xlu1 %v1230_v32, %s1293_s19  ;;  %1226 = vrot.lane.b32.xlu0 %v1225_v35, %s1293_s19 }
  0x46   : > { %1093 = vmatmul.mubr.msk.bf16.gmra.mrb[12].mxu1 %vm534_vm6, %v608_v0 }
  0x47   : > { %1096 = vmatprep.mubr.msk.bf16.mxu1 %vm1295_vm5, %v1294_v45  ;;  %v336_v45 = vsel %vm333_vm7, %v334_v17, %v335_v19 }
  0x48   : > { %1241 = vrot.lane.b32.xlu1 %v1240_v43, %s1292_s8  ;;  %1236 = vrot.lane.b32.xlu0 %v1235_v40, %s1292_s8 }
  0x4c   : > { %1251 = vrot.lane.b32.xlu1 %v1250_v55, %s1291_s7  ;;  %1246 = vrot.lane.b32.xlu0 %v1245_v56, %s1291_s7  ;;  %v339_v56 = vrot.slane %v1351_v6, 3 }
  0x4e   : > { %1097 = vmatmul.mubr.msk.bf16.gmra.mrb[16].mxu1 %vm534_vm6, %v611_v9  ;;  %v340_v0 = vsel %vm333_vm7, %v337_v13, %v339_v56  ;;  %v342_v2 = vsel %vm333_vm7, %v339_v56, %v341_v57 }
  0x50   : > { %1261 = vrot.lane.b32.xlu1 %v1260_v62, %s1293_s19  ;;  %1256 = vrot.lane.b32.xlu0 %v1255_v63, %s1293_s19 }
  0x8a   : > { %v1127_v14 = vpop.permute.xlu1 %1126  ;;  %v1117_v15 = vpop.permute.xlu0 %1116 }
  0x8b   : > { %v1119_v20 = vunpack.i.h.bf16 %v1117_v15  ;;  %v1118_v21 = vunpack.i.l.bf16 %v1117_v15  ;;  %v1129_v28 = vunpack.i.h.bf16 %v1127_v14  ;;  %v1128_v29 = vunpack.i.l.bf16 %v1127_v14 }
  0x8d   : > { %v567_v36 = vsel %vm534_vm6, %v336_v45, %v1118_v21  ;;  %v568_v33 = vsel %vm534_vm6, %v338_v25, %v1119_v20 }
  0x8e   : > { %v1132_v22 = vpop.permute.xlu1 %1131  ;;  %v1122_v23 = vpop.permute.xlu0 %1121  ;;  %v577_v40 = vsel %vm545_vm8, %v567_v36, %v1128_v29  ;;  %v578_v47 = vsel %vm545_vm8, %v568_v33, %v1129_v28  ;;  %v343_v33 = vrot.slane %v1410_v46, 3 }
  0x8f   : > { %v1124_v26 = vunpack.i.h.bf16 %v1122_v23  ;;  %v1123_v27 = vunpack.i.l.bf16 %v1122_v23  ;;  %v1134_v30 = vunpack.i.h.bf16 %v1132_v22  ;;  %v1133_v31 = vunpack.i.l.bf16 %v1132_v22 }
  0x91   : > { %v536_v32 = vsel %vm534_vm6, %v1362_v11, %v1124_v26  ;;  %v535_v35 = vsel %vm534_vm6, %v1365_v12, %v1123_v27 }
  0x92   : > { %v1142_v37 = vpop.permute.xlu1 %1141  ;;  %v1137_v38 = vpop.permute.xlu0 %1136  ;;  %v546_v11 = vsel %vm545_vm8, %v535_v35, %v1133_v31  ;;  %v547_v48 = vsel %vm545_vm8, %v536_v32, %v1134_v30 }
  0x93   : > { %v1144_v39 = vunpack.i.h.bf16 %v1142_v37  ;;  %v1143_v41 = vunpack.i.l.bf16 %v1142_v37  ;;  %v1139_v42 = vunpack.i.h.bf16 %v1137_v38  ;;  %v1138_v43 = vunpack.i.l.bf16 %v1137_v38 }
  0x94   : > { %v345_v37 = vrot.slane %v1440_v1, 3 }
  0x95   : > { %v587_v12 = vsel %vm556_vm9, %v577_v40, %v1138_v43  ;;  %v588_v49 = vsel %vm556_vm9, %v578_v47, %v1139_v42  ;;  %v557_v50 = vsel %vm556_vm9, %v546_v11, %v1143_v41  ;;  %v558_v51 = vsel %vm556_vm9, %v547_v48, %v1144_v39 }
  0x96   : > { %v1152_v52 = vpop.permute.xlu1 %1151  ;;  %v1147_v53 = vpop.permute.xlu0 %1146  ;;  %v598_v54 = vpack.c.bf16 %v588_v49, %v587_v12  ;;  %v597_v55 = vpack.c.bf16 %v558_v51, %v557_v50  ;;  %v344_v47 = vsel %vm333_vm7, %v341_v57, %v343_v33  ;;  %v346_v11 = vsel %vm333_vm7, %v343_v33, %v345_v37 }
  0x97   : > { %v1154_v58 = vunpack.i.h.bf16 %v1152_v52  ;;  %v1153_v59 = vunpack.i.l.bf16 %v1152_v52  ;;  %v1149_v60 = vunpack.i.h.bf16 %v1147_v53  ;;  %v1148_v61 = vunpack.i.l.bf16 %v1147_v53 }
  0x98   : > { %810 = vmatprep.mubr.bf16.mxu0 %v598_v54 }
  0x99   : > { %811 = vmatmul.mubr.bf16.vlgmr.msra.gmra.mrb[0].mxu0 %v597_v55  ;;  %v538_v14 = vsel %vm534_vm6, %v1348_v5, %v1154_v58  ;;  %v537_v15 = vsel %vm534_vm6, %v1359_v10, %v1153_v59  ;;  %v570_v17 = vsel %vm534_vm6, %v342_v2, %v1149_v60  ;;  %v569_v19 = vsel %vm534_vm6, %v340_v0, %v1148_v61 }
  0x9a   : > { %v1162_v62 = vpop.permute.xlu1 %1161  ;;  %v1157_v63 = vpop.permute.xlu0 %1156 }
  0x9b   : > { %v1164_v3 = vunpack.i.h.bf16 %v1162_v62  ;;  %v1163_v4 = vunpack.i.l.bf16 %v1162_v62  ;;  %v1159_v8 = vunpack.i.h.bf16 %v1157_v63  ;;  %v1158_v9 = vunpack.i.l.bf16 %v1157_v63 }
  0x9d   : > { %v548_v25 = vsel %vm545_vm8, %v537_v15, %v1163_v4  ;;  %v549_v26 = vsel %vm545_vm8, %v538_v14, %v1164_v3  ;;  %v579_v27 = vsel %vm545_vm8, %v569_v19, %v1158_v9  ;;  %v580_v5 = vsel %vm545_vm8, %v570_v17, %v1159_v8 }
  0x9e   : > { %v1172_v20 = vpop.permute.xlu1 %1171  ;;  %v1167_v21 = vpop.permute.xlu0 %1166  ;;  %v347_v15 = vrot.slane %v1457_v18, 3  ;;  %v349_v17 = vrot.slane %v1479_v34, 3 }
  0x9f   : > { %v1174_v22 = vunpack.i.h.bf16 %v1172_v20  ;;  %v1173_v13 = vunpack.i.l.bf16 %v1172_v20  ;;  %v1169_v23 = vunpack.i.h.bf16 %v1167_v21  ;;  %v1168_v45 = vunpack.i.l.bf16 %v1167_v21 }
  0xa1   : > { %v589_v10 = vsel %vm556_vm9, %v579_v27, %v1168_v45  ;;  %v590_v28 = vsel %vm556_vm9, %v580_v5, %v1169_v23  ;;  %v559_v29 = vsel %vm556_vm9, %v548_v25, %v1173_v13  ;;  %v560_v30 = vsel %vm556_vm9, %v549_v26, %v1174_v22 }
  0xa2   : > { %v1182_v31 = vpop.permute.xlu1 %1181  ;;  %v1177_v32 = vpop.permute.xlu0 %1176  ;;  %v601_v35 = vpack.c.bf16 %v590_v28, %v589_v10  ;;  %v600_v36 = vpack.c.bf16 %v560_v30, %v559_v29  ;;  %v348_v45 = vsel %vm333_vm7, %v345_v37, %v347_v15  ;;  %v350_v25 = vsel %vm333_vm7, %v347_v15, %v349_v17 }
  0xa3   : > { %v1184_v38 = vunpack.i.h.bf16 %v1182_v31  ;;  %v1183_v39 = vunpack.i.l.bf16 %v1182_v31  ;;  %v1179_v41 = vunpack.i.h.bf16 %v1177_v32  ;;  %v1178_v42 = vunpack.i.l.bf16 %v1177_v32 }
  0xa4   : > { %818 = vmatprep.mubr.bf16.mxu0 %v601_v35 }
  0xa5   : > { %819 = vmatmul.mubr.bf16.gmra.mrb[4].mxu0 %v600_v36  ;;  %v540_v51 = vsel %vm534_vm6, %v1354_v7, %v1184_v38  ;;  %v539_v52 = vsel %vm534_vm6, %v1351_v6, %v1183_v39  ;;  %v572_v53 = vsel %vm534_vm6, %v346_v11, %v1179_v41  ;;  %v571_v54 = vsel %vm534_vm6, %v344_v47, %v1178_v42 }
  0xa6   : > { %v1192_v43 = vpop.permute.xlu1 %1191  ;;  %v1187_v40 = vpop.permute.xlu0 %1186 }
  0xa7   : > { %v1194_v48 = vunpack.i.h.bf16 %v1192_v43  ;;  %v1193_v12 = vunpack.i.l.bf16 %v1192_v43  ;;  %v1189_v49 = vunpack.i.h.bf16 %v1187_v40  ;;  %v1188_v50 = vunpack.i.l.bf16 %v1187_v40 }
  0xa9   : > { %v550_v61 = vsel %vm545_vm8, %v539_v52, %v1193_v12  ;;  %v551_v62 = vsel %vm545_vm8, %v540_v51, %v1194_v48  ;;  %v581_v63 = vsel %vm545_vm8, %v571_v54, %v1188_v50  ;;  %v582_v7 = vsel %vm545_vm8, %v572_v53, %v1189_v49 }
  0xaa   : > { %v1202_v55 = vpop.permute.xlu1 %1201  ;;  %v1197_v56 = vpop.permute.xlu0 %1196 }
  0xab   : > { %v1204_v58 = vunpack.i.h.bf16 %v1202_v55  ;;  %v1203_v57 = vunpack.i.l.bf16 %v1202_v55  ;;  %v1199_v59 = vunpack.i.h.bf16 %v1197_v56  ;;  %v1198_v60 = vunpack.i.l.bf16 %v1197_v56 }
  0xac   : > { %v352_v56 = vsel %vm333_vm7, %v349_v17, %v351_v16 }
  0xad   : > { %v591_v6 = vsel %vm556_vm9, %v581_v63, %v1198_v60  ;;  %v592_v0 = vsel %vm556_vm9, %v582_v7, %v1199_v59  ;;  %v561_v2 = vsel %vm556_vm9, %v550_v61, %v1203_v57  ;;  %v562_v3 = vsel %vm556_vm9, %v551_v62, %v1204_v58 }
  0xae   : > { %v1212_v4 = vpop.permute.xlu1 %1211  ;;  %v1207_v8 = vpop.permute.xlu0 %1206  ;;  %v604_v9 = vpack.c.bf16 %v592_v0, %v591_v6  ;;  %v603_v14 = vpack.c.bf16 %v562_v3, %v561_v2 }
  0xaf   : > { %v1214_v19 = vunpack.i.h.bf16 %v1212_v4  ;;  %v1213_v20 = vunpack.i.l.bf16 %v1212_v4  ;;  %v1209_v21 = vunpack.i.h.bf16 %v1207_v8  ;;  %v1208_v22 = vunpack.i.l.bf16 %v1207_v8 }
  0xb0   : > { %826 = vmatprep.mubr.bf16.mxu0 %v604_v9 }
  0xb1   : > { %827 = vmatmul.mubr.bf16.gmra.mrb[8].mxu0 %v603_v14  ;;  %v542_v28 = vsel %vm534_vm6, %v1440_v1, %v1214_v19  ;;  %v541_v29 = vsel %vm534_vm6, %v1410_v46, %v1213_v20  ;;  %v574_v30 = vsel %vm534_vm6, %v350_v25, %v1209_v21  ;;  %v573_v31 = vsel %vm534_vm6, %v348_v45, %v1208_v22 }
  0xb2   : > { %v1222_v13 = vpop.permute.xlu1 %1221  ;;  %v1217_v23 = vpop.permute.xlu0 %1216 }
  0xb3   : > { %v1224_v26 = vunpack.i.h.bf16 %v1222_v13  ;;  %v1223_v27 = vunpack.i.l.bf16 %v1222_v13  ;;  %v1219_v5 = vunpack.i.h.bf16 %v1217_v23  ;;  %v1218_v10 = vunpack.i.l.bf16 %v1217_v23 }
  0xb5   : > { %v552_v39 = vsel %vm545_vm8, %v541_v29, %v1223_v27  ;;  %v553_v41 = vsel %vm545_vm8, %v542_v28, %v1224_v26  ;;  %v583_v42 = vsel %vm545_vm8, %v573_v31, %v1218_v10  ;;  %v584_v1 = vsel %vm545_vm8, %v574_v30, %v1219_v5 }
  0xb6   : > { %v1232_v32 = vpop.permute.xlu1 %1231  ;;  %v1227_v35 = vpop.permute.xlu0 %1226 }
  0xb7   : > { %v1234_v36 = vunpack.i.h.bf16 %v1232_v32  ;;  %v1233_v33 = vunpack.i.l.bf16 %v1232_v32  ;;  %v1229_v37 = vunpack.i.h.bf16 %v1227_v35  ;;  %v1228_v38 = vunpack.i.l.bf16 %v1227_v35 }
  0xb9   : > { %v593_v46 = vsel %vm556_vm9, %v583_v42, %v1228_v38  ;;  %v594_v43 = vsel %vm556_vm9, %v584_v1, %v1229_v37  ;;  %v563_v40 = vsel %vm556_vm9, %v552_v39, %v1233_v33  ;;  %v564_v47 = vsel %vm556_vm9, %v553_v41, %v1234_v36  ;;  %v997_v41 = vld [vmem:[%s1734_s2] ss:$0 sm:$0xff] }
  0xba   : > { %v1242_v11 = vpop.permute.xlu1 %1241  ;;  %v1237_v48 = vpop.permute.xlu0 %1236  ;;  %v607_v12 = vpack.c.bf16 %v594_v43, %v593_v46  ;;  %v606_v49 = vpack.c.bf16 %v564_v47, %v563_v40 }
  0xbb   : > { %v1244_v50 = vunpack.i.h.bf16 %v1242_v11  ;;  %v1243_v51 = vunpack.i.l.bf16 %v1242_v11  ;;  %v1239_v52 = vunpack.i.h.bf16 %v1237_v48  ;;  %v1238_v53 = vunpack.i.l.bf16 %v1237_v48 }
  0xbc   : > { %834 = vmatprep.mubr.bf16.mxu0 %v607_v12 }
  0xbd   : > { %835 = vmatmul.mubr.bf16.gmra.mrb[12].mxu0 %v606_v49  ;;  %v544_v61 = vsel %vm534_vm6, %v1479_v34, %v1244_v50  ;;  %v543_v62 = vsel %vm534_vm6, %v1457_v18, %v1243_v51  ;;  %v576_v63 = vsel %vm534_vm6, %v1551_v24, %v1239_v52  ;;  %v575_v7 = vsel %vm534_vm6, %v352_v56, %v1238_v53 }
  0xbe   : > { %v1252_v54 = vpop.permute.xlu1 %1251  ;;  %v1247_v55 = vpop.permute.xlu0 %1246 }
  0xbf   : > { %v1254_v58 = vunpack.i.h.bf16 %v1252_v54  ;;  %v1253_v57 = vunpack.i.l.bf16 %v1252_v54  ;;  %v1249_v59 = vunpack.i.h.bf16 %v1247_v55  ;;  %v1248_v60 = vunpack.i.l.bf16 %v1247_v55 }
  0xc1   : > { %v554_v4 = vsel %vm545_vm8, %v543_v62, %v1253_v57  ;;  %v555_v8 = vsel %vm545_vm8, %v544_v61, %v1254_v58  ;;  %v585_v34 = vsel %vm545_vm8, %v575_v7, %v1248_v60  ;;  %v586_v9 = vsel %vm545_vm8, %v576_v63, %v1249_v59 }
  0xc2   : > { %v1262_v6 = vpop.permute.xlu1 %1261  ;;  %v1257_v0 = vpop.permute.xlu0 %1256 }
  0xc3   : > { %v1264_v44 = vunpack.i.h.bf16 %v1262_v6  ;;  %v1263_v2 = vunpack.i.l.bf16 %v1262_v6  ;;  %v1259_v16 = vunpack.i.h.bf16 %v1257_v0  ;;  %v1258_v3 = vunpack.i.l.bf16 %v1257_v0 }
  0xc5   : > { %v595_v18 = vsel %vm556_vm9, %v585_v34, %v1258_v3  ;;  %v596_v24 = vsel %vm556_vm9, %v586_v9, %v1259_v16  ;;  %v565_v14 = vsel %vm556_vm9, %v554_v4, %v1263_v2  ;;  %v566_v15 = vsel %vm556_vm9, %v555_v8, %v1264_v44 }
  0xc6   : > { %v610_v17 = vpack.c.bf16 %v596_v24, %v595_v18  ;;  %v609_v19 = vpack.c.bf16 %v566_v15, %v565_v14 }
  0xc8   : > { %842 = vmatprep.mubr.bf16.mxu0 %v610_v17 }
  0xc9   : > { %843 = vmatmul.mubr.bf16.gmra.mrb[16].mxu0 %v609_v19 }
 0x101   : > { %v885_v20 = vpop.f32.mrb[0].mxu1 }
 0x102   : > { %v1082_v21 = vpop.f32.mrb[1].mxu1 }
 0x103   : > { %v888_v22 = vpop.f32.mrb[2].mxu1 }
 0x104   : > { %v1083_v13 = vpop.f32.mrb[3].mxu1 }
 0x109   : > { %v893_v23 = vpop.f32.mrb[4].mxu1 }
 0x10a   : > { %v1086_v45 = vpop.f32.mrb[5].mxu1 }
 0x10b   : > { %v896_v25 = vpop.f32.mrb[6].mxu1 }
 0x10c   : > { %v1087_v26 = vpop.f32.mrb[7].mxu1 }
 0x111   : > { %v901_v27 = vpop.f32.mrb[8].mxu1 }
 0x112   : > { %v1090_v5 = vpop.f32.mrb[9].mxu1 }
 0x113   : > { %v904_v10 = vpop.f32.mrb[10].mxu1 }
 0x114   : > { %v1091_v28 = vpop.f32.mrb[11].mxu1 }
 0x119   : > { %v909_v29 = vpop.f32.mrb[12].mxu1 }
 0x11a   : > { %v1094_v30 = vpop.f32.mrb[13].mxu1 }
 0x11b   : > { %v912_v31 = vpop.f32.mrb[14].mxu1 }
 0x11c   : > { %v1095_v32 = vpop.f32.mrb[15].mxu1 }
 0x121   : > { %v1694_v35 = vpop.f32.mrb[16].mxu1 }
 0x122   : > { %v1098_v36 = vpop.f32.mrb[17].mxu1 }
 0x123   : > { %v1696_v33 = vpop.f32.mrb[18].mxu1 }
 0x124   : > { %v1099_v37 = vpop.f32.mrb[19].mxu1 }
 0x16c   : > { %v1039_v38 = vpop.f32.mrb[0].mxu0 }
 0x16d   : > { %v1040_v39 = vpop.f32.mrb[1].mxu0 }
 0x16e   : > { %v1041_v42 = vadd.f32 %v1040_v39, %v1039_v38  ;;  %v1042_v1 = vpop.f32.mrb[2].mxu0 }
 0x16f   : > { %v1043_v46 = vpop.f32.mrb[3].mxu0 }
 0x170   : > { %v1044_v43 = vadd.f32 %v1043_v46, %v1042_v1  ;;  %v813_v40 = vadd.f32 %v1041_v42, %v997_v41 }
 0x172   : > { %v886_v47 = vadd.f32 %v885_v20, %v813_v40  ;;  %v816_v11 = vadd.f32 %v1044_v43, %v997_v41 }
 0x174   : > { %925 = vst.msk [vmem:[%s1705_s10] sm:$0xff] %vm924_vm10, %v886_v47  ;;  %v889_v48 = vadd.f32 %v888_v22, %v816_v11 }
 0x176   : > { %926 = vst.msk [vmem:[%s1705_s10 + $0x8] sm:$0xff] %vm924_vm10, %v889_v48 }
 0x178   : > { %v1045_v12 = vpop.f32.mrb[4].mxu0 }
 0x179   : > { %v1046_v49 = vpop.f32.mrb[5].mxu0 }
 0x17a   : > { %v1047_v50 = vadd.f32 %v1046_v49, %v1045_v12  ;;  %v1048_v51 = vpop.f32.mrb[6].mxu0 }
 0x17b   : > { %v1049_v52 = vpop.f32.mrb[7].mxu0 }
 0x17c   : > { %v1050_v53 = vadd.f32 %v1049_v52, %v1048_v51  ;;  %v821_v54 = vadd.f32 %v1047_v50, %v997_v41 }
 0x17e   : > { %v894_v55 = vadd.f32 %v893_v23, %v821_v54  ;;  %v824_v56 = vadd.f32 %v1050_v53, %v997_v41 }
 0x180   : > { %927 = vst.msk [vmem:[%s1705_s10 + $0x10] sm:$0xff] %vm924_vm10, %v894_v55  ;;  %v897_v58 = vadd.f32 %v896_v25, %v824_v56 }
 0x182   : > { %928 = vst.msk [vmem:[%s1705_s10 + $0x18] sm:$0xff] %vm924_vm10, %v897_v58 }
 0x184   : > { %v1051_v57 = vpop.f32.mrb[8].mxu0 }
 0x185   : > { %v1052_v59 = vpop.f32.mrb[9].mxu0 }
 0x186   : > { %v1053_v60 = vadd.f32 %v1052_v59, %v1051_v57  ;;  %v1054_v61 = vpop.f32.mrb[10].mxu0 }
 0x187   : > { %v1055_v62 = vpop.f32.mrb[11].mxu0 }
 0x188   : > { %v1056_v63 = vadd.f32 %v1055_v62, %v1054_v61  ;;  %v829_v7 = vadd.f32 %v1053_v60, %v997_v41 }
 0x18a   : > { %v902_v6 = vadd.f32 %v901_v27, %v829_v7  ;;  %v832_v0 = vadd.f32 %v1056_v63, %v997_v41 }
 0x18c   : > { %929 = vst.msk [vmem:[%s1705_s10 + $0x20] sm:$0xff] %vm924_vm10, %v902_v6  ;;  %v905_v44 = vadd.f32 %v904_v10, %v832_v0 }
 0x18e   : > { %930 = vst.msk [vmem:[%s1705_s10 + $0x28] sm:$0xff] %vm924_vm10, %v905_v44 }
 0x190   : > { %v1057_v2 = vpop.f32.mrb[12].mxu0 }
 0x191   : > { %v1058_v16 = vpop.f32.mrb[13].mxu0 }
 0x192   : > { %v1059_v3 = vadd.f32 %v1058_v16, %v1057_v2  ;;  %v1060_v4 = vpop.f32.mrb[14].mxu0 }
 0x193   : > { %v1061_v8 = vpop.f32.mrb[15].mxu0 }
 0x194   : > { %v1062_v34 = vadd.f32 %v1061_v8, %v1060_v4  ;;  %v837_v9 = vadd.f32 %v1059_v3, %v997_v41 }
 0x196   : > { %v910_v18 = vadd.f32 %v909_v29, %v837_v9  ;;  %v840_v24 = vadd.f32 %v1062_v34, %v997_v41 }
 0x198   : > { %931 = vst.msk [vmem:[%s1705_s10 + $0x30] sm:$0xff] %vm924_vm10, %v910_v18  ;;  %v913_v14 = vadd.f32 %v912_v31, %v840_v24 }
 0x19a   : > { %932 = vst.msk [vmem:[%s1705_s10 + $0x38] sm:$0xff] %vm924_vm10, %v913_v14 }
 0x19c   : > { %v1063_v15 = vpop.f32.mrb[16].mxu0 }
 0x19d   : > { %v1064_v17 = vpop.f32.mrb[17].mxu0 }
 0x19e   : > { %v1065_v19 = vadd.f32 %v1064_v17, %v1063_v15  ;;  %v1066_v20 = vpop.f32.mrb[18].mxu0 }
 0x19f   : > { %v1067_v21 = vpop.f32.mrb[19].mxu0 }
 0x1a0   : > { %v845_v22 = vadd.f32 %v1065_v19, %v997_v41  ;;  %v1068_v13 = vadd.f32 %v1067_v21, %v1066_v20 }
 0x1a2   : > { %v918_v23 = vadd.f32 %v1694_v35, %v845_v22  ;;  %v848_v45 = vadd.f32 %v1068_v13, %v997_v41 }
 0x1a4   : > { %933 = vst.msk [vmem:[%s1705_s10 + $0x40] sm:$0xff] %vm924_vm10, %v918_v23  ;;  %v921_v25 = vadd.f32 %v1696_v33, %v848_v45 }
 0x1a6   : > { %934 = vst.msk [vmem:[%s1705_s10 + $0x48] sm:$0xff] %vm924_vm10, %v921_v25 }
 0x1a7 PF: > { %s13_s12 = sadd.s32 1, %s1289_s12  }
 0x1a8   : > { %p10_p4 = scmp.ge.s32.totalorder %s13_s12, 4  }
 0x1aa   :  { %12 = sbr.rel (!%p10_p4) target bundleno = 1 (0x1), region = 62 }

// kernel: istt_nofold_forward.27
= control target key start
LH: loop header
LB: loop body
LE: loop exit
PB: predicated region body
PF: predicated region fallthrough
CT: control target
= control target key end

     0   :  { %s1164_s12 = smov 0   ;;  %s1673_s0 = inlined_call_operand.vmem [shape: f32[2,110,16], index: 0, kind: input, shape index: {}]   ;;  %s1674_s1 = inlined_call_operand.vmem [shape: bf16[144,8], index: 1, kind: input, shape index: {}]   ;;  %s1675_s2 = inlined_call_operand.vmem [shape: f32[1,8], index: 2, kind: input, shape index: {}]   ;;  %s1676_s3 = inlined_call_operand.vmem [shape: f32[2,80,8], index: 3, kind: output, shape index: {}]  }
   0x1 LB: > { %s884_s13 = sadd.s32 4294967295, %s1134_s12   ;;  %p888_p0 = scmp.ge.s32.totalorder %s1134_s12, 1  ;;  %s1134_s12 = sphi %s1164_s12, %s13_s12  }
   0x2   : > { %p137_p1 = scmp.lt.s32.totalorder %s1134_s12, 3 }
   0x4   : > { %p138_p2 = pnand %p888_p0, %p137_p1 }
   0x5   : > { %p161_p3 = scmp.lt.s32.totalorder (!%p138_p2), %s884_s13, 1  ;;  %v1136_v0 = vmov (!%p138_p2), 0   ;;  %v1119_v1 = vld [vmem:[%s1674_s1] sm:$0xff] (!%p138_p2)   ;;  %v1120_v2 = vld [vmem:[%s1674_s1 + $0x8] sm:$0xff] (!%p138_p2)   ;;  %vm248_vm0 = vcmask (!%p138_p2), 1045504   ;;  %vm196_vm1 = vcmask (!%p138_p2), 1046528  }
   0x6   : > { %141 = sbr.rel (%p138_p2) target bundleno = 431 (0x1af), region = 32  ;;  %735 = vmatprep.subr.bf16.mxu0 (!%p138_p2), %v1136_v0  ;;  %908 = vmatprep.subr.bf16.mxu1 (!%p138_p2), %v1136_v0  ;;  %vm333_vm2 = vcmask (!%p138_p2), 1044480   ;;  %v1121_v10 = vld [vmem:[%s1674_s1 + $0x10] sm:$0xff] (!%p138_p2)   ;;  %vm385_vm3 = vcmask (!%p138_p2), 1043456   ;;  %vm470_vm4 = vcmask (!%p138_p2), 1042432   ;;  %v1122_v26 = vld [vmem:[%s1674_s1 + $0x18] sm:$0xff] (!%p138_p2)  }
   0x7   : > { %736 = vmatpush1.bf16.msra.mxu0 (!%p138_p2), %v1119_v1  ;;  %917 = vmatpush1.bf16.msra.mxu1 (!%p138_p2), %v1119_v1  ;;  %s1137_s26 = smov (!%p138_p2), 48   ;;  %s1138_s27 = smov (!%p138_p2), 16   ;;  %v1123_v42 = vld [vmem:[%s1674_s1 + $0x20] sm:$0xff] (!%p138_p2)   ;;  %v1124_v58 = vld [vmem:[%s1674_s1 + $0x28] sm:$0xff] (!%p138_p2)   ;;  %vm522_vm5 = vcmask (!%p138_p2), 1041408   ;;  %vm554_vm6 = vcmask (!%p138_p2), 130048  }
   0x8   : > { %737 = vmatprep.subr.bf16.mxu0 (!%p138_p2), %v1136_v0  ;;  %909 = vmatprep.subr.bf16.mxu1 (!%p138_p2), %v1136_v0  ;;  %s1139_s30 = smov (!%p138_p2), 64   ;;  %s1140_s4 = smov (!%p138_p2), 32   ;;  %vm565_vm7 = vcmask (!%p138_p2), 261120   ;;  %vm576_vm8 = vcmask (!%p138_p2), 392192   ;;  %vm587_vm9 = vcmask (!%p138_p2), 523264   ;;  %vm598_vm10 = vcmask (!%p138_p2), 654336  }
   0x9   : > { %s1141_s7 = smov (!%p138_p2), 96   ;;  %s1142_s8 = smov (!%p138_p2), 80   ;;  %vm609_vm11 = vcmask (!%p138_p2), 785408   ;;  %vm620_vm12 = vcmask (!%p138_p2), 916480   ;;  %vm818_vm13 = vcmask (!%p138_p2), 64512  }
   0xa   : > { %s1143_s11 = smov (!%p138_p2), 112  }
   0xb   : > { %738 = vmatpush1.bf16.msra.mxu0 (!%p138_p2), %v1120_v2  ;;  %918 = vmatpush1.bf16.msra.mxu1 (!%p138_p2), %v1120_v2 }
   0xc   : > { %739 = vmatprep.subr.bf16.mxu0 (!%p138_p2), %v1136_v0  ;;  %910 = vmatprep.subr.bf16.mxu1 (!%p138_p2), %v1136_v0 }
   0xd   : > { %s1678_s13 = smov (!%p161_p3, %s884_s13), 1 }
   0xe   : > { %s926_s16 = smul.u32 112, %s1678_s13 }
   0xf   : > { %740 = vmatpush1.bf16.msra.mxu0 %v1121_v10  ;;  %919 = vmatpush1.bf16.msra.mxu1 %v1121_v10  ;;  %s927_s18 = smul.u32 80, %s1678_s13 }
  0x10   : > { %s1188_s21 = scalar_lea.vmem %s1673_s0, %s926_s16  ;;  %741 = vmatprep.subr.bf16.mxu0 %v1136_v0  ;;  %911 = vmatprep.subr.bf16.mxu1 %v1136_v0 }
  0x11   : > { %v1191_v3 = vld [vmem:[%s1188_s21 + $0x10] sm:$0xff]  ;;  %v1194_v4 = vld [vmem:[%s1188_s21 + $0x18] sm:$0xff]  ;;  %v1199_v7 = vld [vmem:[%s1188_s21 + $0x8] sm:$0xff]  ;;  %s1648_s23 = scalar_lea.vmem %s1676_s3, %s927_s18 }
  0x12   : > { %v252_v5 = vrot.slane %v1191_v3, 2  ;;  %v254_v6 = vrot.slane %v1194_v4, 2  ;;  %v1202_v8 = vld [vmem:[%s1188_s21] sm:$0xff]  ;;  %v200_v9 = vrot.slane %v1191_v3, 1  ;;  %v250_v11 = vrot.slane %v1199_v7, 2  ;;  %v1260_v43 = vld [vmem:[%s1188_s21 + $0x30] sm:$0xff] }
  0x13   : > { %v249_v12 = vrot.slane %v1202_v8, 2  ;;  %v197_v13 = vrot.slane %v1202_v8, 1  ;;  %v198_v14 = vrot.slane %v1199_v7, 1  ;;  %v334_v16 = vrot.slane %v1199_v7, 3  ;;  %v1222_v18 = vld [vmem:[%s1188_s21 + $0x20] sm:$0xff]  ;;  %742 = vmatpush1.bf16.msra.mxu0 %v1122_v26  ;;  %v1263_v44 = vld [vmem:[%s1188_s21 + $0x38] sm:$0xff]  ;;  %920 = vmatpush1.bf16.msra.mxu1 %v1122_v26 }
  0x14   : > { %v1217_v15 = vsel %vm248_vm0, %v252_v5, %v254_v6  ;;  %v335_v17 = vrot.slane %v1191_v3, 3  ;;  %v253_v19 = vsel %vm248_vm0, %v250_v11, %v252_v5  ;;  %v337_v28 = vrot.slane %v1194_v4, 3  ;;  %v1266_v45 = vld [vmem:[%s1188_s21 + $0x40] sm:$0xff]  ;;  %743 = vmatprep.subr.bf16.mxu0 %v1136_v0  ;;  %912 = vmatprep.subr.bf16.mxu1 %v1136_v0  ;;  %v1287_v57 = vld [vmem:[%s1188_s21 + $0x28] sm:$0xff] }
  0x15   : > { %v251_v20 = vsel %vm248_vm0, %v249_v12, %v250_v11  ;;  %v199_v21 = vsel %vm196_vm1, %v197_v13, %v198_v14  ;;  %v954_v22 = vpack.i.bf16 %v1217_v15, %v253_v19  ;;  %v201_v24 = vsel %vm196_vm1, %v198_v14, %v200_v9  ;;  %v1313_v10 = vld [vmem:[%s1188_s21 + $0x48] sm:$0xff] }
  0x16   : > { %v949_v23 = vpack.i.bf16 %v253_v19, %v251_v20  ;;  %v336_v25 = vsel %vm333_vm2, %v334_v16, %v335_v17  ;;  %v944_v27 = vpack.i.bf16 %v201_v24, %v199_v21  ;;  %v387_v29 = vrot.slane %v1191_v3, 4  ;;  %v1126_v20 = vld [vmem:[%s1674_s1 + $0x38] sm:$0xff]  }
  0x17   : > { %v389_v30 = vrot.slane %v1194_v4, 4  ;;  %955 = vrot.lane.b32.xlu1 %v954_v22, %s1137_s26  ;;  %v391_v31 = vrot.slane %v1222_v18, 4  ;;  %v386_v32 = vrot.slane %v1199_v7, 4  ;;  %v202_v33 = vrot.slane %v1194_v4, 1  ;;  %744 = vmatpush1.bf16.msra.mxu0 %v1123_v42 }
  0x18   : > { %v204_v34 = vrot.slane %v1222_v18, 1  ;;  %945 = vrot.lane.b32.xlu0 %v944_v27, %s1138_s27  ;;  %v338_v35 = vsel %vm333_vm2, %v335_v17, %v337_v28  ;;  %v471_v37 = vrot.slane %v1191_v3, 5  ;;  %v472_v38 = vrot.slane %v1194_v4, 5  ;;  %745 = vmatprep.subr.bf16.mxu0 %v1136_v0 }
  0x19   : > { %v390_v36 = vsel %vm385_vm3, %v387_v29, %v389_v30  ;;  %v959_v39 = vpack.i.bf16 %v338_v35, %v336_v25  ;;  %v1253_v40 = vsel %vm385_vm3, %v389_v30, %v391_v31  ;;  %v388_v41 = vsel %vm385_vm3, %v386_v32, %v387_v29  ;;  %921 = vmatpush1.bf16.msra.mxu1 %v1123_v42 }
  0x1a   : > { %v969_v46 = vpack.i.bf16 %v1253_v40, %v390_v36  ;;  %v203_v47 = vsel %vm196_vm1, %v200_v9, %v202_v33  ;;  %v474_v48 = vrot.slane %v1222_v18, 5  ;;  %v256_v49 = vrot.slane %v1222_v18, 2  ;;  %v1125_v9 = vld [vmem:[%s1674_s1 + $0x30] sm:$0xff]   ;;  %913 = vmatprep.subr.bf16.mxu1 %v1136_v0 }
  0x1b   : > { %960 = vrot.lane.b32.xlu1 %v959_v39, %s1139_s30  ;;  %v964_v50 = vpack.i.bf16 %v390_v36, %v388_v41  ;;  %v205_v51 = vsel %vm196_vm1, %v202_v33, %v204_v34  ;;  %v473_v52 = vsel %vm470_vm4, %v471_v37, %v472_v38  ;;  %v208_v54 = vrot.slane %v1260_v43, 1  ;;  %746 = vmatpush1.bf16.msra.mxu0 %v1124_v58  ;;  %v1368_v36 = vld [vmem:[%s1188_s21 + $0x50] sm:$0xff] }
  0x1c   : > { %950 = vrot.lane.b32.xlu0 %v949_v23, %s1140_s4  ;;  %v475_v53 = vsel %vm470_vm4, %v472_v38, %v474_v48  ;;  %v210_v55 = vrot.slane %v1263_v44, 1  ;;  %v212_v56 = vrot.slane %v1266_v45, 1  ;;  %v979_v59 = vpack.i.bf16 %v205_v51, %v203_v47  ;;  %747 = vmatprep.subr.bf16.mxu0 %v1136_v0 }
  0x1d   : > { %v257_v60 = vsel %vm248_vm0, %v254_v6, %v256_v49  ;;  %v974_v61 = vpack.i.bf16 %v475_v53, %v473_v52  ;;  %v258_v62 = vrot.slane %v1287_v57, 2  ;;  %v260_v63 = vrot.slane %v1260_v43, 2  ;;  %922 = vmatpush1.bf16.msra.mxu1 %v1124_v58 }
  0x1e   : > { %v211_v1 = vsel %vm196_vm1, %v208_v54, %v210_v55  ;;  %v213_v2 = vsel %vm196_vm1, %v210_v55, %v212_v56  ;;  %v262_v5 = vrot.slane %v1263_v44, 2  ;;  %v264_v6 = vrot.slane %v1266_v45, 2  ;;  %914 = vmatprep.subr.bf16.mxu1 %v1136_v0 }
  0x1f   : > { %970 = vrot.lane.b32.xlu1 %v969_v46, %s1141_s7  ;;  %v989_v11 = vpack.i.bf16 %v257_v60, %v1217_v15  ;;  %v984_v12 = vpack.i.bf16 %v213_v2, %v211_v1  ;;  %v1322_v13 = vsel %vm248_vm0, %v256_v49, %v258_v62  ;;  %v339_v14 = vrot.slane %v1222_v18, 3  ;;  %748 = vmatpush1.bf16.msra.mxu0 %v1125_v9 }
  0x20   : > { %965 = vrot.lane.b32.xlu0 %v964_v50, %s1142_s8  ;;  %v341_v16 = vrot.slane %v1287_v57, 3  ;;  %v1329_v15 = vsel %vm248_vm0, %v260_v63, %v262_v5  ;;  %v265_v17 = vsel %vm248_vm0, %v262_v5, %v264_v6  ;;  %v266_v19 = vrot.slane %v1313_v10, 2  ;;  %749 = vmatprep.subr.bf16.mxu0 %v1136_v0 }
  0x21   : > { %v999_v21 = vpack.i.bf16 %v1322_v13, %v257_v60  ;;  %v393_v22 = vrot.slane %v1287_v57, 4  ;;  %v994_v23 = vpack.i.bf16 %v265_v17, %v1329_v15  ;;  %v340_v24 = vsel %vm333_vm2, %v337_v28, %v339_v14  ;;  %v1127_v28 = vld [vmem:[%s1674_s1 + $0x40] sm:$0xff]   ;;  %923 = vmatpush1.bf16.msra.mxu1 %v1125_v9 }
  0x22   : > { %v342_v25 = vsel %vm333_vm2, %v339_v14, %v341_v16  ;;  %v1352_v26 = vsel %vm248_vm0, %v264_v6, %v266_v19  ;;  %v345_v27 = vrot.slane %v1263_v44, 3  ;;  %v347_v29 = vrot.slane %v1266_v45, 3  ;;  %915 = vmatprep.subr.bf16.mxu1 %v1136_v0 }
  0x23   : > { %980 = vrot.lane.b32.xlu1 %v979_v59, %s1138_s27  ;;  %v349_v30 = vrot.slane %v1313_v10, 3  ;;  %750 = vmatpush1.bf16.msra.mxu0 %v1126_v20  ;;  %v1009_v32 = vpack.i.bf16 %v342_v25, %v340_v24  ;;  %v394_v33 = vsel %vm385_vm3, %v391_v31, %v393_v22  ;;  %v395_v35 = vrot.slane %v1260_v43, 4 }
  0x24   : > { %975 = vrot.lane.b32.xlu0 %v974_v61, %s1143_s11  ;;  %751 = vmatprep.subr.bf16.mxu0 %v1136_v0  ;;  %v1004_v37 = vpack.i.bf16 %v1352_v26, %v265_v17  ;;  %v397_v38 = vrot.slane %v1263_v44, 4  ;;  %v399_v39 = vrot.slane %v1266_v45, 4  ;;  %v401_v41 = vrot.slane %v1313_v10, 4 }
  0x25   : > { %v348_v42 = vsel %vm333_vm2, %v345_v27, %v347_v29  ;;  %v350_v31 = vsel %vm333_vm2, %v347_v29, %v349_v30  ;;  %v476_v46 = vrot.slane %v1287_v57, 5  ;;  %v478_v47 = vrot.slane %v1260_v43, 5  ;;  %924 = vmatpush1.bf16.msra.mxu1 %v1126_v20 }
  0x26   : > { %v403_v49 = vrot.slane %v1368_v36, 4  ;;  %916 = vmatprep.subr.bf16.mxu1 %v1136_v0  ;;  %v1019_v50 = vpack.i.bf16 %v394_v33, %v1253_v40  ;;  %v1390_v51 = vsel %vm385_vm3, %v393_v22, %v395_v35  ;;  %v1014_v52 = vpack.i.bf16 %v350_v31, %v348_v42 }
  0x27   : > { %990 = vrot.lane.b32.xlu1 %v989_v11, %s1140_s4  ;;  %752 = vmatpush1.bf16.msra.mxu0 %v1127_v28  ;;  %v1396_v53 = vsel %vm385_vm3, %v397_v38, %v399_v39  ;;  %v402_v55 = vsel %vm385_vm3, %v399_v39, %v401_v41  ;;  %v206_v0 = vrot.slane %v1287_v57, 1  ;;  %v477_v40 = vsel %vm470_vm4, %v474_v48, %v476_v46 }
  0x28   : > { %985 = vrot.lane.b32.xlu0 %v984_v12, %s1138_s27  ;;  %v479_v58 = vsel %vm470_vm4, %v476_v46, %v478_v47  ;;  %v1409_v59 = vsel %vm385_vm3, %v401_v41, %v403_v49  ;;  %v482_v60 = vrot.slane %v1266_v45, 5  ;;  %v484_v61 = vrot.slane %v1313_v10, 5 }
  0x29   : > { %925 = vmatpush1.bf16.msra.mxu1 %v1127_v28  ;;  %v1029_v1 = vpack.i.bf16 %v1390_v51, %v394_v33  ;;  %v1024_v48 = vpack.i.bf16 %v402_v55, %v1396_v53  ;;  %v1039_v2 = vpack.i.bf16 %v479_v58, %v477_v40  ;;  %v207_v5 = vsel %vm196_vm1, %v204_v34, %v206_v0 }
  0x2a   : > { %v209_v6 = vsel %vm196_vm1, %v206_v0, %v208_v54  ;;  %v486_v9 = vrot.slane %v1368_v36, 5  ;;  %v1034_v11 = vpack.i.bf16 %v1409_v59, %v402_v55  ;;  %v214_v12 = vrot.slane %v1313_v10, 1 }
  0x2b   : > { %1000 = vrot.lane.b32.xlu1 %v999_v21, %s1137_s26  ;;  %v523_v14 = vrot.slane %v1191_v3, 6  ;;  %v485_v17 = vsel %vm470_vm4, %v482_v60, %v484_v61  ;;  %v216_v20 = vrot.slane %v1368_v36, 1  ;;  %v524_v34 = vrot.slane %v1194_v4, 6 }
  0x2c   : > { %995 = vrot.lane.b32.xlu0 %v994_v23, %s1140_s4  ;;  %v526_v21 = vrot.slane %v1222_v18, 6  ;;  %v528_v54 = vrot.slane %v1287_v57, 6  ;;  %v530_v22 = vrot.slane %v1260_v43, 6  ;;  %v534_v23 = vrot.slane %v1266_v45, 6 }
  0x2d   : > { %v536_v24 = vrot.slane %v1313_v10, 6  ;;  %v487_v25 = vsel %vm470_vm4, %v484_v61, %v486_v9  ;;  %v525_v29 = vsel %vm522_vm5, %v523_v14, %v524_v34  ;;  %v1049_v46 = vpack.i.bf16 %v209_v6, %v207_v5  ;;  %v183_v61 = vld [vmem:[%s1188_s21 + $0x58] sm:$0xff] }
  0x2e   : > { %v527_v28 = vsel %vm522_vm5, %v524_v34, %v526_v21  ;;  %v1449_v39 = vsel %vm522_vm5, %v528_v54, %v530_v22  ;;  %v261_v55 = vsel %vm248_vm0, %v258_v62, %v260_v63  ;;  %v268_v0 = vrot.slane %v1368_v36, 2 }
  0x2f   : > { %1010 = vrot.lane.b32.xlu1 %v1009_v32, %s1139_s30  ;;  %v538_v32 = vrot.slane %v1368_v36, 6  ;;  %v632_v33 = vpack.c.bf16 %v527_v28, %v525_v29  ;;  %v537_v41 = vsel %vm522_vm5, %v534_v23, %v536_v24  ;;  %v215_v40 = vsel %vm196_vm1, %v212_v56, %v214_v12 }
  0x30   : > { %1005 = vrot.lane.b32.xlu0 %v1004_v37, %s1137_s26  ;;  %v1446_v37 = vsel %vm522_vm5, %v526_v21, %v528_v54  ;;  %v217_v58 = vsel %vm196_vm1, %v214_v12, %v216_v20  ;;  %v269_v62 = vsel %vm248_vm0, %v266_v19, %v268_v0  ;;  %v343_v63 = vrot.slane %v1260_v43, 3  ;;  %v184_v20 = vld [vmem:[%s1188_s21 + $0x60] sm:$0xff] }
  0x31   : > { %v634_v42 = vpack.c.bf16 %v1449_v39, %v1446_v37  ;;  %v539_v31 = vsel %vm522_vm5, %v536_v24, %v538_v32  ;;  %901 = vmatprep.mubr.msk.bf16.mxu0 %vm554_vm6, %v632_v33  ;;  %v1069_v56 = vpack.i.bf16 %v1329_v15, %v261_v55  ;;  %v1064_v5 = vpack.i.bf16 %v269_v62, %v1352_v26 }
  0x32   : > { %v346_v19 = vsel %vm333_vm2, %v343_v63, %v345_v27  ;;  %v351_v6 = vrot.slane %v1368_v36, 3  ;;  %v398_v26 = vsel %vm385_vm3, %v395_v35, %v397_v38  ;;  %v532_v34 = vrot.slane %v1263_v44, 6 }
  0x33   : > { %1020 = vrot.lane.b32.xlu1 %v1019_v50, %s1142_s8  ;;  %v638_v50 = vpack.c.bf16 %v539_v31, %v537_v41  ;;  %v1089_v21 = vpack.i.bf16 %v398_v26, %v1390_v51  ;;  %v480_v38 = vrot.slane %v1263_v44, 5  ;;  %v540_v51 = vrot.slane %v183_v61, 6 }
  0x34   : > { %1015 = vrot.lane.b32.xlu0 %v1014_v52, %s1139_s30  ;;  %v1044_v52 = vpack.i.bf16 %v487_v25, %v485_v17  ;;  %v352_v27 = vsel %vm333_vm2, %v349_v30, %v351_v6  ;;  %v405_v17 = vrot.slane %v183_v61, 4  ;;  %v1512_v30 = vsel %vm522_vm5, %v530_v22, %v532_v34 }
  0x35   : > { %904 = vmatprep.mubr.msk.bf16.mxu1 %vm554_vm6, %v638_v50  ;;  %v1515_v24 = vsel %vm522_vm5, %v532_v34, %v534_v23  ;;  %v438_v25 = vrot.slane %v184_v20, 4  ;;  %v542_v28 = vrot.slane %v184_v20, 6  ;;  %v1099_v33 = vpack.i.bf16 %v1396_v53, %v398_v26 }
  0x36   : > { %v406_v35 = vsel %vm385_vm3, %v403_v49, %v405_v17  ;;  %v636_v29 = vpack.c.bf16 %v1515_v24, %v1512_v30  ;;  %v481_v22 = vsel %vm470_vm4, %v478_v47, %v480_v38  ;;  %v483_v23 = vsel %vm470_vm4, %v480_v38, %v482_v60 }
  0x37   : > { %1030 = vrot.lane.b32.xlu1 %v1029_v1, %s1141_s7  ;;  %v1059_v1 = vpack.i.bf16 %v261_v55, %v1322_v13  ;;  %v344_v13 = vsel %vm333_vm2, %v341_v16, %v343_v63  ;;  %v1094_v49 = vpack.i.bf16 %v406_v35, %v1409_v59  ;;  %v1532_v41 = vsel %vm522_vm5, %v538_v32, %v540_v51 }
  0x38   : > { %1025 = vrot.lane.b32.xlu0 %v1024_v48, %s1142_s8  ;;  %v1054_v48 = vpack.i.bf16 %v217_v58, %v215_v40  ;;  %v1079_v15 = vpack.i.bf16 %v346_v19, %v344_v13  ;;  %v1535_v31 = vsel %vm522_vm5, %v540_v51, %v542_v28  ;;  %v439_v53 = vsel %vm385_vm3, %v405_v17, %v438_v25 }
  0x39   : > { %v488_v59 = vrot.slane %v183_v61, 5  ;;  %v640_v50 = vpack.c.bf16 %v1535_v31, %v1532_v41  ;;  %v1109_v47 = vpack.i.bf16 %v483_v23, %v481_v22  ;;  %v1104_v60 = vpack.i.bf16 %v439_v53, %v406_v35 }
  0x3b   : > { %1040 = vrot.lane.b32.xlu1 %v1039_v2, %s1143_s11  ;;  %v301_v2 = vrot.slane %v183_v61, 2  ;;  %v489_v32 = vsel %vm470_vm4, %v486_v9, %v488_v59 }
  0x3c   : > { %1035 = vrot.lane.b32.xlu0 %v1034_v11, %s1141_s7  ;;  %v353_v11 = vrot.slane %v183_v61, 3 }
  0x3d   : > { %v302_v12 = vsel %vm248_vm0, %v268_v0, %v301_v2 }
  0x3e   : > { %v1074_v16 = vpack.i.bf16 %v302_v12, %v269_v62  ;;  %v354_v14 = vsel %vm333_vm2, %v351_v6, %v353_v11 }
  0x3f   : > { %1050 = vrot.lane.b32.xlu1 %v1049_v46, %s1138_s27  ;;  %v1084_v54 = vpack.i.bf16 %v354_v14, %v352_v27  ;;  %v490_v46 = vrot.slane %v184_v20, 5 }
  0x40   : > { %1045 = vrot.lane.b32.xlu0 %v1044_v52, %s1143_s11 }
  0x41   : > { %v491_v52 = vsel %vm470_vm4, %v488_v59, %v490_v46 }
  0x42   : > { %v1114_v55 = vpack.i.bf16 %v491_v52, %v489_v32 }
  0x43   : > { %1060 = vrot.lane.b32.xlu1 %v1059_v1, %s1140_s4 }
  0x44   : > { %1055 = vrot.lane.b32.xlu0 %v1054_v48, %s1138_s27 }
  0x47   : > { %1070 = vrot.lane.b32.xlu1 %v1069_v56, %s1137_s26 }
  0x48   : > { %1065 = vrot.lane.b32.xlu0 %v1064_v5, %s1140_s4 }
  0x4b   : > { %1080 = vrot.lane.b32.xlu1 %v1079_v15, %s1139_s30 }
  0x4c   : > { %1075 = vrot.lane.b32.xlu0 %v1074_v16, %s1137_s26 }
  0x4f   : > { %1090 = vrot.lane.b32.xlu1 %v1089_v21, %s1142_s8 }
  0x50   : > { %1085 = vrot.lane.b32.xlu0 %v1084_v54, %s1139_s30 }
  0x53   : > { %1100 = vrot.lane.b32.xlu1 %v1099_v33, %s1141_s7 }
  0x54   : > { %1095 = vrot.lane.b32.xlu0 %v1094_v49, %s1142_s8 }
  0x57   : > { %1110 = vrot.lane.b32.xlu1 %v1109_v47, %s1143_s11 }
  0x58   : > { %1105 = vrot.lane.b32.xlu0 %v1104_v60, %s1141_s7 }
  0x5c   : > { %1115 = vrot.lane.b32.xlu0 %v1114_v55, %s1143_s11 }
  0x89   : > { %v956_v0 = vpop.permute.xlu1 %955 }
  0x8a   : > { %v946_v40 = vpop.permute.xlu0 %945  ;;  %v958_v48 = vunpack.i.h.bf16 %v956_v0  ;;  %v957_v62 = vunpack.i.l.bf16 %v956_v0 }
  0x8b   : > { %v948_v58 = vunpack.i.h.bf16 %v946_v40  ;;  %v947_v61 = vunpack.i.l.bf16 %v946_v40 }
  0x8d   : > { %v961_v1 = vpop.permute.xlu1 %960  ;;  %v556_v5 = vsel %vm554_vm6, %v1199_v7, %v948_v58  ;;  %v555_v13 = vsel %vm554_vm6, %v1202_v8, %v947_v61 }
  0x8e   : > { %v951_v36 = vpop.permute.xlu0 %950  ;;  %v963_v9 = vunpack.i.h.bf16 %v961_v1  ;;  %v962_v63 = vunpack.i.l.bf16 %v961_v1 }
  0x8f   : > { %v953_v2 = vunpack.i.h.bf16 %v951_v36  ;;  %v952_v56 = vunpack.i.l.bf16 %v951_v36 }
  0x91   : > { %v566_v19 = vsel %vm565_vm7, %v555_v13, %v952_v56  ;;  %v567_v6 = vsel %vm565_vm7, %v556_v5, %v953_v2  ;;  %v971_v11 = vpop.permute.xlu1 %970 }
  0x92   : > { %v577_v12 = vsel %vm576_vm8, %v566_v19, %v957_v62  ;;  %v578_v15 = vsel %vm576_vm8, %v567_v6, %v958_v48  ;;  %v966_v26 = vpop.permute.xlu0 %965  ;;  %v973_v17 = vunpack.i.h.bf16 %v971_v11  ;;  %v972_v8 = vunpack.i.l.bf16 %v971_v11 }
  0x93   : > { %v968_v16 = vunpack.i.h.bf16 %v966_v26  ;;  %v967_v27 = vunpack.i.l.bf16 %v966_v26  ;;  %v588_v14 = vsel %vm587_vm9, %v577_v12, %v962_v63  ;;  %v589_v7 = vsel %vm587_vm9, %v578_v15, %v963_v9 }
  0x95   : > { %v599_v20 = vsel %vm598_vm10, %v588_v14, %v967_v27  ;;  %v600_v34 = vsel %vm598_vm10, %v589_v7, %v968_v16  ;;  %v981_v21 = vpop.permute.xlu1 %980 }
  0x96   : > { %v976_v54 = vpop.permute.xlu0 %975  ;;  %v610_v25 = vsel %vm609_vm11, %v599_v20, %v972_v8  ;;  %v611_v51 = vsel %vm609_vm11, %v600_v34, %v973_v17  ;;  %v983_v47 = vunpack.i.h.bf16 %v981_v21  ;;  %v982_v60 = vunpack.i.l.bf16 %v981_v21 }
  0x97   : > { %v978_v35 = vunpack.i.h.bf16 %v976_v54  ;;  %v977_v38 = vunpack.i.l.bf16 %v976_v54 }
  0x98   : > { %v558_v40 = vsel %vm554_vm6, %v1194_v4, %v983_v47  ;;  %v557_v58 = vsel %vm554_vm6, %v1191_v3, %v982_v60 }
  0x99   : > { %v991_v28 = vpop.permute.xlu1 %990  ;;  %v621_v33 = vsel %vm620_vm12, %v610_v25, %v977_v38  ;;  %v622_v49 = vsel %vm620_vm12, %v611_v51, %v978_v35 }
  0x9a   : > { %v986_v22 = vpop.permute.xlu0 %985  ;;  %v631_v23 = vpack.c.bf16 %v622_v49, %v621_v33  ;;  %v993_v52 = vunpack.i.h.bf16 %v991_v28  ;;  %v992_v55 = vunpack.i.l.bf16 %v991_v28 }
  0x9b   : > { %v988_v61 = vunpack.i.h.bf16 %v986_v22  ;;  %v987_v1 = vunpack.i.l.bf16 %v986_v22 }
  0x9c   : > { %768 = vmatmul.mubr.bf16.vlgmr.msra.gmra.mrb[0].mxu0 %v631_v23  ;;  %v568_v36 = vsel %vm565_vm7, %v557_v58, %v992_v55  ;;  %v569_v9 = vsel %vm565_vm7, %v558_v40, %v993_v52 }
  0x9d   : > { %v1001_v53 = vpop.permute.xlu1 %1000  ;;  %902 = vmatprep.mubr.msk.bf16.mxu0 %vm554_vm6, %v634_v42  ;;  %v562_v4 = vsel %vm554_vm6, %v1263_v44, %v988_v61  ;;  %v561_v3 = vsel %vm554_vm6, %v1260_v43, %v987_v1 }
  0x9e   : > { %v996_v59 = vpop.permute.xlu0 %995  ;;  %v1003_v37 = vunpack.i.h.bf16 %v1001_v53  ;;  %v1002_v39 = vunpack.i.l.bf16 %v1001_v53 }
  0x9f   : > { %v998_v42 = vunpack.i.h.bf16 %v996_v59  ;;  %v997_v62 = vunpack.i.l.bf16 %v996_v59 }
  0xa0   : > { %v579_v6 = vsel %vm576_vm8, %v568_v36, %v1002_v39  ;;  %v580_v11 = vsel %vm576_vm8, %v569_v9, %v1003_v37 }
  0xa1   : > { %v1011_v46 = vpop.permute.xlu1 %1010  ;;  %v572_v26 = vsel %vm565_vm7, %v561_v3, %v997_v62  ;;  %v573_v16 = vsel %vm565_vm7, %v562_v4, %v998_v42 }
  0xa2   : > { %v1006_v32 = vpop.permute.xlu0 %1005  ;;  %v1013_v63 = vunpack.i.h.bf16 %v1011_v46  ;;  %v1012_v2 = vunpack.i.l.bf16 %v1011_v46 }
  0xa3   : > { %v1008_v27 = vunpack.i.h.bf16 %v1006_v32  ;;  %v1007_v14 = vunpack.i.l.bf16 %v1006_v32 }
  0xa4   : > { %v590_v44 = vsel %vm587_vm9, %v579_v6, %v1012_v2  ;;  %v591_v7 = vsel %vm587_vm9, %v580_v11, %v1013_v63 }
  0xa5   : > { %v1021_v0 = vpop.permute.xlu1 %1020  ;;  %v583_v53 = vsel %vm576_vm8, %v572_v26, %v1007_v14  ;;  %v584_v59 = vsel %vm576_vm8, %v573_v16, %v1008_v27 }
  0xa6   : > { %v1016_v48 = vpop.permute.xlu0 %1015  ;;  %v1023_v5 = vunpack.i.h.bf16 %v1021_v0  ;;  %v1022_v13 = vunpack.i.l.bf16 %v1021_v0 }
  0xa7   : > { %v1018_v43 = vunpack.i.h.bf16 %v1016_v48  ;;  %v1017_v17 = vunpack.i.l.bf16 %v1016_v48 }
  0xa8   : > { %v601_v20 = vsel %vm598_vm10, %v590_v44, %v1022_v13  ;;  %v602_v34 = vsel %vm598_vm10, %v591_v7, %v1023_v5 }
  0xa9   : > { %v1031_v56 = vpop.permute.xlu1 %1030  ;;  %v594_v60 = vsel %vm587_vm9, %v583_v53, %v1017_v17  ;;  %v595_v32 = vsel %vm587_vm9, %v584_v59, %v1018_v43 }
  0xaa   : > { %v1026_v19 = vpop.permute.xlu0 %1025  ;;  %v1033_v12 = vunpack.i.h.bf16 %v1031_v56  ;;  %v1032_v15 = vunpack.i.l.bf16 %v1031_v56 }
  0xab   : > { %v1028_v51 = vunpack.i.h.bf16 %v1026_v19  ;;  %v1027_v28 = vunpack.i.l.bf16 %v1026_v19 }
  0xac   : > { %v612_v38 = vsel %vm609_vm11, %v601_v20, %v1032_v15  ;;  %v613_v25 = vsel %vm609_vm11, %v602_v34, %v1033_v12 }
  0xad   : > { %v1041_v8 = vpop.permute.xlu1 %1040  ;;  %v605_v55 = vsel %vm598_vm10, %v594_v60, %v1027_v28  ;;  %v606_v0 = vsel %vm598_vm10, %v595_v32, %v1028_v51 }
  0xae   : > { %v1043_v21 = vunpack.i.h.bf16 %v1041_v8  ;;  %v1042_v54 = vunpack.i.l.bf16 %v1041_v8  ;;  %v1036_v35 = vpop.permute.xlu0 %1035 }
  0xaf   : > { %v1038_v33 = vunpack.i.h.bf16 %v1036_v35  ;;  %v1037_v49 = vunpack.i.l.bf16 %v1036_v35 }
  0xb0   : > { %v623_v22 = vsel %vm620_vm12, %v612_v38, %v1042_v54  ;;  %v624_v23 = vsel %vm620_vm12, %v613_v25, %v1043_v21 }
  0xb1   : > { %v1051_v46 = vpop.permute.xlu1 %1050  ;;  %v633_v47 = vpack.c.bf16 %v624_v23, %v623_v22  ;;  %v616_v61 = vsel %vm609_vm11, %v605_v55, %v1037_v49  ;;  %v617_v1 = vsel %vm609_vm11, %v606_v0, %v1038_v33 }
  0xb2   : > { %v1046_v52 = vpop.permute.xlu0 %1045  ;;  %v1053_v2 = vunpack.i.h.bf16 %v1051_v46  ;;  %v1052_v30 = vunpack.i.l.bf16 %v1051_v46 }
  0xb3   : > { %v1048_v40 = vunpack.i.h.bf16 %v1046_v52  ;;  %v1047_v58 = vunpack.i.l.bf16 %v1046_v52  ;;  %776 = vmatmul.mubr.bf16.gmra.mrb[4].mxu0 %v633_v47 }
  0xb4   : > { %903 = vmatprep.mubr.msk.bf16.mxu0 %vm554_vm6, %v636_v29  ;;  %v560_v3 = vsel %vm554_vm6, %v1287_v57, %v1053_v2  ;;  %v559_v5 = vsel %vm554_vm6, %v1222_v18, %v1052_v30 }
  0xb5   : > { %v1061_v48 = vpop.permute.xlu1 %1060  ;;  %v627_v37 = vsel %vm620_vm12, %v616_v61, %v1047_v58  ;;  %v628_v39 = vsel %vm620_vm12, %v617_v1, %v1048_v40 }
  0xb6   : > { %v1056_v42 = vpop.permute.xlu0 %1055  ;;  %v637_v62 = vpack.c.bf16 %v628_v39, %v627_v37  ;;  %v1063_v29 = vunpack.i.h.bf16 %v1061_v48  ;;  %v1062_v56 = vunpack.i.l.bf16 %v1061_v48 }
  0xb7   : > { %v1058_v13 = vunpack.i.h.bf16 %v1056_v42  ;;  %v1057_v19 = vunpack.i.l.bf16 %v1056_v42 }
  0xb8   : > { %792 = vmatmul.mubr.bf16.vlgmr.msra.gmra.mrb[0].mxu1 %v637_v62  ;;  %v570_v12 = vsel %vm565_vm7, %v559_v5, %v1062_v56  ;;  %v571_v15 = vsel %vm565_vm7, %v560_v3, %v1063_v29 }
  0xb9   : > { %v1071_v36 = vpop.permute.xlu1 %1070  ;;  %905 = vmatprep.mubr.msk.bf16.mxu1 %vm554_vm6, %v640_v50  ;;  %v564_v57 = vsel %vm554_vm6, %v1313_v10, %v1058_v13  ;;  %v563_v18 = vsel %vm554_vm6, %v1266_v45, %v1057_v19 }
  0xba   : > { %v1066_v9 = vpop.permute.xlu0 %1065  ;;  %v1073_v41 = vunpack.i.h.bf16 %v1071_v36  ;;  %v1072_v31 = vunpack.i.l.bf16 %v1071_v36 }
  0xbb   : > { %v1068_v50 = vunpack.i.h.bf16 %v1066_v9  ;;  %v1067_v11 = vunpack.i.l.bf16 %v1066_v9 }
  0xbc   : > { %v581_v43 = vsel %vm576_vm8, %v570_v12, %v1072_v31  ;;  %v582_v17 = vsel %vm576_vm8, %v571_v15, %v1073_v41 }
  0xbd   : > { %v1081_v63 = vpop.permute.xlu1 %1080  ;;  %v574_v34 = vsel %vm565_vm7, %v563_v18, %v1067_v11  ;;  %v575_v21 = vsel %vm565_vm7, %v564_v57, %v1068_v50 }
  0xbe   : > { %v1076_v24 = vpop.permute.xlu0 %1075  ;;  %v1083_v26 = vunpack.i.h.bf16 %v1081_v63  ;;  %v1082_v16 = vunpack.i.l.bf16 %v1081_v63 }
  0xbf   : > { %v1078_v54 = vunpack.i.h.bf16 %v1076_v24  ;;  %v1077_v35 = vunpack.i.l.bf16 %v1076_v24  ;;  %v891_v24 = vld [vmem:[%s1675_s2] ss:$0 sm:$0xff] }
  0xc0   : > { %v592_v10 = vsel %vm587_vm9, %v581_v43, %v1082_v16  ;;  %v593_v38 = vsel %vm587_vm9, %v582_v17, %v1083_v26 }
  0xc1   : > { %v1091_v4 = vpop.permute.xlu1 %1090  ;;  %v585_v0 = vsel %vm576_vm8, %v574_v34, %v1077_v35  ;;  %v586_v40 = vsel %vm576_vm8, %v575_v21, %v1078_v54 }
  0xc2   : > { %v1086_v6 = vpop.permute.xlu0 %1085  ;;  %v1093_v14 = vunpack.i.h.bf16 %v1091_v4  ;;  %v1092_v44 = vunpack.i.l.bf16 %v1091_v4 }
  0xc3   : > { %v1088_v45 = vunpack.i.h.bf16 %v1086_v6  ;;  %v1087_v25 = vunpack.i.l.bf16 %v1086_v6 }
  0xc4   : > { %v603_v28 = vsel %vm598_vm10, %v592_v10, %v1092_v44  ;;  %v604_v33 = vsel %vm598_vm10, %v593_v38, %v1093_v14 }
  0xc5   : > { %v1101_v27 = vpop.permute.xlu1 %1100  ;;  %v596_v61 = vsel %vm587_vm9, %v585_v0, %v1087_v25  ;;  %v597_v1 = vsel %vm587_vm9, %v586_v40, %v1088_v45 }
  0xc6   : > { %v1096_v7 = vpop.permute.xlu0 %1095  ;;  %v1103_v8 = vunpack.i.h.bf16 %v1101_v27  ;;  %v1102_v20 = vunpack.i.l.bf16 %v1101_v27 }
  0xc7   : > { %v1098_v46 = vunpack.i.h.bf16 %v1096_v7  ;;  %v1097_v47 = vunpack.i.l.bf16 %v1096_v7 }
  0xc8   : > { %v614_v53 = vsel %vm609_vm11, %v603_v28, %v1102_v20  ;;  %v615_v59 = vsel %vm609_vm11, %v604_v33, %v1103_v8 }
  0xc9   : > { %v1111_v51 = vpop.permute.xlu1 %1110  ;;  %v607_v37 = vsel %vm598_vm10, %v596_v61, %v1097_v47  ;;  %v608_v39 = vsel %vm598_vm10, %v597_v1, %v1098_v46 }
  0xca   : > { %v1113_v49 = vunpack.i.h.bf16 %v1111_v51  ;;  %v1112_v22 = vunpack.i.l.bf16 %v1111_v51  ;;  %v1106_v23 = vpop.permute.xlu0 %1105 }
  0xcb   : > { %v1108_v60 = vunpack.i.h.bf16 %v1106_v23  ;;  %v1107_v32 = vunpack.i.l.bf16 %v1106_v23 }
  0xcc   : > { %v625_v52 = vsel %vm620_vm12, %v614_v53, %v1112_v22  ;;  %v626_v55 = vsel %vm620_vm12, %v615_v59, %v1113_v49 }
  0xcd   : > { %v635_v58 = vpack.c.bf16 %v626_v55, %v625_v52  ;;  %v618_v36 = vsel %vm609_vm11, %v607_v37, %v1107_v32  ;;  %v619_v9 = vsel %vm609_vm11, %v608_v39, %v1108_v60 }
  0xce   : > { %v1116_v48 = vpop.permute.xlu0 %1115 }
  0xcf   : > { %v1118_v42 = vunpack.i.h.bf16 %v1116_v48  ;;  %v1117_v62 = vunpack.i.l.bf16 %v1116_v48  ;;  %784 = vmatmul.mubr.bf16.gmra.mrb[8].mxu0 %v635_v58 }
  0xd1   : > { %v629_v63 = vsel %vm620_vm12, %v618_v36, %v1117_v62  ;;  %v630_v2 = vsel %vm620_vm12, %v619_v9, %v1118_v42 }
  0xd2   : > { %v639_v30 = vpack.c.bf16 %v630_v2, %v629_v63 }
  0xd4   : > { %800 = vmatmul.mubr.bf16.gmra.mrb[4].mxu1 %v639_v30 }
 0x16f   : > { %v769_v29 = vpop.f32.mrb[0].mxu0 }
 0x170   : > { %v770_v56 = vadd.f32 %v891_v24, %v769_v29  ;;  %v771_v4 = vpop.f32.mrb[1].mxu0 }
 0x171   : > { %v772_v3 = vpop.f32.mrb[2].mxu0 }
 0x172   : > { %v808_v5 = vmax.f32 %v770_v56, 0.0  ;;  %v773_v13 = vadd.f32 %v891_v24, %v772_v3  ;;  %v774_v19 = vpop.f32.mrb[3].mxu0 }
 0x174   : > { %819 = vst.msk [vmem:[%s1648_s23] sm:$0xff] %vm818_vm13, %v808_v5  ;;  %v809_v6 = vmax.f32 %v773_v13, 0.0 }
 0x176   : > { %820 = vst.msk [vmem:[%s1648_s23 + $0x8] sm:$0xff] %vm818_vm13, %v809_v6 }
 0x186   : > { %v777_v41 = vpop.f32.mrb[4].mxu0 }
 0x187   : > { %v778_v31 = vadd.f32 %v891_v24, %v777_v41  ;;  %v779_v50 = vpop.f32.mrb[5].mxu0 }
 0x188   : > { %v780_v11 = vpop.f32.mrb[6].mxu0 }
 0x189   : > { %v810_v12 = vmax.f32 %v778_v31, 0.0  ;;  %v781_v15 = vadd.f32 %v891_v24, %v780_v11  ;;  %v782_v26 = vpop.f32.mrb[7].mxu0 }
 0x18b   : > { %821 = vst.msk [vmem:[%s1648_s23 + $0x10] sm:$0xff] %vm818_vm13, %v810_v12  ;;  %v811_v16 = vmax.f32 %v781_v15, 0.0  ;;  %v793_v27 = vpop.f32.mrb[0].mxu1 }
 0x18c   : > { %v794_v57 = vadd.f32 %v891_v24, %v793_v27  ;;  %v795_v18 = vpop.f32.mrb[1].mxu1 }
 0x18d   : > { %822 = vst.msk [vmem:[%s1648_s23 + $0x18] sm:$0xff] %vm818_vm13, %v811_v16  ;;  %v796_v14 = vpop.f32.mrb[2].mxu1 }
 0x18e   : > { %v814_v44 = vmax.f32 %v794_v57, 0.0  ;;  %v797_v7 = vadd.f32 %v891_v24, %v796_v14  ;;  %v798_v43 = vpop.f32.mrb[3].mxu1 }
 0x190   : > { %825 = vst.msk [vmem:[%s1648_s23 + $0x30] sm:$0xff] %vm818_vm13, %v814_v44  ;;  %v815_v17 = vmax.f32 %v797_v7, 0.0 }
 0x192   : > { %826 = vst.msk [vmem:[%s1648_s23 + $0x38] sm:$0xff] %vm818_vm13, %v815_v17 }
 0x1a2   : > { %v785_v8 = vpop.f32.mrb[8].mxu0 }
 0x1a3   : > { %v786_v20 = vadd.f32 %v891_v24, %v785_v8  ;;  %v787_v34 = vpop.f32.mrb[9].mxu0 }
 0x1a4   : > { %v788_v21 = vpop.f32.mrb[10].mxu0 }
 0x1a5   : > { %v812_v54 = vmax.f32 %v786_v20, 0.0  ;;  %v789_v35 = vadd.f32 %v891_v24, %v788_v21  ;;  %v790_v10 = vpop.f32.mrb[11].mxu0 }
 0x1a7   : > { %823 = vst.msk [vmem:[%s1648_s23 + $0x20] sm:$0xff] %vm818_vm13, %v812_v54  ;;  %v813_v38 = vmax.f32 %v789_v35, 0.0  ;;  %v801_v45 = vpop.f32.mrb[4].mxu1 }
 0x1a8   : > { %v802_v25 = vadd.f32 %v891_v24, %v801_v45  ;;  %v803_v51 = vpop.f32.mrb[5].mxu1 }
 0x1a9   : > { %824 = vst.msk [vmem:[%s1648_s23 + $0x28] sm:$0xff] %vm818_vm13, %v813_v38  ;;  %v804_v28 = vpop.f32.mrb[6].mxu1 }
 0x1aa   : > { %v816_v33 = vmax.f32 %v802_v25, 0.0  ;;  %v805_v49 = vadd.f32 %v891_v24, %v804_v28  ;;  %v806_v22 = vpop.f32.mrb[7].mxu1 }
 0x1ac   : > { %827 = vst.msk [vmem:[%s1648_s23 + $0x40] sm:$0xff] %vm818_vm13, %v816_v33  ;;  %v817_v23 = vmax.f32 %v805_v49, 0.0 }
 0x1ae   : > { %828 = vst.msk [vmem:[%s1648_s23 + $0x48] sm:$0xff] %vm818_vm13, %v817_v23 }
 0x1af PF: > { %s13_s12 = sadd.s32 1, %s1134_s12  }
 0x1b0   : > { %p10_p4 = scmp.ge.s32.totalorder %s13_s12, 4  }
 0x1b2   :  { %12 = sbr.rel (!%p10_p4) target bundleno = 1 (0x1), region = 62 }

// kernel: istt_nofold_forward.28
= control target key start
LH: loop header
LB: loop body
LE: loop exit
PB: predicated region body
PF: predicated region fallthrough
CT: control target
= control target key end

     0   :  { %s1285_s15 = smov 0   ;;  %s1821_s0 = inlined_call_operand.vmem [shape: f32[2,110,8], index: 0, kind: input, shape index: {}]   ;;  %s1822_s1 = inlined_call_operand.vmem [shape: f32[2,80,16], index: 1, kind: input, shape index: {}]   ;;  %s1823_s2 = inlined_call_operand.vmem [shape: bf16[72,16], index: 2, kind: input, shape index: {}]   ;;  %s1824_s3 = inlined_call_operand.vmem [shape: f32[1,16], index: 3, kind: input, shape index: {}]   ;;  %s1825_s4 = inlined_call_operand.vmem [shape: f32[2,80,16], index: 4, kind: output, shape index: {}]  }
   0x1 LB: > { %s946_s16 = sadd.s32 4294967295, %s1248_s15   ;;  %p950_p0 = scmp.ge.s32.totalorder %s1248_s15, 1  ;;  %s1248_s15 = sphi %s1285_s15, %s14_s15  }
   0x2   : > { %p172_p1 = scmp.lt.s32.totalorder %s1248_s15, 3 }
   0x4   : > { %p173_p2 = pnand %p950_p0, %p172_p1 }
   0x5   : > { %p203_p3 = scmp.lt.s32.totalorder (!%p173_p2), %s946_s16, 1  ;;  %v1237_v0 = vld [vmem:[%s1823_s2] sm:$0xff] (!%p173_p2)   ;;  %v1250_v1 = vmov (!%p173_p2), 0.0   ;;  %v1238_v2 = vld [vmem:[%s1823_s2 + $0x8] sm:$0xff] (!%p173_p2)   ;;  %vm295_vm0 = vcmask (!%p173_p2), 1045504   ;;  %vm243_vm1 = vcmask (!%p173_p2), 1046528  }
   0x6   : > { %176 = sbr.rel (%p173_p2) target bundleno = 439 (0x1b7), region = 36  ;;  %977 = vmatprep.subr.bf16.mxu0 (!%p173_p2), %v1250_v1  ;;  %1007 = vmatprep.subr.bf16.mxu1 (!%p173_p2), %v1250_v1  ;;  %vm380_vm2 = vcmask (!%p173_p2), 1044480   ;;  %vm432_vm3 = vcmask (!%p173_p2), 1043456   ;;  %vm569_vm4 = vcmask (!%p173_p2), 1041408   ;;  %v1239_v25 = vld [vmem:[%s1823_s2 + $0x10] sm:$0xff] (!%p173_p2)   ;;  %s1251_s27 = smov (!%p173_p2), 24  }
   0x7   : > { %978 = vmatpush3.bf16.msra.mxu0 (!%p173_p2), %v1237_v0  ;;  %1012 = vmatpush3.bf16.msra.mxu1 (!%p173_p2), %v1237_v0  ;;  %v1240_v34 = vld [vmem:[%s1823_s2 + $0x18] sm:$0xff] (!%p173_p2)   ;;  %s1252_s30 = smov (!%p173_p2), 8   ;;  %vm517_vm5 = vcmask (!%p173_p2), 1042432   ;;  %s1253_s5 = smov (!%p173_p2), 32   ;;  %vm1259_vm6 = vmmov (!%p173_p2), 0   ;;  %vm621_vm7 = vcmask (!%p173_p2), 64512  }
   0x8   : > { %979 = vmatprep.subr.bf16.mxu0 (!%p173_p2), %v1250_v1  ;;  %1008 = vmatprep.subr.bf16.mxu1 (!%p173_p2), %v1250_v1  ;;  %s1254_s6 = smov (!%p173_p2), 16   ;;  %s1255_s7 = smov (!%p173_p2), 48   ;;  %vm632_vm8 = vcmask (!%p173_p2), 130048   ;;  %vm643_vm9 = vcmask (!%p173_p2), 195584   ;;  %vm654_vm10 = vcmask (!%p173_p2), 261120   ;;  %vm665_vm11 = vcmask (!%p173_p2), 326656  }
   0x9   : > { %s1256_s8 = smov (!%p173_p2), 40   ;;  %s1257_s9 = smov (!%p173_p2), 64   ;;  %987 = vmatprep.mubr.msk.bf16.mxu0 (!%p173_p2), %vm1259_vm6, %v1250_v1  ;;  %999 = vmatprep.mubr.msk.bf16.mxu1 (!%p173_p2), %vm1259_vm6, %v1250_v1  ;;  %vm676_vm12 = vcmask (!%p173_p2), 392192   ;;  %vm687_vm13 = vcmask (!%p173_p2), 457728   ;;  %vm698_vm14 = vcmask (!%p173_p2), 523264   ;;  %vm757_vm15 = vcmask (!%p173_p2), 588800  }
   0xa   : > { %s1258_s10 = smov (!%p173_p2), 56  }
   0xb   : > { %980 = vmatpush3.bf16.msra.mxu0 (!%p173_p2), %v1238_v2  ;;  %1013 = vmatpush3.bf16.msra.mxu1 (!%p173_p2), %v1238_v2 }
   0xc   : > { %981 = vmatprep.subr.bf16.mxu0 (!%p173_p2), %v1250_v1  ;;  %1009 = vmatprep.subr.bf16.mxu1 (!%p173_p2), %v1250_v1 }
   0xd   : > { %s1827_s16 = smov (!%p203_p3, %s946_s16), 1 }
   0xe   : > { %s1017_s19 = smul.u32 112, %s1827_s16 }
   0xf   : > { %982 = vmatpush3.bf16.msra.mxu0 %v1239_v25  ;;  %1014 = vmatpush3.bf16.msra.mxu1 %v1239_v25  ;;  %s1018_s13 = smul.u32 80, %s1827_s16 }
  0x10   : > { %s1309_s24 = scalar_lea.vmem %s1821_s0, %s1017_s19  ;;  %983 = vmatprep.subr.bf16.mxu0 %v1250_v1  ;;  %1010 = vmatprep.subr.bf16.mxu1 %v1250_v1 }
  0x11   : > { %v1312_v3 = vld [vmem:[%s1309_s24 + $0x10] sm:$0xff]  ;;  %v1315_v4 = vld [vmem:[%s1309_s24 + $0x18] sm:$0xff]  ;;  %v1320_v7 = vld [vmem:[%s1309_s24 + $0x8] sm:$0xff]  ;;  %s1778_s18 = scalar_lea.vmem %s1822_s1, %s1018_s13  ;;  %s1787_s16 = scalar_lea.vmem %s1825_s4, %s1018_s13 }
  0x12   : > { %v299_v5 = vrot.slane %v1312_v3, 2  ;;  %v301_v6 = vrot.slane %v1315_v4, 2  ;;  %v1323_v8 = vld [vmem:[%s1309_s24] sm:$0xff]  ;;  %v247_v9 = vrot.slane %v1312_v3, 1  ;;  %v297_v10 = vrot.slane %v1320_v7, 2  ;;  %v1372_v39 = vld [vmem:[%s1309_s24 + $0x30] sm:$0xff] }
  0x13   : > { %v296_v11 = vrot.slane %v1323_v8, 2  ;;  %v244_v12 = vrot.slane %v1323_v8, 1  ;;  %v245_v13 = vrot.slane %v1320_v7, 1  ;;  %v381_v15 = vrot.slane %v1320_v7, 3  ;;  %v1340_v17 = vld [vmem:[%s1309_s24 + $0x20] sm:$0xff]  ;;  %v1375_v40 = vld [vmem:[%s1309_s24 + $0x38] sm:$0xff]  ;;  %984 = vmatpush3.bf16.msra.mxu0 %v1240_v34  ;;  %1015 = vmatpush3.bf16.msra.mxu1 %v1240_v34 }
  0x14   : > { %v1335_v14 = vsel %vm295_vm0, %v299_v5, %v301_v6  ;;  %v382_v16 = vrot.slane %v1312_v3, 3  ;;  %v300_v18 = vsel %vm295_vm0, %v297_v10, %v299_v5  ;;  %v384_v27 = vrot.slane %v1315_v4, 3  ;;  %v1385_v44 = vld [vmem:[%s1309_s24 + $0x40] sm:$0xff]  ;;  %985 = vmatprep.subr.bf16.mxu0 %v1250_v1  ;;  %1011 = vmatprep.subr.bf16.mxu1 %v1250_v1 }
  0x15   : > { %v298_v19 = vsel %vm295_vm0, %v296_v11, %v297_v10  ;;  %v246_v20 = vsel %vm243_vm1, %v244_v12, %v245_v13  ;;  %v1047_v21 = vpack.i.bf16 %v1335_v14, %v300_v18  ;;  %v248_v23 = vsel %vm243_vm1, %v245_v13, %v247_v9  ;;  %v1427_v11 = vld [vmem:[%s1309_s24 + $0x48] sm:$0xff] }
  0x16   : > { %v1042_v22 = vpack.i.bf16 %v300_v18, %v298_v19  ;;  %v383_v24 = vsel %vm380_vm2, %v381_v15, %v382_v16  ;;  %v1037_v26 = vpack.i.bf16 %v248_v23, %v246_v20  ;;  %v434_v28 = vrot.slane %v1312_v3, 4  ;;  %v1430_v12 = vld [vmem:[%s1309_s24 + $0x28] sm:$0xff] }
  0x17   : > { %v436_v29 = vrot.slane %v1315_v4, 4  ;;  %1048 = vrot.lane.b32.xlu1 %v1047_v21, %s1251_s27  ;;  %v438_v30 = vrot.slane %v1340_v17, 4  ;;  %v433_v31 = vrot.slane %v1320_v7, 4  ;;  %v570_v32 = vrot.slane %v1312_v3, 6 }
  0x18   : > { %v571_v33 = vrot.slane %v1315_v4, 6  ;;  %1038 = vrot.lane.b32.xlu0 %v1037_v26, %s1252_s30  ;;  %v385_v35 = vsel %vm380_vm2, %v382_v16, %v384_v27  ;;  %v573_v37 = vrot.slane %v1340_v17, 6  ;;  %v518_v38 = vrot.slane %v1312_v3, 5 }
  0x19   : > { %v437_v36 = vsel %vm432_vm3, %v434_v28, %v436_v29  ;;  %v1052_v41 = vpack.i.bf16 %v385_v35, %v383_v24  ;;  %v1381_v42 = vsel %vm432_vm3, %v436_v29, %v438_v30  ;;  %v435_v43 = vsel %vm432_vm3, %v433_v31, %v434_v28 }
  0x1a   : > { %v1062_v45 = vpack.i.bf16 %v1381_v42, %v437_v36  ;;  %v1057_v46 = vpack.i.bf16 %v437_v36, %v435_v43  ;;  %v572_v47 = vsel %vm569_vm4, %v570_v32, %v571_v33  ;;  %v519_v48 = vrot.slane %v1315_v4, 5 }
  0x1b   : > { %1053 = vrot.lane.b32.xlu1 %v1052_v41, %s1253_s5  ;;  %v574_v49 = vsel %vm569_vm4, %v571_v33, %v573_v37  ;;  %v521_v50 = vrot.slane %v1340_v17, 5  ;;  %v255_v51 = vrot.slane %v1372_v39, 1  ;;  %v257_v52 = vrot.slane %v1375_v40, 1 }
  0x1c   : > { %1043 = vrot.lane.b32.xlu0 %v1042_v22, %s1254_s6  ;;  %v520_v53 = vsel %vm517_vm5, %v518_v38, %v519_v48  ;;  %v259_v54 = vrot.slane %v1385_v44, 1  ;;  %v249_v55 = vrot.slane %v1315_v4, 1  ;;  %v251_v56 = vrot.slane %v1340_v17, 1  ;;  %v1478_v38 = vld [vmem:[%s1309_s24 + $0x50] sm:$0xff] }
  0x1d   : > { %v522_v57 = vsel %vm517_vm5, %v519_v48, %v521_v50  ;;  %v1072_v58 = vpack.i.bf16 %v574_v49, %v572_v47  ;;  %v258_v60 = vsel %vm243_vm1, %v255_v51, %v257_v52  ;;  %v307_v61 = vrot.slane %v1372_v39, 2 }
  0x1e   : > { %v1067_v59 = vpack.i.bf16 %v522_v57, %v520_v53  ;;  %v309_v62 = vrot.slane %v1375_v40, 2  ;;  %v260_v63 = vsel %vm243_vm1, %v257_v52, %v259_v54  ;;  %v250_v0 = vsel %vm243_vm1, %v247_v9, %v249_v55 }
  0x1f   : > { %1063 = vrot.lane.b32.xlu1 %v1062_v45, %s1255_s7  ;;  %v252_v2 = vsel %vm243_vm1, %v249_v55, %v251_v56  ;;  %v311_v5 = vrot.slane %v1385_v44, 2  ;;  %v303_v10 = vrot.slane %v1340_v17, 2  ;;  %v1082_v13 = vpack.i.bf16 %v260_v63, %v258_v60 }
  0x20   : > { %1058 = vrot.lane.b32.xlu0 %v1057_v46, %s1256_s8  ;;  %v1077_v15 = vpack.i.bf16 %v252_v2, %v250_v0  ;;  %v1437_v9 = vsel %vm295_vm0, %v307_v61, %v309_v62  ;;  %v313_v18 = vrot.slane %v1427_v11, 2  ;;  %v305_v19 = vrot.slane %v1430_v12, 2 }
  0x21   : > { %v312_v16 = vsel %vm295_vm0, %v309_v62, %v311_v5  ;;  %v304_v20 = vsel %vm295_vm0, %v301_v6, %v303_v10  ;;  %v392_v22 = vrot.slane %v1375_v40, 3  ;;  %v394_v23 = vrot.slane %v1385_v44, 3 }
  0x22   : > { %v1092_v21 = vpack.i.bf16 %v312_v16, %v1437_v9  ;;  %v1087_v24 = vpack.i.bf16 %v304_v20, %v1335_v14  ;;  %v1454_v25 = vsel %vm295_vm0, %v311_v5, %v313_v18  ;;  %v1459_v6 = vsel %vm295_vm0, %v303_v10, %v305_v19 }
  0x23   : > { %1073 = vrot.lane.b32.xlu1 %v1072_v58, %s1257_s9  ;;  %v396_v26 = vrot.slane %v1427_v11, 3  ;;  %v386_v28 = vrot.slane %v1340_v17, 3  ;;  %v388_v29 = vrot.slane %v1430_v12, 3  ;;  %v1102_v14 = vpack.i.bf16 %v1454_v25, %v312_v16  ;;  %v1533_v16 = vld [vmem:[%s1309_s24 + $0x60] sm:$0xff] }
  0x24   : > { %1068 = vrot.lane.b32.xlu0 %v1067_v59, %s1258_s10  ;;  %v1097_v31 = vpack.i.bf16 %v1459_v6, %v304_v20  ;;  %v395_v32 = vsel %vm380_vm2, %v392_v22, %v394_v23  ;;  %v444_v34 = vrot.slane %v1375_v40, 4  ;;  %v446_v35 = vrot.slane %v1385_v44, 4 }
  0x25   : > { %v397_v33 = vsel %vm380_vm2, %v394_v23, %v396_v26  ;;  %v448_v36 = vrot.slane %v1427_v11, 4  ;;  %v387_v41 = vsel %vm380_vm2, %v384_v27, %v386_v28  ;;  %v389_v43 = vsel %vm380_vm2, %v386_v28, %v388_v29  ;;  %v1241_v28 = vld [vmem:[%s1823_s2 + $0x20] ss:$0 sps:$4 sm:$0xff]  }
  0x26   : > { %v440_v45 = vrot.slane %v1430_v12, 4  ;;  %v1112_v46 = vpack.i.bf16 %v397_v33, %v395_v32  ;;  %v450_v47 = vrot.slane %v1478_v38, 4  ;;  %v1107_v48 = vpack.i.bf16 %v389_v43, %v387_v41 }
  0x27   : > { %1083 = vrot.lane.b32.xlu1 %v1082_v13, %s1252_s30  ;;  %v1493_v49 = vsel %vm432_vm3, %v444_v34, %v446_v35  ;;  %v449_v27 = vsel %vm432_vm3, %v446_v35, %v448_v36  ;;  %v442_v53 = vrot.slane %v1372_v39, 4  ;;  %v529_v55 = vrot.slane %v1385_v44, 5 }
  0x28   : > { %1078 = vrot.lane.b32.xlu0 %v1077_v15, %s1252_s30  ;;  %v441_v52 = vsel %vm432_vm3, %v438_v30, %v440_v45  ;;  %v1122_v57 = vpack.i.bf16 %v449_v27, %v1493_v49  ;;  %v1506_v58 = vsel %vm432_vm3, %v448_v36, %v450_v47  ;;  %v531_v59 = vrot.slane %v1427_v11, 5  ;;  %v1530_v15 = vld [vmem:[%s1309_s24 + $0x58] sm:$0xff] }
  0x29   : > { %v533_v60 = vrot.slane %v1478_v38, 5  ;;  %v1117_v30 = vpack.i.bf16 %v441_v52, %v1381_v42  ;;  %v1515_v62 = vsel %vm432_vm3, %v440_v45, %v442_v53  ;;  %v523_v63 = vrot.slane %v1430_v12, 5 }
  0x2a   : > { %v525_v0 = vrot.slane %v1372_v39, 5  ;;  %v1132_v2 = vpack.i.bf16 %v1506_v58, %v449_v27  ;;  %v532_v5 = vsel %vm517_vm5, %v529_v55, %v531_v59  ;;  %v581_v10 = vrot.slane %v1385_v44, 6 }
  0x2b   : > { %1093 = vrot.lane.b32.xlu1 %v1092_v21, %s1254_s6  ;;  %v534_v42 = vsel %vm517_vm5, %v531_v59, %v533_v60  ;;  %v583_v13 = vrot.slane %v1427_v11, 6  ;;  %v1127_v20 = vpack.i.bf16 %v1515_v62, %v441_v52  ;;  %v585_v21 = vrot.slane %v1478_v38, 6 }
  0x2c   : > { %1088 = vrot.lane.b32.xlu0 %v1087_v24, %s1254_s6  ;;  %v587_v23 = vrot.slane %v1530_v15, 6  ;;  %v589_v24 = vrot.slane %v1533_v16, 6  ;;  %v575_v32 = vrot.slane %v1430_v12, 6  ;;  %v577_v33 = vrot.slane %v1372_v39, 6 }
  0x2d   : > { %v1142_v35 = vpack.i.bf16 %v534_v42, %v532_v5  ;;  %v261_v43 = vrot.slane %v1427_v11, 1  ;;  %v263_v45 = vrot.slane %v1478_v38, 1  ;;  %v586_v27 = vsel %vm569_vm4, %v583_v13, %v585_v21 }
  0x2e   : > { %v1552_v36 = vsel %vm569_vm4, %v585_v21, %v587_v23  ;;  %v1555_v41 = vsel %vm569_vm4, %v587_v23, %v589_v24  ;;  %v774_v52 = vsel %vm432_vm3, %v1241_v28, 0  ;;  %v578_v59 = vsel %vm569_vm4, %v575_v32, %v577_v33 }
  0x2f   : > { %1103 = vrot.lane.b32.xlu1 %v1102_v14, %s1251_s27  ;;  %v524_v14 = vsel %vm517_vm5, %v521_v50, %v523_v63  ;;  %v584_v50 = vsel %vm569_vm4, %v581_v10, %v583_v13  ;;  %986 = vmatpush3.bf16.msra.mxu0 %v774_v52  ;;  %v264_v5 = vsel %vm243_vm1, %v261_v43, %v263_v45  ;;  %v315_v42 = vrot.slane %v1478_v38, 2 }
  0x30   : > { %1098 = vrot.lane.b32.xlu0 %v1097_v31, %s1251_s27  ;;  %v526_v31 = vsel %vm517_vm5, %v523_v63, %v525_v0  ;;  %1016 = vmatpush3.bf16.msra.mxu1 %v774_v52  ;;  %v1152_v63 = vpack.i.bf16 %v586_v27, %v584_v50  ;;  %v348_v24 = vrot.slane %v1530_v15, 2 }
  0x33   : > { %1113 = vrot.lane.b32.xlu1 %v1112_v46, %s1253_s5  ;;  %v1232_v46 = vpack.i.bf16 %v1555_v41, %v1552_v36 }
  0x34   : > { %1108 = vrot.lane.b32.xlu0 %v1107_v48, %s1253_s5  ;;  %v1137_v48 = vpack.i.bf16 %v526_v31, %v524_v14  ;;  %v349_v14 = vsel %vm295_vm0, %v315_v42, %v348_v24  ;;  %v400_v31 = vrot.slane %v1530_v15, 3 }
  0x37   : > { %1123 = vrot.lane.b32.xlu1 %v1122_v57, %s1256_s8  ;;  %v576_v57 = vsel %vm569_vm4, %v573_v37, %v575_v32  ;;  %v390_v32 = vrot.slane %v1372_v39, 3 }
  0x38   : > { %1118 = vrot.lane.b32.xlu0 %v1117_v30, %s1256_s8  ;;  %v253_v30 = vrot.slane %v1430_v12, 1  ;;  %v1147_v37 = vpack.i.bf16 %v578_v59, %v576_v57  ;;  %v537_v57 = vrot.slane %v1533_v16, 5  ;;  %v527_v59 = vrot.slane %v1375_v40, 5 }
  0x39   : > { %v391_v50 = vsel %vm380_vm2, %v388_v29, %v390_v32  ;;  %v445_v29 = vsel %vm432_vm3, %v442_v53, %v444_v34 }
  0x3a   : > { %v254_v13 = vsel %vm243_vm1, %v251_v56, %v253_v30  ;;  %v308_v56 = vsel %vm295_vm0, %v305_v19, %v307_v61  ;;  %v1197_v27 = vpack.i.bf16 %v445_v29, %v1515_v62  ;;  %v1207_v34 = vpack.i.bf16 %v1493_v49, %v445_v29 }
  0x3b   : > { %1133 = vrot.lane.b32.xlu1 %v1132_v2, %s1255_s7  ;;  %v262_v2 = vsel %vm243_vm1, %v259_v54, %v261_v43  ;;  %v316_v54 = vsel %vm295_vm0, %v313_v18, %v315_v42  ;;  %v1167_v28 = vpack.i.bf16 %v308_v56, %v1459_v6  ;;  %v398_v18 = vrot.slane %v1478_v38, 3 }
  0x3c   : > { %1128 = vrot.lane.b32.xlu0 %v1127_v20, %s1255_s7  ;;  %v256_v20 = vsel %vm243_vm1, %v253_v30, %v255_v51  ;;  %v1162_v21 = vpack.i.bf16 %v264_v5, %v262_v2  ;;  %v1172_v51 = vpack.i.bf16 %v316_v54, %v1454_v25  ;;  %v1177_v61 = vpack.i.bf16 %v1437_v9, %v308_v56 }
  0x3d   : > { %v1157_v23 = vpack.i.bf16 %v256_v20, %v254_v13  ;;  %v399_v19 = vsel %vm380_vm2, %v396_v26, %v398_v18  ;;  %v401_v25 = vsel %vm380_vm2, %v398_v18, %v400_v31  ;;  %v452_v6 = vrot.slane %v1530_v15, 4 }
  0x3e   : > { %v393_v43 = vsel %vm380_vm2, %v390_v32, %v392_v22  ;;  %v1192_v45 = vpack.i.bf16 %v401_v25, %v399_v19  ;;  %v528_v62 = vsel %vm517_vm5, %v525_v0, %v527_v59 }
  0x3f   : > { %1143 = vrot.lane.b32.xlu1 %v1142_v35, %s1258_s10  ;;  %v1182_v35 = vpack.i.bf16 %v349_v14, %v316_v54  ;;  %v1187_v9 = vpack.i.bf16 %v393_v43, %v391_v50  ;;  %v453_v26 = vsel %vm432_vm3, %v450_v47, %v452_v6  ;;  %v535_v47 = vrot.slane %v1530_v15, 5 }
  0x40   : > { %1138 = vrot.lane.b32.xlu0 %v1137_v48, %s1258_s10  ;;  %v485_v48 = vrot.slane %v1533_v16, 4  ;;  %v1202_v22 = vpack.i.bf16 %v453_v26, %v1506_v58  ;;  %v530_v15 = vsel %vm517_vm5, %v527_v59, %v529_v55  ;;  %v579_v16 = vrot.slane %v1375_v40, 6 }
  0x41   : > { %v536_v53 = vsel %vm517_vm5, %v533_v60, %v535_v47  ;;  %v538_v58 = vsel %vm517_vm5, %v535_v47, %v537_v57  ;;  %v1217_v38 = vpack.i.bf16 %v530_v15, %v528_v62 }
  0x42   : > { %v486_v52 = vsel %vm432_vm3, %v452_v6, %v485_v48  ;;  %v580_v49 = vsel %vm569_vm4, %v577_v33, %v579_v16  ;;  %v582_v60 = vsel %vm569_vm4, %v579_v16, %v581_v10 }
  0x43   : > { %1153 = vrot.lane.b32.xlu1 %v1152_v63, %s1257_s9  ;;  %v1212_v30 = vpack.i.bf16 %v486_v52, %v453_v26  ;;  %v1222_v63 = vpack.i.bf16 %v538_v58, %v536_v53  ;;  %v1227_v55 = vpack.i.bf16 %v582_v60, %v580_v49 }
  0x44   : > { %1148 = vrot.lane.b32.xlu0 %v1147_v37, %s1257_s9 }
  0x47   : > { %1163 = vrot.lane.b32.xlu1 %v1162_v21, %s1252_s30 }
  0x48   : > { %1158 = vrot.lane.b32.xlu0 %v1157_v23, %s1252_s30 }
  0x4b   : > { %1173 = vrot.lane.b32.xlu1 %v1172_v51, %s1254_s6 }
  0x4c   : > { %1168 = vrot.lane.b32.xlu0 %v1167_v28, %s1254_s6 }
  0x4f   : > { %1183 = vrot.lane.b32.xlu1 %v1182_v35, %s1251_s27 }
  0x50   : > { %1178 = vrot.lane.b32.xlu0 %v1177_v61, %s1251_s27 }
  0x53   : > { %1193 = vrot.lane.b32.xlu1 %v1192_v45, %s1253_s5 }
  0x54   : > { %1188 = vrot.lane.b32.xlu0 %v1187_v9, %s1253_s5 }
  0x57   : > { %1203 = vrot.lane.b32.xlu1 %v1202_v22, %s1256_s8 }
  0x58   : > { %1198 = vrot.lane.b32.xlu0 %v1197_v27, %s1256_s8 }
  0x5b   : > { %1213 = vrot.lane.b32.xlu1 %v1212_v30, %s1255_s7 }
  0x5c   : > { %1208 = vrot.lane.b32.xlu0 %v1207_v34, %s1255_s7 }
  0x5f   : > { %1223 = vrot.lane.b32.xlu1 %v1222_v63, %s1258_s10 }
  0x60   : > { %1218 = vrot.lane.b32.xlu0 %v1217_v38, %s1258_s10 }
  0x63   : > { %1233 = vrot.lane.b32.xlu1 %v1232_v46, %s1257_s9 }
  0x64   : > { %1228 = vrot.lane.b32.xlu0 %v1227_v55, %s1257_s9 }
  0x89   : > { %v1049_v0 = vpop.permute.xlu1 %1048 }
  0x8a   : > { %v1039_v37 = vpop.permute.xlu0 %1038  ;;  %v1051_v20 = vunpack.i.h.bf16 %v1049_v0  ;;  %v1050_v21 = vunpack.i.l.bf16 %v1049_v0 }
  0x8b   : > { %v1041_v2 = vunpack.i.h.bf16 %v1039_v37  ;;  %v1040_v33 = vunpack.i.l.bf16 %v1039_v37 }
  0x8d   : > { %v1054_v5 = vpop.permute.xlu1 %1053  ;;  %v623_v36 = vsel %vm621_vm7, %v1320_v7, %v1041_v2  ;;  %v622_v41 = vsel %vm621_vm7, %v1323_v8, %v1040_v33 }
  0x8e   : > { %v1044_v10 = vpop.permute.xlu0 %1043  ;;  %v1056_v46 = vunpack.i.h.bf16 %v1054_v5  ;;  %v1055_v23 = vunpack.i.l.bf16 %v1054_v5 }
  0x8f   : > { %v1046_v42 = vunpack.i.h.bf16 %v1044_v10  ;;  %v1045_v13 = vunpack.i.l.bf16 %v1044_v10 }
  0x91   : > { %v633_v54 = vsel %vm632_vm8, %v622_v41, %v1045_v13  ;;  %v634_v24 = vsel %vm632_vm8, %v623_v36, %v1046_v42  ;;  %v1064_v56 = vpop.permute.xlu1 %1063 }
  0x92   : > { %v644_v51 = vsel %vm643_vm9, %v633_v54, %v1050_v21  ;;  %v645_v28 = vsel %vm643_vm9, %v634_v24, %v1051_v20  ;;  %v1059_v14 = vpop.permute.xlu0 %1058  ;;  %v1066_v8 = vunpack.i.h.bf16 %v1064_v56  ;;  %v1065_v35 = vunpack.i.l.bf16 %v1064_v56 }
  0x93   : > { %v1061_v18 = vunpack.i.h.bf16 %v1059_v14  ;;  %v1060_v31 = vunpack.i.l.bf16 %v1059_v14  ;;  %v655_v7 = vsel %vm654_vm10, %v644_v51, %v1055_v23  ;;  %v656_v32 = vsel %vm654_vm10, %v645_v28, %v1056_v46 }
  0x95   : > { %v666_v61 = vsel %vm665_vm11, %v655_v7, %v1060_v31  ;;  %v667_v19 = vsel %vm665_vm11, %v656_v32, %v1061_v18  ;;  %v1074_v25 = vpop.permute.xlu1 %1073 }
  0x96   : > { %v1076_v6 = vunpack.i.h.bf16 %v1074_v25  ;;  %v1075_v50 = vunpack.i.l.bf16 %v1074_v25  ;;  %v1069_v43 = vpop.permute.xlu0 %1068  ;;  %v677_v26 = vsel %vm676_vm12, %v666_v61, %v1065_v35  ;;  %v678_v48 = vsel %vm676_vm12, %v667_v19, %v1066_v8 }
  0x97   : > { %v1071_v45 = vunpack.i.h.bf16 %v1069_v43  ;;  %v1070_v9 = vunpack.i.l.bf16 %v1069_v43 }
  0x99   : > { %v688_v29 = vsel %vm687_vm13, %v677_v26, %v1070_v9  ;;  %v689_v22 = vsel %vm687_vm13, %v678_v48, %v1071_v45  ;;  %v1084_v27 = vpop.permute.xlu1 %1083 }
  0x9a   : > { %v1079_v52 = vpop.permute.xlu0 %1078  ;;  %v699_v47 = vsel %vm698_vm14, %v688_v29, %v1075_v50  ;;  %v700_v57 = vsel %vm698_vm14, %v689_v22, %v1076_v6  ;;  %v1086_v16 = vunpack.i.h.bf16 %v1084_v27  ;;  %v1085_v63 = vunpack.i.l.bf16 %v1084_v27 }
  0x9b   : > { %v709_v59 = vpack.c.bf16 %v700_v57, %v699_v47  ;;  %v1081_v38 = vunpack.i.h.bf16 %v1079_v52  ;;  %v1080_v49 = vunpack.i.l.bf16 %v1079_v52 }
  0x9c   : > { %v629_v42 = vsel %vm621_vm7, %v1375_v40, %v1086_v16  ;;  %v628_v13 = vsel %vm621_vm7, %v1372_v39, %v1085_v63 }
  0x9d   : > { %988 = vmatmul.mubr.msk.bf16.vlgmr.msra.gmra.mrb[0].mxu0 %vm757_vm15, %v709_v59  ;;  %v1094_v30 = vpop.permute.xlu1 %1093  ;;  %v625_v36 = vsel %vm621_vm7, %v1315_v4, %v1081_v38  ;;  %v624_v41 = vsel %vm621_vm7, %v1312_v3, %v1080_v49 }
  0x9e   : > { %v1089_v34 = vpop.permute.xlu0 %1088  ;;  %991 = vmatprep.mubr.msk.bf16.mxu0 %vm1259_vm6, %v1250_v1  ;;  %v1096_v60 = vunpack.i.h.bf16 %v1094_v30  ;;  %v1095_v55 = vunpack.i.l.bf16 %v1094_v30 }
  0x9f   : > { %v1091_v37 = vunpack.i.h.bf16 %v1089_v34  ;;  %v1090_v2 = vunpack.i.l.bf16 %v1089_v34 }
  0xa0   : > { %v639_v46 = vsel %vm632_vm8, %v628_v13, %v1095_v55  ;;  %v640_v23 = vsel %vm632_vm8, %v629_v42, %v1096_v60 }
  0xa1   : > { %v1104_v53 = vpop.permute.xlu1 %1103  ;;  %v635_v24 = vsel %vm632_vm8, %v624_v41, %v1090_v2  ;;  %v636_v40 = vsel %vm632_vm8, %v625_v36, %v1091_v37 }
  0xa2   : > { %v1099_v58 = vpop.permute.xlu0 %1098  ;;  %v1106_v5 = vunpack.i.h.bf16 %v1104_v53  ;;  %v1105_v10 = vunpack.i.l.bf16 %v1104_v53 }
  0xa3   : > { %v1101_v20 = vunpack.i.h.bf16 %v1099_v58  ;;  %v1100_v21 = vunpack.i.l.bf16 %v1099_v58 }
  0xa4   : > { %v650_v28 = vsel %vm643_vm9, %v639_v46, %v1105_v10  ;;  %v651_v14 = vsel %vm643_vm9, %v640_v23, %v1106_v5 }
  0xa5   : > { %v1114_v62 = vpop.permute.xlu1 %1113  ;;  %v646_v3 = vsel %vm643_vm9, %v635_v24, %v1100_v21  ;;  %v647_v31 = vsel %vm643_vm9, %v636_v40, %v1101_v20 }
  0xa6   : > { %v1109_v15 = vpop.permute.xlu0 %1108  ;;  %v1116_v56 = vunpack.i.h.bf16 %v1114_v62  ;;  %v1115_v51 = vunpack.i.l.bf16 %v1114_v62 }
  0xa7   : > { %v1111_v4 = vunpack.i.h.bf16 %v1109_v15  ;;  %v1110_v18 = vunpack.i.l.bf16 %v1109_v15 }
  0xa8   : > { %v661_v6 = vsel %vm654_vm10, %v650_v28, %v1115_v51  ;;  %v662_v50 = vsel %vm654_vm10, %v651_v14, %v1116_v56 }
  0xa9   : > { %v1124_v0 = vpop.permute.xlu1 %1123  ;;  %v657_v26 = vsel %vm654_vm10, %v646_v3, %v1110_v18  ;;  %v658_v48 = vsel %vm654_vm10, %v647_v31, %v1111_v4 }
  0xaa   : > { %v1119_v33 = vpop.permute.xlu0 %1118  ;;  %v1126_v7 = vunpack.i.h.bf16 %v1124_v0  ;;  %v1125_v32 = vunpack.i.l.bf16 %v1124_v0 }
  0xab   : > { %v1121_v8 = vunpack.i.h.bf16 %v1119_v33  ;;  %v1120_v35 = vunpack.i.l.bf16 %v1119_v33 }
  0xac   : > { %v672_v27 = vsel %vm665_vm11, %v661_v6, %v1125_v32  ;;  %v673_v52 = vsel %vm665_vm11, %v662_v50, %v1126_v7 }
  0xad   : > { %v1134_v54 = vpop.permute.xlu1 %1133  ;;  %v668_v59 = vsel %vm665_vm11, %v657_v26, %v1120_v35  ;;  %v669_v30 = vsel %vm665_vm11, %v658_v48, %v1121_v8 }
  0xae   : > { %v1129_v39 = vpop.permute.xlu0 %1128  ;;  %v1136_v61 = vunpack.i.h.bf16 %v1134_v54  ;;  %v1135_v19 = vunpack.i.l.bf16 %v1134_v54 }
  0xaf   : > { %v1131_v43 = vunpack.i.h.bf16 %v1129_v39  ;;  %v1130_v45 = vunpack.i.l.bf16 %v1129_v39 }
  0xb0   : > { %v683_v34 = vsel %vm676_vm12, %v672_v27, %v1135_v19  ;;  %v684_v53 = vsel %vm676_vm12, %v673_v52, %v1136_v61 }
  0xb1   : > { %v1144_v25 = vpop.permute.xlu1 %1143  ;;  %v679_v62 = vsel %vm676_vm12, %v668_v59, %v1130_v45  ;;  %v680_v15 = vsel %vm676_vm12, %v669_v30, %v1131_v43 }
  0xb2   : > { %v1139_v9 = vpop.permute.xlu0 %1138  ;;  %v1146_v29 = vunpack.i.h.bf16 %v1144_v25  ;;  %v1145_v22 = vunpack.i.l.bf16 %v1144_v25 }
  0xb3   : > { %v1141_v47 = vunpack.i.h.bf16 %v1139_v9  ;;  %v1140_v57 = vunpack.i.l.bf16 %v1139_v9 }
  0xb4   : > { %v694_v49 = vsel %vm687_vm13, %v683_v34, %v1145_v22  ;;  %v695_v60 = vsel %vm687_vm13, %v684_v53, %v1146_v29 }
  0xb5   : > { %v1154_v58 = vpop.permute.xlu1 %1153  ;;  %v690_v37 = vsel %vm687_vm13, %v679_v62, %v1140_v57  ;;  %v691_v2 = vsel %vm687_vm13, %v680_v15, %v1141_v47 }
  0xb6   : > { %v1156_v16 = vunpack.i.h.bf16 %v1154_v58  ;;  %v1155_v63 = vunpack.i.l.bf16 %v1154_v58  ;;  %v1149_v38 = vpop.permute.xlu0 %1148 }
  0xb7   : > { %v1151_v55 = vunpack.i.h.bf16 %v1149_v38  ;;  %v1150_v0 = vunpack.i.l.bf16 %v1149_v38 }
  0xb8   : > { %v705_v33 = vsel %vm698_vm14, %v694_v49, %v1155_v63  ;;  %v706_v5 = vsel %vm698_vm14, %v695_v60, %v1156_v16 }
  0xb9   : > { %v712_v10 = vpack.c.bf16 %v706_v5, %v705_v33  ;;  %v701_v42 = vsel %vm698_vm14, %v690_v37, %v1150_v0  ;;  %v702_v13 = vsel %vm698_vm14, %v691_v2, %v1151_v55  ;;  %v1164_v20 = vpop.permute.xlu1 %1163 }
  0xba   : > { %v710_v21 = vpack.c.bf16 %v702_v13, %v701_v42  ;;  %v1159_v36 = vpop.permute.xlu0 %1158  ;;  %v1166_v56 = vunpack.i.h.bf16 %v1164_v20  ;;  %v1165_v51 = vunpack.i.l.bf16 %v1164_v20 }
  0xbb   : > { %1000 = vmatmul.mubr.msk.bf16.vlgmr.msra.gmra.mrb[0].mxu1 %vm757_vm15, %v712_v10  ;;  %v1161_v39 = vunpack.i.h.bf16 %v1159_v36  ;;  %v1160_v28 = vunpack.i.l.bf16 %v1159_v36 }
  0xbc   : > { %992 = vmatmul.mubr.msk.bf16.gmra.mrb[4].mxu0 %vm757_vm15, %v710_v21  ;;  %1003 = vmatprep.mubr.msk.bf16.mxu1 %vm1259_vm6, %v1250_v1  ;;  %v630_v35 = vsel %vm621_vm7, %v1385_v44, %v1165_v51 }
  0xbd   : > { %v1174_v41 = vpop.permute.xlu1 %1173  ;;  %995 = vmatprep.mubr.msk.bf16.mxu0 %vm1259_vm6, %v1250_v1  ;;  %v631_v1 = vsel %vm621_vm7, %v1427_v11, %v1166_v56  ;;  %v627_v25 = vsel %vm621_vm7, %v1430_v12, %v1161_v39  ;;  %v626_v6 = vsel %vm621_vm7, %v1340_v17, %v1160_v28 }
  0xbe   : > { %v1169_v46 = vpop.permute.xlu0 %1168  ;;  %v1176_v14 = vunpack.i.h.bf16 %v1174_v41  ;;  %v1175_v4 = vunpack.i.l.bf16 %v1174_v41 }
  0xbf   : > { %v1171_v3 = vunpack.i.h.bf16 %v1169_v46  ;;  %v1170_v31 = vunpack.i.l.bf16 %v1169_v46 }
  0xc0   : > { %v641_v50 = vsel %vm632_vm8, %v630_v35, %v1175_v4  ;;  %v642_v43 = vsel %vm632_vm8, %v631_v1, %v1176_v14  ;;  %v849_v1 = vld [vmem:[%s1778_s18] sm:$0xff] }
  0xc1   : > { %v1184_v23 = vpop.permute.xlu1 %1183  ;;  %v637_v9 = vsel %vm632_vm8, %v626_v6, %v1170_v31  ;;  %v638_v11 = vsel %vm632_vm8, %v627_v25, %v1171_v3  ;;  %v850_v25 = vld [vmem:[%s1778_s18 + $0x8] sm:$0xff] }
  0xc2   : > { %v1179_v54 = vpop.permute.xlu0 %1178  ;;  %v1186_v32 = vunpack.i.h.bf16 %v1184_v23  ;;  %v1185_v8 = vunpack.i.l.bf16 %v1184_v23 }
  0xc3   : > { %v1181_v61 = vunpack.i.h.bf16 %v1179_v54  ;;  %v1180_v19 = vunpack.i.l.bf16 %v1179_v54 }
  0xc4   : > { %v652_v29 = vsel %vm643_vm9, %v641_v50, %v1185_v8  ;;  %v653_v22 = vsel %vm643_vm9, %v642_v43, %v1186_v32  ;;  %v954_v32 = vld [vmem:[%s1824_s3] ss:$0 sm:$0xff] }
  0xc5   : > { %v1194_v24 = vpop.permute.xlu1 %1193  ;;  %v648_v17 = vsel %vm643_vm9, %v637_v9, %v1180_v19  ;;  %v649_v52 = vsel %vm643_vm9, %v638_v11, %v1181_v61  ;;  %v855_v11 = vld [vmem:[%s1778_s18 + $0x30] sm:$0xff] }
  0xc6   : > { %v1189_v40 = vpop.permute.xlu0 %1188  ;;  %v1196_v26 = vunpack.i.h.bf16 %v1194_v24  ;;  %v1195_v48 = vunpack.i.l.bf16 %v1194_v24 }
  0xc7   : > { %v1191_v12 = vunpack.i.h.bf16 %v1189_v40  ;;  %v1190_v27 = vunpack.i.l.bf16 %v1189_v40 }
  0xc8   : > { %v663_v62 = vsel %vm654_vm10, %v652_v29, %v1195_v48  ;;  %v664_v15 = vsel %vm654_vm10, %v653_v22, %v1196_v26  ;;  %v851_v48 = vld [vmem:[%s1778_s18 + $0x10] sm:$0xff] }
  0xc9   : > { %v1204_v18 = vpop.permute.xlu1 %1203  ;;  %v659_v49 = vsel %vm654_vm10, %v648_v17, %v1190_v27  ;;  %v660_v60 = vsel %vm654_vm10, %v649_v52, %v1191_v12  ;;  %v856_v17 = vld [vmem:[%s1778_s18 + $0x38] sm:$0xff] }
  0xca   : > { %v1199_v7 = vpop.permute.xlu0 %1198  ;;  %v1206_v47 = vunpack.i.h.bf16 %v1204_v18  ;;  %v1205_v57 = vunpack.i.l.bf16 %v1204_v18 }
  0xcb   : > { %v1201_v59 = vunpack.i.h.bf16 %v1199_v7  ;;  %v1200_v30 = vunpack.i.l.bf16 %v1199_v7 }
  0xcc   : > { %v674_v37 = vsel %vm665_vm11, %v663_v62, %v1205_v57  ;;  %v675_v2 = vsel %vm665_vm11, %v664_v15, %v1206_v47  ;;  %v852_v57 = vld [vmem:[%s1778_s18 + $0x18] sm:$0xff] }
  0xcd   : > { %v1214_v45 = vpop.permute.xlu1 %1213  ;;  %v670_v10 = vsel %vm665_vm11, %v659_v49, %v1200_v30  ;;  %v671_v42 = vsel %vm665_vm11, %v660_v60, %v1201_v59  ;;  %v853_v49 = vld [vmem:[%s1778_s18 + $0x20] sm:$0xff] }
  0xce   : > { %v1209_v44 = vpop.permute.xlu0 %1208  ;;  %v1216_v34 = vunpack.i.h.bf16 %v1214_v45  ;;  %v1215_v53 = vunpack.i.l.bf16 %v1214_v45 }
  0xcf   : > { %v1211_v16 = vunpack.i.h.bf16 %v1209_v44  ;;  %v1210_v63 = vunpack.i.l.bf16 %v1209_v44 }
  0xd0   : > { %v685_v13 = vsel %vm676_vm12, %v674_v37, %v1215_v53  ;;  %v686_v20 = vsel %vm676_vm12, %v675_v2, %v1216_v34 }
  0xd1   : > { %v1224_v58 = vpop.permute.xlu1 %1223  ;;  %v681_v36 = vsel %vm676_vm12, %v670_v10, %v1210_v63  ;;  %v682_v41 = vsel %vm676_vm12, %v671_v42, %v1211_v16  ;;  %v857_v63 = vld [vmem:[%s1778_s18 + $0x40] sm:$0xff]  ;;  %v854_v42 = vld [vmem:[%s1778_s18 + $0x28] sm:$0xff] }
  0xd2   : > { %v1219_v38 = vpop.permute.xlu0 %1218  ;;  %v1226_v55 = vunpack.i.h.bf16 %v1224_v58  ;;  %v1225_v0 = vunpack.i.l.bf16 %v1224_v58 }
  0xd3   : > { %v1221_v33 = vunpack.i.h.bf16 %v1219_v38  ;;  %v1220_v5 = vunpack.i.l.bf16 %v1219_v38 }
  0xd4   : > { %v696_v24 = vsel %vm687_vm13, %v685_v13, %v1225_v0  ;;  %v697_v40 = vsel %vm687_vm13, %v686_v20, %v1226_v55 }
  0xd5   : > { %v1234_v21 = vpop.permute.xlu1 %1233  ;;  %v692_v39 = vsel %vm687_vm13, %v681_v36, %v1220_v5  ;;  %v693_v28 = vsel %vm687_vm13, %v682_v41, %v1221_v33  ;;  %v858_v33 = vld [vmem:[%s1778_s18 + $0x48] sm:$0xff] }
  0xd6   : > { %v1236_v46 = vunpack.i.h.bf16 %v1234_v21  ;;  %v1235_v23 = vunpack.i.l.bf16 %v1234_v21  ;;  %v1229_v54 = vpop.permute.xlu0 %1228 }
  0xd7   : > { %v1231_v56 = vunpack.i.h.bf16 %v1229_v54  ;;  %v1230_v51 = vunpack.i.l.bf16 %v1229_v54 }
  0xd8   : > { %v707_v14 = vsel %vm698_vm14, %v696_v24, %v1235_v23  ;;  %v708_v4 = vsel %vm698_vm14, %v697_v40, %v1236_v46 }
  0xd9   : > { %v713_v18 = vpack.c.bf16 %v708_v4, %v707_v14  ;;  %v703_v3 = vsel %vm698_vm14, %v692_v39, %v1230_v51  ;;  %v704_v31 = vsel %vm698_vm14, %v693_v28, %v1231_v56 }
  0xda   : > { %v711_v7 = vpack.c.bf16 %v704_v31, %v703_v3 }
  0xdb   : > { %1004 = vmatmul.mubr.msk.bf16.gmra.mrb[4].mxu1 %vm757_vm15, %v713_v18 }
  0xdc   : > { %996 = vmatmul.mubr.msk.bf16.gmra.mrb[8].mxu0 %vm757_vm15, %v711_v7 }
 0x170   : > { %v810_v8 = vpop.f32.mrb[0].mxu0 }
 0x171   : > { %v811_v35 = vadd.f32 %v954_v32, %v810_v8  ;;  %v989_v61 = vpop.f32.mrb[1].mxu0 }
 0x172   : > { %v813_v19 = vpop.f32.mrb[2].mxu0 }
 0x173   : > { %v859_v6 = vadd.f32 %v849_v1, %v811_v35  ;;  %v814_v50 = vadd.f32 %v954_v32, %v813_v19  ;;  %v990_v43 = vpop.f32.mrb[3].mxu0 }
 0x175   : > { %869 = vst.msk [vmem:[%s1787_s16] sm:$0xff] %vm632_vm8, %v859_v6  ;;  %v860_v45 = vadd.f32 %v850_v25, %v814_v50 }
 0x177   : > { %870 = vst.msk [vmem:[%s1787_s16 + $0x8] sm:$0xff] %vm632_vm8, %v860_v45 }
 0x18e   : > { %v834_v9 = vpop.f32.mrb[0].mxu1 }
 0x18f   : > { %v818_v26 = vpop.f32.mrb[4].mxu0  ;;  %v835_v44 = vadd.f32 %v954_v32, %v834_v9  ;;  %v1001_v29 = vpop.f32.mrb[1].mxu1 }
 0x190   : > { %v819_v22 = vadd.f32 %v954_v32, %v818_v26  ;;  %v993_v12 = vpop.f32.mrb[5].mxu0  ;;  %v837_v27 = vpop.f32.mrb[2].mxu1 }
 0x191   : > { %v865_v52 = vadd.f32 %v855_v11, %v835_v44  ;;  %v821_v47 = vpop.f32.mrb[6].mxu0  ;;  %v838_v59 = vadd.f32 %v954_v32, %v837_v27  ;;  %v1002_v30 = vpop.f32.mrb[3].mxu1 }
 0x192   : > { %v861_v34 = vadd.f32 %v851_v48, %v819_v22  ;;  %v822_v53 = vadd.f32 %v954_v32, %v821_v47  ;;  %v994_v58 = vpop.f32.mrb[7].mxu0 }
 0x193   : > { %875 = vst.msk [vmem:[%s1787_s16 + $0x30] sm:$0xff] %vm632_vm8, %v865_v52  ;;  %v866_v62 = vadd.f32 %v856_v17, %v838_v59 }
 0x194   : > { %871 = vst.msk [vmem:[%s1787_s16 + $0x10] sm:$0xff] %vm632_vm8, %v861_v34  ;;  %v862_v15 = vadd.f32 %v852_v57, %v822_v53 }
 0x195   : > { %876 = vst.msk [vmem:[%s1787_s16 + $0x38] sm:$0xff] %vm632_vm8, %v866_v62 }
 0x196   : > { %872 = vst.msk [vmem:[%s1787_s16 + $0x18] sm:$0xff] %vm632_vm8, %v862_v15 }
 0x1ae   : > { %v842_v16 = vpop.f32.mrb[4].mxu1 }
 0x1af   : > { %v826_v38 = vpop.f32.mrb[8].mxu0  ;;  %v843_v60 = vadd.f32 %v954_v32, %v842_v16  ;;  %v1005_v55 = vpop.f32.mrb[5].mxu1 }
 0x1b0   : > { %v827_v0 = vadd.f32 %v954_v32, %v826_v38  ;;  %v997_v37 = vpop.f32.mrb[9].mxu0  ;;  %v845_v2 = vpop.f32.mrb[6].mxu1 }
 0x1b1   : > { %v867_v5 = vadd.f32 %v857_v63, %v843_v60  ;;  %v829_v10 = vpop.f32.mrb[10].mxu0  ;;  %v846_v13 = vadd.f32 %v954_v32, %v845_v2  ;;  %v1006_v20 = vpop.f32.mrb[7].mxu1 }
 0x1b2   : > { %v863_v21 = vadd.f32 %v853_v49, %v827_v0  ;;  %v830_v36 = vadd.f32 %v954_v32, %v829_v10  ;;  %v998_v41 = vpop.f32.mrb[11].mxu0 }
 0x1b3   : > { %877 = vst.msk [vmem:[%s1787_s16 + $0x40] sm:$0xff] %vm632_vm8, %v867_v5  ;;  %v868_v46 = vadd.f32 %v858_v33, %v846_v13 }
 0x1b4   : > { %873 = vst.msk [vmem:[%s1787_s16 + $0x20] sm:$0xff] %vm632_vm8, %v863_v21  ;;  %v864_v23 = vadd.f32 %v854_v42, %v830_v36 }
 0x1b5   : > { %878 = vst.msk [vmem:[%s1787_s16 + $0x48] sm:$0xff] %vm632_vm8, %v868_v46 }
 0x1b6   : > { %874 = vst.msk [vmem:[%s1787_s16 + $0x28] sm:$0xff] %vm632_vm8, %v864_v23 }
 0x1b7 PF: > { %s14_s15 = sadd.s32 1, %s1248_s15  }
 0x1b8   : > { %p11_p4 = scmp.ge.s32.totalorder %s14_s15, 4  }
 0x1ba   :  { %13 = sbr.rel (!%p11_p4) target bundleno = 1 (0x1), region = 69 }

// kernel: istt_nofold_forward.29
= control target key start
LH: loop header
LB: loop body
LE: loop exit
PB: predicated region body
PF: predicated region fallthrough
CT: control target
= control target key end

     0   :  { %s2997_s12 = smov 0   ;;  %s5040_s0 = inlined_call_operand.vmem [shape: f32[2,342,16], index: 0, kind: input, shape index: {}]   ;;  %s5041_s1 = inlined_call_operand.vmem [shape: bf16[144,3], index: 1, kind: input, shape index: {}]   ;;  %s5042_s2 = inlined_call_operand.vmem [shape: f32[1,3], index: 2, kind: input, shape index: {}]   ;;  %s5043_s3 = inlined_call_operand.vmem [shape: f32[2,288,3], index: 3, kind: output, shape index: {}]  }
   0x1 LB: > { %s2195_s13 = sadd.s32 4294967295, %s2967_s12   ;;  %p2199_p0 = scmp.ge.s32.totalorder %s2967_s12, 1  ;;  %s2967_s12 = sphi %s2997_s12, %s13_s12  }
   0x2   : > { %p137_p1 = scmp.lt.s32.totalorder %s2967_s12, 3 }
   0x4   : > { %p138_p2 = pnand %p2199_p0, %p137_p1 }
   0x6   : > { %141 = sbr.rel (%p138_p2) target bundleno = 617 (0x269), region = 32 }
   0xd   : > { %p161_p3 = scmp.lt.s32.totalorder %s2195_s13, 1  ;;  %vm250_vm0 = vcmask 1046528   ;;  %s2969_s18 = smov 16   ;;  %vm432_vm1 = vcmask 1045504   ;;  %vm910_vm2 = vcmask 1043456   ;;  %vm728_vm3 = vcmask 1044480  }
   0xe   : > { %s2970_s19 = smov 32   ;;  %s2971_s20 = smov 48   ;;  %vm1206_vm4 = vcmask 1042432   ;;  %vm1388_vm5 = vcmask 1041408   ;;  %vm1498_vm6 = vcmask 130048   ;;  %vm1535_vm7 = vcmask 261120  }
   0xf   : > { %s5244_s13 = smov (!%p161_p3, %s2195_s13), 1  ;;  %s2972_s21 = smov 64   ;;  %vm1572_vm8 = vcmask 392192   ;;  %vm1609_vm9 = vcmask 523264   ;;  %vm1646_vm10 = vcmask 654336   ;;  %vm1683_vm11 = vcmask 785408  }
  0x10   : > { %s2250_s14 = smul.u32 344, %s5244_s13  ;;  %s2973_s22 = smov 80   ;;  %vm1720_vm12 = vcmask 916480   ;;  %vm2103_vm13 = vcmask 23552  }
  0x11   : > { %s2974_s25 = smov 96   ;;  %s2976_s28 = smov 112  }
  0x12   : > { %s3011_s17 = scalar_lea.vmem %s5040_s0, %s2250_s14 }
  0x13   : > { %v3014_v0 = vld [vmem:[%s3011_s17 + $0x20] sm:$0xff]  ;;  %v3017_v1 = vld [vmem:[%s3011_s17 + $0x28] sm:$0xff]  ;;  %v3020_v2 = vld [vmem:[%s3011_s17 + $0x30] sm:$0xff] }
  0x14   : > { %v258_v3 = vrot.slane %v3014_v0, 1  ;;  %v260_v4 = vrot.slane %v3017_v1, 1  ;;  %v262_v5 = vrot.slane %v3020_v2, 1  ;;  %v3026_v6 = vld [vmem:[%s3011_s17] sm:$0xff]  ;;  %v3029_v7 = vld [vmem:[%s3011_s17 + $0x8] sm:$0xff]  ;;  %v3032_v8 = vld [vmem:[%s3011_s17 + $0x10] sm:$0xff] }
  0x15   : > { %v251_v9 = vrot.slane %v3026_v6, 1  ;;  %v252_v10 = vrot.slane %v3029_v7, 1  ;;  %v254_v11 = vrot.slane %v3032_v8, 1  ;;  %v3038_v12 = vld [vmem:[%s3011_s17 + $0x38] sm:$0xff]  ;;  %v3041_v13 = vld [vmem:[%s3011_s17 + $0x40] sm:$0xff]  ;;  %v3051_v19 = vld [vmem:[%s3011_s17 + $0x50] sm:$0xff] }
  0x16   : > { %v3044_v14 = vld [vmem:[%s3011_s17 + $0x18] sm:$0xff]  ;;  %v261_v15 = vsel %vm250_vm0, %v258_v3, %v260_v4  ;;  %v263_v16 = vsel %vm250_vm0, %v260_v4, %v262_v5  ;;  %v264_v17 = vrot.slane %v3038_v12, 1  ;;  %v266_v18 = vrot.slane %v3041_v13, 1  ;;  %v3060_v25 = vld [vmem:[%s3011_s17 + $0x60] sm:$0xff]  ;;  %v3063_v26 = vld [vmem:[%s3011_s17 + $0x48] sm:$0xff] }
  0x17   : > { %v3054_v20 = vld [vmem:[%s3011_s17 + $0x58] sm:$0xff]  ;;  %v2278_v21 = vpack.i.bf16 %v263_v16, %v261_v15  ;;  %v253_v22 = vsel %vm250_vm0, %v251_v9, %v252_v10  ;;  %v255_v23 = vsel %vm250_vm0, %v252_v10, %v254_v11  ;;  %v256_v24 = vrot.slane %v3044_v14, 1  ;;  %v3066_v27 = vld [vmem:[%s3011_s17 + $0x70] sm:$0xff]  ;;  %v3075_v33 = vld [vmem:[%s3011_s17 + $0x80] sm:$0xff] }
  0x18   : > { %v2268_v28 = vpack.i.bf16 %v255_v23, %v253_v22  ;;  %v265_v29 = vsel %vm250_vm0, %v262_v5, %v264_v17  ;;  %v267_v30 = vsel %vm250_vm0, %v264_v17, %v266_v18  ;;  %v270_v31 = vrot.slane %v3051_v19, 1  ;;  %v3072_v32 = vld [vmem:[%s3011_s17 + $0x78] sm:$0xff]  ;;  %v3078_v34 = vld [vmem:[%s3011_s17 + $0x68] sm:$0xff]  ;;  %v3089_v43 = vld [vmem:[%s3011_s17 + $0x90] sm:$0xff] }
  0x19   : > { %2279 = vrot.lane.b32.xlu1 %v2278_v21, %s2969_s18  ;;  %v2283_v35 = vpack.i.bf16 %v267_v30, %v265_v29  ;;  %v257_v36 = vsel %vm250_vm0, %v254_v11, %v256_v24  ;;  %v259_v37 = vsel %vm250_vm0, %v256_v24, %v258_v3  ;;  %v272_v38 = vrot.slane %v3054_v20, 1  ;;  %v3096_v48 = vld [vmem:[%s3011_s17 + $0x98] sm:$0xff]  ;;  %v3102_v52 = vld [vmem:[%s3011_s17 + $0xa0] sm:$0xff]  ;;  %v3105_v53 = vld [vmem:[%s3011_s17 + $0x88] sm:$0xff] }
  0x1a   : > { %2269 = vrot.lane.b32.xlu0 %v2268_v28, %s2969_s18  ;;  %v2273_v39 = vpack.i.bf16 %v259_v37, %v257_v36  ;;  %v274_v40 = vrot.slane %v3060_v25, 1  ;;  %v268_v41 = vrot.slane %v3063_v26, 1  ;;  %v278_v42 = vrot.slane %v3066_v27, 1  ;;  %v3112_v58 = vld [vmem:[%s3011_s17 + $0xb0] sm:$0xff]  ;;  %v3115_v59 = vld [vmem:[%s3011_s17 + $0xb8] sm:$0xff]  ;;  %v3120_v62 = vld [vmem:[%s3011_s17 + $0xc0] sm:$0xff] }
  0x1b   : > { %v273_v44 = vsel %vm250_vm0, %v270_v31, %v272_v38  ;;  %v280_v45 = vrot.slane %v3072_v32, 1  ;;  %v282_v46 = vrot.slane %v3075_v33, 1  ;;  %v276_v47 = vrot.slane %v3078_v34, 1  ;;  %5091 = vst [vmem:[#allocation2_spill] sm:$0xff] %v3112_v58  ;;  %v3123_v63 = vld [vmem:[%s3011_s17 + $0xa8] sm:$0xff]  ;;  %v3132_v16 = vld [vmem:[%s3011_s17 + $0xd0] sm:$0xff] }
  0x1c   : > { %v275_v49 = vsel %vm250_vm0, %v272_v38, %v274_v40  ;;  %v269_v50 = vsel %vm250_vm0, %v266_v18, %v268_v41  ;;  %v271_v51 = vsel %vm250_vm0, %v268_v41, %v270_v31  ;;  %v286_v57 = vrot.slane %v3089_v43, 1  ;;  %v3135_v17 = vld [vmem:[%s3011_s17 + $0xd8] sm:$0xff]  ;;  %v3144_v28 = vld [vmem:[%s3011_s17 + $0xe0] sm:$0xff]  ;;  %v3149_v31 = vld [vmem:[%s3011_s17 + $0xc8] sm:$0xff] }
  0x1d   : > { %2284 = vrot.lane.b32.xlu1 %v2283_v35, %s2969_s18  ;;  %v2293_v54 = vpack.i.bf16 %v275_v49, %v273_v44  ;;  %v281_v55 = vsel %vm250_vm0, %v278_v42, %v280_v45  ;;  %v283_v56 = vsel %vm250_vm0, %v280_v45, %v282_v46  ;;  %v2288_v60 = vpack.i.bf16 %v271_v51, %v269_v50  ;;  %v3160_v44 = vld [vmem:[%s3011_s17 + $0xf0] sm:$0xff]  ;;  %v3168_v49 = vld [vmem:[%s3011_s17 + $0x100] sm:$0xff]  ;;  %v3171_v50 = vld [vmem:[%s3011_s17 + $0xe8] sm:$0xff] }
  0x1e   : > { %2274 = vrot.lane.b32.xlu0 %v2273_v39, %s2969_s18  ;;  %v288_v61 = vrot.slane %v3096_v48, 1  ;;  %v277_v3 = vsel %vm250_vm0, %v274_v40, %v276_v47  ;;  %v279_v4 = vsel %vm250_vm0, %v276_v47, %v278_v42  ;;  %v290_v5 = vrot.slane %v3102_v52, 1  ;;  %v3165_v47 = vld [vmem:[%s3011_s17 + $0xf8] sm:$0xff]  ;;  %v3174_v51 = vld [vmem:[%s3011_s17 + $0x110] sm:$0xff] }
  0x1f   : > { %v284_v9 = vrot.slane %v3105_v53, 1  ;;  %v2303_v10 = vpack.i.bf16 %v283_v56, %v281_v55  ;;  %v294_v11 = vrot.slane %v3112_v58, 1  ;;  %v296_v15 = vrot.slane %v3115_v59, 1 }
  0x20   : > { %v289_v18 = vsel %vm250_vm0, %v286_v57, %v288_v61  ;;  %v291_v21 = vsel %vm250_vm0, %v288_v61, %v290_v5  ;;  %v298_v22 = vrot.slane %v3120_v62, 1  ;;  %v292_v23 = vrot.slane %v3123_v63, 1  ;;  %v3182_v61 = vld [vmem:[%s3011_s17 + $0x120] sm:$0xff] }
  0x21   : > { %2294 = vrot.lane.b32.xlu1 %v2293_v54, %s2969_s18  ;;  %v2298_v24 = vpack.i.bf16 %v279_v4, %v277_v3  ;;  %v285_v29 = vsel %vm250_vm0, %v282_v46, %v284_v9  ;;  %v287_v30 = vsel %vm250_vm0, %v284_v9, %v286_v57  ;;  %v2313_v35 = vpack.i.bf16 %v291_v21, %v289_v18  ;;  %v3177_v54 = vld [vmem:[%s3011_s17 + $0x118] sm:$0xff] }
  0x22   : > { %2289 = vrot.lane.b32.xlu0 %v2288_v60, %s2969_s18  ;;  %v297_v36 = vsel %vm250_vm0, %v294_v11, %v296_v15  ;;  %v302_v37 = vrot.slane %v3132_v16, 1  ;;  %v304_v38 = vrot.slane %v3135_v17, 1  ;;  %v299_v39 = vsel %vm250_vm0, %v296_v15, %v298_v22 }
  0x23   : > { %v293_v40 = vsel %vm250_vm0, %v290_v5, %v292_v23  ;;  %v295_v41 = vsel %vm250_vm0, %v292_v23, %v294_v11  ;;  %v306_v42 = vrot.slane %v3144_v28, 1  ;;  %v2308_v45 = vpack.i.bf16 %v287_v30, %v285_v29 }
  0x24   : > { %v300_v46 = vrot.slane %v3149_v31, 1  ;;  %v2323_v55 = vpack.i.bf16 %v299_v39, %v297_v36  ;;  %v2318_v56 = vpack.i.bf16 %v295_v41, %v293_v40  ;;  %v305_v57 = vsel %vm250_vm0, %v302_v37, %v304_v38 }
  0x25   : > { %2304 = vrot.lane.b32.xlu1 %v2303_v10, %s2969_s18  ;;  %v310_v60 = vrot.slane %v3160_v44, 1  ;;  %v307_v3 = vsel %vm250_vm0, %v304_v38, %v306_v42  ;;  %v312_v4 = vrot.slane %v3165_v47, 1  ;;  %v314_v5 = vrot.slane %v3168_v49, 1  ;;  %v3190_v10 = vld [vmem:[%s3011_s17 + $0x108] sm:$0xff] }
  0x26   : > { %2299 = vrot.lane.b32.xlu0 %v2298_v24, %s2969_s18  ;;  %v308_v9 = vrot.slane %v3171_v50, 1  ;;  %v301_v11 = vsel %vm250_vm0, %v298_v22, %v300_v46  ;;  %v303_v15 = vsel %vm250_vm0, %v300_v46, %v302_v37  ;;  %v318_v18 = vrot.slane %v3174_v51, 1 }
  0x27   : > { %v320_v21 = vrot.slane %v3177_v54, 1  ;;  %v322_v23 = vrot.slane %v3182_v61, 1  ;;  %v2333_v24 = vpack.i.bf16 %v307_v3, %v305_v57  ;;  %v316_v29 = vrot.slane %v3190_v10, 1 }
  0x28   : > { %v2328_v30 = vpack.i.bf16 %v303_v15, %v301_v11  ;;  %v315_v36 = vsel %vm250_vm0, %v312_v4, %v314_v5  ;;  %v309_v22 = vsel %vm250_vm0, %v306_v42, %v308_v9  ;;  %v311_v37 = vsel %vm250_vm0, %v308_v9, %v310_v60 }
  0x29   : > { %2314 = vrot.lane.b32.xlu1 %v2313_v35, %s2969_s18  ;;  %v313_v35 = vsel %vm250_vm0, %v310_v60, %v312_v4  ;;  %v321_v38 = vsel %vm250_vm0, %v318_v18, %v320_v21  ;;  %v436_v39 = vrot.slane %v3032_v8, 2  ;;  %v438_v40 = vrot.slane %v3044_v14, 2 }
  0x2a   : > { %2309 = vrot.lane.b32.xlu0 %v2308_v45, %s2969_s18  ;;  %v323_v41 = vsel %vm250_vm0, %v320_v21, %v322_v23  ;;  %v440_v45 = vrot.slane %v3014_v0, 2  ;;  %v433_v46 = vrot.slane %v3026_v6, 2  ;;  %v317_v42 = vsel %vm250_vm0, %v314_v5, %v316_v29 }
  0x2b   : > { %v2343_v57 = vpack.i.bf16 %v315_v36, %v313_v35  ;;  %v2338_v60 = vpack.i.bf16 %v311_v37, %v309_v22  ;;  %v2353_v3 = vpack.i.bf16 %v323_v41, %v321_v38  ;;  %v439_v9 = vsel %vm432_vm1, %v436_v39, %v438_v40 }
  0x2c   : > { %v441_v11 = vsel %vm432_vm1, %v438_v40, %v440_v45  ;;  %v470_v5 = vrot.slane %v3096_v48, 2  ;;  %v472_v15 = vrot.slane %v3102_v52, 2  ;;  %v444_v23 = vrot.slane %v3020_v2, 2 }
  0x2d   : > { %2324 = vrot.lane.b32.xlu1 %v2323_v55, %s2969_s18  ;;  %v434_v55 = vrot.slane %v3029_v7, 2  ;;  %v468_v7 = vrot.slane %v3089_v43, 2  ;;  %v448_v43 = vrot.slane %v3041_v13, 2  ;;  %v442_v48 = vrot.slane %v3017_v1, 2 }
  0x2e   : > { %2319 = vrot.lane.b32.xlu0 %v2318_v56, %s2969_s18  ;;  %v319_v56 = vsel %vm250_vm0, %v316_v29, %v318_v18  ;;  %v466_v18 = vrot.slane %v3105_v53, 2  ;;  %v464_v29 = vrot.slane %v3075_v33, 2  ;;  %v473_v53 = vsel %vm432_vm1, %v470_v5, %v472_v15 }
  0x2f   : > { %v2348_v4 = vpack.i.bf16 %v319_v56, %v317_v42  ;;  %v435_v6 = vsel %vm432_vm1, %v433_v46, %v434_v55  ;;  %v437_v21 = vsel %vm432_vm1, %v434_v55, %v436_v39  ;;  %v3239_v37 = vpack.i.bf16 %v441_v11, %v439_v9 }
  0x30   : > { %v467_v36 = vsel %vm432_vm1, %v464_v29, %v466_v18  ;;  %v469_v22 = vsel %vm432_vm1, %v466_v18, %v468_v7  ;;  %v2358_v38 = vpack.i.bf16 %v437_v21, %v435_v6  ;;  %v452_v39 = vrot.slane %v3051_v19, 2 }
  0x31   : > { %2334 = vrot.lane.b32.xlu1 %v2333_v24, %s2969_s18  ;;  %v446_v24 = vrot.slane %v3038_v12, 2  ;;  %v3241_v33 = vpack.i.bf16 %v469_v22, %v467_v36  ;;  %v454_v40 = vrot.slane %v3054_v20, 2  ;;  %v456_v41 = vrot.slane %v3060_v25, 2 }
  0x32   : > { %2329 = vrot.lane.b32.xlu0 %v2328_v30, %s2969_s18  ;;  %v471_v30 = vsel %vm432_vm1, %v468_v7, %v470_v5  ;;  %v443_v42 = vsel %vm432_vm1, %v440_v45, %v442_v48  ;;  %v445_v56 = vsel %vm432_vm1, %v442_v48, %v444_v23  ;;  %v460_v45 = vrot.slane %v3066_v27, 2 }
  0x33   : > { %v3235_v35 = vpack.i.bf16 %v473_v53, %v471_v30  ;;  %v447_v46 = vsel %vm432_vm1, %v444_v23, %v446_v24  ;;  %v449_v55 = vsel %vm432_vm1, %v446_v24, %v448_v43  ;;  %v457_v9 = vsel %vm432_vm1, %v454_v40, %v456_v41 }
  0x34   : > { %v462_v11 = vrot.slane %v3072_v32, 2  ;;  %v500_v6 = vrot.slane %v3174_v51, 2  ;;  %v502_v7 = vrot.slane %v3177_v54, 2  ;;  %v458_v21 = vrot.slane %v3078_v34, 2 }
  0x35   : > { %2344 = vrot.lane.b32.xlu1 %v2343_v57, %s2969_s18  ;;  %5092 = vst [vmem:[#allocation3_spill] sm:$0xff] %v3235_v35  ;;  %v450_v57 = vrot.slane %v3063_v26, 2  ;;  %v5047_v23 = vrot.slane %v3182_v61, 2 }
  0x36   : > { %2339 = vrot.lane.b32.xlu0 %v2338_v60, %s2969_s18  ;;  %v3255_v60 = vpack.i.bf16 %v449_v55, %v447_v46  ;;  %v503_v27 = vsel %vm432_vm1, %v500_v6, %v502_v7  ;;  %v463_v34 = vsel %vm432_vm1, %v460_v45, %v462_v11  ;;  %v459_v30 = vsel %vm432_vm1, %v456_v41, %v458_v21 }
  0x37   : > { %v451_v5 = vsel %vm432_vm1, %v448_v43, %v450_v57  ;;  %v453_v18 = vsel %vm432_vm1, %v450_v57, %v452_v39  ;;  %v505_v32 = vsel %vm432_vm1, %v502_v7, %v5047_v23  ;;  %v465_v43 = vsel %vm432_vm1, %v462_v11, %v464_v29  ;;  %v2909_v23 = vld [vmem:[%s3011_s17 + $0x68] sm:$0xff] }
  0x38   : > { %v3282_v54 = vpack.i.bf16 %v453_v18, %v451_v5  ;;  %v3286_v48 = vpack.i.bf16 %v505_v32, %v503_v27  ;;  %v461_v53 = vsel %vm432_vm1, %v458_v21, %v460_v45  ;;  %v3292_v36 = vpack.i.bf16 %v465_v43, %v463_v34 }
  0x39   : > { %2354 = vrot.lane.b32.xlu1 %v2353_v3, %s2969_s18  ;;  %v3257_v3 = vpack.i.bf16 %v445_v56, %v443_v42  ;;  %v3296_v22 = vpack.i.bf16 %v461_v53, %v459_v30  ;;  %v478_v29 = vrot.slane %v3115_v59, 2  ;;  %v484_v41 = vrot.slane %v3132_v16, 2 }
  0x3a   : > { %2349 = vrot.lane.b32.xlu0 %v2348_v4, %s2969_s18  ;;  %v455_v4 = vsel %vm432_vm1, %v452_v39, %v454_v40  ;;  %v480_v39 = vrot.slane %v3120_v62, 2  ;;  %v474_v40 = vrot.slane %v3123_v63, 2  ;;  %v486_v46 = vrot.slane %v3135_v17, 2 }
  0x3b   : > { %v3272_v24 = vpack.i.bf16 %v457_v9, %v455_v4  ;;  %v5050_v55 = vrot.slane %v3102_v52, 4  ;;  %v948_v42 = vrot.slane %v3123_v63, 4  ;;  %v950_v56 = vrot.slane %v3112_v58, 4 }
  0x3c   : > { %v481_v4 = vsel %vm432_vm1, %v478_v29, %v480_v39  ;;  %v488_v9 = vrot.slane %v3144_v28, 2  ;;  %v482_v45 = vrot.slane %v3149_v31, 2  ;;  %v475_v11 = vsel %vm432_vm1, %v472_v15, %v474_v40 }
  0x3d   : > { %2364 = vrot.lane.b32.xlu1 %v3239_v37, %s2970_s19  ;;  %v949_v5 = vsel %vm910_vm2, %v5050_v55, %v948_v42  ;;  %v951_v18 = vsel %vm910_vm2, %v948_v42, %v950_v56  ;;  %v487_v32 = vsel %vm432_vm1, %v484_v41, %v486_v46  ;;  %v492_v15 = vrot.slane %v3160_v44, 2 }
  0x3e   : > { %2359 = vrot.lane.b32.xlu0 %v2358_v38, %s2970_s19  ;;  %v476_v38 = vrot.slane %v3112_v58, 2  ;;  %v3325_v21 = vpack.i.bf16 %v951_v18, %v949_v5  ;;  %v489_v43 = vsel %vm432_vm1, %v486_v46, %v488_v9  ;;  %v494_v30 = vrot.slane %v3165_v47, 2 }
  0x3f   : > { %v496_v53 = vrot.slane %v3168_v49, 2  ;;  %v3343_v42 = vpack.i.bf16 %v489_v43, %v487_v32  ;;  %v729_v32 = vrot.slane %v3032_v8, 3  ;;  %v911_v43 = vrot.slane %v3032_v8, 4 }
  0x40   : > { %v479_v57 = vsel %vm432_vm1, %v476_v38, %v478_v29  ;;  %v477_v7 = vsel %vm432_vm1, %v474_v40, %v476_v38  ;;  %5093 = vst [vmem:[#allocation4_spill] sm:$0xff] %v3325_v21  ;;  %v483_v38 = vsel %vm432_vm1, %v480_v39, %v482_v45  ;;  %v485_v29 = vsel %vm432_vm1, %v482_v45, %v484_v41 }
  0x41   : > { %2374 = vrot.lane.b32.xlu1 %v3255_v60, %s2970_s19  ;;  %v3329_v27 = vpack.i.bf16 %v481_v4, %v479_v57  ;;  %v2408_v34 = vpack.i.bf16 %v477_v7, %v475_v11  ;;  %v490_v40 = vrot.slane %v3171_v50, 2  ;;  %v3346_v57 = vpack.i.bf16 %v485_v29, %v483_v38 }
  0x42   : > { %2369 = vrot.lane.b32.xlu0 %v3257_v3, %s2970_s19  ;;  %v495_v46 = vsel %vm432_vm1, %v492_v15, %v494_v30  ;;  %v497_v4 = vsel %vm432_vm1, %v494_v30, %v496_v53  ;;  %v498_v41 = vrot.slane %v3190_v10, 2  ;;  %v912_v30 = vrot.slane %v3044_v14, 4 }
  0x43   : > { %v491_v11 = vsel %vm432_vm1, %v488_v9, %v490_v40  ;;  %v493_v39 = vsel %vm432_vm1, %v490_v40, %v492_v15  ;;  %v3355_v45 = vpack.i.bf16 %v497_v4, %v495_v46  ;;  %v730_v15 = vrot.slane %v3044_v14, 3 }
  0x44   : > { %v3359_v7 = vpack.i.bf16 %v493_v39, %v491_v11  ;;  %v499_v5 = vsel %vm432_vm1, %v496_v53, %v498_v41  ;;  %v501_v9 = vsel %vm432_vm1, %v498_v41, %v500_v6  ;;  %v732_v6 = vrot.slane %v3014_v0, 3 }
  0x45   : > { %2384 = vrot.lane.b32.xlu1 %v3272_v24, %s2970_s19  ;;  %v3369_v18 = vpack.i.bf16 %v501_v9, %v499_v5  ;;  %v914_v53 = vrot.slane %v3014_v0, 4  ;;  %v5046_v38 = vrot.slane %v3102_v52, 3  ;;  %v731_v29 = vsel %vm728_vm3, %v729_v32, %v730_v15 }
  0x46   : > { %2379 = vrot.lane.b32.xlu0 %v3282_v54, %s2970_s19  ;;  %v733_v40 = vsel %vm728_vm3, %v730_v15, %v732_v6  ;;  %v766_v46 = vrot.slane %v3123_v63, 3  ;;  %v916_v14 = vrot.slane %v3017_v1, 4  ;;  %v918_v4 = vrot.slane %v3020_v2, 4 }
  0x47   : > { %v2473_v8 = vpack.i.bf16 %v733_v40, %v731_v29  ;;  %v915_v11 = vsel %vm910_vm2, %v912_v30, %v914_v53  ;;  %v1207_v9 = vrot.slane %v3014_v0, 5  ;;  %v1208_v32 = vrot.slane %v3017_v1, 5 }
  0x48   : > { %v767_v63 = vsel %vm728_vm3, %v5046_v38, %v766_v46  ;;  %v917_v5 = vsel %vm910_vm2, %v914_v53, %v916_v14  ;;  %v1210_v15 = vrot.slane %v3020_v2, 5 }
  0x49   : > { %2394 = vrot.lane.b32.xlu1 %v3292_v36, %s2970_s19 }
  0x4a   : > { %2389 = vrot.lane.b32.xlu0 %v3296_v22, %s2970_s19  ;;  %v1211_v29 = vsel %vm1206_vm4, %v1208_v32, %v1210_v15 }
  0x4d   : > { %2404 = vrot.lane.b32.xlu1 %v3235_v35, %s2970_s19 }
  0x4e   : > { %2399 = vrot.lane.b32.xlu0 %v3241_v33, %s2970_s19 }
  0x51   : > { %2414 = vrot.lane.b32.xlu1 %v3329_v27, %s2970_s19 }
  0x52   : > { %2409 = vrot.lane.b32.xlu0 %v2408_v34, %s2970_s19 }
  0x55   : > { %2424 = vrot.lane.b32.xlu1 %v3343_v42, %s2970_s19 }
  0x56   : > { %2419 = vrot.lane.b32.xlu0 %v3346_v57, %s2970_s19 }
  0x59   : > { %2434 = vrot.lane.b32.xlu1 %v3355_v45, %s2970_s19 }
  0x5a   : > { %2429 = vrot.lane.b32.xlu0 %v3359_v7, %s2970_s19 }
  0x5d   : > { %2444 = vrot.lane.b32.xlu1 %v3286_v48, %s2970_s19 }
  0x5e   : > { %2439 = vrot.lane.b32.xlu0 %v3369_v18, %s2970_s19 }
  0x61   : > { %2454 = vrot.lane.b32.xlu1 %v3257_v3, %s2971_s20  ;;  %v768_v3 = vrot.slane %v3112_v58, 3 }
  0x62   : > { %2449 = vrot.lane.b32.xlu0 %v3239_v37, %s2971_s20  ;;  %v913_v37 = vsel %vm910_vm2, %v911_v43, %v912_v30  ;;  %v952_v43 = vrot.slane %v3115_v59, 4  ;;  %v954_v30 = vrot.slane %v3120_v62, 4 }
  0x63   : > { %v769_v39 = vsel %vm728_vm3, %v766_v46, %v768_v3  ;;  %v5045_v46 = vrot.slane %v3112_v58, 5 }
  0x64   : > { %v2478_v41 = vpack.i.bf16 %v769_v39, %v767_v63  ;;  %v953_v40 = vsel %vm910_vm2, %v950_v56, %v952_v43  ;;  %v770_v39 = vrot.slane %v3115_v59, 3 }
  0x65   : > { %2464 = vrot.lane.b32.xlu1 %v3282_v54, %s2971_s20  ;;  %v2483_v54 = vpack.i.bf16 %v915_v11, %v913_v37  ;;  %v1246_v37 = vrot.slane %v3120_v62, 5  ;;  %v2898_v11 = vld [vmem:[%s5041_s1] sm:$0xff]  }
  0x66   : > { %2459 = vrot.lane.b32.xlu0 %v3255_v60, %s2971_s20  ;;  %v919_v60 = vsel %vm910_vm2, %v916_v14, %v918_v4  ;;  %v1244_v14 = vrot.slane %v3115_v59, 5 }
  0x67   : > { %v3416_v53 = vpack.i.bf16 %v919_v60, %v917_v5 }
  0x68   : > { %v1245_v5 = vsel %vm1206_vm4, %v5045_v46, %v1244_v14  ;;  %v1247_v60 = vsel %vm1206_vm4, %v1244_v14, %v1246_v37 }
  0x69   : > { %2474 = vrot.lane.b32.xlu1 %v2473_v8, %s2972_s21  ;;  %v955_v8 = vsel %vm910_vm2, %v952_v43, %v954_v30  ;;  %v2899_v43 = vld [vmem:[%s5041_s1 + $0x8] sm:$0xff]  }
  0x6a   : > { %2469 = vrot.lane.b32.xlu0 %v2408_v34, %s2971_s20  ;;  %v1209_v34 = vsel %vm1206_vm4, %v1207_v9, %v1208_v32  ;;  %v2498_v56 = vpack.i.bf16 %v955_v8, %v953_v40  ;;  %v734_v9 = vrot.slane %v3017_v1, 3  ;;  %v736_v32 = vrot.slane %v3020_v2, 3 }
  0x6b   : > { %v2503_v63 = vpack.i.bf16 %v1211_v29, %v1209_v34  ;;  %v2508_v34 = vpack.i.bf16 %v1247_v60, %v1245_v5  ;;  %v771_v29 = vsel %vm728_vm3, %v768_v3, %v770_v39  ;;  %v922_v5 = vrot.slane %v3041_v13, 4 }
  0x6c   : > { %v735_v8 = vsel %vm728_vm3, %v732_v6, %v734_v9  ;;  %v737_v14 = vsel %vm728_vm3, %v734_v9, %v736_v32  ;;  %v958_v6 = vrot.slane %v3132_v16, 4  ;;  %v2901_v9 = vld [vmem:[%s5041_s1 + $0x18] sm:$0xff]  }
  0x6d   : > { %2484 = vrot.lane.b32.xlu1 %v2483_v54, %s2973_s22  ;;  %v772_v54 = vrot.slane %v3120_v62, 3  ;;  %v2518_v60 = vpack.i.bf16 %v737_v14, %v735_v8  ;;  %v1214_v14 = vrot.slane %v3041_v13, 5 }
  0x6e   : > { %2479 = vrot.lane.b32.xlu0 %v2478_v41, %s2972_s21  ;;  %v2975_v41 = vmov 0  }
  0x6f   : > { %1926 = vmatprep.subr.bf16.mxu0 %v2975_v41  ;;  %2232 = vmatprep.subr.bf16.mxu1 %v2975_v41  ;;  %v773_v40 = vsel %vm728_vm3, %v770_v39, %v772_v54  ;;  %v920_v39 = vrot.slane %v3038_v12, 4 }
  0x70   : > { %1927 = vmatpush1.bf16.msra.mxu0 %v2898_v11  ;;  %2241 = vmatpush1.bf16.msra.mxu1 %v2898_v11  ;;  %v2900_v11 = vld [vmem:[%s5041_s1 + $0x10] sm:$0xff]   ;;  %v2523_v3 = vpack.i.bf16 %v773_v40, %v771_v29  ;;  %v1250_v29 = vrot.slane %v3132_v16, 5  ;;  %v1212_v40 = vrot.slane %v3038_v12, 5 }
  0x71   : > { %2494 = vrot.lane.b32.xlu1 %v3416_v53, %s2974_s25  ;;  %1928 = vmatprep.subr.bf16.mxu0 %v2975_v41  ;;  %v921_v8 = vsel %vm910_vm2, %v918_v4, %v920_v39 }
  0x72   : > { %2489 = vrot.lane.b32.xlu0 %v3325_v21, %s2973_s22  ;;  %2233 = vmatprep.subr.bf16.mxu1 %v2975_v41 }
  0x74   : > { %1929 = vmatpush1.bf16.msra.mxu0 %v2899_v43  ;;  %2242 = vmatpush1.bf16.msra.mxu1 %v2899_v43 }
  0x75   : > { %2504 = vrot.lane.b32.xlu1 %v2503_v63, %s2976_s28  ;;  %v956_v63 = vrot.slane %v3149_v31, 4  ;;  %1930 = vmatprep.subr.bf16.mxu0 %v2975_v41 }
  0x76   : > { %2499 = vrot.lane.b32.xlu0 %v2498_v56, %s2974_s25  ;;  %2234 = vmatprep.subr.bf16.mxu1 %v2975_v41 }
  0x77   : > { %v957_v43 = vsel %vm910_vm2, %v954_v30, %v956_v63  ;;  %v923_v30 = vsel %vm910_vm2, %v920_v39, %v922_v5 }
  0x78   : > { %1931 = vmatpush1.bf16.msra.mxu0 %v2900_v11  ;;  %2243 = vmatpush1.bf16.msra.mxu1 %v2900_v11  ;;  %v2902_v11 = vld [vmem:[%s5041_s1 + $0x20] sm:$0xff]  }
  0x79   : > { %2514 = vrot.lane.b32.xlu1 %v3329_v27, %s2971_s20  ;;  %v1248_v27 = vrot.slane %v3149_v31, 5  ;;  %1932 = vmatprep.subr.bf16.mxu0 %v2975_v41 }
  0x7a   : > { %2509 = vrot.lane.b32.xlu0 %v2508_v34, %s2976_s28  ;;  %v959_v34 = vsel %vm910_vm2, %v956_v63, %v958_v6  ;;  %2235 = vmatprep.subr.bf16.mxu1 %v2975_v41 }
  0x7b   : > { %v3500_v63 = vpack.i.bf16 %v959_v34, %v957_v43  ;;  %v1249_v4 = vsel %vm1206_vm4, %v1246_v37, %v1248_v27  ;;  %v1251_v39 = vsel %vm1206_vm4, %v1248_v27, %v1250_v29  ;;  %v1215_v43 = vsel %vm1206_vm4, %v1212_v40, %v1214_v14 }
  0x7c   : > { %1933 = vmatpush1.bf16.msra.mxu0 %v2901_v9  ;;  %2244 = vmatpush1.bf16.msra.mxu1 %v2901_v9  ;;  %v738_v37 = vrot.slane %v3038_v12, 3  ;;  %v1389_v9 = vrot.slane %v3014_v0, 6  ;;  %v1390_v27 = vrot.slane %v3017_v1, 6  ;;  %v5044_v12 = vrot.slane %v3112_v58, 6 }
  0x7d   : > { %2524 = vrot.lane.b32.xlu1 %v2523_v3, %s2972_s21  ;;  %v3502_v3 = vpack.i.bf16 %v923_v30, %v921_v8  ;;  %1934 = vmatprep.subr.bf16.mxu0 %v2975_v41  ;;  %v1426_v8 = vrot.slane %v3115_v59, 6  ;;  %v5048_v1 = vrot.slane %v3120_v62, 6  ;;  %v776_v59 = vrot.slane %v3132_v16, 3 }
  0x7e   : > { %2519 = vrot.lane.b32.xlu0 %v2518_v60, %s2972_s21  ;;  %v1213_v60 = vsel %vm1206_vm4, %v1210_v15, %v1212_v40  ;;  %2236 = vmatprep.subr.bf16.mxu1 %v2975_v41  ;;  %v2903_v15 = vld [vmem:[%s5041_s1 + $0x28] sm:$0xff]   ;;  %v2553_v40 = vpack.i.bf16 %v1251_v39, %v1249_v4  ;;  %v1391_v0 = vsel %vm1388_vm5, %v1389_v9, %v1390_v27  ;;  %v774_v4 = vrot.slane %v3149_v31, 3 }
  0x7f   : > { %v2548_v34 = vpack.i.bf16 %v1215_v43, %v1213_v60  ;;  %v739_v30 = vsel %vm728_vm3, %v736_v32, %v738_v37  ;;  %v2904_v60 = vld [vmem:[%s5041_s1 + $0x30] sm:$0xff]   ;;  %v1427_v32 = vsel %vm1388_vm5, %v5044_v12, %v1426_v8  ;;  %v1429_v31 = vsel %vm1388_vm5, %v1426_v8, %v5048_v1 }
  0x80   : > { %1935 = vmatpush1.bf16.msra.mxu0 %v2902_v11  ;;  %2245 = vmatpush1.bf16.msra.mxu1 %v2902_v11  ;;  %v932_v1 = vrot.slane %v2909_v23, 4 }
  0x81   : > { %2534 = vrot.lane.b32.xlu1 %v2498_v56, %s2973_s22  ;;  %v740_v56 = vrot.slane %v3041_v13, 3  ;;  %1936 = vmatprep.subr.bf16.mxu0 %v2975_v41  ;;  %v928_v13 = vrot.slane %v3054_v20, 4 }
  0x82   : > { %2529 = vrot.lane.b32.xlu0 %v3416_v53, %s2973_s22  ;;  %v5049_v53 = vrot.slane %v3020_v2, 6  ;;  %2237 = vmatprep.subr.bf16.mxu1 %v2975_v41 }
  0x83   : > { %v741_v11 = vsel %vm728_vm3, %v738_v37, %v740_v56  ;;  %v1776_v37 = vpack.c.bf16 %v1429_v31, %v1427_v32  ;;  %v960_v32 = vrot.slane %v3135_v17, 4  ;;  %v962_v31 = vrot.slane %v3144_v28, 4 }
  0x84   : > { %v1393_v39 = vsel %vm1388_vm5, %v1390_v27, %v5049_v53  ;;  %1937 = vmatpush1.bf16.msra.mxu0 %v2903_v15  ;;  %2246 = vmatpush1.bf16.msra.mxu1 %v2903_v15  ;;  %v2563_v9 = vpack.i.bf16 %v741_v11, %v739_v30  ;;  %v924_v27 = vrot.slane %v3063_v26, 4  ;;  %v775_v15 = vsel %vm728_vm3, %v772_v54, %v774_v4  ;;  %v3723_v53 = vld [vmem:[%s3011_s17 + $0x70] sm:$0xff] }
  0x85   : > { %2544 = vrot.lane.b32.xlu1 %v3500_v63, %s2974_s25  ;;  %v1758_v43 = vpack.c.bf16 %v1393_v39, %v1391_v0  ;;  %1938 = vmatprep.subr.bf16.mxu0 %v2975_v41  ;;  %v926_v0 = vrot.slane %v3051_v19, 4  ;;  %v1216_v54 = vrot.slane %v3063_v26, 5 }
  0x86   : > { %2539 = vrot.lane.b32.xlu0 %v3502_v3, %s2974_s25  ;;  %2238 = vmatprep.subr.bf16.mxu1 %v2975_v41  ;;  %v925_v11 = vsel %vm910_vm2, %v922_v5, %v924_v27 }
  0x87   : > { %2212 = vmatprep.mubr.msk.bf16.mxu0 %vm1498_vm6, %v1758_v43  ;;  %2221 = vmatprep.mubr.msk.bf16.mxu1 %vm1498_vm6, %v1776_v37 }
  0x88   : > { %1939 = vmatpush1.bf16.msra.mxu0 %v2904_v60  ;;  %2247 = vmatpush1.bf16.msra.mxu1 %v2904_v60  ;;  %v1218_v60 = vrot.slane %v3051_v19, 5 }
  0x89   : > { %2554 = vrot.lane.b32.xlu1 %v2553_v40, %s2976_s28  ;;  %v777_v40 = vsel %vm728_vm3, %v774_v4, %v776_v59  ;;  %1940 = vmatprep.subr.bf16.mxu0 %v2975_v41  ;;  %v927_v4 = vsel %vm910_vm2, %v924_v27, %v926_v0 }
  0x8a   : > { %2549 = vrot.lane.b32.xlu0 %v2548_v34, %s2976_s28  ;;  %v2905_v34 = vld [vmem:[%s5041_s1 + $0x38] sm:$0xff]   ;;  %2239 = vmatprep.subr.bf16.mxu1 %v2975_v41  ;;  %v2568_v30 = vpack.i.bf16 %v777_v40, %v775_v15  ;;  %v2583_v5 = vpack.i.bf16 %v927_v4, %v925_v11  ;;  %v1219_v27 = vsel %vm1206_vm4, %v1216_v54, %v1218_v60  ;;  %v778_v11 = vrot.slane %v3135_v17, 3 }
  0x8b   : > { %v3564_v39 = vpop.permute.xlu1 %2279  ;;  %v961_v40 = vsel %vm910_vm2, %v958_v6, %v960_v32  ;;  %v780_v6 = vrot.slane %v3144_v28, 3 }
  0x8c   : > { %v3576_v8 = vpop.permute.xlu0 %2269  ;;  %1941 = vmatpush1.bf16.msra.mxu0 %v2905_v34  ;;  %2248 = vmatpush1.bf16.msra.mxu1 %v2905_v34  ;;  %v1254_v34 = vrot.slane %v3144_v28, 5  ;;  %v779_v28 = vsel %vm728_vm3, %v776_v59, %v778_v11  ;;  %v964_v59 = vrot.slane %v3171_v50, 4 }
  0x8d   : > { %2564 = vrot.lane.b32.xlu1 %v2563_v9, %s2972_s21  ;;  %1942 = vmatprep.subr.bf16.mxu0 %v2975_v41  ;;  %v1217_v9 = vsel %vm1206_vm4, %v1214_v14, %v1216_v54 }
  0x8e   : > { %2559 = vrot.lane.b32.xlu0 %v3346_v57, %s2971_s20  ;;  %v2906_v57 = vld [vmem:[%s5041_s1 + $0x40] sm:$0xff]   ;;  %2240 = vmatprep.subr.bf16.mxu1 %v2975_v41  ;;  %v1252_v41 = vrot.slane %v3135_v17, 5  ;;  %v2593_v14 = vpack.i.bf16 %v1219_v27, %v1217_v9  ;;  %v744_v9 = vrot.slane %v3051_v19, 3 }
  0x8f   : > { %v3591_v43 = vpop.permute.xlu1 %2284 }
  0x90   : > { %5094 = vst [vmem:[#allocation5_spill] sm:$0xff] %v3591_v43  ;;  %v3598_v37 = vpop.permute.xlu0 %2274  ;;  %1943 = vmatpush1.bf16.msra.mxu0 %v2906_v57  ;;  %2249 = vmatpush1.bf16.msra.mxu1 %v2906_v57  ;;  %v1255_v12 = vsel %vm1206_vm4, %v1252_v41, %v1254_v34  ;;  %v742_v57 = vrot.slane %v3063_v26, 3  ;;  %v5115_v43 = vrot.slane %v3168_v49, 3 }
  0x91   : > { %2574 = vrot.lane.b32.xlu1 %v3502_v3, %s2973_s22  ;;  %v963_v3 = vsel %vm910_vm2, %v960_v32, %v962_v31  ;;  %v1253_v32 = vsel %vm1206_vm4, %v1250_v29, %v1252_v41  ;;  %v966_v41 = vrot.slane %v3160_v44, 4 }
  0x92   : > { %2569 = vrot.lane.b32.xlu0 %v2568_v30, %s2972_s21  ;;  %v2588_v54 = vpack.i.bf16 %v963_v3, %v961_v40  ;;  %v2598_v17 = vpack.i.bf16 %v1255_v12, %v1253_v32  ;;  %v743_v26 = vsel %vm728_vm3, %v740_v56, %v742_v57  ;;  %v745_v40 = vsel %vm728_vm3, %v742_v57, %v744_v9 }
  0x93   : > { %v3611_v15 = vpop.permute.xlu1 %2294  ;;  %v2608_v16 = vpack.i.bf16 %v745_v40, %v743_v26  ;;  %v930_v56 = vrot.slane %v3060_v25, 4  ;;  %v967_v32 = vsel %vm910_vm2, %v964_v59, %v966_v41  ;;  %v1256_v57 = vrot.slane %v3171_v50, 5 }
  0x94   : > { %5095 = vst [vmem:[#allocation6_spill] sm:$0xff] %v3611_v15  ;;  %v3619_v30 = vpop.permute.xlu0 %2289  ;;  %v1220_v40 = vrot.slane %v3054_v20, 5  ;;  %v1224_v15 = vrot.slane %v2909_v23, 5 }
  0x95   : > { %5096 = vst [vmem:[#allocation7_spill] sm:$0xff] %v3619_v30  ;;  %2584 = vrot.lane.b32.xlu1 %v2583_v5, %s2974_s25  ;;  %v931_v26 = vsel %vm910_vm2, %v928_v13, %v930_v56  ;;  %v1226_v30 = vrot.slane %v3723_v53, 5 }
  0x96   : > { %2579 = vrot.lane.b32.xlu0 %v3500_v63, %s2973_s22  ;;  %v781_v63 = vsel %vm728_vm3, %v778_v11, %v780_v6  ;;  %v1221_v20 = vsel %vm1206_vm4, %v1218_v60, %v1220_v40  ;;  %v3702_v60 = vld [vmem:[%s3011_s17 + $0x58] sm:$0xff] }
  0x97   : > { %v3626_v4 = vpop.permute.xlu1 %2304  ;;  %v2613_v12 = vpack.i.bf16 %v781_v63, %v779_v28  ;;  %v929_v63 = vsel %vm910_vm2, %v926_v0, %v928_v13  ;;  %v1257_v0 = vsel %vm1206_vm4, %v1254_v34, %v1256_v57  ;;  %v782_v34 = vrot.slane %v3171_v50, 3  ;;  %5102 = vst [vmem:[#allocation13_spill] sm:$0xff] %v3702_v60 }
  0x98   : > { %5097 = vst [vmem:[#allocation8_spill] sm:$0xff] %v3626_v4  ;;  %v3634_v27 = vpop.permute.xlu0 %2299  ;;  %v933_v4 = vsel %vm910_vm2, %v930_v56, %v932_v1  ;;  %v750_v56 = vrot.slane %v2909_v23, 3  ;;  %v5107_v23 = vrot.slane %v3060_v25, 5 }
  0x99   : > { %5098 = vst [vmem:[#allocation9_spill] sm:$0xff] %v3634_v27  ;;  %2594 = vrot.lane.b32.xlu1 %v2593_v14, %s2976_s28 }
  0x9a   : > { %2589 = vrot.lane.b32.xlu0 %v2588_v54, %s2974_s25 }
  0x9b   : > { %v3642_v29 = vpop.permute.xlu1 %2314 }
  0x9c   : > { %v3648_v3 = vpop.permute.xlu0 %2309 }
  0x9d   : > { %5099 = vst [vmem:[#allocation10_spill] sm:$0xff] %v3648_v3  ;;  %2604 = vrot.lane.b32.xlu1 %v3343_v42, %s2971_s20  ;;  %v965_v42 = vsel %vm910_vm2, %v962_v31, %v964_v59  ;;  %v3681_v59 = vpack.i.bf16 %v931_v26, %v929_v63  ;;  %v3706_v63 = vld [vmem:[%s3011_s17 + $0x60] sm:$0xff] }
  0x9e   : > { %2599 = vrot.lane.b32.xlu0 %v2598_v17, %s2976_s28  ;;  %v1258_v17 = vrot.slane %v3160_v44, 5  ;;  %v3678_v31 = vpack.i.bf16 %v967_v32, %v965_v42  ;;  %v784_v32 = vrot.slane %v3160_v44, 3  ;;  %5103 = vst [vmem:[#allocation14_spill] sm:$0xff] %v3706_v63  ;;  %v748_v26 = vrot.slane %v3706_v63, 3 }
  0x9f   : > { %v3655_v14 = vpop.permute.xlu1 %2324  ;;  %v783_v44 = vsel %vm728_vm3, %v780_v6, %v782_v34  ;;  %v1260_v6 = vrot.slane %v3165_v47, 5 }
  0xa0   : > { %5100 = vst [vmem:[#allocation11_spill] sm:$0xff] %v3655_v14  ;;  %v3659_v11 = vpop.permute.xlu0 %2319  ;;  %v1259_v13 = vsel %vm1206_vm4, %v1256_v57, %v1258_v17  ;;  %v746_v57 = vrot.slane %v3702_v60, 3  ;;  %v785_v50 = vsel %vm728_vm3, %v782_v34, %v784_v32  ;;  %v1262_v34 = vrot.slane %v3168_v49, 5 }
  0xa1   : > { %2614 = vrot.lane.b32.xlu1 %v2613_v12, %s2972_s21  ;;  %v5051_v12 = vrot.slane %v3060_v25, 5 }
  0xa2   : > { %2609 = vrot.lane.b32.xlu0 %v2608_v16, %s2972_s21  ;;  %v749_v38 = vsel %vm728_vm3, %v746_v57, %v748_v26 }
  0xa3   : > { %v3667_v28 = vpop.permute.xlu1 %2334 }
  0xa4   : > { %v3675_v16 = vpop.permute.xlu0 %2329 }
  0xa5   : > { %5101 = vst [vmem:[#allocation12_spill] sm:$0xff] %v3675_v16  ;;  %2624 = vrot.lane.b32.xlu1 %v2588_v54, %s2973_s22  ;;  %v1223_v54 = vsel %vm1206_vm4, %v1220_v40, %v5051_v12 }
  0xa6   : > { %2619 = vrot.lane.b32.xlu0 %v2583_v5, %s2973_s22  ;;  %v2643_v5 = vpack.i.bf16 %v1259_v13, %v1257_v0  ;;  %v2638_v19 = vpack.i.bf16 %v1223_v54, %v1221_v20  ;;  %v968_v13 = vrot.slane %v3165_v47, 4  ;;  %v970_v20 = vrot.slane %v3168_v49, 4 }
  0xa7   : > { %v3685_v46 = vpop.permute.xlu1 %2344  ;;  %v747_v54 = vsel %vm728_vm3, %v744_v9, %v746_v57  ;;  %v2663_v9 = vpack.i.bf16 %v785_v50, %v783_v44  ;;  %v5058_v44 = vrot.slane %v3168_v49, 3 }
  0xa8   : > { %v3693_v42 = vpop.permute.xlu0 %2339  ;;  %v969_v57 = vsel %vm910_vm2, %v966_v41, %v968_v13  ;;  %v971_v3 = vsel %vm910_vm2, %v968_v13, %v970_v20  ;;  %v786_v41 = vrot.slane %v3165_v47, 3 }
  0xa9   : > { %2634 = vrot.lane.b32.xlu1 %v3678_v31, %s2974_s25  ;;  %v3755_v50 = vpack.i.bf16 %v971_v3, %v969_v57  ;;  %v3780_v57 = vld [vmem:[%s3011_s17 + $0x80] sm:$0xff] }
  0xaa   : > { %2629 = vrot.lane.b32.xlu0 %v3681_v59, %s2974_s25  ;;  %v3771_v3 = vsel %vm728_vm3, %v784_v32, %v786_v41  ;;  %v938_v25 = vrot.slane %v3780_v57, 4  ;;  %v5118_v35 = vrot.slane %v3780_v57, 3 }
  0xab   : > { %v3709_v40 = vpop.permute.xlu1 %2354 }
  0xac   : > { %v3711_v0 = vpop.permute.xlu0 %2349 }
  0xad   : > { %2644 = vrot.lane.b32.xlu1 %v2643_v5, %s2976_s28  ;;  %v934_v5 = vrot.slane %v3723_v53, 4 }
  0xae   : > { %2639 = vrot.lane.b32.xlu0 %v2638_v19, %s2976_s28  ;;  %v2658_v19 = vpack.i.bf16 %v749_v38, %v747_v54  ;;  %v3747_v38 = vsel %vm1206_vm4, %v1260_v6, %v1262_v34 }
  0xaf   : > { %v3726_v55 = vpop.permute.xlu1 %2364  ;;  %v935_v27 = vsel %vm910_vm2, %v932_v1, %v934_v5  ;;  %v1227_v1 = vsel %vm1206_vm4, %v1224_v15, %v1226_v30 }
  0xb0   : > { %5104 = vst [vmem:[#allocation15_spill] sm:$0xff] %v3726_v55  ;;  %v3730_v12 = vpop.permute.xlu0 %2359  ;;  %v3760_v47 = vpack.i.bf16 %v935_v27, %v933_v4  ;;  %v2911_v4 = vld [vmem:[%s3011_s17 + $0x78] sm:$0xff] }
  0xb1   : > { %2654 = vrot.lane.b32.xlu1 %v3359_v7, %s2971_s20  ;;  %v3744_v7 = vsel %vm1206_vm4, %v1258_v17, %v1260_v6  ;;  %v972_v17 = vrot.slane %v3190_v10, 4  ;;  %v1225_v6 = vsel %vm1206_vm4, %v5107_v23, %v1224_v15  ;;  %v936_v27 = vrot.slane %v2911_v4, 4 }
  0xb2   : > { %2649 = vrot.lane.b32.xlu0 %v3272_v24, %s2971_s20  ;;  %v2693_v54 = vpack.i.bf16 %v3747_v38, %v3744_v7  ;;  %v3786_v15 = vsel %vm728_vm3, %v748_v26, %v750_v56  ;;  %v5110_v38 = vrot.slane %v3723_v53, 3  ;;  %v1264_v23 = vrot.slane %v3190_v10, 5 }
  0xb3   : > { %v3741_v21 = vpop.permute.xlu1 %2374  ;;  %v973_v13 = vsel %vm910_vm2, %v970_v20, %v972_v17 }
  0xb4   : > { %5105 = vst [vmem:[#allocation16_spill] sm:$0xff] %v3741_v21  ;;  %v3751_v24 = vpop.permute.xlu0 %2369  ;;  %v3791_v32 = vsel %vm728_vm3, %v750_v56, %v5110_v38  ;;  %v1228_v38 = vrot.slane %v2911_v4, 5 }
  0xb5   : > { %5106 = vst [vmem:[#allocation17_spill] sm:$0xff] %v3751_v24  ;;  %2664 = vrot.lane.b32.xlu1 %v2663_v9, %s2972_s21 }
  0xb6   : > { %2659 = vrot.lane.b32.xlu0 %v2658_v19, %s2972_s21  ;;  %v3776_v19 = vsel %vm728_vm3, %v786_v41, %v5058_v44  ;;  %v1266_v41 = vrot.slane %v3174_v51, 5  ;;  %v2688_v44 = vpack.i.bf16 %v1227_v1, %v1225_v6  ;;  %v937_v1 = vsel %vm910_vm2, %v934_v5, %v936_v27 }
  0xb7   : > { %v3768_v9 = vpop.permute.xlu1 %2384  ;;  %v790_v5 = vrot.slane %v3190_v10, 3 }
  0xb8   : > { %5108 = vst [vmem:[#allocation18_spill] sm:$0xff] %v3768_v9  ;;  %v3783_v7 = vpop.permute.xlu0 %2379  ;;  %v5111_v9 = vrot.slane %v3174_v51, 4  ;;  %v3822_v56 = vsel %vm1206_vm4, %v1264_v23, %v1266_v41 }
  0xb9   : > { %5109 = vst [vmem:[#allocation19_spill] sm:$0xff] %v3783_v7  ;;  %2674 = vrot.lane.b32.xlu1 %v3678_v31, %s2973_s22  ;;  %v1230_v7 = vrot.slane %v3780_v57, 5  ;;  %v3845_v31 = vld [vmem:[%s3011_s17 + $0x120] sm:$0xff] }
  0xba   : > { %v975_v26 = vsel %vm910_vm2, %v972_v17, %v5111_v9  ;;  %2669 = vrot.lane.b32.xlu0 %v3681_v59, %s2973_s22  ;;  %v939_v17 = vsel %vm910_vm2, %v936_v27, %v938_v25  ;;  %v3819_v9 = vsel %vm1206_vm4, %v1262_v34, %v1264_v23  ;;  %v3835_v34 = vsel %vm1206_vm4, %v1226_v30, %v1228_v38 }
  0xbb   : > { %v3806_v21 = vpop.permute.xlu1 %2394  ;;  %v3810_v20 = vpack.i.bf16 %v975_v26, %v973_v13  ;;  %v3816_v6 = vpack.i.bf16 %v939_v17, %v937_v1  ;;  %v3828_v13 = vld [vmem:[%s3011_s17 + $0x110] sm:$0xff]  ;;  %v754_v26 = vrot.slane %v2911_v4, 3  ;;  %v3838_v23 = vsel %vm1206_vm4, %v1228_v38, %v1230_v7  ;;  %v3841_v17 = vld [vmem:[%s3011_s17 + $0x118] sm:$0xff]  ;;  %v3851_v1 = vld [vmem:[%s3011_s17 + $0x88] sm:$0xff] }
  0xbc   : > { %5112 = vst [vmem:[#allocation20_spill] sm:$0xff] %v3806_v21  ;;  %v3814_v59 = vpop.permute.xlu0 %2389  ;;  %v976_v10 = vrot.slane %v3841_v17, 4  ;;  %v940_v21 = vrot.slane %v3851_v1, 4  ;;  %v1268_v38 = vrot.slane %v3841_v17, 5  ;;  %v1232_v27 = vrot.slane %v3851_v1, 5 }
  0xbd   : > { %5113 = vst [vmem:[#allocation21_spill] sm:$0xff] %v3814_v59  ;;  %2684 = vrot.lane.b32.xlu1 %v3755_v50, %s2974_s25  ;;  %v3855_v59 = vld [vmem:[%s3011_s17 + $0x90] sm:$0xff]  ;;  %v3870_v30 = vsel %vm728_vm3, %v5115_v43, %v790_v5  ;;  %v5116_v63 = vrot.slane %v3828_v13, 3  ;;  %v3885_v60 = vsel %vm728_vm3, %v754_v26, %v5118_v35  ;;  %v5119_v43 = vrot.slane %v3174_v51, 4 }
  0xbe   : > { %2679 = vrot.lane.b32.xlu0 %v3760_v47, %s2974_s25  ;;  %v5122_v35 = vrot.slane %v3855_v59, 4  ;;  %v5123_v49 = vrot.slane %v3845_v31, 5  ;;  %v5130_v14 = vrot.slane %v3845_v31, 3 }
  0xbf   : > { %v3848_v4 = vpop.permute.xlu1 %2404  ;;  %v3875_v16 = vsel %vm728_vm3, %v790_v5, %v5116_v63  ;;  %v977_v63 = vsel %vm910_vm2, %v5119_v43, %v976_v10  ;;  %v941_v5 = vsel %vm910_vm2, %v938_v25, %v940_v21 }
  0xc0   : > { %v3860_v24 = vpop.permute.xlu0 %2399  ;;  %v3908_v51 = vsel %vm1206_vm4, %v1268_v38, %v5123_v49  ;;  %v2336_v49 = vunpack.i.l.bf16 %v3667_v28 }
  0xc1   : > { %5114 = vst [vmem:[#allocation22_spill] sm:$0xff] %v3860_v24  ;;  %2694 = vrot.lane.b32.xlu1 %v2693_v54, %s2976_s28  ;;  %v5117_v24 = vrot.slane %v3723_v53, 3  ;;  %v5120_v54 = vrot.slane %v3845_v31, 4 }
  0xc2   : > { %2689 = vrot.lane.b32.xlu0 %v2688_v44, %s2976_s28  ;;  %v3903_v44 = vsel %vm1206_vm4, %v1266_v41, %v1268_v38  ;;  %v2337_v38 = vunpack.i.h.bf16 %v3667_v28  ;;  %v758_v28 = vrot.slane %v3851_v1, 3 }
  0xc3   : > { %v3880_v58 = vsel %vm728_vm3, %v5117_v24, %v754_v26  ;;  %v979_v53 = vsel %vm910_vm2, %v976_v10, %v5120_v54  ;;  %v3896_v24 = vpop.permute.xlu1 %2414  ;;  %v943_v26 = vsel %vm910_vm2, %v940_v21, %v5122_v35  ;;  %v3917_v54 = vsel %vm1206_vm4, %v1230_v7, %v1232_v27 }
  0xc4   : > { %5121 = vst [vmem:[#allocation23_spill] sm:$0xff] %v3896_v24  ;;  %v3910_v43 = vpop.permute.xlu0 %2409  ;;  %v5125_v21 = vrot.slane %v3855_v59, 5  ;;  %v794_v35 = vrot.slane %v3841_v17, 3  ;;  %v3932_v7 = vpack.i.bf16 %v979_v53, %v977_v63  ;;  %v2346_v10 = vunpack.i.l.bf16 %v3685_v46  ;;  %v3945_v53 = vld [vmem:[%s3011_s17 + $0x128] sm:$0xff]  ;;  %v3960_v63 = vld [vmem:[%s3011_s17 + $0xd0] sm:$0xff] }
  0xc5   : > { %5124 = vst [vmem:[#allocation24_spill] sm:$0xff] %v3910_v43  ;;  %2704 = vrot.lane.b32.xlu1 %v3355_v45, %s2971_s20  ;;  %v2347_v45 = vunpack.i.h.bf16 %v3685_v46  ;;  %v3952_v43 = vld [vmem:[%s3011_s17 + $0x130] sm:$0xff]  ;;  %v3955_v46 = vld [vmem:[%s3011_s17 + $0xd8] sm:$0xff]  ;;  %v1525_v55 = vsel %vm1498_vm6, %v3960_v63, %v2336_v49 }
  0xc6   : > { %v3922_v41 = vsel %vm1206_vm4, %v1232_v27, %v5125_v21  ;;  %2699 = vrot.lane.b32.xlu0 %v3296_v22, %s2971_s20  ;;  %v3934_v27 = vpack.i.bf16 %v943_v26, %v941_v5  ;;  %v2342_v5 = vunpack.i.h.bf16 %v3693_v42  ;;  %v2341_v26 = vunpack.i.l.bf16 %v3693_v42  ;;  %5127 = vst [vmem:[#allocation26_spill] sm:$0xff] %v3955_v46 }
  0xc7   : > { %v2425_v25 = vpop.permute.xlu1 %2424  ;;  %v1526_v22 = vsel %vm1498_vm6, %v3955_v46, %v2337_v38  ;;  %v5128_v42 = vpack.i.bf16 %v3776_v19, %v3771_v3  ;;  %v3976_v38 = vsel %vm728_vm3, %v794_v35, %v5130_v14  ;;  %v5133_v3 = vpack.i.bf16 %v3791_v32, %v3786_v15  ;;  %v3995_v14 = vld [vmem:[%s3011_s17 + $0xf8] sm:$0xff] }
  0xc8   : > { %v2427_v21 = vunpack.i.h.bf16 %v2425_v25  ;;  %v2426_v24 = vunpack.i.l.bf16 %v2425_v25  ;;  %v3949_v1 = vpop.permute.xlu0 %2419  ;;  %v5129_v25 = vrot.slane %v3828_v13, 3  ;;  %v5134_v19 = vrot.slane %v3780_v57, 3  ;;  %5135 = vst [vmem:[#allocation29_spill] sm:$0xff] %v3995_v14 }
  0xc9   : > { %5126 = vst [vmem:[#allocation25_spill] sm:$0xff] %v3949_v1  ;;  %2714 = vrot.lane.b32.xlu1 %v5128_v42, %s2972_s21  ;;  %v5137_v15 = vrot.slane %v3855_v59, 3 }
  0xca   : > { %v3971_v1 = vsel %vm728_vm3, %v5129_v25, %v794_v35  ;;  %v3979_v46 = vsel %vm1535_vm7, %v1526_v22, %v2427_v21  ;;  %v3982_v49 = vsel %vm1535_vm7, %v1525_v55, %v2426_v24  ;;  %2709 = vrot.lane.b32.xlu0 %v5133_v3, %s2972_s21  ;;  %v3991_v42 = vsel %vm728_vm3, %v5134_v19, %v758_v28  ;;  %v4000_v21 = vld [vmem:[%s3011_s17 + $0xf0] sm:$0xff]  ;;  %v4011_v22 = vld [vmem:[%s3011_s17 + $0xe8] sm:$0xff]  ;;  %v4016_v19 = vld [vmem:[%s3011_s17 + $0xe0] sm:$0xff] }
  0xcb   : > { %5131 = vst [vmem:[#allocation27_spill] sm:$0xff] %v3979_v46  ;;  %5132 = vst [vmem:[#allocation28_spill] sm:$0xff] %v3982_v49  ;;  %v980_v25 = vrot.slane %v3945_v53, 4  ;;  %v1530_v35 = vsel %vm1498_vm6, %v3995_v14, %v2347_v45  ;;  %v1529_v55 = vsel %vm1498_vm6, %v4000_v21, %v2346_v10  ;;  %v2435_v24 = vpop.permute.xlu1 %2434  ;;  %v4007_v57 = vsel %vm728_vm3, %v758_v28, %v5137_v15 }
  0xcc   : > { %5136 = vst [vmem:[#allocation30_spill] sm:$0xff] %v4000_v21  ;;  %5138 = vst [vmem:[#allocation31_spill] sm:$0xff] %v4011_v22  ;;  %v1528_v3 = vsel %vm1498_vm6, %v4011_v22, %v2342_v5  ;;  %v1527_v45 = vsel %vm1498_vm6, %v4016_v19, %v2341_v26  ;;  %v2437_v46 = vunpack.i.h.bf16 %v2435_v24  ;;  %v2436_v10 = vunpack.i.l.bf16 %v2435_v24  ;;  %v2430_v49 = vpop.permute.xlu0 %2429 }
  0xcd   : > { %v2357_v14 = vunpack.i.h.bf16 %v3709_v40  ;;  %v2356_v28 = vunpack.i.l.bf16 %v3709_v40  ;;  %v2432_v15 = vunpack.i.h.bf16 %v2430_v49  ;;  %v2431_v32 = vunpack.i.l.bf16 %v2430_v49  ;;  %2724 = vrot.lane.b32.xlu1 %v3755_v50, %s2973_s22 }
  0xce   : > { %v2352_v5 = vunpack.i.h.bf16 %v3711_v0  ;;  %v2351_v21 = vunpack.i.l.bf16 %v3711_v0  ;;  %v4027_v22 = vsel %vm1535_vm7, %v1530_v35, %v2437_v46  ;;  %v4030_v26 = vsel %vm1535_vm7, %v1529_v55, %v2436_v10  ;;  %2719 = vrot.lane.b32.xlu0 %v3760_v47, %s2973_s22  ;;  %v4044_v46 = vld [vmem:[%s3011_s17 + $0x98] sm:$0xff] }
  0xcf   : > { %5139 = vst [vmem:[#allocation32_spill] sm:$0xff] %v4027_v22  ;;  %5140 = vst [vmem:[#allocation33_spill] sm:$0xff] %v4030_v26  ;;  %v4035_v40 = vsel %vm1535_vm7, %v1527_v45, %v2431_v32  ;;  %v4038_v49 = vsel %vm1535_vm7, %v1528_v3, %v2432_v15  ;;  %v2445_v50 = vpop.permute.xlu1 %2444  ;;  %v5143_v24 = vrot.slane %v3845_v31, 4  ;;  %v944_v35 = vrot.slane %v4044_v46, 4 }
  0xd0   : > { %5141 = vst [vmem:[#allocation34_spill] sm:$0xff] %v4035_v40  ;;  %5142 = vst [vmem:[#allocation35_spill] sm:$0xff] %v4038_v49  ;;  %v2447_v55 = vunpack.i.h.bf16 %v2445_v50  ;;  %v2446_v10 = vunpack.i.l.bf16 %v2445_v50  ;;  %v2440_v47 = vpop.permute.xlu0 %2439  ;;  %v5144_v32 = vrot.slane %v3952_v43, 4  ;;  %v1272_v3 = vrot.slane %v3945_v53, 5  ;;  %v4058_v49 = vld [vmem:[%s3011_s17 + $0x108] sm:$0xff]  ;;  %v4063_v40 = vld [vmem:[%s3011_s17 + $0x100] sm:$0xff] }
  0xd1   : > { %v981_v0 = vsel %vm910_vm2, %v5143_v24, %v980_v25  ;;  %v1534_v15 = vsel %vm1498_vm6, %v3841_v17, %v2357_v14  ;;  %v1533_v22 = vsel %vm1498_vm6, %v3828_v13, %v2356_v28  ;;  %v2442_v24 = vunpack.i.h.bf16 %v2440_v47  ;;  %2734 = vrot.lane.b32.xlu1 %v3810_v20, %s2974_s25  ;;  %5145 = vst [vmem:[#allocation36_spill] sm:$0xff] %v4058_v49 }
  0xd2   : > { %v983_v45 = vsel %vm910_vm2, %v980_v25, %v5144_v32  ;;  %v2441_v26 = vunpack.i.l.bf16 %v2440_v47  ;;  %v1532_v50 = vsel %vm1498_vm6, %v4058_v49, %v2352_v5  ;;  %5146 = vst [vmem:[#allocation37_spill] sm:$0xff] %v4063_v40  ;;  %v1531_v25 = vsel %vm1498_vm6, %v4063_v40, %v2351_v21  ;;  %2729 = vrot.lane.b32.xlu0 %v3816_v6, %s2974_s25  ;;  %v2934_v40 = vld [vmem:[%s3011_s17] sm:$0xff] }
  0xd3   : > { %v4068_v17 = vsel %vm1535_vm7, %v1534_v15, %v2447_v55  ;;  %v4071_v13 = vsel %vm1535_vm7, %v1533_v22, %v2446_v10  ;;  %v2282_v14 = vunpack.i.h.bf16 %v3564_v39  ;;  %v4080_v5 = vsel %vm1535_vm7, %v1532_v50, %v2442_v24  ;;  %v4082_v47 = vpop.permute.xlu1 %2454  ;;  %v4123_v10 = vld [vmem:[%s3011_s17 + $0xa0] sm:$0xff] }
  0xd4   : > { %5147 = vst [vmem:[#allocation38_spill] sm:$0xff] %v4068_v17  ;;  %5148 = vst [vmem:[#allocation39_spill] sm:$0xff] %v4071_v13  ;;  %v4077_v28 = vsel %vm1535_vm7, %v1531_v25, %v2441_v26  ;;  %v4086_v55 = vpop.permute.xlu0 %2449  ;;  %v2281_v26 = vunpack.i.l.bf16 %v3564_v39  ;;  %v5151_v32 = vpack.i.bf16 %v3822_v56, %v3819_v9  ;;  %v4096_v15 = vpack.i.bf16 %v983_v45, %v981_v0  ;;  %v2933_v17 = vld [vmem:[%s3011_s17 + $0x8] sm:$0xff] }
  0xd5   : > { %5149 = vst [vmem:[#allocation40_spill] sm:$0xff] %v4077_v28  ;;  %5150 = vst [vmem:[#allocation41_spill] sm:$0xff] %v4080_v5  ;;  %v5152_v24 = vrot.slane %v3855_v59, 4  ;;  %v1236_v25 = vrot.slane %v4044_v46, 5  ;;  %v2272_v22 = vunpack.i.h.bf16 %v3576_v8  ;;  %v2271_v21 = vunpack.i.l.bf16 %v3576_v8  ;;  %v2932_v5 = vld [vmem:[%s3011_s17 + $0x20] sm:$0xff] }
  0xd6   : > { %2744 = vrot.lane.b32.xlu1 %v5151_v32, %s2976_s28  ;;  %v5153_v39 = vpack.i.bf16 %v3838_v23, %v3835_v34  ;;  %v5154_v56 = vrot.slane %v3102_v52, 4  ;;  %v5155_v0 = vrot.slane %v3845_v31, 5  ;;  %v2927_v32 = vld [vmem:[%s3011_s17 + $0x28] sm:$0xff]  ;;  %v4127_v23 = vld [vmem:[%s3011_s17 + $0x38] sm:$0xff]  ;;  %v616_v34 = vrot.slane %v3945_v53, 2 }
  0xd7   : > { %v945_v50 = vsel %vm910_vm2, %v5152_v24, %v944_v35  ;;  %v4118_v24 = vsel %vm1498_vm6, %v2927_v32, %v2282_v14  ;;  %v4120_v8 = vpop.permute.xlu1 %2464  ;;  %5158 = vst [vmem:[#allocation44_spill] sm:$0xff] %v4127_v23  ;;  %v4137_v14 = vld [vmem:[%s3011_s17 + $0xc8] sm:$0xff]  ;;  %v618_v13 = vrot.slane %v3952_v43, 2  ;;  %v4145_v28 = vsel %vm1498_vm6, %v2932_v5, %v2281_v26 }
  0xd8   : > { %2739 = vrot.lane.b32.xlu0 %v5153_v39, %s2976_s28  ;;  %v947_v9 = vsel %vm910_vm2, %v944_v35, %v5154_v56  ;;  %v4114_v45 = vsel %vm1206_vm4, %v5155_v0, %v1272_v3  ;;  %5156 = vst [vmem:[#allocation42_spill] sm:$0xff] %v4118_v24  ;;  %5157 = vst [vmem:[#allocation43_spill] sm:$0xff] %v4120_v8  ;;  %v1394_v35 = vrot.slane %v4127_v23, 6  ;;  %v4131_v39 = vld [vmem:[%s3011_s17 + $0x40] sm:$0xff]  ;;  %v4134_v0 = vpop.permute.xlu0 %2459  ;;  %v1430_v32 = vrot.slane %v4137_v14, 6 }
  0xd9   : > { %5159 = vst [vmem:[#allocation45_spill] sm:$0xff] %v4134_v0  ;;  %5160 = vst [vmem:[#allocation46_spill] sm:$0xff] %v4137_v14  ;;  %v2277_v49 = vunpack.i.h.bf16 %v3598_v37  ;;  %v4150_v56 = vpack.i.bf16 %v947_v9, %v945_v50  ;;  %v5162_v8 = vrot.slane %v3952_v43, 5  ;;  %v1500_v23 = vsel %vm1498_vm6, %v2933_v17, %v2272_v22 }
  0xda   : > { %5161 = vst [vmem:[#allocation47_spill] sm:$0xff] %v4145_v28  ;;  %2754 = vrot.lane.b32.xlu1 %v3369_v18, %s2971_s20  ;;  %v1499_v24 = vsel %vm1498_vm6, %v2934_v40, %v2271_v21  ;;  %v2276_v5 = vunpack.i.l.bf16 %v3598_v37  ;;  %v5163_v18 = vrot.slane %v3855_v59, 5  ;;  %v5164_v50 = vrot.slane %v4123_v10, 5 }
  0xdb   : > { %v4155_v14 = vsel %vm1206_vm4, %v1272_v3, %v5162_v8  ;;  %v4169_v3 = vpop.permute.xlu1 %2474  ;;  %v5165_v40 = vrot.slane %v3020_v2, 6  ;;  %v798_v22 = vrot.slane %v3945_v53, 3  ;;  %v5167_v8 = vrot.slane %v3120_v62, 6 }
  0xdc   : > { %2749 = vrot.lane.b32.xlu0 %v3292_v36, %s2971_s20  ;;  %v4167_v26 = vsel %vm1206_vm4, %v5163_v18, %v1236_v25  ;;  %v4174_v17 = vsel %vm1206_vm4, %v1236_v25, %v5164_v50  ;;  %v5166_v36 = vrot.slane %v4131_v39, 6  ;;  %v4187_v9 = vpop.permute.xlu0 %2469  ;;  %v5168_v2 = vrot.slane %v3960_v63, 6 }
  0xdd   : > { %v4179_v37 = vsel %vm1388_vm5, %v5165_v40, %v1394_v35  ;;  %v4192_v25 = vsel %vm1388_vm5, %v5167_v8, %v1430_v32  ;;  %v5169_v50 = vrot.slane %v3182_v61, 2  ;;  %v4205_v53 = vsel %vm432_vm1, %v616_v34, %v618_v13  ;;  %v2935_v40 = vld [vmem:[%s3011_s17 + $0x18] sm:$0xff] }
  0xde   : > { %v4184_v21 = vsel %vm1388_vm5, %v1394_v35, %v5166_v36  ;;  %v4197_v18 = vsel %vm1388_vm5, %v1430_v32, %v5168_v2  ;;  %v4209_v36 = vsel %vm1498_vm6, %v2935_v40, %v2277_v49  ;;  %v5170_v62 = vpack.i.bf16 %v3875_v16, %v3870_v30  ;;  %v2936_v2 = vld [vmem:[%s3011_s17 + $0x10] sm:$0xff]  ;;  %v4245_v32 = vld [vmem:[%s3011_s17 + $0x138] sm:$0xff] }
  0xdf   : > { %v4202_v35 = vsel %vm432_vm1, %v5169_v50, %v616_v34  ;;  %v800_v61 = vrot.slane %v3952_v43, 3  ;;  %v762_v8 = vrot.slane %v4044_v46, 3  ;;  %v4221_v13 = vsel %vm1498_vm6, %v2936_v2, %v2276_v5  ;;  %v2485_v40 = vpop.permute.xlu1 %2484 }
  0xe0   : > { %2764 = vrot.lane.b32.xlu1 %v5170_v62, %s2972_s21  ;;  %v2317_v49 = vunpack.i.h.bf16 %v3642_v29  ;;  %v5171_v16 = vpack.i.bf16 %v3885_v60, %v3880_v58  ;;  %v2316_v50 = vunpack.i.l.bf16 %v3642_v29  ;;  %v5172_v58 = vrot.slane %v3845_v31, 3  ;;  %v2480_v30 = vpop.permute.xlu0 %2479 }
  0xe1   : > { %v2362_v2 = vunpack.i.h.bf16 %v3730_v12  ;;  %v2407_v29 = vunpack.i.h.bf16 %v3848_v4  ;;  %v2406_v34 = vunpack.i.l.bf16 %v3848_v4  ;;  %v4252_v62 = vsel %vm728_vm3, %v798_v22, %v800_v61 }
  0xe2   : > { %2759 = vrot.lane.b32.xlu0 %v5171_v16, %s2972_s21  ;;  %v4240_v60 = vsel %vm728_vm3, %v5172_v58, %v798_v22  ;;  %v2361_v16 = vunpack.i.l.bf16 %v3730_v12  ;;  %v5173_v31 = vrot.slane %v3855_v59, 3  ;;  %v1518_v12 = vsel %vm1498_vm6, %v4044_v46, %v2317_v49 }
  0xe3   : > { %v2452_v5 = vunpack.i.h.bf16 %v4086_v55  ;;  %v2451_v28 = vunpack.i.l.bf16 %v4086_v55  ;;  %v1517_v22 = vsel %vm1498_vm6, %v3855_v59, %v2316_v50  ;;  %v2477_v61 = vunpack.i.h.bf16 %v4169_v3  ;;  %v2495_v46 = vpop.permute.xlu1 %2494 }
  0xe4   : > { %2774 = vrot.lane.b32.xlu1 %v3810_v20, %s2973_s22  ;;  %v4257_v58 = vsel %vm728_vm3, %v5173_v31, %v762_v8  ;;  %v5175_v20 = vrot.slane %v3102_v52, 3  ;;  %v2476_v31 = vunpack.i.l.bf16 %v4169_v3  ;;  %v1536_v55 = vsel %vm1535_vm7, %v1499_v24, %v2361_v16  ;;  %v2490_v52 = vpop.permute.xlu0 %2489 }
  0xe5   : > { %5174 = vst [vmem:[#allocation48_spill] sm:$0xff] %v4257_v58  ;;  %v1537_v0 = vsel %vm1535_vm7, %v1500_v23, %v2362_v2  ;;  %v2486_v58 = vunpack.i.l.bf16 %v2485_v40  ;;  %v2496_v59 = vunpack.i.l.bf16 %v2495_v46  ;;  %v1573_v3 = vsel %vm1572_vm8, %v1536_v55, %v2451_v28 }
  0xe6   : > { %2769 = vrot.lane.b32.xlu0 %v3816_v6, %s2973_s22  ;;  %v4268_v4 = vsel %vm728_vm3, %v762_v8, %v5175_v20  ;;  %v2487_v6 = vunpack.i.h.bf16 %v2485_v40  ;;  %v1555_v8 = vsel %vm1535_vm7, %v1518_v12, %v2407_v29  ;;  %v1554_v20 = vsel %vm1535_vm7, %v1517_v22, %v2406_v34 }
  0xe7   : > { %5176 = vst [vmem:[#allocation49_spill] sm:$0xff] %v4268_v4  ;;  %v2497_v4 = vunpack.i.h.bf16 %v2495_v46  ;;  %v1574_v50 = vsel %vm1572_vm8, %v1537_v0, %v2452_v5  ;;  %v2472_v24 = vunpack.i.h.bf16 %v4187_v9  ;;  %v2471_v23 = vunpack.i.l.bf16 %v4187_v9  ;;  %v2505_v29 = vpop.permute.xlu1 %2504 }
  0xe8   : > { %2784 = vrot.lane.b32.xlu1 %v3932_v7, %s2974_s25  ;;  %v1610_v40 = vsel %vm1609_vm9, %v1573_v3, %v2476_v31  ;;  %v1611_v34 = vsel %vm1609_vm9, %v1574_v50, %v2477_v61  ;;  %v2482_v2 = vunpack.i.h.bf16 %v2480_v30  ;;  %v2481_v16 = vunpack.i.l.bf16 %v2480_v30  ;;  %v2500_v22 = vpop.permute.xlu0 %2499  ;;  %v4298_v30 = vld [vmem:[%s3011_s17 + $0x140] sm:$0xff]  ;;  %v4311_v50 = vld [vmem:[%s3011_s17 + $0x48] sm:$0xff] }
  0xe9   : > { %v1647_v12 = vsel %vm1646_vm10, %v1610_v40, %v2486_v58  ;;  %v1648_v28 = vsel %vm1646_vm10, %v1611_v34, %v2487_v6  ;;  %v2507_v0 = vunpack.i.h.bf16 %v2505_v29  ;;  %v2506_v5 = vunpack.i.l.bf16 %v2505_v29 }
  0xea   : > { %2779 = vrot.lane.b32.xlu0 %v3934_v27, %s2974_s25  ;;  %v1684_v9 = vsel %vm1683_vm11, %v1647_v12, %v2496_v59  ;;  %v1685_v46 = vsel %vm1683_vm11, %v1648_v28, %v2497_v4  ;;  %v2492_v55 = vunpack.i.h.bf16 %v2490_v52  ;;  %v2491_v49 = vunpack.i.l.bf16 %v2490_v52  ;;  %v4318_v12 = vld [vmem:[%s3011_s17 + $0x50] sm:$0xff] }
  0xeb   : > { %v5177_v61 = vpack.i.bf16 %v3908_v51, %v3903_v44  ;;  %v2502_v58 = vunpack.i.h.bf16 %v2500_v22  ;;  %v2501_v31 = vunpack.i.l.bf16 %v2500_v22  ;;  %v5178_v6 = vpack.i.bf16 %v3922_v41, %v3917_v54  ;;  %v4308_v44 = vpop.permute.xlu1 %2514  ;;  %v5180_v22 = vld [vmem:[#allocation11_spill] sm:$0xff] }
  0xec   : > { %v1721_v59 = vsel %vm1720_vm12, %v1684_v9, %v2506_v5  ;;  %v1722_v4 = vsel %vm1720_vm12, %v1685_v46, %v2507_v0  ;;  %v1592_v52 = vsel %vm1572_vm8, %v1555_v8, %v2472_v24  ;;  %v1591_v3 = vsel %vm1572_vm8, %v1554_v20, %v2471_v23  ;;  %v2510_v41 = vpop.permute.xlu0 %2509 }
  0xed   : > { %2794 = vrot.lane.b32.xlu1 %v5177_v61, %s2976_s28  ;;  %v1757_v51 = vpack.c.bf16 %v1722_v4, %v1721_v59  ;;  %v1398_v40 = vrot.slane %v4311_v50, 6  ;;  %v1628_v34 = vsel %vm1609_vm9, %v1591_v3, %v2481_v16  ;;  %v1629_v54 = vsel %vm1609_vm9, %v1592_v52, %v2482_v2  ;;  %v5183_v4 = vld [vmem:[#allocation15_spill] sm:$0xff] }
  0xee   : > { %2789 = vrot.lane.b32.xlu0 %v5178_v6, %s2976_s28  ;;  %v1096_v29 = vrot.slane %v4298_v30, 4  ;;  %v1400_v8 = vrot.slane %v4318_v12, 6  ;;  %v1665_v20 = vsel %vm1646_vm10, %v1628_v34, %v2491_v49  ;;  %v1666_v24 = vsel %vm1646_vm10, %v1629_v54, %v2492_v55 }
  0xef   : > { %v2512_v23 = vunpack.i.h.bf16 %v2510_v41  ;;  %v2511_v28 = vunpack.i.l.bf16 %v2510_v41  ;;  %1959 = vmatmul.mubr.bf16.vlgmr.msra.gmra.mrb[0].mxu0 %v1757_v51  ;;  %v2322_v16 = vunpack.i.h.bf16 %v3659_v11  ;;  %v2321_v2 = vunpack.i.l.bf16 %v3659_v11  ;;  %v2525_v9 = vpop.permute.xlu1 %2524  ;;  %v4365_v41 = vld [vmem:[%s3011_s17 + $0xa8] sm:$0xff] }
  0xf0   : > { %v1702_v0 = vsel %vm1683_vm11, %v1665_v20, %v2501_v31  ;;  %v1703_v5 = vsel %vm1683_vm11, %v1666_v24, %v2502_v58  ;;  %v5179_v49 = vpack.c.bf16 %v4184_v21, %v4179_v37  ;;  %v5181_v55 = vrot.slane %v4131_v39, 6  ;;  %v2520_v58 = vpop.permute.xlu0 %2519  ;;  %v5182_v21 = vld [vmem:[#allocation26_spill] sm:$0xff] }
  0xf1   : > { %2804 = vrot.lane.b32.xlu1 %v3286_v48, %s2971_s20  ;;  %v2327_v48 = vunpack.i.h.bf16 %v5180_v22  ;;  %v1739_v46 = vsel %vm1720_vm12, %v1702_v0, %v2511_v28  ;;  %v1740_v11 = vsel %vm1720_vm12, %v1703_v5, %v2512_v23  ;;  %v4346_v37 = vsel %vm1388_vm5, %v1398_v40, %v1400_v8  ;;  %v5187_v23 = vld [vmem:[#allocation24_spill] sm:$0xff] }
  0xf2   : > { %2799 = vrot.lane.b32.xlu0 %v3241_v33, %s2971_s20  ;;  %2213 = vmatprep.mubr.msk.bf16.mxu0 %vm1498_vm6, %v5179_v49  ;;  %v4341_v61 = vsel %vm1388_vm5, %v5181_v55, %v1398_v40  ;;  %v1775_v33 = vpack.c.bf16 %v1740_v11, %v1739_v46  ;;  %v1434_v31 = vrot.slane %v5182_v21, 6  ;;  %v1436_v6 = vrot.slane %v4016_v19, 6 }
  0xf3   : > { %v2326_v59 = vunpack.i.l.bf16 %v5180_v22  ;;  %v2367_v52 = vunpack.i.h.bf16 %v5183_v4  ;;  %v2366_v3 = vunpack.i.l.bf16 %v5183_v4  ;;  %v5184_v51 = vpack.i.bf16 %v3976_v38, %v3971_v1  ;;  %v2535_v0 = vpop.permute.xlu1 %2534 }
  0xf4   : > { %v5185_v34 = vrot.slane %v4245_v32, 4  ;;  %v5186_v40 = vrot.slane %v3952_v43, 4  ;;  %v1520_v20 = vsel %vm1498_vm6, %v4365_v41, %v2322_v16  ;;  %v1519_v24 = vsel %vm1498_vm6, %v4123_v10, %v2321_v2  ;;  %2031 = vmatmul.mubr.bf16.vlgmr.msra.gmra.mrb[0].mxu1 %v1775_v33 }
  0xf5   : > { %2814 = vrot.lane.b32.xlu1 %v5184_v51, %s2972_s21  ;;  %v2412_v28 = vunpack.i.h.bf16 %v5187_v23  ;;  %v2411_v1 = vunpack.i.l.bf16 %v5187_v23  ;;  %v5188_v38 = vpack.i.bf16 %v4007_v57, %v3991_v42  ;;  %v5189_v5 = vpack.c.bf16 %v4197_v18, %v4192_v25  ;;  %v2530_v57 = vpop.permute.xlu0 %2529 }
  0xf6   : > { %v4362_v54 = vsel %vm910_vm2, %v5186_v40, %v5185_v34  ;;  %v1762_v16 = vpack.c.bf16 %v4346_v37, %v4341_v61  ;;  %v1276_v2 = vrot.slane %v4245_v32, 5  ;;  %v1278_v49 = vrot.slane %v4298_v30, 5  ;;  %v5203_v30 = vld [vmem:[#allocation2_spill] sm:$0xff] }
  0xf7   : > { %2809 = vrot.lane.b32.xlu0 %v5188_v38, %s2972_s21  ;;  %2222 = vmatprep.mubr.msk.bf16.mxu1 %vm1498_vm6, %v5189_v5  ;;  %v1240_v46 = vrot.slane %v4365_v41, 5  ;;  %v2457_v11 = vunpack.i.h.bf16 %v4082_v47  ;;  %v2456_v42 = vunpack.i.l.bf16 %v4082_v47  ;;  %v5190_v55 = vrot.slane %v3960_v63, 6 }
  0xf8   : > { %v4396_v18 = vsel %vm1388_vm5, %v1434_v31, %v1436_v6  ;;  %v1538_v33 = vsel %vm1535_vm7, %v4221_v13, %v2366_v3  ;;  %v1539_v21 = vsel %vm1535_vm7, %v4209_v36, %v2367_v52  ;;  %v2517_v4 = vunpack.i.h.bf16 %v4308_v44  ;;  %v2545_v52 = vpop.permute.xlu1 %2544 }
  0xf9   : > { %v4391_v25 = vsel %vm1388_vm5, %v5190_v55, %v1434_v31  ;;  %v2516_v47 = vunpack.i.l.bf16 %v4308_v44  ;;  %2824 = vrot.lane.b32.xlu1 %v3932_v7, %s2973_s22  ;;  %v1556_v63 = vsel %vm1535_vm7, %v1519_v24, %v2411_v1  ;;  %v1557_v51 = vsel %vm1535_vm7, %v1520_v20, %v2412_v28  ;;  %v2540_v5 = vpop.permute.xlu0 %2539 }
  0xfa   : > { %v2527_v34 = vunpack.i.h.bf16 %v2525_v9  ;;  %v2526_v31 = vunpack.i.l.bf16 %v2525_v9  ;;  %v2522_v13 = vunpack.i.h.bf16 %v2520_v58  ;;  %v2521_v3 = vunpack.i.l.bf16 %v2520_v58 }
  0xfb   : > { %2819 = vrot.lane.b32.xlu0 %v3934_v27, %s2973_s22  ;;  %v2537_v40 = vunpack.i.h.bf16 %v2535_v0  ;;  %v2536_v36 = vunpack.i.l.bf16 %v2535_v0  ;;  %v1575_v23 = vsel %vm1572_vm8, %v1538_v33, %v2456_v42  ;;  %v1576_v44 = vsel %vm1572_vm8, %v1539_v21, %v2457_v11 }
  0xfc   : > { %v2532_v38 = vunpack.i.h.bf16 %v2530_v57  ;;  %v2531_v7 = vunpack.i.l.bf16 %v2530_v57  ;;  %v1593_v24 = vsel %vm1572_vm8, %v1556_v63, %v2516_v47  ;;  %v1594_v20 = vsel %vm1572_vm8, %v1557_v51, %v2517_v4  ;;  %v2555_v33 = vpop.permute.xlu1 %2554 }
  0xfd   : > { %v2547_v9 = vunpack.i.h.bf16 %v2545_v52  ;;  %v2546_v28 = vunpack.i.l.bf16 %v2545_v52  ;;  %2834 = vrot.lane.b32.xlu1 %v4096_v15, %s2974_s25  ;;  %v1630_v27 = vsel %vm1609_vm9, %v1593_v24, %v2526_v31  ;;  %v1631_v58 = vsel %vm1609_vm9, %v1594_v20, %v2527_v34  ;;  %v2550_v51 = vpop.permute.xlu0 %2549 }
  0xfe   : > { %v2542_v1 = vunpack.i.h.bf16 %v2540_v5  ;;  %v2541_v0 = vunpack.i.l.bf16 %v2540_v5  ;;  %v1612_v11 = vsel %vm1609_vm9, %v1575_v23, %v2521_v3  ;;  %v1613_v42 = vsel %vm1609_vm9, %v1576_v44, %v2522_v13 }
  0xff   : > { %2829 = vrot.lane.b32.xlu0 %v4150_v56, %s2974_s25  ;;  %v1667_v57 = vsel %vm1646_vm10, %v1630_v27, %v2536_v36  ;;  %v1668_v55 = vsel %vm1646_vm10, %v1631_v58, %v2537_v40  ;;  %v1649_v21 = vsel %vm1646_vm10, %v1612_v11, %v2531_v7  ;;  %v1650_v4 = vsel %vm1646_vm10, %v1613_v42, %v2532_v38  ;;  %v5195_v58 = vld [vmem:[#allocation14_spill] sm:$0xff]  ;;  %v5198_v42 = vld [vmem:[#allocation49_spill] sm:$0xff] }
 0x100   : > { %v2557_v47 = vunpack.i.h.bf16 %v2555_v33  ;;  %v2556_v63 = vunpack.i.l.bf16 %v2555_v33  ;;  %v1704_v34 = vsel %vm1683_vm11, %v1667_v57, %v2546_v28  ;;  %v1705_v31 = vsel %vm1683_vm11, %v1668_v55, %v2547_v9  ;;  %v4440_v7 = vpop.permute.xlu1 %2564  ;;  %v5194_v28 = vld [vmem:[#allocation13_spill] sm:$0xff] }
 0x101   : > { %v2552_v52 = vunpack.i.h.bf16 %v2550_v51  ;;  %v2551_v3 = vunpack.i.l.bf16 %v2550_v51  ;;  %v5191_v13 = vpack.i.bf16 %v4155_v14, %v4114_v45  ;;  %v1686_v40 = vsel %vm1683_vm11, %v1649_v21, %v2541_v0  ;;  %v4446_v20 = vpop.permute.xlu0 %2559  ;;  %v2940_v0 = vld [vmem:[%s3011_s17 + $0xb8] sm:$0xff]  ;;  %v2941_v21 = vld [vmem:[%s3011_s17 + $0xb0] sm:$0xff]  ;;  %v5207_v51 = vld [vmem:[#allocation23_spill] sm:$0xff] }
 0x102   : > { %v1687_v36 = vsel %vm1683_vm11, %v1650_v4, %v2542_v1  ;;  %v5192_v23 = vpack.i.bf16 %v4174_v17, %v4167_v26  ;;  %v1741_v44 = vsel %vm1720_vm12, %v1704_v34, %v2556_v63  ;;  %v1742_v38 = vsel %vm1720_vm12, %v1705_v31, %v2557_v47  ;;  %v5199_v55 = vld [vmem:[#allocation5_spill] sm:$0xff]  ;;  %v5206_v63 = vld [vmem:[#allocation12_spill] sm:$0xff] }
 0x103   : > { %2844 = vrot.lane.b32.xlu1 %v5191_v13, %s2976_s28  ;;  %v1723_v5 = vsel %vm1720_vm12, %v1686_v40, %v2551_v3  ;;  %v1724_v45 = vsel %vm1720_vm12, %v1687_v36, %v2552_v52  ;;  %v1777_v14 = vpack.c.bf16 %v1742_v38, %v1741_v44  ;;  %v1780_v24 = vpack.c.bf16 %v4396_v18, %v4391_v25  ;;  %v5208_v3 = vld [vmem:[#allocation45_spill] sm:$0xff]  ;;  %v5209_v36 = vld [vmem:[#allocation31_spill] sm:$0xff] }
 0x104   : > { %2839 = vrot.lane.b32.xlu0 %v5192_v23, %s2976_s28  ;;  %v1759_v9 = vpack.c.bf16 %v1724_v45, %v1723_v5  ;;  %v5193_v26 = vrot.slane %v4245_v32, 4  ;;  %v1402_v27 = vrot.slane %v5194_v28, 6  ;;  %v1404_v1 = vrot.slane %v5195_v58, 6  ;;  %v2575_v22 = vpop.permute.xlu1 %2574 }
 0x105   : > { %v1522_v11 = vsel %vm1498_vm6, %v2940_v0, %v2327_v48  ;;  %v5196_v25 = vpack.i.bf16 %v4205_v53, %v4202_v35  ;;  %2039 = vmatmul.mubr.bf16.gmra.mrb[4].mxu1 %v1777_v14  ;;  %v2863_v18 = vpack.i.bf16 %v4252_v62, %v4240_v60  ;;  %v2287_v33 = vunpack.i.h.bf16 %v5199_v55  ;;  %v5200_v48 = vld [vmem:[#allocation3_spill] sm:$0xff]  ;;  %v5210_v14 = vld [vmem:[#allocation30_spill] sm:$0xff] }
 0x106   : > { %v4453_v17 = vsel %vm910_vm2, %v5193_v26, %v1096_v29  ;;  %v5197_v29 = vld [vmem:[#allocation48_spill] sm:$0xff]  ;;  %v1521_v4 = vsel %vm1498_vm6, %v2941_v21, %v2326_v59  ;;  %1967 = vmatmul.mubr.bf16.gmra.mrb[4].mxu0 %v1759_v9  ;;  %v5201_v35 = vrot.slane %v3952_v43, 5  ;;  %v4488_v62 = vsel %vm1206_vm4, %v1276_v2, %v1278_v49  ;;  %2223 = vmatprep.mubr.msk.bf16.mxu1 %vm1498_vm6, %v1780_v24  ;;  %v5211_v9 = vld [vmem:[#allocation42_spill] sm:$0xff] }
 0x107   : > { %2854 = vrot.lane.b32.xlu1 %v5196_v25, %s2971_s20  ;;  %v2858_v57 = vpack.i.bf16 %v5198_v42, %v5197_v29  ;;  %v2286_v60 = vunpack.i.l.bf16 %v5199_v55  ;;  %v2883_v59 = vpack.i.bf16 %v4453_v17, %v4362_v54  ;;  %2214 = vmatprep.mubr.msk.bf16.mxu0 %vm1498_vm6, %v1762_v16  ;;  %v5202_v43 = vrot.slane %v4123_v10, 5  ;;  %v5205_v54 = vld [vmem:[#allocation17_spill] sm:$0xff]  ;;  %v2570_v16 = vpop.permute.xlu0 %2569  ;;  %v5212_v17 = vld [vmem:[#allocation47_spill] sm:$0xff] }
 0x108   : > { %2849 = vrot.lane.b32.xlu0 %v5200_v48, %s2971_s20  ;;  %v4481_v53 = vsel %vm1206_vm4, %v5201_v35, %v1276_v2  ;;  %v5204_v2 = vrot.slane %v5203_v30, 5  ;;  %v2372_v61 = vunpack.i.h.bf16 %v5205_v54  ;;  %v2371_v37 = vunpack.i.l.bf16 %v5205_v54  ;;  %v2585_v5 = vpop.permute.xlu1 %2584 }
 0x109   : > { %v4502_v32 = vsel %vm1206_vm4, %v5202_v43, %v1240_v46  ;;  %v4517_v10 = vsel %vm1388_vm5, %v1400_v8, %v1402_v27  ;;  %v4522_v47 = vsel %vm1388_vm5, %v1402_v27, %v1404_v1  ;;  %v2417_v34 = vunpack.i.h.bf16 %v5207_v51 }
 0x10a   : > { %v4509_v49 = vsel %vm1206_vm4, %v1240_v46, %v5204_v2  ;;  %v2332_v46 = vunpack.i.h.bf16 %v5206_v63  ;;  %v2416_v31 = vunpack.i.l.bf16 %v5207_v51  ;;  %v2893_v52 = vpack.i.bf16 %v4488_v62, %v4481_v53 }
 0x10b   : > { %2864 = vrot.lane.b32.xlu1 %v2863_v18, %s2972_s21  ;;  %v2462_v13 = vunpack.i.h.bf16 %v5208_v3  ;;  %v2461_v8 = vunpack.i.l.bf16 %v5208_v3  ;;  %v2888_v40 = vpack.i.bf16 %v4509_v49, %v4502_v32  ;;  %v1438_v23 = vrot.slane %v5209_v36, 6  ;;  %v2580_v25 = vpop.permute.xlu0 %2579 }
 0x10c   : > { %2859 = vrot.lane.b32.xlu0 %v2858_v57, %s2972_s21  ;;  %v2567_v44 = vunpack.i.h.bf16 %v4440_v7  ;;  %v2566_v38 = vunpack.i.l.bf16 %v4440_v7  ;;  %v1764_v45 = vpack.c.bf16 %v4522_v47, %v4517_v10  ;;  %v1440_v24 = vrot.slane %v5210_v14, 6 }
 0x10d   : > { %v1541_v26 = vsel %vm1535_vm7, %v5211_v9, %v2372_v61  ;;  %v1540_v28 = vsel %vm1535_vm7, %v5212_v17, %v2371_v37  ;;  %v2577_v27 = vunpack.i.h.bf16 %v2575_v22  ;;  %v2576_v0 = vunpack.i.l.bf16 %v2575_v22  ;;  %v2595_v22 = vpop.permute.xlu1 %2594 }
 0x10e   : > { %v1559_v18 = vsel %vm1535_vm7, %v1522_v11, %v2417_v34  ;;  %v1558_v29 = vsel %vm1535_vm7, %v1521_v4, %v2416_v31  ;;  %v2587_v7 = vunpack.i.h.bf16 %v2585_v5  ;;  %v2586_v42 = vunpack.i.l.bf16 %v2585_v5 }
 0x10f   : > { %2874 = vrot.lane.b32.xlu1 %v4096_v15, %s2973_s22  ;;  %v1577_v57 = vsel %vm1572_vm8, %v1540_v28, %v2461_v8  ;;  %v1578_v21 = vsel %vm1572_vm8, %v1541_v26, %v2462_v13  ;;  %v2562_v48 = vunpack.i.h.bf16 %v4446_v20  ;;  %v2561_v35 = vunpack.i.l.bf16 %v4446_v20  ;;  %v2590_v49 = vpop.permute.xlu0 %2589 }
 0x110   : > { %2869 = vrot.lane.b32.xlu0 %v4150_v56, %s2973_s22  ;;  %v1614_v11 = vsel %vm1609_vm9, %v1577_v57, %v2566_v38  ;;  %v1615_v4 = vsel %vm1609_vm9, %v1578_v21, %v2567_v44  ;;  %v2572_v53 = vunpack.i.h.bf16 %v2570_v16  ;;  %v2571_v62 = vunpack.i.l.bf16 %v2570_v16  ;;  %v5213_v16 = vld [vmem:[#allocation4_spill] sm:$0xff] }
 0x111   : > { %v1651_v15 = vsel %vm1646_vm10, %v1614_v11, %v2576_v0  ;;  %v1652_v43 = vsel %vm1646_vm10, %v1615_v4, %v2577_v27  ;;  %v2597_v32 = vunpack.i.h.bf16 %v2595_v22  ;;  %v2596_v2 = vunpack.i.l.bf16 %v2595_v22  ;;  %v4569_v13 = vpop.permute.xlu1 %2604  ;;  %v5215_v0 = vld [vmem:[#allocation37_spill] sm:$0xff]  ;;  %v5217_v11 = vld [vmem:[#allocation44_spill] sm:$0xff] }
 0x112   : > { %v1688_v54 = vsel %vm1683_vm11, %v1651_v15, %v2586_v42  ;;  %v1689_v20 = vsel %vm1683_vm11, %v1652_v43, %v2587_v7  ;;  %v2582_v61 = vunpack.i.h.bf16 %v2580_v25  ;;  %v2581_v56 = vunpack.i.l.bf16 %v2580_v25  ;;  %v5218_v22 = vld [vmem:[#allocation25_spill] sm:$0xff] }
 0x113   : > { %2884 = vrot.lane.b32.xlu1 %v2883_v59, %s2974_s25  ;;  %v2592_v37 = vunpack.i.h.bf16 %v2590_v49  ;;  %v2591_v10 = vunpack.i.l.bf16 %v2590_v49  ;;  %v1725_v47 = vsel %vm1720_vm12, %v1688_v54, %v2596_v2  ;;  %v1726_v51 = vsel %vm1720_vm12, %v1689_v20, %v2597_v32  ;;  %v2600_v44 = vpop.permute.xlu0 %2599  ;;  %v5219_v54 = vld [vmem:[#allocation46_spill] sm:$0xff] }
 0x114   : > { %2879 = vrot.lane.b32.xlu0 %v5213_v16, %s2974_s25  ;;  %v2331_v34 = vunpack.i.l.bf16 %v5206_v63  ;;  %v1596_v31 = vsel %vm1572_vm8, %v1559_v18, %v2562_v48  ;;  %v1595_v3 = vsel %vm1572_vm8, %v1558_v29, %v2561_v35  ;;  %v1761_v8 = vpack.c.bf16 %v1726_v51, %v1725_v47  ;;  %v5216_v18 = vld [vmem:[#allocation16_spill] sm:$0xff]  ;;  %v4593_v35 = vld [vmem:[%s3011_s17 + $0x68] sm:$0xff] }
 0x115   : > { %v1632_v59 = vsel %vm1609_vm9, %v1595_v3, %v2571_v62  ;;  %v1633_v36 = vsel %vm1609_vm9, %v1596_v31, %v2572_v53  ;;  %v1439_v38 = vsel %vm1388_vm5, %v1436_v6, %v1438_v23  ;;  %v1441_v5 = vsel %vm1388_vm5, %v1438_v23, %v1440_v24  ;;  %v5214_v6 = vld [vmem:[#allocation29_spill] sm:$0xff]  ;;  %v2615_v7 = vpop.permute.xlu1 %2614  ;;  %v4601_v53 = vld [vmem:[%s3011_s17 + $0x70] sm:$0xff] }
 0x116   : > { %v1669_v9 = vsel %vm1646_vm10, %v1632_v59, %v2581_v56  ;;  %v1670_v26 = vsel %vm1646_vm10, %v1633_v36, %v2582_v61  ;;  %v2602_v17 = vunpack.i.h.bf16 %v2600_v44  ;;  %v2601_v28 = vunpack.i.l.bf16 %v2600_v44  ;;  %1975 = vmatmul.mubr.bf16.gmra.mrb[8].mxu0 %v1761_v8  ;;  %v2945_v61 = vld [vmem:[%s3011_s17 + $0xc0] sm:$0xff] }
 0x117   : > { %2894 = vrot.lane.b32.xlu1 %v2893_v52, %s2976_s28  ;;  %v1706_v27 = vsel %vm1683_vm11, %v1669_v9, %v2591_v10  ;;  %v1707_v19 = vsel %vm1683_vm11, %v1670_v26, %v2592_v37  ;;  %2215 = vmatprep.mubr.msk.bf16.mxu0 %vm1498_vm6, %v1764_v45  ;;  %v1442_v23 = vrot.slane %v5214_v6, 6  ;;  %v1444_v25 = vrot.slane %v5215_v0, 6  ;;  %v2610_v48 = vpop.permute.xlu0 %2609  ;;  %v5220_v10 = vld [vmem:[#allocation43_spill] sm:$0xff] }
 0x118   : > { %2889 = vrot.lane.b32.xlu0 %v2888_v40, %s2976_s28  ;;  %v2377_v29 = vunpack.i.h.bf16 %v5216_v18  ;;  %v1743_v52 = vsel %vm1720_vm12, %v1706_v27, %v2601_v28  ;;  %v1744_v42 = vsel %vm1720_vm12, %v1707_v19, %v2602_v17  ;;  %v1782_v57 = vpack.c.bf16 %v1441_v5, %v1439_v38 }
 0x119   : > { %v2376_v21 = vunpack.i.l.bf16 %v5216_v18  ;;  %v1779_v40 = vpack.c.bf16 %v1744_v42, %v1743_v52  ;;  %v1406_v45 = vrot.slane %v4593_v35, 6  ;;  %v1506_v4 = vsel %vm1498_vm6, %v5217_v11, %v2287_v33  ;;  %v2944_v33 = vld [vmem:[%s3011_s17 + $0x30] sm:$0xff]  ;;  %v2625_v56 = vpop.permute.xlu1 %2624 }
 0x11a   : > { %v1408_v62 = vrot.slane %v4601_v53, 6  ;;  %v2422_v15 = vunpack.i.h.bf16 %v5218_v22  ;;  %v2421_v43 = vunpack.i.l.bf16 %v5218_v22  ;;  %v4609_v32 = vsel %vm1388_vm5, %v1440_v24, %v1442_v23 }
 0x11b   : > { %2047 = vmatmul.mubr.bf16.gmra.mrb[8].mxu1 %v1779_v40  ;;  %v4614_v2 = vsel %vm1388_vm5, %v1442_v23, %v1444_v25  ;;  %v1505_v49 = vsel %vm1498_vm6, %v2944_v33, %v2286_v60  ;;  %v1524_v20 = vsel %vm1498_vm6, %v5219_v54, %v2332_v46  ;;  %v1523_v14 = vsel %vm1498_vm6, %v2945_v61, %v2331_v34  ;;  %v2620_v60 = vpop.permute.xlu0 %2619 }
 0x11c   : > { %v1543_v24 = vsel %vm1535_vm7, %v1506_v4, %v2377_v29  ;;  %2224 = vmatprep.mubr.msk.bf16.mxu1 %vm1498_vm6, %v1782_v57  ;;  %v1542_v37 = vsel %vm1535_vm7, %v1505_v49, %v2376_v21  ;;  %v2467_v16 = vunpack.i.h.bf16 %v5220_v10  ;;  %v2466_v55 = vunpack.i.l.bf16 %v5220_v10 }
 0x11d   : > { %v1407_v63 = vsel %vm1388_vm5, %v1404_v1, %v1406_v45  ;;  %v2607_v46 = vunpack.i.h.bf16 %v4569_v13  ;;  %v2606_v47 = vunpack.i.l.bf16 %v4569_v13  ;;  %v1409_v51 = vsel %vm1388_vm5, %v1406_v45, %v1408_v62  ;;  %v2635_v38 = vpop.permute.xlu1 %2634 }
 0x11e   : > { %v1784_v34 = vpack.c.bf16 %v4614_v2, %v4609_v32  ;;  %v1560_v31 = vsel %vm1535_vm7, %v1523_v14, %v2421_v43  ;;  %v1561_v3 = vsel %vm1535_vm7, %v1524_v20, %v2422_v15  ;;  %v2617_v8 = vunpack.i.h.bf16 %v2615_v7 }
 0x11f   : > { %v2616_v59 = vunpack.i.l.bf16 %v2615_v7  ;;  %v2612_v58 = vunpack.i.h.bf16 %v2610_v48  ;;  %v2611_v36 = vunpack.i.l.bf16 %v2610_v48  ;;  %v2627_v1 = vunpack.i.h.bf16 %v2625_v56  ;;  %v2630_v17 = vpop.permute.xlu0 %2629 }
 0x120   : > { %v2626_v44 = vunpack.i.l.bf16 %v2625_v56  ;;  %v1579_v13 = vsel %vm1572_vm8, %v1542_v37, %v2466_v55  ;;  %v1580_v5 = vsel %vm1572_vm8, %v1543_v24, %v2467_v16  ;;  %v2622_v9 = vunpack.i.h.bf16 %v2620_v60  ;;  %v5221_v55 = vld [vmem:[#allocation7_spill] sm:$0xff] }
 0x121   : > { %v2621_v26 = vunpack.i.l.bf16 %v2620_v60  ;;  %v1597_v28 = vsel %vm1572_vm8, %v1560_v31, %v2606_v47  ;;  %v1598_v27 = vsel %vm1572_vm8, %v1561_v3, %v2607_v46  ;;  %v2637_v19 = vunpack.i.h.bf16 %v2635_v38  ;;  %v2645_v48 = vpop.permute.xlu1 %2644  ;;  %v5222_v47 = vld [vmem:[#allocation36_spill] sm:$0xff] }
 0x122   : > { %v2636_v6 = vunpack.i.l.bf16 %v2635_v38  ;;  %v1634_v23 = vsel %vm1609_vm9, %v1597_v28, %v2616_v59  ;;  %v1635_v18 = vsel %vm1609_vm9, %v1598_v27, %v2617_v8  ;;  %v2632_v29 = vunpack.i.h.bf16 %v2630_v17  ;;  %v4668_v3 = vld [vmem:[%s3011_s17 + $0x110] sm:$0xff] }
 0x123   : > { %v2631_v7 = vunpack.i.l.bf16 %v2630_v17  ;;  %v1617_v52 = vsel %vm1609_vm9, %v1580_v5, %v2612_v58  ;;  %v1616_v42 = vsel %vm1609_vm9, %v1579_v13, %v2611_v36  ;;  %v1671_v57 = vsel %vm1646_vm10, %v1634_v23, %v2626_v44  ;;  %v2640_v22 = vpop.permute.xlu0 %2639  ;;  %v4679_v44 = vld [vmem:[%s3011_s17 + $0x80] sm:$0xff] }
 0x124   : > { %v1672_v21 = vsel %vm1646_vm10, %v1635_v18, %v2627_v1  ;;  %v1653_v40 = vsel %vm1646_vm10, %v1616_v42, %v2621_v26  ;;  %v1654_v45 = vsel %vm1646_vm10, %v1617_v52, %v2622_v9  ;;  %v2647_v11 = vunpack.i.h.bf16 %v2645_v48  ;;  %v4675_v1 = vld [vmem:[%s3011_s17 + $0x78] sm:$0xff] }
 0x125   : > { %v2646_v4 = vunpack.i.l.bf16 %v2645_v48  ;;  %v1708_v15 = vsel %vm1683_vm11, %v1671_v57, %v2636_v6  ;;  %v1709_v43 = vsel %vm1683_vm11, %v1672_v21, %v2637_v19  ;;  %v2642_v32 = vunpack.i.h.bf16 %v2640_v22  ;;  %v2655_v61 = vpop.permute.xlu1 %2654 }
 0x126   : > { %v2641_v2 = vunpack.i.l.bf16 %v2640_v22  ;;  %v1690_v33 = vsel %vm1683_vm11, %v1653_v40, %v2631_v7  ;;  %v1691_v49 = vsel %vm1683_vm11, %v1654_v45, %v2632_v29  ;;  %v1746_v20 = vsel %vm1720_vm12, %v1709_v43, %v2647_v11  ;;  %v5224_v40 = vld [vmem:[#allocation28_spill] sm:$0xff]  ;;  %v5225_v11 = vld [vmem:[#allocation27_spill] sm:$0xff] }
 0x127   : > { %v1745_v54 = vsel %vm1720_vm12, %v1708_v15, %v2646_v4  ;;  %v1728_v24 = vsel %vm1720_vm12, %v1691_v49, %v2642_v32  ;;  %v1766_v37 = vpack.c.bf16 %v1409_v51, %v1407_v63  ;;  %v2650_v10 = vpop.permute.xlu0 %2649  ;;  %v2291_v60 = vunpack.i.l.bf16 %v5221_v55  ;;  %v5223_v51 = vld [vmem:[#allocation19_spill] sm:$0xff] }
 0x128   : > { %v1727_v14 = vsel %vm1720_vm12, %v1690_v33, %v2641_v2  ;;  %v1781_v56 = vpack.c.bf16 %v1746_v20, %v1745_v54  ;;  %v1446_v31 = vrot.slane %v5222_v47, 6  ;;  %v1448_v8 = vrot.slane %v4668_v3, 6 }
 0x129   : > { %v1763_v16 = vpack.c.bf16 %v1728_v24, %v1727_v14  ;;  %v2665_v46 = vpop.permute.xlu1 %2664  ;;  %v2292_v63 = vunpack.i.h.bf16 %v5221_v55  ;;  %v2381_v59 = vunpack.i.l.bf16 %v5223_v51  ;;  %v2382_v36 = vunpack.i.h.bf16 %v5223_v51 }
 0x12a   : > { %2055 = vmatmul.mubr.bf16.gmra.mrb[12].mxu1 %v1781_v56  ;;  %v1412_v38 = vrot.slane %v4679_v44, 6  ;;  %v1507_v13 = vsel %vm1498_vm6, %v4131_v39, %v2291_v60  ;;  %v1447_v9 = vsel %vm1388_vm5, %v1444_v25, %v1446_v31  ;;  %v1449_v26 = vsel %vm1388_vm5, %v1446_v31, %v1448_v8 }
 0x12b   : > { %1983 = vmatmul.mubr.bf16.gmra.mrb[12].mxu0 %v1763_v16  ;;  %2225 = vmatprep.mubr.msk.bf16.mxu1 %vm1498_vm6, %v1784_v34  ;;  %v2660_v58 = vpop.permute.xlu0 %2659  ;;  %v1410_v34 = vrot.slane %v4675_v1, 6  ;;  %v1508_v17 = vsel %vm1498_vm6, %v4311_v50, %v2292_v63  ;;  %v1544_v28 = vsel %vm1535_vm7, %v1507_v13, %v2381_v59  ;;  %v2657_v27 = vunpack.i.h.bf16 %v2655_v61 }
 0x12c   : > { %2216 = vmatprep.mubr.msk.bf16.mxu0 %vm1498_vm6, %v1766_v37  ;;  %v2656_v19 = vunpack.i.l.bf16 %v2655_v61  ;;  %v1545_v23 = vsel %vm1535_vm7, %v1508_v17, %v2382_v36  ;;  %v2652_v39 = vunpack.i.h.bf16 %v2650_v10  ;;  %v2651_v18 = vunpack.i.l.bf16 %v2650_v10 }
 0x12d   : > { %v2675_v5 = vpop.permute.xlu1 %2674  ;;  %v1411_v0 = vsel %vm1388_vm5, %v1408_v62, %v1410_v34  ;;  %v2667_v25 = vunpack.i.h.bf16 %v2665_v46  ;;  %v2666_v29 = vunpack.i.l.bf16 %v2665_v46  ;;  %v1413_v7 = vsel %vm1388_vm5, %v1410_v34, %v1412_v38 }
 0x12e   : > { %v1786_v50 = vpack.c.bf16 %v1449_v26, %v1447_v9  ;;  %v2662_v52 = vunpack.i.h.bf16 %v2660_v58  ;;  %v2661_v42 = vunpack.i.l.bf16 %v2660_v58  ;;  %v2677_v57 = vunpack.i.h.bf16 %v2675_v5 }
 0x12f   : > { %v2670_v6 = vpop.permute.xlu0 %2669  ;;  %v2676_v21 = vunpack.i.l.bf16 %v2675_v5  ;;  %v1599_v45 = vsel %vm1572_vm8, %v5224_v40, %v2656_v19  ;;  %v1600_v4 = vsel %vm1572_vm8, %v5225_v11, %v2657_v27  ;;  %v1581_v43 = vsel %vm1572_vm8, %v1544_v28, %v2651_v18  ;;  %v2949_v18 = vld [vmem:[%s3011_s17 + $0x118] sm:$0xff]  ;;  %v4738_v40 = vld [vmem:[%s3011_s17 + $0x90] sm:$0xff] }
 0x130   : > { %v2672_v22 = vunpack.i.h.bf16 %v2670_v6  ;;  %v2671_v62 = vunpack.i.l.bf16 %v2670_v6  ;;  %v1582_v32 = vsel %vm1572_vm8, %v1545_v23, %v2652_v39  ;;  %v1636_v49 = vsel %vm1609_vm9, %v1599_v45, %v2666_v29  ;;  %v5226_v6 = vld [vmem:[#allocation6_spill] sm:$0xff]  ;;  %v2953_v11 = vld [vmem:[%s3011_s17 + $0x58] sm:$0xff] }
 0x131   : > { %v2685_v48 = vpop.permute.xlu1 %2684  ;;  %v1637_v54 = vsel %vm1609_vm9, %v1600_v4, %v2667_v25  ;;  %v1618_v14 = vsel %vm1609_vm9, %v1581_v43, %v2661_v42  ;;  %v1619_v24 = vsel %vm1609_vm9, %v1582_v32, %v2662_v52  ;;  %v1673_v56 = vsel %vm1646_vm10, %v1636_v49, %v2676_v21  ;;  %v4727_v29 = vld [vmem:[%s3011_s17 + $0x120] sm:$0xff] }
 0x132   : > { %v2687_v2 = vunpack.i.h.bf16 %v2685_v48  ;;  %v2686_v33 = vunpack.i.l.bf16 %v2685_v48  ;;  %v1674_v37 = vsel %vm1646_vm10, %v1637_v54, %v2677_v57  ;;  %v1655_v16 = vsel %vm1646_vm10, %v1618_v14, %v2671_v62  ;;  %v5227_v52 = vld [vmem:[#allocation18_spill] sm:$0xff] }
 0x133   : > { %v2680_v15 = vpop.permute.xlu0 %2679  ;;  %v1656_v55 = vsel %vm1646_vm10, %v1619_v24, %v2672_v22  ;;  %v1768_v28 = vpack.c.bf16 %v1413_v7, %v1411_v0  ;;  %v2297_v23 = vunpack.i.h.bf16 %v5226_v6  ;;  %v1450_v25 = vrot.slane %v2949_v18, 6 }
 0x134   : > { %v2682_v20 = vunpack.i.h.bf16 %v2680_v15  ;;  %v2681_v61 = vunpack.i.l.bf16 %v2680_v15  ;;  %v1710_v31 = vsel %vm1683_vm11, %v1673_v56, %v2686_v33  ;;  %v1711_v63 = vsel %vm1683_vm11, %v1674_v37, %v2687_v2 }
 0x135   : > { %v2695_v10 = vpop.permute.xlu1 %2694  ;;  %v1452_v0 = vrot.slane %v4727_v29, 6  ;;  %v2296_v7 = vunpack.i.l.bf16 %v5226_v6  ;;  %v2387_v42 = vunpack.i.h.bf16 %v5227_v52  ;;  %v2386_v21 = vunpack.i.l.bf16 %v5227_v52 }
 0x136   : > { %v2697_v60 = vunpack.i.h.bf16 %v2695_v10  ;;  %v2696_v46 = vunpack.i.l.bf16 %v2695_v10  ;;  %v1692_v58 = vsel %vm1683_vm11, %v1655_v16, %v2681_v61  ;;  %v1693_v36 = vsel %vm1683_vm11, %v1656_v55, %v2682_v20 }
 0x137   : > { %v2690_v47 = vpop.permute.xlu0 %2689  ;;  %v1416_v45 = vrot.slane %v4738_v40, 6  ;;  %v1510_v4 = vsel %vm1498_vm6, %v2953_v11, %v2297_v23  ;;  %v1451_v62 = vsel %vm1388_vm5, %v1448_v8, %v1450_v25  ;;  %v1453_v15 = vsel %vm1388_vm5, %v1450_v25, %v1452_v0 }
 0x138   : > { %v2692_v51 = vunpack.i.h.bf16 %v2690_v47  ;;  %v2691_v59 = vunpack.i.l.bf16 %v2690_v47  ;;  %v1747_v34 = vsel %vm1720_vm12, %v1710_v31, %v2696_v46  ;;  %v1748_v13 = vsel %vm1720_vm12, %v1711_v63, %v2697_v60  ;;  %v5228_v60 = vld [vmem:[#allocation34_spill] sm:$0xff]  ;;  %v5229_v47 = vld [vmem:[#allocation35_spill] sm:$0xff] }
 0x139   : > { %v2705_v5 = vpop.permute.xlu1 %2704  ;;  %v1783_v17 = vpack.c.bf16 %v1748_v13, %v1747_v34  ;;  %v1509_v43 = vsel %vm1498_vm6, %v4318_v12, %v2296_v7  ;;  %v1547_v32 = vsel %vm1535_vm7, %v1510_v4, %v2387_v42  ;;  %v1788_v12 = vpack.c.bf16 %v1453_v15, %v1451_v62 }
 0x13a   : > { %v1729_v9 = vsel %vm1720_vm12, %v1692_v58, %v2691_v59  ;;  %v1730_v26 = vsel %vm1720_vm12, %v1693_v36, %v2692_v51  ;;  %v2707_v2 = vunpack.i.h.bf16 %v2705_v5  ;;  %v2706_v33 = vunpack.i.l.bf16 %v2705_v5 }
 0x13b   : > { %v2700_v27 = vpop.permute.xlu0 %2699  ;;  %v1765_v19 = vpack.c.bf16 %v1730_v26, %v1729_v9  ;;  %2063 = vmatmul.mubr.bf16.gmra.mrb[16].mxu1 %v1783_v17  ;;  %v1546_v54 = vsel %vm1535_vm7, %v1509_v43, %v2386_v21 }
 0x13c   : > { %2226 = vmatprep.mubr.msk.bf16.mxu1 %vm1498_vm6, %v1786_v50  ;;  %v4734_v50 = vld [vmem:[%s3011_s17 + $0x88] sm:$0xff]  ;;  %v2702_v20 = vunpack.i.h.bf16 %v2700_v27  ;;  %v2701_v61 = vunpack.i.l.bf16 %v2700_v27  ;;  %v1601_v46 = vsel %vm1572_vm8, %v5228_v60, %v2706_v33  ;;  %v1602_v31 = vsel %vm1572_vm8, %v5229_v47, %v2707_v2 }
 0x13d   : > { %1991 = vmatmul.mubr.bf16.gmra.mrb[16].mxu0 %v1765_v19  ;;  %v2715_v39 = vpop.permute.xlu1 %2714  ;;  %v1414_v48 = vrot.slane %v4734_v50, 6 }
 0x13e   : > { %2217 = vmatprep.mubr.msk.bf16.mxu0 %vm1498_vm6, %v1768_v28  ;;  %v2717_v8 = vunpack.i.h.bf16 %v2715_v39  ;;  %v2716_v14 = vunpack.i.l.bf16 %v2715_v39  ;;  %v1584_v59 = vsel %vm1572_vm8, %v1547_v32, %v2702_v20  ;;  %v1583_v58 = vsel %vm1572_vm8, %v1546_v54, %v2701_v61  ;;  %v5230_v54 = vld [vmem:[#allocation9_spill] sm:$0xff] }
 0x13f   : > { %v2710_v57 = vpop.permute.xlu0 %2709  ;;  %v1415_v3 = vsel %vm1388_vm5, %v1412_v38, %v1414_v48  ;;  %v1417_v24 = vsel %vm1388_vm5, %v1414_v48, %v1416_v45  ;;  %v2301_v20 = vunpack.i.l.bf16 %v5230_v54 }
 0x140   : > { %v2712_v56 = vunpack.i.h.bf16 %v2710_v57  ;;  %v2711_v37 = vunpack.i.l.bf16 %v2710_v57  ;;  %v1638_v13 = vsel %vm1609_vm9, %v1601_v46, %v2716_v14  ;;  %v1639_v5 = vsel %vm1609_vm9, %v1602_v31, %v2717_v8  ;;  %v2954_v8 = vld [vmem:[%s3011_s17 + $0x128] sm:$0xff]  ;;  %v4794_v46 = vld [vmem:[%s3011_s17 + $0xa0] sm:$0xff] }
 0x141   : > { %v2725_v22 = vpop.permute.xlu1 %2724  ;;  %v1770_v2 = vpack.c.bf16 %v1417_v24, %v1415_v3  ;;  %v1454_v14 = vrot.slane %v2954_v8, 6  ;;  %v2302_v24 = vunpack.i.h.bf16 %v5230_v54  ;;  %v1420_v47 = vrot.slane %v4794_v46, 6  ;;  %v2958_v31 = vld [vmem:[%s3011_s17 + $0x60] sm:$0xff] }
 0x142   : > { %v2727_v10 = vunpack.i.h.bf16 %v2725_v22  ;;  %v2726_v16 = vunpack.i.l.bf16 %v2725_v22  ;;  %v1620_v17 = vsel %vm1609_vm9, %v1583_v58, %v2711_v37  ;;  %v1621_v28 = vsel %vm1609_vm9, %v1584_v59, %v2712_v56  ;;  %v4786_v56 = vld [vmem:[%s3011_s17 + $0x130] sm:$0xff]  ;;  %v5231_v37 = vld [vmem:[#allocation21_spill] sm:$0xff] }
 0x143   : > { %v2720_v49 = vpop.permute.xlu0 %2719  ;;  %v1456_v3 = vrot.slane %v4786_v56, 6  ;;  %v1512_v58 = vsel %vm1498_vm6, %v4593_v35, %v2302_v24 }
 0x144   : > { %v2722_v63 = vunpack.i.h.bf16 %v2720_v49  ;;  %v2721_v38 = vunpack.i.l.bf16 %v2720_v49  ;;  %v1675_v27 = vsel %vm1646_vm10, %v1638_v13, %v2726_v16  ;;  %v1676_v19 = vsel %vm1646_vm10, %v1639_v5, %v2727_v10 }
 0x145   : > { %v2735_v55 = vpop.permute.xlu1 %2734  ;;  %v2391_v10 = vunpack.i.l.bf16 %v5231_v37  ;;  %v1457_v59 = vsel %vm1388_vm5, %v1454_v14, %v1456_v3 }
 0x146   : > { %v2737_v36 = vunpack.i.h.bf16 %v2735_v55  ;;  %v2736_v34 = vunpack.i.l.bf16 %v2735_v55  ;;  %v1657_v23 = vsel %vm1646_vm10, %v1620_v17, %v2721_v38  ;;  %v1658_v39 = vsel %vm1646_vm10, %v1621_v28, %v2722_v63 }
 0x147   : > { %v2730_v51 = vpop.permute.xlu0 %2729  ;;  %v2392_v55 = vunpack.i.h.bf16 %v5231_v37  ;;  %v1511_v63 = vsel %vm1498_vm6, %v2958_v31, %v2301_v20 }
 0x148   : > { %v2732_v9 = vunpack.i.h.bf16 %v2730_v51  ;;  %v2731_v26 = vunpack.i.l.bf16 %v2730_v51  ;;  %v1712_v52 = vsel %vm1683_vm11, %v1675_v27, %v2736_v34  ;;  %v1713_v42 = vsel %vm1683_vm11, %v1676_v19, %v2737_v36 }
 0x149   : > { %v2745_v6 = vpop.permute.xlu1 %2744  ;;  %v1455_v51 = vsel %vm1388_vm5, %v1452_v0, %v1454_v14  ;;  %v1548_v36 = vsel %vm1535_vm7, %v1511_v63, %v2391_v10 }
 0x14a   : > { %v2747_v18 = vunpack.i.h.bf16 %v2745_v6  ;;  %v2746_v25 = vunpack.i.l.bf16 %v2745_v6  ;;  %v1694_v48 = vsel %vm1683_vm11, %v1657_v23, %v2731_v26  ;;  %v1695_v11 = vsel %vm1683_vm11, %v1658_v39, %v2732_v9 }
 0x14b   : > { %v2740_v7 = vpop.permute.xlu0 %2739  ;;  %v1549_v9 = vsel %vm1535_vm7, %v1512_v58, %v2392_v55  ;;  %v1790_v35 = vpack.c.bf16 %v1457_v59, %v1455_v51 }
 0x14c   : > { %v2742_v57 = vunpack.i.h.bf16 %v2740_v7  ;;  %v2741_v21 = vunpack.i.l.bf16 %v2740_v7  ;;  %v1749_v4 = vsel %vm1720_vm12, %v1712_v52, %v2746_v25  ;;  %v1750_v22 = vsel %vm1720_vm12, %v1713_v42, %v2747_v18  ;;  %v5232_v25 = vld [vmem:[#allocation33_spill] sm:$0xff]  ;;  %v5233_v52 = vld [vmem:[#allocation32_spill] sm:$0xff] }
 0x14d   : > { %v2755_v62 = vpop.permute.xlu1 %2754  ;;  %v1785_v32 = vpack.c.bf16 %v1750_v22, %v1749_v4 }
 0x14e   : > { %v1731_v15 = vsel %vm1720_vm12, %v1694_v48, %v2741_v21  ;;  %v1732_v43 = vsel %vm1720_vm12, %v1695_v11, %v2742_v57  ;;  %v2757_v34 = vunpack.i.h.bf16 %v2755_v62  ;;  %v2756_v13 = vunpack.i.l.bf16 %v2755_v62 }
 0x14f   : > { %v2750_v33 = vpop.permute.xlu0 %2749  ;;  %v1767_v49 = vpack.c.bf16 %v1732_v43, %v1731_v15  ;;  %2071 = vmatmul.mubr.bf16.gmra.mrb[20].mxu1 %v1785_v32 }
 0x150   : > { %2227 = vmatprep.mubr.msk.bf16.mxu1 %vm1498_vm6, %v1788_v12  ;;  %v2956_v12 = vld [vmem:[%s3011_s17 + $0x98] sm:$0xff]  ;;  %v2752_v26 = vunpack.i.h.bf16 %v2750_v33  ;;  %v2751_v17 = vunpack.i.l.bf16 %v2750_v33  ;;  %v1603_v7 = vsel %vm1572_vm8, %v5232_v25, %v2756_v13  ;;  %v1604_v40 = vsel %vm1572_vm8, %v5233_v52, %v2757_v34 }
 0x151   : > { %1999 = vmatmul.mubr.bf16.gmra.mrb[20].mxu0 %v1767_v49  ;;  %v1418_v60 = vrot.slane %v2956_v12, 6 }
 0x152   : > { %v2765_v61 = vpop.permute.xlu1 %2764  ;;  %2218 = vmatprep.mubr.msk.bf16.mxu0 %vm1498_vm6, %v1770_v2  ;;  %v1585_v21 = vsel %vm1572_vm8, %v1548_v36, %v2751_v17  ;;  %v1586_v48 = vsel %vm1572_vm8, %v1549_v9, %v2752_v26  ;;  %v2959_v17 = vld [vmem:[%s3011_s17 + $0x138] sm:$0xff] }
 0x153   : > { %v1419_v29 = vsel %vm1388_vm5, %v1416_v45, %v1418_v60  ;;  %v2767_v0 = vunpack.i.h.bf16 %v2765_v61  ;;  %v2766_v28 = vunpack.i.l.bf16 %v2765_v61  ;;  %v1421_v27 = vsel %vm1388_vm5, %v1418_v60, %v1420_v47 }
 0x154   : > { %v2760_v16 = vpop.permute.xlu0 %2759  ;;  %v1772_v36 = vpack.c.bf16 %v1421_v27, %v1419_v29 }
 0x155   : > { %v2762_v19 = vunpack.i.h.bf16 %v2760_v16  ;;  %v2761_v6 = vunpack.i.l.bf16 %v2760_v16  ;;  %v1640_v22 = vsel %vm1609_vm9, %v1603_v7, %v2766_v28  ;;  %v1641_v62 = vsel %vm1609_vm9, %v1604_v40, %v2767_v0  ;;  %v2960_v28 = vld [vmem:[%s3011_s17 + $0x140] sm:$0xff]  ;;  %s2251_s17 = smul.u32 288, %s5244_s13 }
 0x156   : > { %v2775_v38 = vpop.permute.xlu1 %2774  ;;  %v1458_v0 = vrot.slane %v2959_v17, 6 }
 0x157   : > { %v2777_v23 = vunpack.i.h.bf16 %v2775_v38  ;;  %v2776_v39 = vunpack.i.l.bf16 %v2775_v38  ;;  %v1622_v32 = vsel %vm1609_vm9, %v1585_v21, %v2761_v6  ;;  %v1623_v2 = vsel %vm1609_vm9, %v1586_v48, %v2762_v19  ;;  %s4927_s23 = scalar_lea.vmem %s5043_s3, %s2251_s17 }
 0x158   : > { %v2770_v5 = vpop.permute.xlu0 %2769  ;;  %v1460_v19 = vrot.slane %v2960_v28, 6  ;;  %v1459_v7 = vsel %vm1388_vm5, %v1456_v3, %v1458_v0 }
 0x159   : > { %v2772_v42 = vunpack.i.h.bf16 %v2770_v5  ;;  %v2771_v45 = vunpack.i.l.bf16 %v2770_v5  ;;  %v1677_v33 = vsel %vm1646_vm10, %v1640_v22, %v2776_v39  ;;  %v1678_v49 = vsel %vm1646_vm10, %v1641_v62, %v2777_v23  ;;  %v5234_v5 = vld [vmem:[#allocation8_spill] sm:$0xff] }
 0x15a   : > { %v2785_v18 = vpop.permute.xlu1 %2784  ;;  %v2307_v9 = vunpack.i.h.bf16 %v5234_v5  ;;  %v2306_v6 = vunpack.i.l.bf16 %v5234_v5  ;;  %v5235_v23 = vld [vmem:[#allocation20_spill] sm:$0xff]  ;;  %v1461_v52 = vsel %vm1388_vm5, %v1458_v0, %v1460_v19 }
 0x15b   : > { %v2787_v11 = vunpack.i.h.bf16 %v2785_v18  ;;  %v2786_v4 = vunpack.i.l.bf16 %v2785_v18  ;;  %v1659_v20 = vsel %vm1646_vm10, %v1622_v32, %v2771_v45  ;;  %v1660_v61 = vsel %vm1646_vm10, %v1623_v2, %v2772_v42 }
 0x15c   : > { %v2780_v57 = vpop.permute.xlu0 %2779  ;;  %v2397_v39 = vunpack.i.h.bf16 %v5235_v23  ;;  %v2396_v27 = vunpack.i.l.bf16 %v5235_v23  ;;  %v1422_v18 = vrot.slane %v4365_v41, 6  ;;  %v1513_v40 = vsel %vm1498_vm6, %v4601_v53, %v2306_v6 }
 0x15d   : > { %v2782_v15 = vunpack.i.h.bf16 %v2780_v57  ;;  %v2781_v43 = vunpack.i.l.bf16 %v2780_v57  ;;  %v1714_v37 = vsel %vm1683_vm11, %v1677_v33, %v2786_v4  ;;  %v1715_v10 = vsel %vm1683_vm11, %v1678_v49, %v2787_v11  ;;  %v5237_v33 = vld [vmem:[#allocation40_spill] sm:$0xff] }
 0x15e   : > { %v1550_v41 = vsel %vm1535_vm7, %v1513_v40, %v2396_v27  ;;  %v5236_v4 = vrot.slane %v5203_v30, 6  ;;  %v1792_v53 = vpack.c.bf16 %v1461_v52, %v1459_v7  ;;  %v5239_v52 = vld [vmem:[#allocation10_spill] sm:$0xff] }
 0x15f   : > { %v2795_v54 = vpop.permute.xlu1 %2794  ;;  %v1696_v12 = vsel %vm1683_vm11, %v1659_v20, %v2781_v43  ;;  %v1697_v60 = vsel %vm1683_vm11, %v1660_v61, %v2782_v15  ;;  %v2312_v40 = vunpack.i.h.bf16 %v5239_v52 }
 0x160   : > { %v2797_v8 = vunpack.i.h.bf16 %v2795_v54  ;;  %v2796_v14 = vunpack.i.l.bf16 %v2795_v54  ;;  %v2790_v24 = vpop.permute.xlu0 %2789  ;;  %v1425_v22 = vsel %vm1388_vm5, %v1422_v18, %v5236_v4  ;;  %v5238_v54 = vld [vmem:[#allocation41_spill] sm:$0xff] }
 0x161   : > { %v2792_v16 = vunpack.i.h.bf16 %v2790_v24  ;;  %v2791_v55 = vunpack.i.l.bf16 %v2790_v24 }
 0x162   : > { %v1751_v31 = vsel %vm1720_vm12, %v1714_v37, %v2796_v14  ;;  %v1752_v63 = vsel %vm1720_vm12, %v1715_v10, %v2797_v8 }
 0x163   : > { %v2805_v38 = vpop.permute.xlu1 %2804  ;;  %v1733_v51 = vsel %vm1720_vm12, %v1696_v12, %v2791_v55  ;;  %v1734_v59 = vsel %vm1720_vm12, %v1697_v60, %v2792_v16  ;;  %v1787_v58 = vpack.c.bf16 %v1752_v63, %v1751_v31 }
 0x164   : > { %v2800_v34 = vpop.permute.xlu0 %2799  ;;  %v1769_v13 = vpack.c.bf16 %v1734_v59, %v1733_v51  ;;  %v2807_v45 = vunpack.i.h.bf16 %v2805_v38  ;;  %v2806_v57 = vunpack.i.l.bf16 %v2805_v38 }
 0x165   : > { %2079 = vmatmul.mubr.bf16.gmra.mrb[24].mxu1 %v1787_v58  ;;  %v2802_v48 = vunpack.i.h.bf16 %v2800_v34  ;;  %v2801_v11 = vunpack.i.l.bf16 %v2800_v34 }
 0x166   : > { %2007 = vmatmul.mubr.bf16.gmra.mrb[24].mxu0 %v1769_v13  ;;  %2228 = vmatprep.mubr.msk.bf16.mxu1 %vm1498_vm6, %v1790_v35  ;;  %v1514_v35 = vsel %vm1498_vm6, %v4675_v1, %v2307_v9  ;;  %v1423_v1 = vsel %vm1388_vm5, %v1420_v47, %v1422_v18  ;;  %v1605_v49 = vsel %vm1572_vm8, %v5237_v33, %v2806_v57 }
 0x167   : > { %v2815_v26 = vpop.permute.xlu1 %2814  ;;  %2219 = vmatprep.mubr.msk.bf16.mxu0 %vm1498_vm6, %v1772_v36  ;;  %v1551_v42 = vsel %vm1535_vm7, %v1514_v35, %v2397_v39  ;;  %v1606_v46 = vsel %vm1572_vm8, %v5238_v54, %v2807_v45  ;;  %v1587_v30 = vsel %vm1572_vm8, %v1550_v41, %v2801_v11  ;;  %v1774_v27 = vpack.c.bf16 %v1425_v22, %v1423_v1  ;;  %v5240_v45 = vld [vmem:[#allocation22_spill] sm:$0xff] }
 0x168   : > { %v2817_v56 = vunpack.i.h.bf16 %v2815_v26  ;;  %v2816_v3 = vunpack.i.l.bf16 %v2815_v26  ;;  %v1588_v8 = vsel %vm1572_vm8, %v1551_v42, %v2802_v48  ;;  %v2311_v42 = vunpack.i.l.bf16 %v5239_v52 }
 0x169   : > { %v2810_v29 = vpop.permute.xlu0 %2809  ;;  %v2402_v57 = vunpack.i.h.bf16 %v5240_v45 }
 0x16a   : > { %v2812_v62 = vunpack.i.h.bf16 %v2810_v29  ;;  %v2811_v15 = vunpack.i.l.bf16 %v2810_v29  ;;  %v1642_v37 = vsel %vm1609_vm9, %v1605_v49, %v2816_v3  ;;  %v1643_v10 = vsel %vm1609_vm9, %v1606_v46, %v2817_v56  ;;  %v5241_v46 = vld [vmem:[#allocation39_spill] sm:$0xff] }
 0x16b   : > { %v2825_v25 = vpop.permute.xlu1 %2824  ;;  %v1516_v56 = vsel %vm1498_vm6, %v4734_v50, %v2312_v40  ;;  %v1515_v3 = vsel %vm1498_vm6, %v4679_v44, %v2311_v42  ;;  %v5242_v50 = vld [vmem:[#allocation38_spill] sm:$0xff] }
 0x16c   : > { %v2827_v43 = vunpack.i.h.bf16 %v2825_v25  ;;  %v2826_v32 = vunpack.i.l.bf16 %v2825_v25  ;;  %v1624_v12 = vsel %vm1609_vm9, %v1587_v30, %v2811_v15  ;;  %v1625_v60 = vsel %vm1609_vm9, %v1588_v8, %v2812_v62 }
 0x16d   : > { %v2820_v21 = vpop.permute.xlu0 %2819  ;;  %v1553_v62 = vsel %vm1535_vm7, %v1516_v56, %v2402_v57 }
 0x16e   : > { %v2822_v20 = vunpack.i.h.bf16 %v2820_v21  ;;  %v2821_v47 = vunpack.i.l.bf16 %v2820_v21  ;;  %v1679_v31 = vsel %vm1646_vm10, %v1642_v37, %v2826_v32  ;;  %v1680_v63 = vsel %vm1646_vm10, %v1643_v10, %v2827_v43 }
 0x16f   : > { %v2835_v2 = vpop.permute.xlu1 %2834  ;;  %v2401_v21 = vunpack.i.l.bf16 %v5240_v45 }
 0x170   : > { %v2837_v14 = vunpack.i.h.bf16 %v2835_v2  ;;  %v2836_v24 = vunpack.i.l.bf16 %v2835_v2  ;;  %v1661_v51 = vsel %vm1646_vm10, %v1624_v12, %v2821_v47  ;;  %v1662_v59 = vsel %vm1646_vm10, %v1625_v60, %v2822_v20 }
 0x171   : > { %v2830_v61 = vpop.permute.xlu0 %2829 }
 0x172   : > { %v2832_v16 = vunpack.i.h.bf16 %v2830_v61  ;;  %v2831_v55 = vunpack.i.l.bf16 %v2830_v61  ;;  %v1716_v13 = vsel %vm1683_vm11, %v1679_v31, %v2836_v24  ;;  %v1717_v5 = vsel %vm1683_vm11, %v1680_v63, %v2837_v14 }
 0x174   : > { %v1698_v17 = vsel %vm1683_vm11, %v1661_v51, %v2831_v55  ;;  %v1699_v0 = vsel %vm1683_vm11, %v1662_v59, %v2832_v16 }
 0x175   : > { %v2845_v38 = vpop.permute.xlu1 %2844 }
 0x176   : > { %v2847_v58 = vunpack.i.h.bf16 %v2845_v38  ;;  %v2846_v36 = vunpack.i.l.bf16 %v2845_v38  ;;  %v2840_v34 = vpop.permute.xlu0 %2839 }
 0x177   : > { %v2842_v9 = vunpack.i.h.bf16 %v2840_v34  ;;  %v2841_v26 = vunpack.i.l.bf16 %v2840_v34 }
 0x178   : > { %v1753_v28 = vsel %vm1720_vm12, %v1716_v13, %v2846_v36  ;;  %v1754_v19 = vsel %vm1720_vm12, %v1717_v5, %v2847_v58 }
 0x179   : > { %v2855_v6 = vpop.permute.xlu1 %2854  ;;  %v1735_v23 = vsel %vm1720_vm12, %v1698_v17, %v2841_v26  ;;  %v1736_v39 = vsel %vm1720_vm12, %v1699_v0, %v2842_v9  ;;  %v1789_v29 = vpack.c.bf16 %v1754_v19, %v1753_v28 }
 0x17a   : > { %v2850_v18 = vpop.permute.xlu0 %2849  ;;  %v1771_v35 = vpack.c.bf16 %v1736_v39, %v1735_v23  ;;  %v2857_v48 = vunpack.i.h.bf16 %v2855_v6  ;;  %v2856_v11 = vunpack.i.l.bf16 %v2855_v6 }
 0x17b   : > { %2087 = vmatmul.mubr.bf16.gmra.mrb[28].mxu1 %v1789_v29  ;;  %v2852_v4 = vunpack.i.h.bf16 %v2850_v18  ;;  %v2851_v22 = vunpack.i.l.bf16 %v2850_v18  ;;  %v4922_v18 = vld [vmem:[%s5042_s2] ss:$0 sm:$0xff] }
 0x17c   : > { %2015 = vmatmul.mubr.bf16.gmra.mrb[28].mxu0 %v1771_v35  ;;  %2229 = vmatprep.mubr.msk.bf16.mxu1 %vm1498_vm6, %v1792_v53  ;;  %v1552_v53 = vsel %vm1535_vm7, %v1515_v3, %v2401_v21  ;;  %v1607_v20 = vsel %vm1572_vm8, %v5241_v46, %v2856_v11  ;;  %v1608_v47 = vsel %vm1572_vm8, %v5242_v50, %v2857_v48 }
 0x17d   : > { %v2865_v25 = vpop.permute.xlu1 %2864  ;;  %2220 = vmatprep.mubr.msk.bf16.mxu0 %vm1498_vm6, %v1774_v27  ;;  %v1589_v30 = vsel %vm1572_vm8, %v1552_v53, %v2851_v22  ;;  %v1590_v14 = vsel %vm1572_vm8, %v1553_v62, %v2852_v4 }
 0x17e   : > { %v2860_v7 = vpop.permute.xlu0 %2859  ;;  %v2867_v15 = vunpack.i.h.bf16 %v2865_v25  ;;  %v2866_v43 = vunpack.i.l.bf16 %v2865_v25 }
 0x17f   : > { %v2862_v32 = vunpack.i.h.bf16 %v2860_v7  ;;  %v2861_v2 = vunpack.i.l.bf16 %v2860_v7 }
 0x180   : > { %v1644_v10 = vsel %vm1609_vm9, %v1607_v20, %v2866_v43  ;;  %v1645_v16 = vsel %vm1609_vm9, %v1608_v47, %v2867_v15 }
 0x181   : > { %v2875_v41 = vpop.permute.xlu1 %2874  ;;  %v1626_v60 = vsel %vm1609_vm9, %v1589_v30, %v2861_v2  ;;  %v1627_v31 = vsel %vm1609_vm9, %v1590_v14, %v2862_v32 }
 0x182   : > { %v2870_v1 = vpop.permute.xlu0 %2869  ;;  %v2877_v33 = vunpack.i.h.bf16 %v2875_v41  ;;  %v2876_v49 = vunpack.i.l.bf16 %v2875_v41 }
 0x183   : > { %v2872_v44 = vunpack.i.h.bf16 %v2870_v1  ;;  %v2871_v61 = vunpack.i.l.bf16 %v2870_v1 }
 0x184   : > { %v1681_v63 = vsel %vm1646_vm10, %v1644_v10, %v2876_v49  ;;  %v1682_v38 = vsel %vm1646_vm10, %v1645_v16, %v2877_v33 }
 0x185   : > { %v2885_v54 = vpop.permute.xlu1 %2884  ;;  %v1663_v59 = vsel %vm1646_vm10, %v1626_v60, %v2871_v61  ;;  %v1664_v58 = vsel %vm1646_vm10, %v1627_v31, %v2872_v44 }
 0x186   : > { %v2880_v8 = vpop.permute.xlu0 %2879  ;;  %v2887_v24 = vunpack.i.h.bf16 %v2885_v54  ;;  %v2886_v37 = vunpack.i.l.bf16 %v2885_v54 }
 0x187   : > { %v2882_v55 = vunpack.i.h.bf16 %v2880_v8  ;;  %v2881_v12 = vunpack.i.l.bf16 %v2880_v8 }
 0x188   : > { %v1718_v5 = vsel %vm1683_vm11, %v1681_v63, %v2886_v37  ;;  %v1719_v9 = vsel %vm1683_vm11, %v1682_v38, %v2887_v24 }
 0x189   : > { %v2895_v51 = vpop.permute.xlu1 %2894  ;;  %v1700_v0 = vsel %vm1683_vm11, %v1663_v59, %v2881_v12  ;;  %v1701_v28 = vsel %vm1683_vm11, %v1664_v58, %v2882_v55 }
 0x18a   : > { %v2897_v36 = vunpack.i.h.bf16 %v2895_v51  ;;  %v2896_v34 = vunpack.i.l.bf16 %v2895_v51  ;;  %v2890_v13 = vpop.permute.xlu0 %2889 }
 0x18b   : > { %v2892_v26 = vunpack.i.h.bf16 %v2890_v13  ;;  %v2891_v17 = vunpack.i.l.bf16 %v2890_v13 }
 0x18c   : > { %v1755_v19 = vsel %vm1720_vm12, %v1718_v5, %v2896_v34  ;;  %v1756_v6 = vsel %vm1720_vm12, %v1719_v9, %v2897_v36 }
 0x18d   : > { %v1737_v23 = vsel %vm1720_vm12, %v1700_v0, %v2891_v17  ;;  %v1738_v39 = vsel %vm1720_vm12, %v1701_v28, %v2892_v26  ;;  %v1791_v29 = vpack.c.bf16 %v1756_v6, %v1755_v19 }
 0x18e   : > { %v1773_v27 = vpack.c.bf16 %v1738_v39, %v1737_v23 }
 0x18f   : > { %2095 = vmatmul.mubr.bf16.gmra.mrb[32].mxu1 %v1791_v29 }
 0x190   : > { %2023 = vmatmul.mubr.bf16.gmra.mrb[32].mxu0 %v1773_v27 }
 0x1c2   : > { %v1960_v35 = vpop.f32.mrb[0].mxu0 }
 0x1c3   : > { %v1961_v25 = vadd.f32 %v4922_v18, %v1960_v35  ;;  %v1962_v7 = vpop.f32.mrb[1].mxu0 }
 0x1c4   : > { %v1963_v52 = vpop.f32.mrb[2].mxu0 }
 0x1c5   : > { %2104 = vst.msk [vmem:[%s4927_s23] sm:$0xff] %vm2103_vm13, %v1961_v25  ;;  %v1964_v40 = vadd.f32 %v4922_v18, %v1963_v52  ;;  %v1965_v42 = vpop.f32.mrb[3].mxu0 }
 0x1c7   : > { %2105 = vst.msk [vmem:[%s4927_s23 + $0x8] sm:$0xff] %vm2103_vm13, %v1964_v40  ;;  %v2032_v45 = vpop.f32.mrb[0].mxu1 }
 0x1c8   : > { %v2033_v57 = vadd.f32 %v4922_v18, %v2032_v45  ;;  %v2034_v21 = vpop.f32.mrb[1].mxu1 }
 0x1c9   : > { %v2035_v41 = vpop.f32.mrb[2].mxu1 }
 0x1ca   : > { %2122 = vst.msk [vmem:[%s4927_s23 + $0x90] sm:$0xff] %vm2103_vm13, %v2033_v57  ;;  %v2036_v48 = vadd.f32 %v4922_v18, %v2035_v41  ;;  %v2037_v11 = vpop.f32.mrb[3].mxu1 }
 0x1cc   : > { %2123 = vst.msk [vmem:[%s4927_s23 + $0x98] sm:$0xff] %vm2103_vm13, %v2036_v48 }
 0x1d8   : > { %v2040_v1 = vpop.f32.mrb[4].mxu1 }
 0x1d9   : > { %v1968_v56 = vpop.f32.mrb[4].mxu0  ;;  %v2041_v3 = vadd.f32 %v4922_v18, %v2040_v1  ;;  %v2042_v4 = vpop.f32.mrb[5].mxu1 }
 0x1da   : > { %v1969_v22 = vadd.f32 %v4922_v18, %v1968_v56  ;;  %v1970_v53 = vpop.f32.mrb[5].mxu0  ;;  %v2043_v62 = vpop.f32.mrb[6].mxu1 }
 0x1db   : > { %2124 = vst.msk [vmem:[%s4927_s23 + $0xa0] sm:$0xff] %vm2103_vm13, %v2041_v3  ;;  %v1971_v15 = vpop.f32.mrb[6].mxu0  ;;  %v2044_v43 = vadd.f32 %v4922_v18, %v2043_v62  ;;  %v2045_v32 = vpop.f32.mrb[7].mxu1 }
 0x1dc   : > { %2106 = vst.msk [vmem:[%s4927_s23 + $0x10] sm:$0xff] %vm2103_vm13, %v1969_v22  ;;  %v1972_v2 = vadd.f32 %v4922_v18, %v1971_v15  ;;  %v1973_v33 = vpop.f32.mrb[7].mxu0 }
 0x1dd   : > { %2125 = vst.msk [vmem:[%s4927_s23 + $0xa8] sm:$0xff] %vm2103_vm13, %v2044_v43 }
 0x1de   : > { %2107 = vst.msk [vmem:[%s4927_s23 + $0x18] sm:$0xff] %vm2103_vm13, %v1972_v2 }
 0x1e9   : > { %v1976_v49 = vpop.f32.mrb[8].mxu0 }
 0x1ea   : > { %v1977_v54 = vadd.f32 %v4922_v18, %v1976_v49  ;;  %v1978_v46 = vpop.f32.mrb[9].mxu0 }
 0x1eb   : > { %v1979_v20 = vpop.f32.mrb[10].mxu0 }
 0x1ec   : > { %2108 = vst.msk [vmem:[%s4927_s23 + $0x20] sm:$0xff] %vm2103_vm13, %v1977_v54  ;;  %v1980_v50 = vadd.f32 %v4922_v18, %v1979_v20  ;;  %v1981_v47 = vpop.f32.mrb[11].mxu0 }
 0x1ee   : > { %2109 = vst.msk [vmem:[%s4927_s23 + $0x28] sm:$0xff] %vm2103_vm13, %v1980_v50  ;;  %v2048_v44 = vpop.f32.mrb[8].mxu1 }
 0x1ef   : > { %v2049_v61 = vadd.f32 %v4922_v18, %v2048_v44  ;;  %v2050_v8 = vpop.f32.mrb[9].mxu1 }
 0x1f0   : > { %v2051_v30 = vpop.f32.mrb[10].mxu1 }
 0x1f1   : > { %2126 = vst.msk [vmem:[%s4927_s23 + $0xb0] sm:$0xff] %vm2103_vm13, %v2049_v61  ;;  %v2052_v14 = vadd.f32 %v4922_v18, %v2051_v30  ;;  %v2053_v24 = vpop.f32.mrb[11].mxu1 }
 0x1f3   : > { %2127 = vst.msk [vmem:[%s4927_s23 + $0xb8] sm:$0xff] %vm2103_vm13, %v2052_v14 }
 0x1fd   : > { %v2056_v37 = vpop.f32.mrb[12].mxu1 }
 0x1fe   : > { %v1984_v10 = vpop.f32.mrb[12].mxu0  ;;  %v2057_v16 = vadd.f32 %v4922_v18, %v2056_v37  ;;  %v2058_v55 = vpop.f32.mrb[13].mxu1 }
 0x1ff   : > { %v1985_v12 = vadd.f32 %v4922_v18, %v1984_v10  ;;  %v1986_v60 = vpop.f32.mrb[13].mxu0  ;;  %v2059_v31 = vpop.f32.mrb[14].mxu1 }
 0x200   : > { %2128 = vst.msk [vmem:[%s4927_s23 + $0xc0] sm:$0xff] %vm2103_vm13, %v2057_v16  ;;  %v1987_v63 = vpop.f32.mrb[14].mxu0  ;;  %v2060_v38 = vadd.f32 %v4922_v18, %v2059_v31  ;;  %v2061_v51 = vpop.f32.mrb[15].mxu1 }
 0x201   : > { %2110 = vst.msk [vmem:[%s4927_s23 + $0x30] sm:$0xff] %vm2103_vm13, %v1985_v12  ;;  %v1988_v59 = vadd.f32 %v4922_v18, %v1987_v63  ;;  %v1989_v58 = vpop.f32.mrb[15].mxu0 }
 0x202   : > { %2129 = vst.msk [vmem:[%s4927_s23 + $0xc8] sm:$0xff] %vm2103_vm13, %v2060_v38 }
 0x203   : > { %2111 = vst.msk [vmem:[%s4927_s23 + $0x38] sm:$0xff] %vm2103_vm13, %v1988_v59 }
 0x20e   : > { %v2064_v36 = vpop.f32.mrb[16].mxu1 }
 0x20f   : > { %v2065_v13 = vadd.f32 %v4922_v18, %v2064_v36  ;;  %v2066_v5 = vpop.f32.mrb[17].mxu1 }
 0x210   : > { %v1992_v34 = vpop.f32.mrb[16].mxu0  ;;  %v2067_v17 = vpop.f32.mrb[18].mxu1 }
 0x211   : > { %v1993_v9 = vadd.f32 %v4922_v18, %v1992_v34  ;;  %v1994_v26 = vpop.f32.mrb[17].mxu0  ;;  %2130 = vst.msk [vmem:[%s4927_s23 + $0xd0] sm:$0xff] %vm2103_vm13, %v2065_v13  ;;  %v2068_v28 = vadd.f32 %v4922_v18, %v2067_v17  ;;  %v2069_v19 = vpop.f32.mrb[19].mxu1 }
 0x212   : > { %v1995_v0 = vpop.f32.mrb[18].mxu0 }
 0x213   : > { %2112 = vst.msk [vmem:[%s4927_s23 + $0x40] sm:$0xff] %vm2103_vm13, %v1993_v9  ;;  %v1996_v6 = vadd.f32 %v4922_v18, %v1995_v0  ;;  %v1997_v23 = vpop.f32.mrb[19].mxu0  ;;  %2131 = vst.msk [vmem:[%s4927_s23 + $0xd8] sm:$0xff] %vm2103_vm13, %v2068_v28 }
 0x215   : > { %2113 = vst.msk [vmem:[%s4927_s23 + $0x48] sm:$0xff] %vm2103_vm13, %v1996_v6 }
 0x222   : > { %v2072_v39 = vpop.f32.mrb[20].mxu1 }
 0x223   : > { %v2073_v27 = vadd.f32 %v4922_v18, %v2072_v39  ;;  %v2074_v35 = vpop.f32.mrb[21].mxu1 }
 0x224   : > { %v2000_v29 = vpop.f32.mrb[20].mxu0  ;;  %v2075_v52 = vpop.f32.mrb[22].mxu1 }
 0x225   : > { %v2001_v25 = vadd.f32 %v4922_v18, %v2000_v29  ;;  %v2002_v7 = vpop.f32.mrb[21].mxu0  ;;  %2132 = vst.msk [vmem:[%s4927_s23 + $0xe0] sm:$0xff] %vm2103_vm13, %v2073_v27  ;;  %v2076_v42 = vadd.f32 %v4922_v18, %v2075_v52  ;;  %v2077_v45 = vpop.f32.mrb[23].mxu1 }
 0x226   : > { %v2003_v40 = vpop.f32.mrb[22].mxu0 }
 0x227   : > { %2114 = vst.msk [vmem:[%s4927_s23 + $0x50] sm:$0xff] %vm2103_vm13, %v2001_v25  ;;  %v2004_v57 = vadd.f32 %v4922_v18, %v2003_v40  ;;  %v2005_v21 = vpop.f32.mrb[23].mxu0  ;;  %2133 = vst.msk [vmem:[%s4927_s23 + $0xe8] sm:$0xff] %vm2103_vm13, %v2076_v42 }
 0x229   : > { %2115 = vst.msk [vmem:[%s4927_s23 + $0x58] sm:$0xff] %vm2103_vm13, %v2004_v57 }
 0x238   : > { %v2080_v41 = vpop.f32.mrb[24].mxu1 }
 0x239   : > { %v2008_v48 = vpop.f32.mrb[24].mxu0  ;;  %v2081_v11 = vadd.f32 %v4922_v18, %v2080_v41  ;;  %v2082_v1 = vpop.f32.mrb[25].mxu1 }
 0x23a   : > { %v2009_v56 = vadd.f32 %v4922_v18, %v2008_v48  ;;  %v2010_v3 = vpop.f32.mrb[25].mxu0  ;;  %v2083_v4 = vpop.f32.mrb[26].mxu1 }
 0x23b   : > { %2134 = vst.msk [vmem:[%s4927_s23 + $0xf0] sm:$0xff] %vm2103_vm13, %v2081_v11  ;;  %v2011_v22 = vpop.f32.mrb[26].mxu0  ;;  %v2084_v53 = vadd.f32 %v4922_v18, %v2083_v4  ;;  %v2085_v62 = vpop.f32.mrb[27].mxu1 }
 0x23c   : > { %2116 = vst.msk [vmem:[%s4927_s23 + $0x60] sm:$0xff] %vm2103_vm13, %v2009_v56  ;;  %v2012_v15 = vadd.f32 %v4922_v18, %v2011_v22  ;;  %v2013_v43 = vpop.f32.mrb[27].mxu0 }
 0x23d   : > { %2135 = vst.msk [vmem:[%s4927_s23 + $0xf8] sm:$0xff] %vm2103_vm13, %v2084_v53 }
 0x23e   : > { %2117 = vst.msk [vmem:[%s4927_s23 + $0x68] sm:$0xff] %vm2103_vm13, %v2012_v15 }
 0x24e   : > { %v2088_v32 = vpop.f32.mrb[28].mxu1 }
 0x24f   : > { %v2016_v2 = vpop.f32.mrb[28].mxu0  ;;  %v2089_v33 = vadd.f32 %v4922_v18, %v2088_v32  ;;  %v2090_v49 = vpop.f32.mrb[29].mxu1 }
 0x250   : > { %v2017_v54 = vadd.f32 %v4922_v18, %v2016_v2  ;;  %v2018_v46 = vpop.f32.mrb[29].mxu0  ;;  %v2091_v20 = vpop.f32.mrb[30].mxu1 }
 0x251   : > { %2136 = vst.msk [vmem:[%s4927_s23 + $0x100] sm:$0xff] %vm2103_vm13, %v2089_v33  ;;  %v2019_v50 = vpop.f32.mrb[30].mxu0  ;;  %v2092_v47 = vadd.f32 %v4922_v18, %v2091_v20  ;;  %v2093_v44 = vpop.f32.mrb[31].mxu1 }
 0x252   : > { %2118 = vst.msk [vmem:[%s4927_s23 + $0x70] sm:$0xff] %vm2103_vm13, %v2017_v54  ;;  %v2020_v61 = vadd.f32 %v4922_v18, %v2019_v50  ;;  %v2021_v8 = vpop.f32.mrb[31].mxu0 }
 0x253   : > { %2137 = vst.msk [vmem:[%s4927_s23 + $0x108] sm:$0xff] %vm2103_vm13, %v2092_v47 }
 0x254   : > { %2119 = vst.msk [vmem:[%s4927_s23 + $0x78] sm:$0xff] %vm2103_vm13, %v2020_v61 }
 0x262   : > { %v2096_v30 = vpop.f32.mrb[32].mxu1 }
 0x263   : > { %v2024_v14 = vpop.f32.mrb[32].mxu0  ;;  %v2097_v24 = vadd.f32 %v4922_v18, %v2096_v30  ;;  %v2098_v37 = vpop.f32.mrb[33].mxu1 }
 0x264   : > { %v2025_v10 = vadd.f32 %v4922_v18, %v2024_v14  ;;  %v2026_v16 = vpop.f32.mrb[33].mxu0  ;;  %v2099_v55 = vpop.f32.mrb[34].mxu1 }
 0x265   : > { %2138 = vst.msk [vmem:[%s4927_s23 + $0x110] sm:$0xff] %vm2103_vm13, %v2097_v24  ;;  %v2027_v12 = vpop.f32.mrb[34].mxu0  ;;  %v2100_v60 = vadd.f32 %v4922_v18, %v2099_v55  ;;  %v2101_v31 = vpop.f32.mrb[35].mxu1 }
 0x266   : > { %2120 = vst.msk [vmem:[%s4927_s23 + $0x80] sm:$0xff] %vm2103_vm13, %v2025_v10  ;;  %v2028_v63 = vadd.f32 %v4922_v18, %v2027_v12  ;;  %v2029_v38 = vpop.f32.mrb[35].mxu0 }
 0x267   : > { %2139 = vst.msk [vmem:[%s4927_s23 + $0x118] sm:$0xff] %vm2103_vm13, %v2100_v60 }
 0x268   : > { %2121 = vst.msk [vmem:[%s4927_s23 + $0x88] sm:$0xff] %vm2103_vm13, %v2028_v63 }
 0x269 PF: > { %s13_s12 = sadd.s32 1, %s2967_s12  }
 0x26a   : > { %p10_p4 = scmp.ge.s32.totalorder %s13_s12, 4  }
 0x26c   :  { %12 = sbr.rel (!%p10_p4) target bundleno = 1 (0x1), region = 62 }

</bundles_post_ra>
